<compile_context>
chip_gen: v6e
topology: v6e:2x2x1
jax: 0.10.0
libtpu: 0.0.40
codegen_flags: <defaults>
</compile_context>

<pallas_src>
import functools
import math

import jax
import jax.numpy as jnp
from jax.experimental import pallas as pl
from jax.experimental.pallas import tpu as pltpu

LN2 = math.log(2.0)


def ssp(x):
    """shifted_softplus(x) = softplus(x) - log(2), numerically stable. ssp(0) == 0."""
    return jnp.maximum(x, 0.0) + jnp.log1p(jnp.exp(-jnp.abs(x))) - LN2


# ---------------------------------------------------------------------------
# Fused Pallas kernel: all interaction layers, RBF + cutoff computed in-kernel
# ---------------------------------------------------------------------------

def schnet_stack_kernel(x_ref, d_ref, offsets_ref, idx_i_ref, idx_j_ref,
                        w_in2f_ref, w_f1_ref, b_f1_ref, w_f2_ref, b_f2_ref,
                        w_o1_ref, b_o1_ref, w_o2_ref, b_o2_ref,
                        out_ref,
                        xcur_ref, xf_ref, agg_ref,
                        *, coeff, cutoff):
    """All SchNetInteraction blocks fused.  grid = (layer, pair_tile), both 'arbitrary'.

    Persistent VMEM scratch:
      xcur_ref [N, A] f32   current atom features (residual stream, carried over layers)
      xf_ref   [N, F] bf16  in2f(x) for the current layer (gather operand)
      agg_ref  [N, F] f32   scatter_add accumulator for the current layer
    """
    l = pl.program_id(0)
    pt = pl.program_id(1)
    n_l = pl.num_programs(0)
    n_pt = pl.num_programs(1)

    # Load the embedding into the persistent residual stream once, at the very start.
    @pl.when(jnp.logical_and(l == 0, pt == 0))
    def _load_x():
        xcur_ref[...] = x_ref[...]

    # Per layer: in2f (Dense A->F, no bias, no activation) + zero the accumulator.
    @pl.when(pt == 0)
    def _start_layer():
        xf = jnp.dot(xcur_ref[...], w_in2f_ref[...],
                     preferred_element_type=jnp.float32)
        xf_ref[...] = xf.astype(jnp.bfloat16)
        agg_ref[...] = jnp.zeros_like(agg_ref)

    # ---- per pair-tile work -------------------------------------------------
    # Fused GaussianRBF + CosineCutoff (EUP): padded pairs have d = 2*cutoff -> rcut=0.
    d = d_ref[...]                                                    # [TP, 1]
    off = offsets_ref[...]                                            # [1, R]
    f_ij = jnp.exp(coeff * (d - off) ** 2)                            # [TP, R]
    rcut = 0.5 * (jnp.cos(d * (math.pi / cutoff)) + 1.0)
    rcut = rcut * (d < cutoff).astype(jnp.float32)                    # [TP, 1]

    # filter_network: Dense(R->F, ssp) -> Dense(F->F), then cosine cutoff.
    h = ssp(jnp.dot(f_ij, w_f1_ref[...], preferred_element_type=jnp.float32)
            + b_f1_ref[...])
    Wij = jnp.dot(h, w_f2_ref[...], preferred_element_type=jnp.float32) + b_f2_ref[...]
    Wij = Wij * rcut                                                  # [TP, F]

    TP = d.shape[0]
    N = xcur_ref.shape[0]

    # gather x_j = xf[idx_j]: one-hot [TP, N] @ xf [N, F] on the MXU (bf16 in, f32 acc).
    # Sentinel idx = -1 (padded pairs) matches no column -> zero row.  One-hot built
    # directly in bf16 (exact 0/1) -> no extra VPU conversion pass.
    ids_pn = jax.lax.broadcasted_iota(jnp.int32, (TP, N), 1)
    onehot_j = (ids_pn == idx_j_ref[...]).astype(jnp.bfloat16)        # [TP, N]
    x_j = jnp.dot(onehot_j, xf_ref[...],
                  preferred_element_type=jnp.float32)                 # [TP, F]

    x_ij = x_j * Wij                                                  # [TP, F]

    # scatter_add over idx_i: one-hot built directly in [N, TP] layout (idx_i is a
    # lane-dense [1, TP] row), so the matmul is a standard MXU dot — no transpose.
    ids_np = jax.lax.broadcasted_iota(jnp.int32, (N, TP), 0)
    onehot_i_t = (ids_np == idx_i_ref[...]).astype(jnp.bfloat16)      # [N, TP]
    agg_ref[...] += jnp.dot(onehot_i_t, x_ij.astype(jnp.bfloat16),
                            preferred_element_type=jnp.float32)       # [N, F]

    # ---- layer epilogue: f2out (Dense ssp -> Dense) + residual ---------------
    @pl.when(pt == n_pt - 1)
    def _finish_layer():
        h2 = ssp(jnp.dot(agg_ref[...], w_o1_ref[...],
                         preferred_element_type=jnp.float32) + b_o1_ref[...])
        v = jnp.dot(h2, w_o2_ref[...], preferred_element_type=jnp.float32) + b_o2_ref[...]
        xcur_ref[...] = xcur_ref[...] + v

    @pl.when(jnp.logical_and(l == n_l - 1, pt == n_pt - 1))
    def _write_out():
        out_ref[...] = xcur_ref[...]


# ---------------------------------------------------------------------------
# Wrappers
# ---------------------------------------------------------------------------

def schnet_interactions(x, d, offsets, idx_i_row, idx_j_col, w, tile_pairs,
                        coeff, cutoff):
    Np, Ap = x.shape
    P_pad = d.shape[0]
    R = offsets.shape[1]
    L = w['w_in2f'].shape[0]
    Fp = w['w_in2f'].shape[2]
    n_pt = P_pad // tile_pairs

    def whole(arr):
        return pl.BlockSpec(arr.shape, lambda l, pt: (0,) * arr.ndim)

    def per_layer(arr):
        # weights stacked as [L, d0, d1]; one layer slice per step, layer dim squeezed.
        return pl.BlockSpec((None,) + tuple(arr.shape[1:]), lambda l, pt: (l, 0, 0))

    # Deeper buffering on the tiny pair-stream tiles only when there are enough tiles.
    pair_kwargs = dict(pipeline_mode=pl.Buffered(3)) if n_pt >= 3 else {}

    def pair_rows(width):
        return pl.BlockSpec((tile_pairs, width), lambda l, pt: (pt, 0), **pair_kwargs)

    in_specs = [
        whole(x),                                                  # x (residual input)
        pair_rows(1),                                              # d tile
        whole(offsets),                                            # rbf offsets [1, R]
        pl.BlockSpec((1, tile_pairs), lambda l, pt: (0, pt),
                     **pair_kwargs),                               # idx_i (lane-dense row)
        pair_rows(1),                                              # idx_j (column)
        per_layer(w['w_in2f']),
        per_layer(w['w_f1']), per_layer(w['b_f1']),
        per_layer(w['w_f2']), per_layer(w['b_f2']),
        per_layer(w['w_o1']), per_layer(w['b_o1']),
        per_layer(w['w_o2']), per_layer(w['b_o2']),
    ]

    # Advisory cost estimate so XLA schedules surrounding ops around the long call.
    flops = L * (2 * Np * Ap * Fp                                  # in2f
                 + P_pad * (2 * R * Fp + 2 * Fp * Fp)              # filter network
                 + P_pad * 4 * Np * Fp                             # gather + scatter dots
                 + 2 * Np * Fp * Ap + 2 * Np * Ap * Ap)            # f2out
    transc = L * (P_pad * (R + 1 + Fp) + Np * Ap)                  # rbf exp, cos, ssp
    nbytes = (2 * Np * Ap * 4
              + L * P_pad * 12
              + sum(int(a.size) * 4 for a in w.values()))
    cost = pl.CostEstimate(flops=int(flops), transcendentals=int(transc),
                           bytes_accessed=int(nbytes))

    # Real VMEM headroom: never claim the whole physical budget (64 MiB on v7x).
    try:
        vmem_cap = int(pltpu.get_tpu_info().vmem_capacity_bytes)
    except Exception:
        vmem_cap = 64 * 1024 * 1024
    vmem_limit = min(48 * 1024 * 1024, (vmem_cap * 3) // 4)

    kernel = functools.partial(schnet_stack_kernel, coeff=coeff, cutoff=cutoff)

    return pl.pallas_call(
        kernel,
        out_shape=jax.ShapeDtypeStruct((Np, Ap), jnp.float32),
        grid=(L, n_pt),
        in_specs=in_specs,
        out_specs=pl.BlockSpec((Np, Ap), lambda l, pt: (0, 0)),
        scratch_shapes=[pltpu.VMEM((Np, Ap), jnp.float32),    # residual stream
                        pltpu.VMEM((Np, Fp), jnp.bfloat16),   # in2f(x), bf16 MXU operand
                        pltpu.VMEM((Np, Fp), jnp.float32)],   # scatter accumulator
        input_output_aliases={0: 0},
        cost_estimate=cost,
        compiler_params=pltpu.CompilerParams(
            dimension_semantics=("arbitrary", "arbitrary"),
            vmem_limit_bytes=vmem_limit),
    )(x, d, offsets, idx_i_row, idx_j_col,
      w['w_in2f'], w['w_f1'], w['b_f1'], w['w_f2'], w['b_f2'],
      w['w_o1'], w['b_o1'], w['w_o2'], w['b_o2'])


def schnet_forward(atomic_numbers, r_ij, idx_i, idx_j, params, *, tile_pairs=256):
    """SchNet.forward -> scalar_representation.  tile_pairs: 256 fills the v6e/v7x MXU
    M-tile; sweep {128,256,512} per chip generation."""
    cutoff = float(params['cutoff'])
    coeff = float(params['rbf_coeff'])
    offsets = params['rbf_offsets']                                  # [1, R]
    w = params['interactions']
    L, A, F = w['w_in2f'].shape

    x = params['embedding'][atomic_numbers]                          # [N, A] (nn.Embedding)
    N = x.shape[0]
    P = r_ij.shape[0]

    # Lane/sublane-dense padding: feature dims -> multiples of 128, atoms -> 8,
    # pairs -> tile_pairs.  Zero padding is exact (ssp(0)=0, padded weights are 0).
    A_pad = 128 * pl.cdiv(A, 128)
    F_pad = 128 * pl.cdiv(F, 128)
    N_pad = 8 * pl.cdiv(N, 8)
    P_pad = tile_pairs * pl.cdiv(P, tile_pairs)
    pad_p = P_pad - P

    x = jnp.pad(x, ((0, N_pad - N), (0, A_pad - A)))

    # d_ij in the wrapper (lane-dense; avoids a 3/128-lane reduction in-kernel).
    d = jnp.sqrt(jnp.sum(r_ij * r_ij, axis=-1, keepdims=True))       # [P, 1]
    d = jnp.pad(d, ((0, pad_p), (0, 0)), constant_values=2.0 * cutoff)  # pad -> rcut = 0
    idx_i_row = jnp.pad(idx_i.astype(jnp.int32), ((0, pad_p),),
                        constant_values=-1)[None, :]                 # [1, P_pad]
    idx_j_col = jnp.pad(idx_j.astype(jnp.int32), ((0, pad_p),),
                        constant_values=-1)[:, None]                 # [P_pad, 1]

    wp = {
        'w_in2f': jnp.pad(w['w_in2f'], ((0, 0), (0, A_pad - A), (0, F_pad - F))),
        'w_f1':   jnp.pad(w['w_f1'],   ((0, 0), (0, 0),         (0, F_pad - F))),
        'b_f1':   jnp.pad(w['b_f1'],   ((0, 0), (0, 0),         (0, F_pad - F))),
        'w_f2':   jnp.pad(w['w_f2'],   ((0, 0), (0, F_pad - F), (0, F_pad - F))),
        'b_f2':   jnp.pad(w['b_f2'],   ((0, 0), (0, 0),         (0, F_pad - F))),
        'w_o1':   jnp.pad(w['w_o1'],   ((0, 0), (0, F_pad - F), (0, A_pad - A))),
        'b_o1':   jnp.pad(w['b_o1'],   ((0, 0), (0, 0),         (0, A_pad - A))),
        'w_o2':   jnp.pad(w['w_o2'],   ((0, 0), (0, A_pad - A), (0, A_pad - A))),
        'b_o2':   jnp.pad(w['b_o2'],   ((0, 0), (0, 0),         (0, A_pad - A))),
    }

    out = schnet_interactions(x, d, offsets, idx_i_row, idx_j_col, wp,
                              tile_pairs, coeff, cutoff)             # [N_pad, A_pad]
    return out[:N, :A]                                               # scalar_representation


# ---------------------------------------------------------------------------
# Deterministic parameter init (shapes match SchNet.__init__), weights stacked per layer
# ---------------------------------------------------------------------------

def init_params(key, n_atom_basis, n_filters, n_rbf, n_interactions, max_z, cutoff):
    keys = jax.random.split(key, 1 + n_interactions)
    emb = jax.random.normal(keys[0], (max_z, n_atom_basis), jnp.float32) * 0.1
    emb = emb.at[0].set(0.0)  # padding_idx=0

    # GaussianRBF defaults: offsets = linspace(0, cutoff, n_rbf), width = spacing
    offsets = jnp.linspace(0.0, cutoff, n_rbf, dtype=jnp.float32)
    width = float(offsets[1] - offsets[0])
    coeff = -0.5 / (width ** 2)

    def dense_w(k, din, dout):
        return jax.random.normal(k, (din, dout), jnp.float32) * (1.0 / math.sqrt(din))

    def dense_b(k, dout):
        return jax.random.normal(k, (1, dout), jnp.float32) * 0.1

    names = ('w_in2f', 'w_f1', 'b_f1', 'w_f2', 'b_f2', 'w_o1', 'b_o1', 'w_o2', 'b_o2')
    per = {n: [] for n in names}
    for li in range(n_interactions):
        ks = jax.random.split(keys[1 + li], 9)
        per['w_in2f'].append(dense_w(ks[0], n_atom_basis, n_filters))
        per['w_f1'].append(dense_w(ks[1], n_rbf, n_filters))
        per['b_f1'].append(dense_b(ks[2], n_filters))
        per['w_f2'].append(dense_w(ks[3], n_filters, n_filters))
        per['b_f2'].append(dense_b(ks[4], n_filters))
        per['w_o1'].append(dense_w(ks[5], n_filters, n_atom_basis))
        per['b_o1'].append(dense_b(ks[6], n_atom_basis))
        per['w_o2'].append(dense_w(ks[7], n_atom_basis, n_atom_basis))
        per['b_o2'].append(dense_b(ks[8], n_atom_basis))
    interactions = {k: jnp.stack(v, axis=0) for k, v in per.items()}
    return dict(embedding=emb, rbf_offsets=offsets[None, :], rbf_coeff=coeff,
                cutoff=float(cutoff), interactions=interactions)


# ---------------------------------------------------------------------------
# Pure-JAX reference (same math, no Pallas) for a correctness check
# ---------------------------------------------------------------------------

def ref_forward(atomic_numbers, r_ij, idx_i, idx_j, params):
    x = params['embedding'][atomic_numbers]
    d = jnp.linalg.norm(r_ij, axis=1)
    f_ij = jnp.exp(params['rbf_coeff'] * (d[:, None] - params['rbf_offsets']) ** 2)
    rc = 0.5 * (jnp.cos(d * math.pi / params['cutoff']) + 1.0) * (d < params['cutoff'])
    w = params['interactions']
    for l in range(w['w_in2f'].shape[0]):
        xf = x @ w['w_in2f'][l]
        h = ssp(f_ij @ w['w_f1'][l] + w['b_f1'][l])
        Wij = (h @ w['w_f2'][l] + w['b_f2'][l]) * rc[:, None]
        x_ij = xf[idx_j] * Wij
        agg = jax.ops.segment_sum(x_ij, idx_i, num_segments=x.shape[0])
        h2 = ssp(agg @ w['w_o1'][l] + w['b_o1'][l])
        v = h2 @ w['w_o2'][l] + w['b_o2'][l]
        x = x + v
    return x


if __name__ == "__main__":
    n_atom_basis = 32
    n_filters = 32
    n_rbf = 16
    n_interactions = 2
    max_z = 101
    cutoff = 5.0
    n_atoms = 16
    n_pairs = 300      # not a multiple of tile_pairs -> exercises padding + 2 pair tiles

    key = jax.random.PRNGKey(0)
    k_par, k_z, k_r, k_i, k_j = jax.random.split(key, 5)

    params = init_params(k_par, n_atom_basis, n_filters, n_rbf,
                         n_interactions, max_z, cutoff)

    atomic_numbers = jax.random.randint(k_z, (n_atoms,), 1, max_z, dtype=jnp.int32)
    r_ij = jax.random.normal(k_r, (n_pairs, 3), jnp.float32) * 2.0
    idx_i = jax.random.randint(k_i, (n_pairs,), 0, n_atoms, dtype=jnp.int32)
    idx_j = jax.random.randint(k_j, (n_pairs,), 0, n_atoms, dtype=jnp.int32)

    fwd = jax.jit(lambda z, r, i, j: schnet_forward(z, r, i, j, params))
    out = jax.block_until_ready(fwd(atomic_numbers, r_ij, idx_i, idx_j))

    ref = ref_forward(atomic_numbers, r_ij, idx_i, idx_j, params)
    assert out.shape == (n_atoms, n_atom_basis)
    err = float(jnp.max(jnp.abs(out - ref)))
    # bf16 MXU operands on the gather/scatter matmuls -> small (<~1e-2) deviation expected
    assert err < 3e-2, f"mismatch vs JAX reference: max abs err {err}"
    print("KERNEL_OK")
</pallas_src>

<mosaic_0001>
module attributes {stable_mosaic.version = 11 : i64} {
  func.func @schnet_stack_kernel(%arg0: i32, %arg1: i32, %arg2: memref<16x128xf32, #tpu.memory_space<vmem>>, %arg3: memref<256x1xf32, #tpu.memory_space<vmem>>, %arg4: memref<1x16xf32, #tpu.memory_space<vmem>>, %arg5: memref<1x256xi32, #tpu.memory_space<vmem>>, %arg6: memref<256x1xi32, #tpu.memory_space<vmem>>, %arg7: memref<1x128x128xf32, #tpu.memory_space<vmem>>, %arg8: memref<1x16x128xf32, #tpu.memory_space<vmem>>, %arg9: memref<1x1x128xf32, #tpu.memory_space<vmem>>, %arg10: memref<1x128x128xf32, #tpu.memory_space<vmem>>, %arg11: memref<1x1x128xf32, #tpu.memory_space<vmem>>, %arg12: memref<1x128x128xf32, #tpu.memory_space<vmem>>, %arg13: memref<1x1x128xf32, #tpu.memory_space<vmem>>, %arg14: memref<1x128x128xf32, #tpu.memory_space<vmem>>, %arg15: memref<1x1x128xf32, #tpu.memory_space<vmem>>, %arg16: memref<16x128xf32, #tpu.memory_space<vmem>>, %arg17: memref<16x128xf32, #tpu.memory_space<vmem>>, %arg18: memref<16x128xbf16, #tpu.memory_space<vmem>>, %arg19: memref<16x128xf32, #tpu.memory_space<vmem>>) attributes {dimension_semantics = [#tpu.dimension_semantics<arbitrary>, #tpu.dimension_semantics<arbitrary>], iteration_bounds = array<i64: 2, 2>, scalar_prefetch = 0 : i64, scratch_operands = 3 : i64, tpu.core_type = #tpu.core_type<tc>, window_params = [{pipeline_mode = #tpu.pipeline_mode<synchronous>, transform_indices = @transform_0, window_bounds = array<i64: 16, 128>}, {transform_indices = @transform_1, window_bounds = array<i64: 256, 1>}, {pipeline_mode = #tpu.pipeline_mode<synchronous>, transform_indices = @transform_2, window_bounds = array<i64: 1, 16>}, {transform_indices = @transform_3, window_bounds = array<i64: 1, 256>}, {transform_indices = @transform_4, window_bounds = array<i64: 256, 1>}, {transform_indices = @transform_5, window_bounds = array<i64: 1, 128, 128>}, {transform_indices = @transform_6, window_bounds = array<i64: 1, 16, 128>}, {transform_indices = @transform_7, window_bounds = array<i64: 1, 1, 128>}, {transform_indices = @transform_8, window_bounds = array<i64: 1, 128, 128>}, {transform_indices = @transform_9, window_bounds = array<i64: 1, 1, 128>}, {transform_indices = @transform_10, window_bounds = array<i64: 1, 128, 128>}, {transform_indices = @transform_11, window_bounds = array<i64: 1, 1, 128>}, {transform_indices = @transform_12, window_bounds = array<i64: 1, 128, 128>}, {transform_indices = @transform_13, window_bounds = array<i64: 1, 1, 128>}, {pipeline_mode = #tpu.pipeline_mode<synchronous>, transform_indices = @transform_14, window_bounds = array<i64: 16, 128>}]} {
    %c0_i32 = arith.constant 0 : i32
    %0 = arith.cmpi eq, %arg0, %c0_i32 : i32
    %c0_i32_0 = arith.constant 0 : i32
    %1 = arith.cmpi eq, %arg1, %c0_i32_0 : i32
    %2 = arith.andi %0, %1 : i1
    %3 = arith.extui %2 : i1 to i32
    %c0_i32_1 = arith.constant 0 : i32
    %4 = arith.cmpi ne, %3, %c0_i32_1 : i32
    scf.if %4 {
      %c0_44 = arith.constant 0 : index
      %c0_45 = arith.constant 0 : index
      %85 = vector.load %arg2[%c0_44, %c0_45] : memref<16x128xf32, #tpu.memory_space<vmem>>, vector<16x128xf32>
      %c0_46 = arith.constant 0 : index
      %c0_47 = arith.constant 0 : index
      %86 = vector.load %arg17[%c0_46, %c0_47] : memref<16x128xf32, #tpu.memory_space<vmem>>, vector<16x128xf32>
      tpu.vector_store %arg17[%c0_46, %c0_47], %85 {strides = array<i32>} : memref<16x128xf32, #tpu.memory_space<vmem>>, vector<16x128xf32>,
    } else {
    }
    %c0_i32_2 = arith.constant 0 : i32
    %5 = arith.cmpi eq, %arg1, %c0_i32_2 : i32
    %6 = arith.extui %5 : i1 to i32
    %c0_i32_3 = arith.constant 0 : i32
    %7 = arith.cmpi ne, %6, %c0_i32_3 : i32
    scf.if %7 {
      %c0_44 = arith.constant 0 : index
      %c0_45 = arith.constant 0 : index
      %85 = vector.load %arg17[%c0_44, %c0_45] : memref<16x128xf32, #tpu.memory_space<vmem>>, vector<16x128xf32>
      %c0_46 = arith.constant 0 : index
      %c0_47 = arith.constant 0 : index
      %c0_48 = arith.constant 0 : index
      %86 = vector.load %arg7[%c0_46, %c0_47, %c0_48] : memref<1x128x128xf32, #tpu.memory_space<vmem>>, vector<1x128x128xf32>
      %87 = vector.shape_cast %86 : vector<1x128x128xf32> to vector<128x128xf32>
      %cst_49 = arith.constant dense<0.000000e+00> : vector<16x128xf32>
      %88 = tpu.matmul %85, %87, %cst_49 {dimension_numbers = #tpu.dot_dimension_numbers<[1], [0], [0], [1], [0, 0, 1, 1], [], []>} : vector<16x128xf32>, vector<128x128xf32>, vector<16x128xf32> -> vector<16x128xf32>
      %89 = arith.truncf %88 : vector<16x128xf32> to vector<16x128xbf16>
      %c0_50 = arith.constant 0 : index
      %c0_51 = arith.constant 0 : index
      %90 = vector.load %arg18[%c0_50, %c0_51] : memref<16x128xbf16, #tpu.memory_space<vmem>>, vector<16x128xbf16>
      tpu.vector_store %arg18[%c0_50, %c0_51], %89 {strides = array<i32>} : memref<16x128xbf16, #tpu.memory_space<vmem>>, vector<16x128xbf16>,
      %cst_52 = arith.constant 0.000000e+00 : f32
      %91 = vector.broadcast %cst_52 : f32 to vector<16x128xf32>
      %c0_53 = arith.constant 0 : index
      %c0_54 = arith.constant 0 : index
      %92 = vector.load %arg19[%c0_53, %c0_54] : memref<16x128xf32, #tpu.memory_space<vmem>>, vector<16x128xf32>
      tpu.vector_store %arg19[%c0_53, %c0_54], %91 {strides = array<i32>} : memref<16x128xf32, #tpu.memory_space<vmem>>, vector<16x128xf32>,
    } else {
    }
    %c0 = arith.constant 0 : index
    %c0_4 = arith.constant 0 : index
    %8 = vector.load %arg3[%c0, %c0_4] : memref<256x1xf32, #tpu.memory_space<vmem>>, vector<256x1xf32>
    %c0_5 = arith.constant 0 : index
    %c0_6 = arith.constant 0 : index
    %9 = vector.load %arg4[%c0_5, %c0_6] : memref<1x16xf32, #tpu.memory_space<vmem>>, vector<1x16xf32>
    %10 = vector.broadcast %8 : vector<256x1xf32> to vector<256x16xf32>
    %11 = vector.broadcast %9 : vector<1x16xf32> to vector<256x16xf32>
    %12 = arith.subf %10, %11 : vector<256x16xf32>
    %13 = arith.mulf %12, %12 : vector<256x16xf32>
    %cst = arith.constant -4.49999952 : f32
    %14 = vector.broadcast %cst : f32 to vector<256x16xf32>
    %15 = arith.mulf %14, %13 : vector<256x16xf32>
    %16 = math.exp %15 : vector<256x16xf32>
    %cst_7 = arith.constant 0.628318548 : f32
    %17 = vector.broadcast %cst_7 : f32 to vector<256x1xf32>
    %18 = arith.mulf %8, %17 : vector<256x1xf32>
    %19 = math.cos %18 : vector<256x1xf32>
    %cst_8 = arith.constant 1.000000e+00 : f32
    %20 = vector.broadcast %cst_8 : f32 to vector<256x1xf32>
    %21 = arith.addf %19, %20 : vector<256x1xf32>
    %cst_9 = arith.constant 5.000000e-01 : f32
    %22 = vector.broadcast %cst_9 : f32 to vector<256x1xf32>
    %23 = arith.mulf %22, %21 : vector<256x1xf32>
    %cst_10 = arith.constant 5.000000e+00 : f32
    %24 = vector.broadcast %cst_10 : f32 to vector<256x1xf32>
    %25 = arith.cmpf olt, %8, %24 : vector<256x1xf32>
    %26 = arith.extui %25 : vector<256x1xi1> to vector<256x1xi32>
    %27 = arith.sitofp %26 : vector<256x1xi32> to vector<256x1xf32>
    %28 = arith.mulf %23, %27 : vector<256x1xf32>
    %c0_11 = arith.constant 0 : index
    %c0_12 = arith.constant 0 : index
    %c0_13 = arith.constant 0 : index
    %29 = vector.load %arg8[%c0_11, %c0_12, %c0_13] : memref<1x16x128xf32, #tpu.memory_space<vmem>>, vector<1x16x128xf32>
    %30 = vector.shape_cast %29 : vector<1x16x128xf32> to vector<16x128xf32>
    %cst_14 = arith.constant dense<0.000000e+00> : vector<256x128xf32>
    %31 = tpu.matmul %16, %30, %cst_14 {dimension_numbers = #tpu.dot_dimension_numbers<[1], [0], [0], [1], [0, 0, 1, 1], [], []>} : vector<256x16xf32>, vector<16x128xf32>, vector<256x128xf32> -> vector<256x128xf32>
    %c0_15 = arith.constant 0 : index
    %c0_16 = arith.constant 0 : index
    %c0_17 = arith.constant 0 : index
    %32 = vector.load %arg9[%c0_15, %c0_16, %c0_17] : memref<1x1x128xf32, #tpu.memory_space<vmem>>, vector<1x1x128xf32>
    %33 = vector.shape_cast %32 : vector<1x1x128xf32> to vector<1x128xf32>
    %34 = vector.broadcast %33 : vector<1x128xf32> to vector<256x128xf32>
    %35 = arith.addf %31, %34 : vector<256x128xf32>
    %cst_18 = arith.constant 0.000000e+00 : f32
    %36 = vector.broadcast %cst_18 : f32 to vector<256x128xf32>
    %37 = arith.maximumf %35, %36 : vector<256x128xf32>
    %38 = math.absf %35 : vector<256x128xf32>
    %cst_19 = arith.constant 0.000000e+00 : f32
    %39 = vector.broadcast %cst_19 : f32 to vector<256x128xf32>
    %40 = arith.subf %39, %38 : vector<256x128xf32>
    %41 = math.exp %40 : vector<256x128xf32>
    %42 = math.log1p %41 : vector<256x128xf32>
    %43 = arith.addf %37, %42 : vector<256x128xf32>
    %cst_20 = arith.constant 0.693147182 : f32
    %44 = vector.broadcast %cst_20 : f32 to vector<256x128xf32>
    %45 = arith.subf %43, %44 : vector<256x128xf32>
    %c0_21 = arith.constant 0 : index
    %c0_22 = arith.constant 0 : index
    %c0_23 = arith.constant 0 : index
    %46 = vector.load %arg10[%c0_21, %c0_22, %c0_23] : memref<1x128x128xf32, #tpu.memory_space<vmem>>, vector<1x128x128xf32>
    %47 = vector.shape_cast %46 : vector<1x128x128xf32> to vector<128x128xf32>
    %cst_24 = arith.constant dense<0.000000e+00> : vector<256x128xf32>
    %48 = tpu.matmul %45, %47, %cst_24 {dimension_numbers = #tpu.dot_dimension_numbers<[1], [0], [0], [1], [0, 0, 1, 1], [], []>} : vector<256x128xf32>, vector<128x128xf32>, vector<256x128xf32> -> vector<256x128xf32>
    %c0_25 = arith.constant 0 : index
    %c0_26 = arith.constant 0 : index
    %c0_27 = arith.constant 0 : index
    %49 = vector.load %arg11[%c0_25, %c0_26, %c0_27] : memref<1x1x128xf32, #tpu.memory_space<vmem>>, vector<1x1x128xf32>
    %50 = vector.shape_cast %49 : vector<1x1x128xf32> to vector<1x128xf32>
    %51 = vector.broadcast %50 : vector<1x128xf32> to vector<256x128xf32>
    %52 = arith.addf %48, %51 : vector<256x128xf32>
    %53 = vector.broadcast %28 : vector<256x1xf32> to vector<256x128xf32>
    %54 = arith.mulf %52, %53 : vector<256x128xf32>
    %55 = tpu.iota {dimensions = array<i32: 1>} : vector<256x16xi32>
    %c0_28 = arith.constant 0 : index
    %c0_29 = arith.constant 0 : index
    %56 = vector.load %arg6[%c0_28, %c0_29] : memref<256x1xi32, #tpu.memory_space<vmem>>, vector<256x1xi32>
    %57 = vector.broadcast %56 : vector<256x1xi32> to vector<256x16xi32>
    %58 = arith.cmpi eq, %55, %57 : vector<256x16xi32>
    %59 = arith.extui %58 : vector<256x16xi1> to vector<256x16xi32>
    %60 = arith.sitofp %59 : vector<256x16xi32> to vector<256x16xf32>
    %61 = arith.truncf %60 : vector<256x16xf32> to vector<256x16xbf16>
    %c0_30 = arith.constant 0 : index
    %c0_31 = arith.constant 0 : index
    %62 = vector.load %arg18[%c0_30, %c0_31] : memref<16x128xbf16, #tpu.memory_space<vmem>>, vector<16x128xbf16>
    %cst_32 = arith.constant dense<0.000000e+00> : vector<256x128xf32>
    %63 = tpu.matmul %61, %62, %cst_32 {dimension_numbers = #tpu.dot_dimension_numbers<[1], [0], [0], [1], [0, 0, 1, 1], [], []>} : vector<256x16xbf16>, vector<16x128xbf16>, vector<256x128xf32> -> vector<256x128xf32>
    %64 = arith.mulf %63, %54 : vector<256x128xf32>
    %65 = tpu.iota {dimensions = array<i32: 0>} : vector<16x256xi32>
    %c0_33 = arith.constant 0 : index
    %c0_34 = arith.constant 0 : index
    %66 = vector.load %arg5[%c0_33, %c0_34] : memref<1x256xi32, #tpu.memory_space<vmem>>, vector<1x256xi32>
    %67 = vector.broadcast %66 : vector<1x256xi32> to vector<16x256xi32>
    %68 = arith.cmpi eq, %65, %67 : vector<16x256xi32>
    %69 = arith.extui %68 : vector<16x256xi1> to vector<16x256xi32>
    %70 = arith.sitofp %69 : vector<16x256xi32> to vector<16x256xf32>
    %71 = arith.truncf %70 : vector<16x256xf32> to vector<16x256xbf16>
    %c0_35 = arith.constant 0 : index
    %c0_36 = arith.constant 0 : index
    %72 = vector.load %arg19[%c0_35, %c0_36] : memref<16x128xf32, #tpu.memory_space<vmem>>, vector<16x128xf32>
    %73 = arith.truncf %64 : vector<256x128xf32> to vector<256x128xbf16>
    %cst_37 = arith.constant dense<0.000000e+00> : vector<16x128xf32>
    %74 = tpu.matmul %71, %73, %cst_37 {dimension_numbers = #tpu.dot_dimension_numbers<[1], [0], [0], [1], [0, 0, 1, 1], [], []>} : vector<16x256xbf16>, vector<256x128xbf16>, vector<16x128xf32> -> vector<16x128xf32>
    %75 = arith.addf %72, %74 : vector<16x128xf32>
    %c0_38 = arith.constant 0 : index
    %c0_39 = arith.constant 0 : index
    %76 = vector.load %arg19[%c0_38, %c0_39] : memref<16x128xf32, #tpu.memory_space<vmem>>, vector<16x128xf32>
    tpu.vector_store %arg19[%c0_38, %c0_39], %75 {strides = array<i32>} : memref<16x128xf32, #tpu.memory_space<vmem>>, vector<16x128xf32>,
    %c1_i32 = arith.constant 1 : i32
    %77 = arith.cmpi eq, %arg1, %c1_i32 : i32
    %78 = arith.extui %77 : i1 to i32
    %c0_i32_40 = arith.constant 0 : i32
    %79 = arith.cmpi ne, %78, %c0_i32_40 : i32
    scf.if %79 {
      %c0_44 = arith.constant 0 : index
      %c0_45 = arith.constant 0 : index
      %85 = vector.load %arg19[%c0_44, %c0_45] : memref<16x128xf32, #tpu.memory_space<vmem>>, vector<16x128xf32>
      %c0_46 = arith.constant 0 : index
      %c0_47 = arith.constant 0 : index
      %c0_48 = arith.constant 0 : index
      %86 = vector.load %arg12[%c0_46, %c0_47, %c0_48] : memref<1x128x128xf32, #tpu.memory_space<vmem>>, vector<1x128x128xf32>
      %87 = vector.shape_cast %86 : vector<1x128x128xf32> to vector<128x128xf32>
      %cst_49 = arith.constant dense<0.000000e+00> : vector<16x128xf32>
      %88 = tpu.matmul %85, %87, %cst_49 {dimension_numbers = #tpu.dot_dimension_numbers<[1], [0], [0], [1], [0, 0, 1, 1], [], []>} : vector<16x128xf32>, vector<128x128xf32>, vector<16x128xf32> -> vector<16x128xf32>
      %c0_50 = arith.constant 0 : index
      %c0_51 = arith.constant 0 : index
      %c0_52 = arith.constant 0 : index
      %89 = vector.load %arg13[%c0_50, %c0_51, %c0_52] : memref<1x1x128xf32, #tpu.memory_space<vmem>>, vector<1x1x128xf32>
      %90 = vector.shape_cast %89 : vector<1x1x128xf32> to vector<1x128xf32>
      %91 = vector.broadcast %90 : vector<1x128xf32> to vector<16x128xf32>
      %92 = arith.addf %88, %91 : vector<16x128xf32>
      %cst_53 = arith.constant 0.000000e+00 : f32
      %93 = vector.broadcast %cst_53 : f32 to vector<16x128xf32>
      %94 = arith.maximumf %92, %93 : vector<16x128xf32>
      %95 = math.absf %92 : vector<16x128xf32>
      %cst_54 = arith.constant 0.000000e+00 : f32
      %96 = vector.broadcast %cst_54 : f32 to vector<16x128xf32>
      %97 = arith.subf %96, %95 : vector<16x128xf32>
      %98 = math.exp %97 : vector<16x128xf32>
      %99 = math.log1p %98 : vector<16x128xf32>
      %100 = arith.addf %94, %99 : vector<16x128xf32>
      %cst_55 = arith.constant 0.693147182 : f32
      %101 = vector.broadcast %cst_55 : f32 to vector<16x128xf32>
      %102 = arith.subf %100, %101 : vector<16x128xf32>
      %c0_56 = arith.constant 0 : index
      %c0_57 = arith.constant 0 : index
      %c0_58 = arith.constant 0 : index
      %103 = vector.load %arg14[%c0_56, %c0_57, %c0_58] : memref<1x128x128xf32, #tpu.memory_space<vmem>>, vector<1x128x128xf32>
      %104 = vector.shape_cast %103 : vector<1x128x128xf32> to vector<128x128xf32>
      %cst_59 = arith.constant dense<0.000000e+00> : vector<16x128xf32>
      %105 = tpu.matmul %102, %104, %cst_59 {dimension_numbers = #tpu.dot_dimension_numbers<[1], [0], [0], [1], [0, 0, 1, 1], [], []>} : vector<16x128xf32>, vector<128x128xf32>, vector<16x128xf32> -> vector<16x128xf32>
      %c0_60 = arith.constant 0 : index
      %c0_61 = arith.constant 0 : index
      %c0_62 = arith.constant 0 : index
      %106 = vector.load %arg15[%c0_60, %c0_61, %c0_62] : memref<1x1x128xf32, #tpu.memory_space<vmem>>, vector<1x1x128xf32>
      %107 = vector.shape_cast %106 : vector<1x1x128xf32> to vector<1x128xf32>
      %108 = vector.broadcast %107 : vector<1x128xf32> to vector<16x128xf32>
      %109 = arith.addf %105, %108 : vector<16x128xf32>
      %c0_63 = arith.constant 0 : index
      %c0_64 = arith.constant 0 : index
      %110 = vector.load %arg17[%c0_63, %c0_64] : memref<16x128xf32, #tpu.memory_space<vmem>>, vector<16x128xf32>
      %111 = arith.addf %110, %109 : vector<16x128xf32>
      %c0_65 = arith.constant 0 : index
      %c0_66 = arith.constant 0 : index
      %112 = vector.load %arg17[%c0_65, %c0_66] : memref<16x128xf32, #tpu.memory_space<vmem>>, vector<16x128xf32>
      tpu.vector_store %arg17[%c0_65, %c0_66], %111 {strides = array<i32>} : memref<16x128xf32, #tpu.memory_space<vmem>>, vector<16x128xf32>,
    } else {
    }
    %c1_i32_41 = arith.constant 1 : i32
    %80 = arith.cmpi eq, %arg0, %c1_i32_41 : i32
    %c1_i32_42 = arith.constant 1 : i32
    %81 = arith.cmpi eq, %arg1, %c1_i32_42 : i32
    %82 = arith.andi %80, %81 : i1
    %83 = arith.extui %82 : i1 to i32
    %c0_i32_43 = arith.constant 0 : i32
    %84 = arith.cmpi ne, %83, %c0_i32_43 : i32
    scf.if %84 {
      %c0_44 = arith.constant 0 : index
      %c0_45 = arith.constant 0 : index
      %85 = vector.load %arg17[%c0_44, %c0_45] : memref<16x128xf32, #tpu.memory_space<vmem>>, vector<16x128xf32>
      %c0_46 = arith.constant 0 : index
      %c0_47 = arith.constant 0 : index
      %86 = vector.load %arg16[%c0_46, %c0_47] : memref<16x128xf32, #tpu.memory_space<vmem>>, vector<16x128xf32>
      tpu.vector_store %arg16[%c0_46, %c0_47], %85 {strides = array<i32>} : memref<16x128xf32, #tpu.memory_space<vmem>>, vector<16x128xf32>,
    } else {
    }
    return
  }
  func.func @transform_0(%arg0: i32, %arg1: i32) -> (i32, i32) {
    %c0_i32 = arith.constant 0 : i32
    %c0_i32_0 = arith.constant 0 : i32
    %c0_i32_1 = arith.constant 0 : i32
    return %c0_i32, %c0_i32_0 : i32, i32
  }
  func.func @transform_1(%arg0: i32, %arg1: i32) -> (i32, i32) {
    %c0_i32 = arith.constant 0 : i32
    %c0_i32_0 = arith.constant 0 : i32
    return %arg1, %c0_i32 : i32, i32
  }
  func.func @transform_2(%arg0: i32, %arg1: i32) -> (i32, i32) {
    %c0_i32 = arith.constant 0 : i32
    %c0_i32_0 = arith.constant 0 : i32
    %c0_i32_1 = arith.constant 0 : i32
    return %c0_i32, %c0_i32_0 : i32, i32
  }
  func.func @transform_3(%arg0: i32, %arg1: i32) -> (i32, i32) {
    %c0_i32 = arith.constant 0 : i32
    %c0_i32_0 = arith.constant 0 : i32
    return %c0_i32, %arg1 : i32, i32
  }
  func.func @transform_4(%arg0: i32, %arg1: i32) -> (i32, i32) {
    %c0_i32 = arith.constant 0 : i32
    %c0_i32_0 = arith.constant 0 : i32
    return %arg1, %c0_i32 : i32, i32
  }
  func.func @transform_5(%arg0: i32, %arg1: i32) -> (i32, i32, i32) {
    %c0_i32 = arith.constant 0 : i32
    %c0_i32_0 = arith.constant 0 : i32
    %c0_i32_1 = arith.constant 0 : i32
    return %arg0, %c0_i32, %c0_i32_0 : i32, i32, i32
  }
  func.func @transform_6(%arg0: i32, %arg1: i32) -> (i32, i32, i32) {
    %c0_i32 = arith.constant 0 : i32
    %c0_i32_0 = arith.constant 0 : i32
    %c0_i32_1 = arith.constant 0 : i32
    return %arg0, %c0_i32, %c0_i32_0 : i32, i32, i32
  }
  func.func @transform_7(%arg0: i32, %arg1: i32) -> (i32, i32, i32) {
    %c0_i32 = arith.constant 0 : i32
    %c0_i32_0 = arith.constant 0 : i32
    %c0_i32_1 = arith.constant 0 : i32
    return %arg0, %c0_i32, %c0_i32_0 : i32, i32, i32
  }
  func.func @transform_8(%arg0: i32, %arg1: i32) -> (i32, i32, i32) {
    %c0_i32 = arith.constant 0 : i32
    %c0_i32_0 = arith.constant 0 : i32
    %c0_i32_1 = arith.constant 0 : i32
    return %arg0, %c0_i32, %c0_i32_0 : i32, i32, i32
  }
  func.func @transform_9(%arg0: i32, %arg1: i32) -> (i32, i32, i32) {
    %c0_i32 = arith.constant 0 : i32
    %c0_i32_0 = arith.constant 0 : i32
    %c0_i32_1 = arith.constant 0 : i32
    return %arg0, %c0_i32, %c0_i32_0 : i32, i32, i32
  }
  func.func @transform_10(%arg0: i32, %arg1: i32) -> (i32, i32, i32) {
    %c0_i32 = arith.constant 0 : i32
    %c0_i32_0 = arith.constant 0 : i32
    %c0_i32_1 = arith.constant 0 : i32
    return %arg0, %c0_i32, %c0_i32_0 : i32, i32, i32
  }
  func.func @transform_11(%arg0: i32, %arg1: i32) -> (i32, i32, i32) {
    %c0_i32 = arith.constant 0 : i32
    %c0_i32_0 = arith.constant 0 : i32
    %c0_i32_1 = arith.constant 0 : i32
    return %arg0, %c0_i32, %c0_i32_0 : i32, i32, i32
  }
  func.func @transform_12(%arg0: i32, %arg1: i32) -> (i32, i32, i32) {
    %c0_i32 = arith.constant 0 : i32
    %c0_i32_0 = arith.constant 0 : i32
    %c0_i32_1 = arith.constant 0 : i32
    return %arg0, %c0_i32, %c0_i32_0 : i32, i32, i32
  }
  func.func @transform_13(%arg0: i32, %arg1: i32) -> (i32, i32, i32) {
    %c0_i32 = arith.constant 0 : i32
    %c0_i32_0 = arith.constant 0 : i32
    %c0_i32_1 = arith.constant 0 : i32
    return %arg0, %c0_i32, %c0_i32_0 : i32, i32, i32
  }
  func.func @transform_14(%arg0: i32, %arg1: i32) -> (i32, i32) {
    %c0_i32 = arith.constant 0 : i32
    %c0_i32_0 = arith.constant 0 : i32
    %c0_i32_1 = arith.constant 0 : i32
    return %c0_i32, %c0_i32_0 : i32, i32
  }
}

</mosaic_0001>

<bundles_post_ra>
// kernel: _lambda_.1
= control target key start
LH: loop header
LB: loop body
LE: loop exit
PB: predicated region body
PF: predicated region fallthrough
CT: control target
= control target key end

     0   :  { %s8391_s29 = smov 0   ;;  %s8393_s30 = smov 0   ;;  %s13226_s0 = inlined_call_operand.vmem [shape: f32[16,128], index: 0, kind: input, shape index: {}, may-alias: {0,14}]   ;;  %s13227_s1 = inlined_call_operand.vmem [shape: f32[512,1], index: 1, kind: input, shape index: {}]   ;;  %s13228_s2 = inlined_call_operand.vmem [shape: f32[1,16], index: 2, kind: input, shape index: {}]   ;;  %s13229_s3 = inlined_call_operand.vmem [shape: s32[1,512], index: 3, kind: input, shape index: {}]   ;;  %s13230_s4 = inlined_call_operand.vmem [shape: s32[512,1], index: 4, kind: input, shape index: {}]   ;;  %s13231_s5 = inlined_call_operand.vmem [shape: f32[2,128,128], index: 5, kind: input, shape index: {}]   ;;  %s13232_s6 = inlined_call_operand.vmem [shape: f32[2,16,128], index: 6, kind: input, shape index: {}]   ;;  %s13233_s7 = inlined_call_operand.vmem [shape: f32[2,1,128], index: 7, kind: input, shape index: {}]   ;;  %s13234_s8 = inlined_call_operand.vmem [shape: f32[2,128,128], index: 8, kind: input, shape index: {}]   ;;  %s13235_s9 = inlined_call_operand.vmem [shape: f32[2,1,128], index: 9, kind: input, shape index: {}]   ;;  %s13236_s10 = inlined_call_operand.vmem [shape: f32[2,128,128], index: 10, kind: input, shape index: {}]   ;;  %s13237_s11 = inlined_call_operand.vmem [shape: f32[2,1,128], index: 11, kind: input, shape index: {}]   ;;  %s13238_s12 = inlined_call_operand.vmem [shape: f32[2,128,128], index: 12, kind: input, shape index: {}]   ;;  %s13239_s13 = inlined_call_operand.vmem [shape: f32[2,1,128], index: 13, kind: input, shape index: {}]   ;;  %s13240_s14 = inlined_call_operand.vmem [shape: f32[16,128], index: 14, kind: output, shape index: {}, may-alias: {0,14}]  }
   0x1   :  { %13421 = sst [smem:[#allocation82_spill]] %s13227_s1  ;;  %s8395_s15 = smov 0  }
   0x2   :  { %13422 = sst [smem:[#allocation83_spill]] %s13229_s3  ;;  %s8397_s16 = smov 0  }
   0x3   :  { %13423 = sst [smem:[#allocation84_spill]] %s13230_s4  ;;  %s8399_s17 = smov 0  }
   0x4   :  { %13424 = sst [smem:[#allocation85_spill]] %s13231_s5 }
   0x5   :  { %13425 = sst [smem:[#allocation86_spill]] %s13232_s6 }
   0x6   :  { %13426 = sst [smem:[#allocation87_spill]] %s13233_s7 }
   0x7   :  { %13427 = sst [smem:[#allocation88_spill]] %s13234_s8 }
   0x8   :  { %13428 = sst [smem:[#allocation89_spill]] %s13240_s14 }
   0x9 LB: > { %13429 = sst [smem:[#allocation5_spill]] %s8292_s30  ;;  %s33_s18 = sadd.s32 1, %s8296_s15  ;;  %s8304_s17 = sphi %s8399_s17, %s24_s17   ;;  %s8300_s16 = sphi %s8397_s16, %s13877_s16   ;;  %s8296_s15 = sphi %s8395_s15, %s13876_s15   ;;  %s8292_s30 = sphi %s8393_s30, %s13875_s30   ;;  %s8288_s29 = sphi %s8391_s29, %s13874_s29  }
   0xa   : > { %13430 = sst [smem:[#allocation6_spill]] %s8296_s15  ;;  %s36_s19 = sadd.s32 1, %s8300_s16 }
   0xb   : > { %13431 = sst [smem:[#allocation7_spill]] %s8300_s16  ;;  %p34_p0 = scmp.ge.s32.totalorder %s33_s18, 2 }
   0xc   : > { %13432 = sst [smem:[#allocation8_spill]] %s8304_s17  ;;  %p6933_p1 = scmp.ge.s32.totalorder %s8304_s17, 1 }
   0xd   : > { %p523_p2 = scmp.lt.s32.totalorder %s8304_s17, 5  ;;  %s13879_s18 = smov (%p34_p0, %s33_s18), 0 }
   0xe   : > { %13433 = sst [smem:[#allocation9_spill]] %s13879_s18  ;;  %s13881_s19 = smov (!%p34_p0, %s36_s19), %s8300_s16 }
   0xf   : > { %p524_p3 = pnand %p6933_p1, %p523_p2  ;;  %p38_p4 = scmp.ge.s32.totalorder %s13881_s19, 2 }
  0x11   : > { %s13883_s19 = smov (%p38_p4, %s13881_s19), 0  ;;  %527 = sbr.rel (%p524_p3) target bundleno = 2328 (0x918), region = 76 }
  0x12   : > { %13434 = sst [smem:[#allocation10_spill]] %s13883_s19 }
  0x16   : > { %s6934_s20 = sshll.u32 %s8288_s29, 5  ;;  %s6936_s21 = sshll.u32 %s8288_s29, 1 }
  0x17   : > { %p611_p5 = scmp.lt.s32.totalorder %s6934_s20, 63  ;;  %p617_p6 = scmp.lt.s32.totalorder %s6936_s21, 3 }
  0x18   : > { %p627_p7 = scmp.lt.s32.totalorder %s8292_s30, 1  ;;  %p665_p8 = scmp.eq.s32.totalorder %s8292_s30, 0 }
  0x19   : > { %s13885_s20 = smov (!%p611_p5, %s6934_s20), 63  ;;  %s13887_s21 = smov (!%p617_p6, %s6936_s21), 3 }
  0x1a   : > { %13435 = sst [smem:[#allocation11_spill]] %s13887_s21  ;;  %s6935_s22 = sshll.u32 %s13885_s20, 3 }
  0x1b   : > { %p666_p9 = scmp.eq.s32.totalorder %s8288_s29, 0  ;;  %s13436_s1 = sld [smem:[#allocation82_spill]] }
  0x1c   : > { %s13438_s4 = sld [smem:[#allocation84_spill]] }
  0x1d   : > { %p667_p10 = pnand %p666_p9, %p665_p8  ;;  %s13439_s5 = sld [smem:[#allocation85_spill]] }
  0x1e   : > { %s8447_s15 = scalar_select %p627_p7, %s8292_s30, 1 }
  0x1f   : > { %s13440_s6 = sld [smem:[#allocation86_spill]] }
  0x20   : > { %s7243_s20 = sshll.u32 %s8447_s15, 7  ;;  %s7244_s23 = sshll.u32 %s8447_s15, 4 }
  0x21   : > { %s8435_s25 = scalar_lea.vmem %s13436_s1, %s6935_s22  ;;  %s13441_s7 = sld [smem:[#allocation87_spill]] }
  0x22   : > { %s8444_s16 = scalar_lea.vmem %s13438_s4, %s6935_s22  ;;  %s13442_s8 = sld [smem:[#allocation88_spill]] }
  0x23   : > { %s8454_s26 = scalar_lea.vmem %s13439_s5, %s7243_s20  ;;  %s647_s1 = scalar_lea.vmem %s13235_s9, %s8447_s15 }
  0x24   : > { %s8479_s27 = scalar_lea.vmem %s13236_s10, %s7243_s20  ;;  %s655_s28 = scalar_lea.vmem %s13237_s11, %s8447_s15 }
  0x25   : > { %s8459_s19 = scalar_lea.vmem %s13440_s6, %s7244_s23  ;;  %670 = sbr.rel (%p667_p10) target bundleno = 44 (0x2c), region = 80 }
  0x27   : > { %s8465_s4 = scalar_lea.vmem %s13441_s7, %s8447_s15  ;;  %s8488_s7 = scalar_lea.vmem %s13238_s12, %s7243_s20 }
  0x28   : > { %s8470_s30 = scalar_lea.vmem %s13442_s8, %s7243_s20  ;;  %s663_s8 = scalar_lea.vmem %s13239_s13, %s8447_s15 }
  0x2a   : > { %v671_v0 = vld [vmem:[%s13226_s0] sm:$0xff]  ;;  %v672_v1 = vld [vmem:[%s13226_s0 + $0x8] sm:$0xff] }
  0x2b   : > { %673 = vst [vmem:[#allocation2] sm:$0xff] %v671_v0  ;;  %674 = vst [vmem:[#allocation2 + $0x8] sm:$0xff] %v672_v1 }
  0x2c PF: > { %p6949_p11 = scmp.ne.s32.totalorder %s8288_s29, 0 }
  0x2e   : > { %677 = sbr.rel (%p6949_p11) target bundleno = 282 (0x11a), region = 84 }
  0x33   : > { %v695_v2 = vld [vmem:[%s8454_s26 + $0x78] sm:$0xff]  ;;  %v694_v3 = vld [vmem:[%s8454_s26 + $0x70] sm:$0xff]  ;;  %v693_v4 = vld [vmem:[%s8454_s26 + $0x68] sm:$0xff]  ;;  %v8306_v20 = vmov 0.0  }
  0x34   : > { %7430 = vmatprep.subr.mxu0 %v695_v2  ;;  %v692_v5 = vld [vmem:[%s8454_s26 + $0x60] sm:$0xff]  ;;  %v691_v7 = vld [vmem:[%s8454_s26 + $0x58] sm:$0xff]  ;;  %v690_v8 = vld [vmem:[%s8454_s26 + $0x50] sm:$0xff]  ;;  %781 = vst [vmem:[#allocation4 + $0x8] sm:$0xff] %v8306_v20 }
  0x35   : > { %7431 = vmatpush3.msra.mxu0 %v695_v2  ;;  %v678_v6 = vld [vmem:[#allocation2] sm:$0xff]  ;;  %v689_v9 = vld [vmem:[%s8454_s26 + $0x48] sm:$0xff]  ;;  %v687_v11 = vld [vmem:[%s8454_s26 + $0x38] sm:$0xff]  ;;  %782 = vst [vmem:[#allocation4] sm:$0xff] %v8306_v20 }
  0x36   : > { %7432 = vmatprep.subr.mxu0 %v694_v3  ;;  %7462 = vmatprep.mubr.f32.mxu0 %v678_v6  ;;  %v688_v10 = vld [vmem:[%s8454_s26 + $0x40] sm:$0xff]  ;;  %v686_v12 = vld [vmem:[%s8454_s26 + $0x30] sm:$0xff]  ;;  %v685_v13 = vld [vmem:[%s8454_s26 + $0x28] sm:$0xff] }
  0x37   : > { %7433 = vmatpush3.msra.mxu0 %v694_v3  ;;  %v684_v14 = vld [vmem:[%s8454_s26 + $0x20] sm:$0xff]  ;;  %v683_v15 = vld [vmem:[%s8454_s26 + $0x18] sm:$0xff]  ;;  %v682_v16 = vld [vmem:[%s8454_s26 + $0x10] sm:$0xff] }
  0x38   : > { %7434 = vmatprep.subr.mxu0 %v693_v4  ;;  %v681_v17 = vld [vmem:[%s8454_s26 + $0x8] sm:$0xff]  ;;  %v680_v18 = vld [vmem:[%s8454_s26] sm:$0xff] }
  0x39   : > { %7435 = vmatpush3.msra.mxu0 %v693_v4  ;;  %v679_v19 = vld [vmem:[#allocation2 + $0x8] sm:$0xff] }
  0x3a   : > { %7436 = vmatprep.subr.mxu0 %v692_v5 }
  0x3b   : > { %7437 = vmatpush3.msra.mxu0 %v692_v5 }
  0x3c   : > { %7438 = vmatprep.subr.mxu0 %v691_v7 }
  0x3d   : > { %7439 = vmatpush3.msra.mxu0 %v691_v7 }
  0x3e   : > { %7440 = vmatprep.subr.mxu0 %v690_v8 }
  0x3f   : > { %7441 = vmatpush3.msra.mxu0 %v690_v8 }
  0x40   : > { %7442 = vmatprep.subr.mxu0 %v689_v9 }
  0x41   : > { %7443 = vmatpush3.msra.mxu0 %v689_v9 }
  0x42   : > { %7444 = vmatprep.subr.mxu0 %v688_v10 }
  0x43   : > { %7445 = vmatpush3.msra.mxu0 %v688_v10 }
  0x44   : > { %7446 = vmatprep.subr.mxu0 %v687_v11 }
  0x45   : > { %7447 = vmatpush3.msra.mxu0 %v687_v11 }
  0x46   : > { %7448 = vmatprep.subr.mxu0 %v686_v12 }
  0x47   : > { %7449 = vmatpush3.msra.mxu0 %v686_v12 }
  0x48   : > { %7450 = vmatprep.subr.mxu0 %v685_v13 }
  0x49   : > { %7451 = vmatpush3.msra.mxu0 %v685_v13 }
  0x4a   : > { %7452 = vmatprep.subr.mxu0 %v684_v14 }
  0x4b   : > { %7453 = vmatpush3.msra.mxu0 %v684_v14 }
  0x4c   : > { %7454 = vmatprep.subr.mxu0 %v683_v15 }
  0x4d   : > { %7455 = vmatpush3.msra.mxu0 %v683_v15 }
  0x4e   : > { %7456 = vmatprep.subr.mxu0 %v682_v16 }
  0x4f   : > { %7457 = vmatpush3.msra.mxu0 %v682_v16 }
  0x50   : > { %7458 = vmatprep.subr.mxu0 %v681_v17 }
  0x51   : > { %7459 = vmatpush3.msra.mxu0 %v681_v17 }
  0x52   : > { %7460 = vmatprep.subr.mxu0 %v680_v18 }
  0x53   : > { %7461 = vmatpush3.msra.mxu0 %v680_v18 }
  0x54   : > { %7463 = vmatmul.mubr.f32.vlgmr.msra.gmra.mxu0 %v679_v19 }
 0x114   : > { %v7464_v21 = vpop.f32.mrf.mxu0 }
 0x116   : > { %v762_v22 = vpop.f32.mrf.mxu0 }
 0x117   : > { %v7253_v23 = vpack.c.bf16 %v7464_v21, %v762_v22 }
 0x119   : > { %7254 = vst [vmem:[#allocation3] sm:$0xff] %v7253_v23  }
 0x11a PF: > { %v785_v24 = vld [vmem:[%s8435_s25 + $0x10] sm:$0xff]  ;;  %v8307_v25 = vmov 0   ;;  %v783_v27 = vld [vmem:[%s8435_s25] sm:$0xff]  ;;  %v786_v29 = vld [vmem:[%s8435_s25 + $0x18] sm:$0xff]  ;;  %v13268_v60 = vmov 683565275  }
 0x11b   : > { %7880 = vset.pattern.permute.xlu1 %v8307_v25  ;;  %7879 = vset.pattern.permute.xlu0 %v8307_v25  ;;  %v8518_v26 = vmul.f32 0.62831855, %v785_v24  ;;  %v8521_v28 = vmul.f32 0.62831855, %v783_v27  ;;  %v8526_v32 = vmul.f32 0.62831855, %v786_v29 }
 0x11c   : > { %828 = vperm.xlu1 %7880, %v785_v24   ;;  %818 = vperm.xlu0 %7879, %v783_v27   ;;  %v784_v33 = vld [vmem:[%s8435_s25 + $0x8] sm:$0xff]  ;;  %v8537_v41 = vld [vmem:[%s8435_s25 + $0x20] sm:$0xff]  ;;  %v8542_v47 = vld [vmem:[%s8435_s25 + $0x38] sm:$0xff]  ;;  %v13259_v62 = vmov 2475754826   ;;  %s13822_s22 = sld [smem:[#allocation83_spill]] }
 0x11d   : > { %13443 = vst [vmem:[#allocation12_spill] sm:$0xff] %v8518_v26  ;;  %13444 = vst [vmem:[#allocation13_spill] sm:$0xff] %v8521_v28  ;;  %v13249_v30 = vand.u32 2147483647, %v8518_v26  ;;  %v1383_v31 = vand.u32 2139095040, %v8518_v26  ;;  %v1177_v34 = vand.u32 2139095040, %v8521_v28 }
 0x11e   : > { %13445 = vst [vmem:[#allocation14_spill] sm:$0xff] %v8526_v32  ;;  %v1486_v38 = vand.u32 2139095040, %v8526_v32  ;;  %v8534_v39 = vld [vmem:[%s8435_s25 + $0x28] sm:$0xff]  ;;  %v13247_v48 = vand.u32 2147483647, %v8521_v28  ;;  %v8546_v49 = vld [vmem:[%s8435_s25 + $0x30] sm:$0xff] }
 0x11f   : > { %v1384_v35 = vshrl.u32 %v1383_v31, 23  ;;  %v1387_v36 = vand.u32 8388607, %v13249_v30  ;;  %v1178_v37 = vshrl.u32 %v1177_v34, 23  ;;  %v13250_v54 = vand.u32 2147483647, %v8526_v32 }
 0x120   : > { %833 = vperm.xlu1 %7880, %v786_v29   ;;  %823 = vperm.xlu0 %7879, %v784_v33   ;;  %v1487_v43 = vshrl.u32 %v1486_v38, 23  ;;  %v8554_v57 = vmul.f32 0.62831855, %v784_v33  ;;  %v8558_v58 = vld [vmem:[%s8435_s25 + $0x48] sm:$0xff]  ;;  %v13261_v0 = vmov 2131351028  }
 0x121   : > { %v6961_v40 = vadd.s32 4294967169, %v1384_v35  ;;  %v6953_v42 = vadd.s32 4294967169, %v1178_v37  ;;  %v1388_v45 = vor.u32 8388608, %v1387_v36  ;;  %v791_v2 = vld [vmem:[%s8435_s25 + $0x40] sm:$0xff]  ;;  %v13253_v3 = vmov 2102212464  }
 0x122   : > { %v6965_v51 = vadd.s32 4294967169, %v1487_v43  ;;  %13446 = vst [vmem:[#allocation15_spill] sm:$0xff] %v8554_v57  ;;  %v13255_v5 = vmov 920167782   ;;  %v13266_v15 = vmov 1326507024  }
 0x123   : > { %v1390_v44 = vadd.s32 1, %v6961_v40  ;;  %v1184_v46 = vadd.s32 1, %v6953_v42  ;;  %v8552_v56 = vshll.u32 %v1388_v45, 8  ;;  %v794_v17 = vld [vmem:[%s8435_s25 + $0x58] sm:$0xff]  ;;  %p6525_p12 = scmp.eq.s32.totalorder %s8288_s29, 1  ;;  %p7236_p13 = scmp.ne.s32.totalorder %s8288_s29, 1 }
 0x124   : > { %843 = vperm.xlu1 %7880, %v8534_v39   ;;  %838 = vperm.xlu0 %7879, %v8537_v41   ;;  %v8566_v8 = vadd.s32 1, %v6965_v51 }
 0x125   : > { %vm1391_vm0 = vcmp.gt.s32.totalorder %v1390_v44, 0  ;;  %vm1185_vm1 = vcmp.gt.s32.totalorder %v1184_v46, 0 }
 0x126   : > { %v1392_v50 = vsel %vm1391_vm0, %v1390_v44, 0  ;;  %v1186_v53 = vsel %vm1185_vm1, %v1184_v46, 0  ;;  %vm1494_vm6 = vcmp.gt.s32.totalorder %v8566_v8, 0 }
 0x127   : > { %v1394_v52 = vand.u32 31, %v1392_v50  ;;  %v8550_v55 = vshrl.u32 %v1392_v50, 5  ;;  %v1188_v7 = vand.u32 31, %v1186_v53  ;;  %v8571_v12 = vshrl.u32 %v1186_v53, 5 }
 0x128   : > { %853 = vperm.xlu1 %7880, %v8542_v47   ;;  %848 = vperm.xlu0 %7879, %v8546_v49   ;;  %v1181_v53 = vand.u32 8388607, %v13247_v48 }
 0x129   : > { %v1395_v59 = vsub.s32 32, %v1394_v52  ;;  %v1397_v61 = vshll.u32 %v13268_v60, %v1394_v52  ;;  %v1400_v63 = vshll.u32 %v13259_v62, %v1394_v52  ;;  %v1403_v1 = vshll.u32 %v13261_v0, %v1394_v52 }
 0x12a   : > { %v1406_v4 = vshll.u32 %v13253_v3, %v1394_v52  ;;  %v1409_v6 = vshll.u32 %v13255_v5, %v1394_v52  ;;  %vm1412_vm2 = vcmp.lt.s32.totalorder %v8550_v55, 1  ;;  %vm1415_vm3 = vcmp.lt.s32.totalorder %v8550_v55, 4  ;;  %v793_v52 = vld [vmem:[%s8435_s25 + $0x50] sm:$0xff] }
 0x12b   : > { %v1398_v9 = vshrl.u32 %v13259_v62, %v1395_v59  ;;  %v1401_v10 = vshrl.u32 %v13261_v0, %v1395_v59  ;;  %v1404_v11 = vshrl.u32 %v13253_v3, %v1395_v59  ;;  %v1396_v13 = vshrl.u32 %v13268_v60, %v1395_v59 }
 0x12c   : > { %863 = vperm.xlu1 %7880, %v8558_v58   ;;  %v1407_v14 = vshrl.u32 %v13255_v5, %v1395_v59  ;;  %v1410_v16 = vshrl.u32 %v13266_v15, %v1395_v59  ;;  %858 = vperm.xlu0 %7879, %v791_v2   ;;  %vm1414_vm4 = vcmp.lt.s32.totalorder %v8550_v55, 3  ;;  %v1189_v23 = vsub.s32 32, %v1188_v7 }
 0x12d   : > { %v1399_v18 = vor.u32 %v1398_v9, %v1397_v61  ;;  %v1402_v19 = vor.u32 %v1401_v10, %v1400_v63  ;;  %v1405_v20 = vor.u32 %v1404_v11, %v1403_v1  ;;  %vm1413_vm5 = vcmp.lt.s32.totalorder %v8550_v55, 2 }
 0x12e   : > { %v1408_v21 = vor.u32 %v1407_v14, %v1406_v4  ;;  %v1411_v22 = vor.u32 %v1410_v16, %v1409_v6  ;;  %v1191_v33 = vshll.u32 %v13268_v60, %v1188_v7  ;;  %v1194_v34 = vshll.u32 %v13259_v62, %v1188_v7 }
 0x12f   : > { %v1417_v24 = vsel %vm1415_vm3, %v1405_v20, 2102212464  ;;  %v1420_v25 = vsel %vm1412_vm2, %v1399_v18, %v1402_v19  ;;  %v1424_v27 = vsel %vm1412_vm2, %v1402_v19, %v1405_v20  ;;  %v1416_v35 = vsel %vm1412_vm2, %v1396_v13, %v1399_v18 }
 0x130   : > { %873 = vperm.xlu1 %7880, %v794_v17   ;;  %v1421_v29 = vsel %vm1415_vm3, %v1408_v21, 920167782  ;;  %v1425_v31 = vsel %vm1415_vm3, %v1411_v22, 1326507024  ;;  %v1418_v36 = vsel %vm1414_vm4, %v1402_v19, %v1417_v24  ;;  %v1192_v43 = vshrl.u32 %v13259_v62, %v1189_v23  ;;  %868 = vperm.xlu0 %7879, %v793_v52  }
 0x131   : > { %v1422_v37 = vsel %vm1414_vm4, %v1405_v20, %v1421_v29  ;;  %v1426_v38 = vsel %vm1414_vm4, %v1408_v21, %v1425_v31  ;;  %v1195_v44 = vshrl.u32 %v13261_v0, %v1189_v23  ;;  %v1197_v59 = vshll.u32 %v13261_v0, %v1188_v7 }
 0x132   : > { %v1423_v40 = vsel %vm1413_vm5, %v1420_v25, %v1422_v37  ;;  %v1427_v42 = vsel %vm1413_vm5, %v1424_v27, %v1426_v38  ;;  %v1198_v61 = vshrl.u32 %v13253_v3, %v1189_v23  ;;  %v1280_v63 = vand.u32 2139095040, %v8554_v57 }
 0x133   : > { %v8597_v45 = vmul.u32.u64.low %v8552_v56, %v1427_v42  ;;  %v8598_v46 = vmul.u32.u64.high %v8552_v56, %v1427_v42, %v8597_v45  ;;  %v8601_v50 = vmul.u32.u64.low %v8552_v56, %v1423_v40  ;;  %v8602_v51 = vmul.u32.u64.high %v8552_v56, %v1423_v40, %v8601_v50 }
 0x134   : > { %v1200_v1 = vshll.u32 %v13253_v3, %v1188_v7  ;;  %v1201_v2 = vshrl.u32 %v13255_v5, %v1189_v23  ;;  %v1203_v4 = vshll.u32 %v13255_v5, %v1188_v7  ;;  %v1204_v6 = vshrl.u32 %v13266_v15, %v1189_v23 }
 0x135   : > { %v1419_v9 = vsel %vm1413_vm5, %v1416_v35, %v1418_v36  ;;  %v1193_v10 = vor.u32 %v1192_v43, %v1191_v33  ;;  %v1196_v11 = vor.u32 %v1195_v44, %v1194_v34  ;;  %v1438_v13 = vadd.s32 1, %v8602_v51 }
 0x136   : > { %v1199_v14 = vor.u32 %v1198_v61, %v1197_v59  ;;  %v1202_v16 = vor.u32 %v1201_v2, %v1200_v1  ;;  %vm1206_vm7 = vcmp.lt.s32.totalorder %v8571_v12, 1  ;;  %vm1437_vm8 = vc.u32 %v8598_v46, %v8601_v50 }
 0x137   : > { %v1205_v17 = vor.u32 %v1204_v6, %v1203_v4  ;;  %vm1208_vm9 = vcmp.lt.s32.totalorder %v8571_v12, 3  ;;  %vm1209_vm10 = vcmp.lt.s32.totalorder %v8571_v12, 4  ;;  %v1182_v55 = vor.u32 8388608, %v1181_v53 }
 0x138   : > { %v1215_v7 = vsel %vm1209_vm10, %v1202_v16, 920167782  ;;  %v1490_v18 = vand.u32 8388607, %v13250_v54  ;;  %v1435_v19 = vmul.u32 %v8552_v56, %v1419_v9  ;;  %vm1207_vm11 = vcmp.lt.s32.totalorder %v8571_v12, 2 }
 0x139   : > { %v1219_v20 = vsel %vm1209_vm10, %v1205_v17, 1326507024  ;;  %v1281_v21 = vshrl.u32 %v1280_v63, 23  ;;  %v1439_v22 = vsel %vm1437_vm8, %v1438_v13, %v8602_v51  ;;  %v1214_v24 = vsel %vm1206_vm7, %v1193_v10, %v1196_v11 }
 0x13a   : > { %v1216_v25 = vsel %vm1208_vm9, %v1199_v14, %v1215_v7  ;;  %v1495_v27 = vsel %vm1494_vm6, %v8566_v8, 0  ;;  %v1218_v56 = vsel %vm1206_vm7, %v1196_v11, %v1199_v14  ;;  %v1220_v29 = vsel %vm1208_vm9, %v1202_v16, %v1219_v20 }
 0x13b   : > { %v8644_v31 = vshll.u32 %v1182_v55, 8  ;;  %v1440_v33 = vadd.s32 %v1439_v22, %v1435_v19  ;;  %v1217_v34 = vsel %vm1207_vm11, %v1214_v24, %v1216_v25  ;;  %v1497_v35 = vand.u32 31, %v1495_v27 }
 0x13c   : > { %v1190_v36 = vshrl.u32 %v13268_v60, %v1189_v23  ;;  %v1221_v37 = vsel %vm1207_vm11, %v1218_v56, %v1220_v29  ;;  %v1491_v38 = vor.u32 8388608, %v1490_v18  ;;  %v6957_v8 = vadd.s32 4294967169, %v1281_v21 }
 0x13d   : > { %v1211_v40 = vsel %vm1209_vm10, %v1199_v14, 2102212464  ;;  %v8653_v42 = vshrl.u32 %v1495_v27, 5  ;;  %v1498_v43 = vsub.s32 32, %v1497_v35  ;;  %v1500_v44 = vshll.u32 %v13268_v60, %v1497_v35 }
 0x13e   : > { %v8657_v45 = vmul.u32.u64.low %v8644_v31, %v1217_v34  ;;  %v8658_v51 = vmul.u32.u64.high %v8644_v31, %v1217_v34, %v8657_v45  ;;  %v1503_v23 = vshll.u32 %v13259_v62, %v1497_v35  ;;  %v1506_v52 = vshll.u32 %v13261_v0, %v1497_v35 }
 0x13f   : > { %v1441_v53 = vadd.s32 536870912, %v1440_v33  ;;  %v8664_v59 = vmul.u32.u64.low %v8644_v31, %v1221_v37  ;;  %v8665_v61 = vmul.u32.u64.high %v8644_v31, %v1221_v37, %v8664_v59  ;;  %v1501_v63 = vshrl.u32 %v13259_v62, %v1498_v43 }
 0x140   : > { %v1504_v1 = vshrl.u32 %v13261_v0, %v1498_v43  ;;  %v1507_v2 = vshrl.u32 %v13253_v3, %v1498_v43  ;;  %v1509_v4 = vshll.u32 %v13253_v3, %v1497_v35  ;;  %v1287_v6 = vadd.s32 1, %v6957_v8 }
 0x141   : > { %v1502_v9 = vor.u32 %v1501_v63, %v1500_v44  ;;  %v1510_v13 = vshrl.u32 %v13255_v5, %v1498_v43  ;;  %v1512_v14 = vshll.u32 %v13255_v5, %v1497_v35  ;;  %vm1515_vm12 = vcmp.lt.s32.totalorder %v8653_v42, 1  ;;  %v796_v63 = vld [vmem:[%s8435_s25 + $0x68] sm:$0xff] }
 0x142   : > { %v1505_v16 = vor.u32 %v1504_v1, %v1503_v23  ;;  %v1508_v17 = vor.u32 %v1507_v2, %v1506_v52  ;;  %v1513_v55 = vshrl.u32 %v13266_v15, %v1498_v43  ;;  %vm1518_vm13 = vcmp.lt.s32.totalorder %v8653_v42, 4  ;;  %883 = vperm.xlu1 %7880, %v796_v63  }
 0x143   : > { %v8676_v7 = vshrl.u32 %v1441_v53, 30  ;;  %v1511_v18 = vor.u32 %v1510_v13, %v1509_v4  ;;  %vm1517_vm14 = vcmp.lt.s32.totalorder %v8653_v42, 3  ;;  %vm1516_vm15 = vcmp.lt.s32.totalorder %v8653_v42, 2 }
 0x144   : > { %v1514_v19 = vor.u32 %v1513_v55, %v1512_v14  ;;  %v1523_v20 = vsel %vm1515_vm12, %v1502_v9, %v1505_v16  ;;  %v1210_v21 = vsel %vm1206_vm7, %v1190_v36, %v1193_v10  ;;  %v1212_v22 = vsel %vm1208_vm9, %v1196_v11, %v1211_v40 }
 0x145   : > { %13447 = vst [vmem:[#allocation16_spill] sm:$0xff] %v8676_v7  ;;  %v1524_v24 = vsel %vm1518_vm13, %v1511_v18, 920167782  ;;  %v1527_v25 = vsel %vm1515_vm12, %v1505_v16, %v1508_v17  ;;  %v1531_v29 = vshll.u32 %v1491_v38, 8  ;;  %vm1288_vm0 = vcmp.gt.s32.totalorder %v1287_v6, 0 }
 0x146   : > { %v1525_v27 = vsel %vm1517_vm14, %v1508_v17, %v1524_v24  ;;  %v1528_v56 = vsel %vm1518_vm13, %v1514_v19, 1326507024  ;;  %v1443_v10 = vshll.u32 %v8676_v7, 30  ;;  %v1213_v35 = vsel %vm1207_vm11, %v1210_v21, %v1212_v22 }
 0x147   : > { %v1526_v11 = vsel %vm1516_vm15, %v1523_v20, %v1525_v27  ;;  %v1529_v34 = vsel %vm1517_vm14, %v1511_v18, %v1528_v56  ;;  %vm1231_vm1 = vc.u32 %v8665_v61, %v8657_v45  ;;  %v1232_v37 = vadd.s32 1, %v8658_v51 }
 0x148   : > { %v1530_v36 = vsel %vm1516_vm15, %v1527_v25, %v1529_v34  ;;  %v1499_v38 = vshrl.u32 %v13268_v60, %v1498_v43  ;;  %v1289_v8 = vsel %vm1288_vm0, %v1287_v6, 0  ;;  %v1520_v40 = vsel %vm1518_vm13, %v1508_v17, 2102212464 }
 0x149   : > { %v8709_v44 = vmul.u32.u64.low %v1531_v29, %v1526_v11  ;;  %v8710_v23 = vmul.u32.u64.high %v1531_v29, %v1526_v11, %v8709_v44  ;;  %v1291_v12 = vand.u32 31, %v1289_v8  ;;  %v8713_v52 = vsub.s32 %v1440_v33, %v1443_v10 }
 0x14a   : > { %v8715_v53 = vmul.u32.u64.low %v1531_v29, %v1530_v36  ;;  %v8716_v59 = vmul.u32.u64.high %v1531_v29, %v1530_v36, %v8715_v53  ;;  %v1229_v1 = vmul.u32 %v8644_v31, %v1213_v35  ;;  %v13248_v2 = vand.u32 2147483647, %v8554_v57 }
 0x14b   : > { %v1233_v43 = vsel %vm1231_vm1, %v1232_v37, %v8658_v51  ;;  %v1519_v4 = vsel %vm1515_vm12, %v1499_v38, %v1502_v9  ;;  %v1521_v6 = vsel %vm1517_vm14, %v1505_v16, %v1520_v40  ;;  %v1292_v13 = vsub.s32 32, %v1291_v12 }
 0x14c   : > { %v1446_v33 = vsub.s32 0, %v8713_v52  ;;  %v1234_v14 = vadd.s32 %v1233_v43, %v1229_v1  ;;  %v1522_v17 = vsel %vm1516_vm15, %v1519_v4, %v1521_v6  ;;  %v1284_v31 = vand.u32 8388607, %v13248_v2 }
 0x14d   : > { %v1294_v55 = vshll.u32 %v13268_v60, %v1291_v12  ;;  %v1295_v51 = vshrl.u32 %v13259_v62, %v1292_v13  ;;  %v1297_v18 = vshll.u32 %v13259_v62, %v1291_v12  ;;  %v1298_v9 = vshrl.u32 %v13261_v0, %v1292_v13 }
 0x14e   : > { %v1541_v16 = vadd.s32 1, %v8710_v23  ;;  %v1290_v19 = vshrl.u32 %v1289_v8, 5  ;;  %v1303_v20 = vshll.u32 %v13253_v3, %v1291_v12  ;;  %v1304_v21 = vshrl.u32 %v13255_v5, %v1292_v13 }
 0x14f   : > { %v6962_v42 = vmin.u32 %v1446_v33, %v8713_v52  ;;  %vm1540_vm2 = vc.u32 %v8716_v59, %v8709_v44  ;;  %v1300_v22 = vshll.u32 %v13261_v0, %v1291_v12  ;;  %v1301_v24 = vshrl.u32 %v13253_v3, %v1292_v13 }
 0x150   : > { %v1235_v25 = vadd.s32 536870912, %v1234_v14  ;;  %v1538_v27 = vmul.u32 %v1531_v29, %v1522_v17  ;;  %v1285_v56 = vor.u32 8388608, %v1284_v31  ;;  %v1296_v10 = vor.u32 %v1295_v51, %v1294_v55 }
 0x151   : > { %v1299_v11 = vor.u32 %v1298_v9, %v1297_v18  ;;  %v1306_v34 = vshll.u32 %v13255_v5, %v1291_v12  ;;  %v1307_v35 = vshrl.u32 %v13266_v15, %v1292_v13  ;;  %v1542_v36 = vsel %vm1540_vm2, %v1541_v16, %v8710_v23 }
 0x152   : > { %v1305_v37 = vor.u32 %v1304_v21, %v1303_v20  ;;  %vm1309_vm3 = vcmp.lt.s32.totalorder %v1290_v19, 1  ;;  %v1448_v38 = vclz %v6962_v42  ;;  %v1302_v8 = vor.u32 %v1301_v24, %v1300_v22 }
 0x153   : > { %v8746_v40 = vshrl.u32 %v1235_v25, 30  ;;  %v1308_v53 = vor.u32 %v1307_v35, %v1306_v34  ;;  %vm1311_vm4 = vcmp.lt.s32.totalorder %v1290_v19, 3  ;;  %vm1312_vm5 = vcmp.lt.s32.totalorder %v1290_v19, 4 }
 0x154   : > { %v1543_v63 = vadd.s32 %v1542_v36, %v1538_v27  ;;  %vm1310_vm6 = vcmp.lt.s32.totalorder %v1290_v19, 2  ;;  %v1317_v29 = vsel %vm1309_vm3, %v1296_v10, %v1299_v11  ;;  %v1325_v1 = vshll.u32 %v1285_v56, 8 }
 0x155   : > { %13448 = vst [vmem:[#allocation17_spill] sm:$0xff] %v8746_v40  ;;  %v1293_v12 = vshrl.u32 %v13268_v60, %v1292_v13  ;;  %v1318_v43 = vsel %vm1312_vm5, %v1305_v37, 920167782  ;;  %v8751_v4 = vmul.f32 0.62831855, %v8534_v39  ;;  %v6963_v23 = vadd.s32 4294967294, %v1448_v38 }
 0x156   : > { %v1314_v6 = vsel %vm1312_vm5, %v1302_v8, 2102212464  ;;  %v1319_v33 = vsel %vm1311_vm4, %v1302_v8, %v1318_v43  ;;  %v1321_v17 = vsel %vm1309_vm3, %v1299_v11, %v1302_v8  ;;  %v1237_v31 = vshll.u32 %v8746_v40, 30 }
 0x157   : > { %13449 = vst [vmem:[#allocation18_spill] sm:$0xff] %v8751_v4  ;;  %v1320_v55 = vsel %vm1310_vm6, %v1317_v29, %v1319_v33  ;;  %v1322_v51 = vsel %vm1312_vm5, %v1308_v53, 1326507024  ;;  %v1544_v18 = vadd.s32 536870912, %v1543_v63  ;;  %v1313_v39 = vsel %vm1309_vm3, %v1293_v12, %v1296_v10  ;;  %v795_v29 = vld [vmem:[%s8435_s25 + $0x60] sm:$0xff] }
 0x158   : > { %v1323_v9 = vsel %vm1311_vm4, %v1305_v37, %v1322_v51  ;;  %v8758_v16 = vmul.u32.u64.low %v1325_v1, %v1320_v55  ;;  %v8759_v13 = vmul.u32.u64.high %v1325_v1, %v1320_v55, %v8758_v16  ;;  %v1315_v20 = vsel %vm1311_vm4, %v1299_v11, %v1314_v6  ;;  %878 = vperm.xlu0 %7879, %v795_v29  }
 0x159   : > { %v1324_v21 = vsel %vm1310_vm6, %v1321_v17, %v1323_v9  ;;  %v1692_v42 = vand.u32 2139095040, %v8751_v4  ;;  %vm6964_vm7 = vcmp.lt.s32.totalorder %v6963_v23, 0  ;;  %v8769_v27 = vsub.s32 %v1234_v14, %v1237_v31 }
 0x15a   : > { %v8766_v22 = vmul.u32.u64.low %v1325_v1, %v1324_v21  ;;  %v8767_v24 = vmul.u32.u64.high %v1325_v1, %v1324_v21, %v8766_v22  ;;  %v8771_v56 = vshrl.u32 %v1544_v18, 30  ;;  %v1316_v34 = vsel %vm1310_vm6, %v1313_v39, %v1315_v20 }
 0x15b   : > { %v1693_v25 = vshrl.u32 %v1692_v42, 23  ;;  %v1335_v10 = vadd.s32 1, %v8759_v13  ;;  %v8775_v35 = vsel %vm6964_vm7, 0, %v6963_v23  ;;  %v8778_v36 = vmul.f32 0.62831855, %v8537_v41 }
 0x15c   : > { %13450 = vst [vmem:[#allocation19_spill] sm:$0xff] %v8771_v56  ;;  %v1332_v37 = vmul.u32 %v1325_v1, %v1316_v34  ;;  %vm1334_vm8 = vc.u32 %v8767_v24, %v8758_v16  ;;  %v1456_v14 = vsub.s32 4294967266, %v8775_v35  ;;  %v1240_v8 = vsub.s32 0, %v8769_v27 }
 0x15d   : > { %v6973_v11 = vadd.s32 4294967169, %v1693_v25  ;;  %13451 = vst [vmem:[#allocation20_spill] sm:$0xff] %v8778_v36  ;;  %v1546_v19 = vshll.u32 %v8771_v56, 30  ;;  %v1336_v53 = vsel %vm1334_vm8, %v1335_v10, %v8759_v13  ;;  %v1589_v12 = vand.u32 2139095040, %v8778_v36 }
 0x15e   : > { %v1436_v1 = vadd.s32 %v8601_v50, %v8598_v46  ;;  %v1337_v43 = vadd.s32 %v1336_v53, %v1332_v37  ;;  %v13252_v23 = vand.u32 2147483647, %v8751_v4  ;;  %v1452_v33 = vsub.s32 32, %v8775_v35 }
 0x15f   : > { %v1699_v38 = vadd.s32 1, %v6973_v11  ;;  %v1457_v17 = vadd.s32 127, %v1456_v14  ;;  %v6954_v31 = vmin.u32 %v1240_v8, %v8769_v27  ;;  %v8793_v55 = vsub.s32 %v1543_v63, %v1546_v19 }
 0x160   : > { %v1590_v13 = vshrl.u32 %v1589_v12, 23  ;;  %v1338_v21 = vadd.s32 536870912, %v1337_v43  ;;  %v1696_v42 = vand.u32 8388607, %v13252_v23  ;;  %v1454_v48 = vshrl.u32 %v1436_v1, %v1452_v33 }
 0x161   : > { %vm1700_vm9 = vcmp.gt.s32.totalorder %v1699_v38, 0  ;;  %v1549_v25 = vsub.s32 0, %v8793_v55  ;;  %v1242_v37 = vclz %v6954_v31 }
 0x162   : > { %v1701_v41 = vsel %vm1700_vm9, %v1699_v38, 0  ;;  %v6969_v8 = vadd.s32 4294967169, %v1590_v13  ;;  %v8811_v12 = vshrl.u32 %v1338_v21, 30 }
 0x163   : > { %v1703_v6 = vand.u32 31, %v1701_v41  ;;  %v8797_v39 = vshrl.u32 %v1701_v41, 5  ;;  %v1697_v41 = vor.u32 8388608, %v1696_v42  ;;  %v6966_v31 = vmin.u32 %v1549_v25, %v8793_v55 }
 0x164   : > { %13452 = vst [vmem:[#allocation21_spill] sm:$0xff] %v8811_v12  ;;  %v6955_v1 = vadd.s32 4294967294, %v1242_v37  ;;  %v1340_v33 = vshll.u32 %v8811_v12, 30 }
 0x165   : > { %v1704_v51 = vsub.s32 32, %v1703_v6  ;;  %v1706_v18 = vshll.u32 %v13268_v60, %v1703_v6  ;;  %v1709_v9 = vshll.u32 %v13259_v62, %v1703_v6  ;;  %v1712_v46 = vshll.u32 %v13261_v0, %v1703_v6 }
 0x166   : > { %v1715_v50 = vshll.u32 %v13253_v3, %v1703_v6  ;;  %v1718_v20 = vshll.u32 %v13255_v5, %v1703_v6  ;;  %vm1721_vm10 = vcmp.lt.s32.totalorder %v8797_v39, 1  ;;  %vm1723_vm11 = vcmp.lt.s32.totalorder %v8797_v39, 3 }
 0x167   : > { %v1707_v63 = vshrl.u32 %v13259_v62, %v1704_v51  ;;  %v1710_v22 = vshrl.u32 %v13261_v0, %v1704_v51  ;;  %v1713_v34 = vshrl.u32 %v13253_v3, %v1704_v51  ;;  %v1716_v10 = vshrl.u32 %v13255_v5, %v1704_v51 }
 0x168   : > { %v1719_v11 = vshrl.u32 %v13266_v15, %v1704_v51  ;;  %vm1724_vm12 = vcmp.lt.s32.totalorder %v8797_v39, 4  ;;  %v1453_v6 = vshll.u32 %v8713_v52, %v8775_v35  ;;  %vm1722_vm13 = vcmp.lt.s32.totalorder %v8797_v39, 2 }
 0x169   : > { %v1708_v38 = vor.u32 %v1707_v63, %v1706_v18  ;;  %v1711_v14 = vor.u32 %v1710_v22, %v1709_v9  ;;  %v1714_v19 = vor.u32 %v1713_v34, %v1712_v46  ;;  %v1717_v53 = vor.u32 %v1716_v10, %v1715_v50 }
 0x16a   : > { %v1720_v29 = vor.u32 %v1719_v11, %v1718_v20  ;;  %v1458_v18 = vshll.u32 %v1457_v17, 23  ;;  %v1596_v35 = vadd.s32 1, %v6969_v8  ;;  %v1737_v20 = vshll.u32 %v1697_v41, 8 }
 0x16b   : > { %v1729_v9 = vsel %vm1721_vm10, %v1708_v38, %v1711_v14  ;;  %v1730_v13 = vsel %vm1724_vm12, %v1717_v53, 920167782  ;;  %v1733_v50 = vsel %vm1721_vm10, %v1711_v14, %v1714_v19  ;;  %v1551_v21 = vclz %v6966_v31 }
 0x16c   : > { %v1731_v46 = vsel %vm1723_vm11, %v1714_v19, %v1730_v13  ;;  %v1734_v52 = vsel %vm1724_vm12, %v1720_v29, 1326507024  ;;  %vm1597_vm14 = vcmp.gt.s32.totalorder %v1596_v35, 0  ;;  %v1455_v22 = vor.u32 %v1454_v48, %v1453_v6 }
 0x16d   : > { %v1735_v17 = vsel %vm1723_vm11, %v1717_v53, %v1734_v52  ;;  %v1732_v42 = vsel %vm1722_vm13, %v1729_v9, %v1731_v46  ;;  %v1459_v25 = vor.u32 4788187, %v1458_v18  ;;  %v1598_v34 = vsel %vm1597_vm14, %v1596_v35, 0 }
 0x16e   : > { %v1736_v63 = vsel %vm1722_vm13, %v1733_v50, %v1735_v17  ;;  %vm6956_vm15 = vcmp.lt.s32.totalorder %v6955_v1, 0  ;;  %v8836_v10 = vsub.s32 %v1337_v43, %v1340_v33  ;;  %v6967_v8 = vadd.s32 4294967294, %v1551_v21 }
 0x16f   : > { %v8838_v11 = vmul.u32.u64.low %v1737_v20, %v1732_v42  ;;  %v8839_v37 = vmul.u32.u64.high %v1737_v20, %v1732_v42, %v8838_v11  ;;  %v1705_v53 = vshrl.u32 %v13268_v60, %v1704_v51  ;;  %v1726_v31 = vsel %vm1724_vm12, %v1714_v19, 2102212464  ;;  %v798_v51 = vld [vmem:[%s8435_s25 + $0x78] sm:$0xff] }
 0x170   : > { %v8843_v29 = vmul.u32.u64.low %v1737_v20, %v1736_v63  ;;  %v8844_v41 = vmul.u32.u64.high %v1737_v20, %v1736_v63, %v8843_v29  ;;  %v1600_v48 = vand.u32 31, %v1598_v34  ;;  %v1245_v6 = vsel %vm6956_vm15, 0, %v6955_v1  ;;  %893 = vperm.xlu1 %7880, %v798_v51  }
 0x171   : > { %v1462_v18 = vcvt.s32.f32 %v1455_v22  ;;  %v1343_v9 = vsub.s32 0, %v8836_v10  ;;  %v1460_v43 = vand.u32 2147483647, %v1459_v25  ;;  %vm6968_vm0 = vcmp.lt.s32.totalorder %v6967_v8, 0 }
 0x172   : > { %v1725_v13 = vsel %vm1721_vm10, %v1705_v53, %v1708_v38  ;;  %v1727_v46 = vsel %vm1723_vm11, %v1711_v14, %v1726_v31  ;;  %v1250_v50 = vsub.s32 4294967266, %v1245_v6  ;;  %v8854_v52 = vsub.s32 32, %v1600_v48 }
 0x173   : > { %v1230_v19 = vadd.s32 %v8657_v45, %v8665_v61  ;;  %v1539_v35 = vadd.s32 %v8709_v44, %v8716_v59  ;;  %v8861_v1 = vmul.f32 0.62831855, %v8542_v47  ;;  %v8863_v33 = vsel %vm6968_vm0, 0, %v6967_v8 }
 0x174   : > { %v6958_v38 = vmin.u32 %v1343_v9, %v8836_v10  ;;  %v1728_v14 = vsel %vm1722_vm13, %v1725_v13, %v1727_v46  ;;  %v1747_v17 = vadd.s32 1, %v8839_v37  ;;  %v8869_v21 = vmul.f32 %v1462_v18, %v1460_v43 }
 0x175   : > { %13453 = vst [vmem:[#allocation22_spill] sm:$0xff] %v8861_v1  ;;  %v1246_v42 = vsub.s32 32, %v1245_v6  ;;  %v1247_v45 = vshll.u32 %v8769_v27, %v1245_v6  ;;  %vm1746_vm1 = vc.u32 %v8844_v41, %v8838_v11  ;;  %v1251_v61 = vadd.s32 127, %v1250_v50 }
 0x176   : > { %v13251_v47 = vand.u32 2147483647, %v8778_v36  ;;  %v1612_v44 = vshll.u32 %v13253_v3, %v1600_v48  ;;  %v1613_v59 = vshrl.u32 %v13255_v5, %v8854_v52  ;;  %v1559_v39 = vsub.s32 4294967266, %v8863_v33 }
 0x177   : > { %v1744_v63 = vmul.u32 %v1737_v20, %v1728_v14  ;;  %v8879_v22 = vshrl.u32 %v1598_v34, 5  ;;  %v1898_v25 = vand.u32 2139095040, %v8861_v1  ;;  %v1345_v8 = vclz %v6958_v38 }
 0x178   : > { %v1748_v27 = vsel %vm1746_vm1, %v1747_v17, %v8839_v37  ;;  %v1603_v53 = vshll.u32 %v13268_v60, %v1600_v48  ;;  %v1604_v29 = vshrl.u32 %v13259_v62, %v8854_v52  ;;  %v1606_v31 = vshll.u32 %v13259_v62, %v1600_v48 }
 0x179   : > { %v1607_v6 = vshrl.u32 %v13261_v0, %v8854_v52  ;;  %v1609_v18 = vshll.u32 %v13261_v0, %v1600_v48  ;;  %v1610_v20 = vshrl.u32 %v13253_v3, %v8854_v52  ;;  %v1248_v34 = vshrl.u32 %v1230_v19, %v1246_v42 }
 0x17a   : > { %v1614_v9 = vor.u32 %v1613_v59, %v1612_v44  ;;  %v1615_v43 = vshll.u32 %v13255_v5, %v1600_v48  ;;  %v1616_v37 = vshrl.u32 %v13266_v15, %v8854_v52  ;;  %v8895_v13 = vadd.s32 %v1748_v27, %v1744_v63 }
 0x17b   : > { %v1593_v46 = vand.u32 8388607, %v13251_v47  ;;  %vm1621_vm2 = vcmp.lt.s32.totalorder %v8879_v22, 4  ;;  %v1899_v51 = vshrl.u32 %v1898_v25, 23  ;;  %v1252_v50 = vshll.u32 %v1251_v61, 23 }
 0x17c   : > { %v1555_v38 = vsub.s32 32, %v8863_v33  ;;  %v1560_v14 = vadd.s32 127, %v1559_v39  ;;  %v6959_v17 = vadd.s32 4294967294, %v1345_v8  ;;  %v8901_v19 = vor.u32 %v1604_v29, %v1603_v53 }
 0x17d   : > { %v8903_v42 = vor.u32 %v1607_v6, %v1606_v31  ;;  %v1611_v48 = vor.u32 %v1610_v20, %v1609_v18  ;;  %v6981_v44 = vadd.s32 4294967169, %v1899_v51  ;;  %v1617_v59 = vor.u32 %v1616_v37, %v1615_v43 }
 0x17e   : > { %vm1618_vm3 = vcmp.lt.s32.totalorder %v8879_v22, 1  ;;  %vm1620_vm4 = vcmp.lt.s32.totalorder %v8879_v22, 3  ;;  %v1627_v63 = vsel %vm1621_vm2, %v1614_v9, 920167782  ;;  %v8909_v25 = vor.u32 %v1248_v34, %v1247_v45 }
 0x17f   : > { %v1750_v61 = vadd.s32 536870912, %v8895_v13  ;;  %v1594_v39 = vor.u32 8388608, %v1593_v46  ;;  %v1905_v8 = vadd.s32 1, %v6981_v44  ;;  %v8912_v27 = vor.u32 4788187, %v1252_v50 }
 0x180   : > { %v1556_v53 = vshll.u32 %v8793_v55, %v8863_v33  ;;  %v1557_v29 = vshrl.u32 %v1539_v35, %v1555_v38  ;;  %vm6960_vm5 = vcmp.lt.s32.totalorder %v6959_v17, 0  ;;  %vm1619_vm6 = vcmp.lt.s32.totalorder %v8879_v22, 2 }
 0x181   : > { %v1626_v31 = vsel %vm1618_vm3, %v8901_v19, %v8903_v42  ;;  %v1628_v45 = vsel %vm1620_vm4, %v1611_v48, %v1627_v63  ;;  %vm1906_vm7 = vcmp.gt.s32.totalorder %v1905_v8, 0  ;;  %v1561_v6 = vshll.u32 %v1560_v14, 23 }
 0x182   : > { %v1631_v18 = vsel %vm1621_vm2, %v1617_v59, 1326507024  ;;  %v1907_v20 = vsel %vm1906_vm7, %v1905_v8, 0  ;;  %v8926_v55 = vmul.f32 0.62831855, %v8546_v49  ;;  %v8929_v33 = vshrl.u32 %v1750_v61, 30 }
 0x183   : > { %v8931_v34 = vshll.u32 %v1594_v39, 8  ;;  %v1909_v43 = vand.u32 31, %v1907_v20  ;;  %v1333_v46 = vadd.s32 %v8758_v16, %v8767_v24  ;;  %v8936_v51 = vsel %vm6960_vm5, 0, %v6959_v17 }
 0x184   : > { %13454 = vst [vmem:[#allocation23_spill] sm:$0xff] %v8926_v55  ;;  %13455 = vst [vmem:[#allocation24_spill] sm:$0xff] %v8929_v33  ;;  %v1629_v50 = vsel %vm1619_vm6, %v1626_v31, %v1628_v45  ;;  %v8940_v38 = vor.u32 %v1557_v29, %v1556_v53  ;;  %v1630_v49 = vsel %vm1618_vm3, %v8903_v42, %v1611_v48  ;;  %v8949_v59 = vor.u32 4788187, %v1561_v6 }
 0x185   : > { %v1632_v14 = vsel %vm1620_vm4, %v1614_v9, %v1631_v18  ;;  %v8947_v44 = vsub.s32 32, %v1909_v43  ;;  %v1349_v16 = vsub.s32 32, %v8936_v51  ;;  %v13258_v24 = vand.u32 2147483647, %v8861_v1 }
 0x186   : > { %v1795_v17 = vand.u32 2139095040, %v8926_v55  ;;  %v1353_v63 = vsub.s32 4294967266, %v8936_v51  ;;  %v1752_v61 = vshll.u32 %v8929_v33, 30  ;;  %v1633_v9 = vsel %vm1619_vm6, %v1630_v49, %v1632_v14 }
 0x187   : > { %v8957_v39 = vmul.u32.u64.low %v8931_v34, %v1629_v50  ;;  %v8958_v8 = vmul.u32.u64.high %v8931_v34, %v1629_v50, %v8957_v39  ;;  %v8963_v53 = vshrl.u32 %v1907_v20, 5  ;;  %v1912_v29 = vshll.u32 %v13268_v60, %v1909_v43 }
 0x188   : > { %v1921_v31 = vshll.u32 %v13253_v3, %v1909_v43  ;;  %v1913_v45 = vshrl.u32 %v13259_v62, %v8947_v44  ;;  %v1915_v6 = vshll.u32 %v13259_v62, %v1909_v43  ;;  %v1916_v18 = vshrl.u32 %v13261_v0, %v8947_v44 }
 0x189   : > { %v1922_v50 = vshrl.u32 %v13255_v5, %v8947_v44  ;;  %v1918_v49 = vshll.u32 %v13261_v0, %v1909_v43  ;;  %v1919_v20 = vshrl.u32 %v13253_v3, %v8947_v44  ;;  %v1924_v14 = vshll.u32 %v13255_v5, %v1909_v43 }
 0x18a   : > { %v1796_v2 = vshrl.u32 %v1795_v17, 23  ;;  %v8979_v30 = vmul.u32.u64.low %v8931_v34, %v1633_v9  ;;  %v8980_v54 = vmul.u32.u64.high %v8931_v34, %v1633_v9, %v8979_v30  ;;  %v1925_v23 = vshrl.u32 %v13266_v15, %v8947_v44 }
 0x18b   : > { %v1923_v47 = vor.u32 %v1922_v50, %v1921_v31  ;;  %v8985_v35 = vsub.s32 %v8895_v13, %v1752_v61  ;;  %v1602_v37 = vshrl.u32 %v13268_v60, %v8854_v52  ;;  %v1623_v3 = vsel %vm1621_vm2, %v1611_v48, 2102212464  ;;  %v797_v30 = vld [vmem:[%s8435_s25 + $0x70] sm:$0xff] }
 0x18c   : > { %v1902_v43 = vand.u32 8388607, %v13258_v24  ;;  %v1914_v17 = vor.u32 %v1913_v45, %v1912_v29  ;;  %v1917_v5 = vor.u32 %v1916_v18, %v1915_v6  ;;  %v1926_v9 = vor.u32 %v1925_v23, %v1924_v14  ;;  %888 = vperm.xlu0 %7879, %v797_v30  }
 0x18d   : > { %vm1930_vm8 = vcmp.lt.s32.totalorder %v8963_v53, 4  ;;  %v1350_v31 = vshll.u32 %v8836_v10, %v8936_v51  ;;  %v1920_v13 = vor.u32 %v1919_v20, %v1918_v49  ;;  %vm1927_vm9 = vcmp.lt.s32.totalorder %v8963_v53, 1 }
 0x18e   : > { %v6977_v61 = vadd.s32 4294967169, %v1796_v2  ;;  %v1351_v52 = vshrl.u32 %v1333_v46, %v1349_v16  ;;  %v8998_v50 = vadd.s32 127, %v1353_v63  ;;  %vm1929_vm10 = vcmp.lt.s32.totalorder %v8963_v53, 3 }
 0x18f   : > { %v1936_v48 = vsel %vm1930_vm8, %v1923_v47, 920167782  ;;  %v1622_v23 = vsel %vm1618_vm3, %v1602_v37, %v8901_v19  ;;  %v1624_v10 = vsel %vm1620_vm4, %v8903_v42, %v1623_v3  ;;  %v1903_v51 = vor.u32 8388608, %v1902_v43 }
 0x190   : > { %v1940_v2 = vsel %vm1930_vm8, %v1926_v9, 1326507024  ;;  %v1755_v46 = vsub.s32 0, %v8985_v35  ;;  %v1644_v16 = vadd.s32 1, %v8958_v8  ;;  %vm1928_vm11 = vcmp.lt.s32.totalorder %v8963_v53, 2 }
 0x191   : > { %v1935_v63 = vsel %vm1927_vm9, %v1914_v17, %v1917_v5  ;;  %v1937_v19 = vsel %vm1929_vm10, %v1920_v13, %v1936_v48  ;;  %v1939_v37 = vsel %vm1927_vm9, %v1917_v5, %v1920_v13  ;;  %v1941_v3 = vsel %vm1929_vm10, %v1923_v47, %v1940_v2 }
 0x192   : > { %v1802_v42 = vadd.s32 1, %v6977_v61  ;;  %v1625_v29 = vsel %vm1619_vm6, %v1622_v23, %v1624_v10  ;;  %vm1643_vm12 = vc.u32 %v8980_v54, %v8957_v39  ;;  %v13257_v45 = vand.u32 2147483647, %v8926_v55 }
 0x193   : > { %v9028_v6 = vmul.f32 0.62831855, %v8558_v58  ;;  %v9032_v20 = vshll.u32 %v1903_v51, 8  ;;  %v9034_v47 = vor.u32 %v1351_v52, %v1350_v31  ;;  %v1938_v22 = vsel %vm1928_vm11, %v1935_v63, %v1937_v19 }
 0x194   : > { %vm1803_vm13 = vcmp.gt.s32.totalorder %v1802_v42, 0  ;;  %v1942_v14 = vsel %vm1928_vm11, %v1939_v37, %v1941_v3  ;;  %v1355_v9 = vshll.u32 %v8998_v50, 23  ;;  %v6974_v58 = vmin.u32 %v1755_v46, %v8985_v35 }
 0x195   : > { %13456 = vst [vmem:[#allocation25_spill] sm:$0xff] %v9028_v6  ;;  %v1804_v43 = vsel %vm1803_vm13, %v1802_v42, 0  ;;  %v1641_v30 = vmul.u32 %v8931_v34, %v1625_v29  ;;  %v1645_v61 = vsel %vm1643_vm12, %v1644_v16, %v8958_v8  ;;  %v1911_v48 = vshrl.u32 %v13268_v60, %v8947_v44 }
 0x196   : > { %v1799_v31 = vand.u32 8388607, %v13257_v45  ;;  %v1806_v52 = vand.u32 31, %v1804_v43  ;;  %v2104_v23 = vand.u32 2139095040, %v9028_v6  ;;  %v1932_v34 = vsel %vm1930_vm8, %v1920_v13, 2102212464 }
 0x197   : > { %v9050_v10 = vmul.u32.u64.low %v9032_v20, %v1942_v14  ;;  %v9051_v51 = vmul.u32.u64.high %v9032_v20, %v1942_v14, %v9050_v10  ;;  %v9054_v50 = vmul.u32.u64.low %v9032_v20, %v1938_v22  ;;  %v9055_v2 = vmul.u32.u64.high %v9032_v20, %v1938_v22, %v9054_v50 }
 0x198   : > { %v1807_v8 = vsub.s32 32, %v1806_v52  ;;  %v1809_v44 = vshll.u32 %v13268_v60, %v1806_v52  ;;  %v1812_v46 = vshll.u32 %v13259_v62, %v1806_v52  ;;  %v1757_v16 = vclz %v6974_v58 }
 0x199   : > { %v9062_v63 = vshrl.u32 %v1804_v43, 5  ;;  %v1815_v19 = vshll.u32 %v13261_v0, %v1806_v52  ;;  %v13457_v37 = vmov 2102212464   ;;  %v9066_v42 = vadd.s32 %v1645_v61, %v1641_v30 }
 0x19a   : > { %v1818_v3 = vshll.u32 %v13457_v37, %v1806_v52  ;;  %v1800_v29 = vor.u32 8388608, %v1799_v31  ;;  %v1810_v22 = vshrl.u32 %v13259_v62, %v1807_v8  ;;  %v1813_v14 = vshrl.u32 %v13261_v0, %v1807_v8 }
 0x19b   : > { %v1931_v13 = vsel %vm1927_vm9, %v1911_v48, %v1914_v17  ;;  %v1933_v10 = vsel %vm1929_vm10, %v1917_v5, %v1932_v34  ;;  %v1816_v43 = vshrl.u32 %v13457_v37, %v1807_v8  ;;  %v13458_v58 = vmov 920167782  }
 0x19c   : > { %v1819_v45 = vshrl.u32 %v13458_v58, %v1807_v8  ;;  %v1811_v24 = vor.u32 %v1810_v22, %v1809_v44  ;;  %v1814_v49 = vor.u32 %v1813_v14, %v1812_v46  ;;  %v1821_v30 = vshll.u32 %v13458_v58, %v1806_v52 }
 0x19d   : > { %v2105_v61 = vshrl.u32 %v2104_v23, 23  ;;  %v1817_v31 = vor.u32 %v1816_v43, %v1815_v19  ;;  %v1822_v62 = vshrl.u32 %v13266_v15, %v1807_v8  ;;  %vm1824_vm14 = vcmp.lt.s32.totalorder %v9062_v63, 1 }
 0x19e   : > { %v1820_v18 = vor.u32 %v1819_v45, %v1818_v3  ;;  %v6975_v0 = vadd.s32 4294967294, %v1757_v16  ;;  %v1647_v17 = vadd.s32 536870912, %v9066_v42  ;;  %vm1826_vm15 = vcmp.lt.s32.totalorder %v9062_v63, 3 }
 0x19f   : > { %vm1827_vm0 = vcmp.lt.s32.totalorder %v9062_v63, 4  ;;  %v1934_v5 = vsel %vm1928_vm11, %v1931_v13, %v1933_v10  ;;  %v1823_v48 = vor.u32 %v1822_v62, %v1821_v30  ;;  %vm1825_vm1 = vcmp.lt.s32.totalorder %v9062_v63, 2 }
 0x1a0   : > { %v9085_v52 = vshll.u32 %v1800_v29, 8  ;;  %v1953_v45 = vadd.s32 1, %v9055_v2  ;;  %v1832_v23 = vsel %vm1824_vm14, %v1811_v24, %v1814_v49  ;;  %v1833_v34 = vsel %vm1827_vm0, %v1820_v18, 920167782 }
 0x1a1   : > { %v6989_v44 = vadd.s32 4294967169, %v2105_v61  ;;  %vm1952_vm2 = vc.u32 %v9051_v51, %v9054_v50  ;;  %v1808_v53 = vshrl.u32 %v13268_v60, %v1807_v8  ;;  %v1834_v62 = vsel %vm1826_vm15, %v1817_v31, %v1833_v34  ;;  %v800_v34 = vld [vmem:[%s8435_s25 + $0x88] sm:$0xff] }
 0x1a2   : > { %v1836_v46 = vsel %vm1824_vm14, %v1814_v49, %v1817_v31  ;;  %v9099_v16 = vshrl.u32 %v1647_v17, 30  ;;  %v1829_v19 = vsel %vm1827_vm0, %v1817_v31, 2102212464  ;;  %v1835_v3 = vsel %vm1825_vm1, %v1832_v23, %v1834_v62  ;;  %903 = vperm.xlu1 %7880, %v800_v34  }
 0x1a3   : > { %v1837_v29 = vsel %vm1827_vm0, %v1823_v48, 1326507024  ;;  %v1950_v22 = vmul.u32 %v9032_v20, %v1934_v5  ;;  %v9111_v14 = vmul.u32.u64.low %v9085_v52, %v1835_v3  ;;  %v9112_v13 = vmul.u32.u64.high %v9085_v52, %v1835_v3, %v9111_v14 }
 0x1a4   : > { %13459 = vst [vmem:[#allocation26_spill] sm:$0xff] %v9099_v16  ;;  %v1838_v8 = vsel %vm1826_vm15, %v1820_v18, %v1837_v29  ;;  %v9115_v10 = vor.u32 4788187, %v1355_v9  ;;  %v1954_v43 = vsel %vm1952_vm2, %v1953_v45, %v9055_v2  ;;  %v2111_v61 = vadd.s32 1, %v6989_v44 }
 0x1a5   : > { %v1839_v30 = vsel %vm1825_vm1, %v1836_v46, %v1838_v8  ;;  %v1828_v20 = vsel %vm1824_vm14, %v1808_v53, %v1811_v24  ;;  %v1830_v18 = vsel %vm1826_vm15, %v1814_v49, %v1829_v19  ;;  %v1649_v5 = vshll.u32 %v9099_v16, 30  ;;  %v799_v19 = vld [vmem:[%s8435_s25 + $0x80] sm:$0xff] }
 0x1a6   : > { %v9125_v31 = vmul.u32.u64.low %v9085_v52, %v1839_v30  ;;  %v9126_v17 = vmul.u32.u64.high %v9085_v52, %v1839_v30, %v9125_v31  ;;  %v13263_v2 = vand.u32 2147483647, %v9028_v6  ;;  %vm2112_vm3 = vcmp.gt.s32.totalorder %v2111_v61, 0  ;;  %898 = vperm.xlu0 %7879, %v799_v19  }
 0x1a7   : > { %v13460_v48 = vand.u32 2147483647, %v8912_v27  ;;  %v13461_v45 = vcvt.s32.f32 %v8909_v25  ;;  %vm6976_vm4 = vcmp.lt.s32.totalorder %v6975_v0, 0  ;;  %v9137_v49 = vadd.s32 %v1954_v43, %v1950_v22 }
 0x1a8   : > { %v2113_v23 = vsel %vm2112_vm3, %v2111_v61, 0  ;;  %v13462_v44 = vand.u32 2147483647, %v8949_v59  ;;  %v13463_v53 = vcvt.s32.f32 %v8940_v38  ;;  %v1831_v46 = vsel %vm1825_vm1, %v1828_v20, %v1830_v18  ;;  %v802_v20 = vld [vmem:[%s8435_s25 + $0x98] sm:$0xff] }
 0x1a9   : > { %v9135_v24 = vmul.f32 %v13461_v45, %v13460_v48  ;;  %v1850_v27 = vadd.s32 1, %v9112_v13  ;;  %v2115_v25 = vand.u32 31, %v2113_v23  ;;  %v9154_v59 = vadd.s32 %v8838_v11, %v8844_v41  ;;  %v8202_v41 = vld [vmem:[%s8435_s25 + $0x40] sm:$0xff]  ;;  %913 = vperm.xlu1 %7880, %v802_v20  }
 0x1aa   : > { %v9144_v62 = vmul.f32 %v13463_v53, %v13462_v44  ;;  %vm1849_vm5 = vc.u32 %v9126_v17, %v9111_v14  ;;  %v9159_v38 = vsel %vm6976_vm4, 0, %v6975_v0  ;;  %v9162_v63 = vsub.s32 %v9066_v42, %v1649_v5 }
 0x1ab   : > { %v2108_v22 = vand.u32 8388607, %v13263_v2  ;;  %v2116_v8 = vsub.s32 32, %v2115_v25  ;;  %v1956_v30 = vadd.s32 536870912, %v9137_v49  ;;  %v1847_v11 = vmul.u32 %v9085_v52, %v1831_v46 }
 0x1ac   : > { %v9170_v61 = vmul.f32 0.62831855, %v8202_v41  ;;  %v1851_v0 = vsel %vm1849_vm5, %v1850_v27, %v9112_v13  ;;  %v2114_v18 = vshrl.u32 %v2113_v23, 5  ;;  %v2118_v42 = vshll.u32 %v13268_v60, %v2115_v25 }
 0x1ad   : > { %v13465_v31 = vmov 2475754826   ;;  %v13466_v45 = vmov 2131351028   ;;  %v2125_v52 = vshrl.u32 %v13457_v37, %v2116_v8  ;;  %v1652_v53 = vsub.s32 0, %v9162_v63 }
 0x1ae   : > { %13464 = vst [vmem:[#allocation27_spill] sm:$0xff] %v9170_v61  ;;  %v2121_v5 = vshll.u32 %v13465_v31, %v2115_v25  ;;  %v2119_v48 = vshrl.u32 %v13465_v31, %v2116_v8  ;;  %v2122_v34 = vshrl.u32 %v13466_v45, %v2116_v8  ;;  %v2124_v44 = vshll.u32 %v13466_v45, %v2115_v25 }
 0x1af   : > { %v2109_v46 = vor.u32 8388608, %v2108_v22  ;;  %v2127_v19 = vshll.u32 %v13457_v37, %v2115_v25  ;;  %v2128_v13 = vshrl.u32 %v13458_v58, %v2116_v8  ;;  %v1765_v23 = vsub.s32 4294967266, %v9159_v38 }
 0x1b0   : > { %v9184_v27 = vshrl.u32 %v1956_v30, 30  ;;  %v9186_v41 = vadd.s32 %v1851_v0, %v1847_v11  ;;  %v2001_v20 = vand.u32 2139095040, %v9170_v61  ;;  %v2120_v2 = vor.u32 %v2119_v48, %v2118_v42 }
 0x1b1   : > { %v2123_v9 = vor.u32 %v2122_v34, %v2121_v5  ;;  %v2129_v43 = vor.u32 %v2128_v13, %v2127_v19  ;;  %v2130_v29 = vshll.u32 %v13458_v58, %v2115_v25  ;;  %vm13333_vm6 = vcmp.lt.s32.totalorder %v8518_v26, 0 }
 0x1b2   : > { %13467 = vst [vmem:[#allocation28_spill] sm:$0xff] %v9184_v27  ;;  %v2117_v22 = vshrl.u32 %v13268_v60, %v2116_v8  ;;  %v2126_v3 = vor.u32 %v2125_v52, %v2124_v44  ;;  %v2131_v40 = vshrl.u32 %v13266_v15, %v2116_v8  ;;  %vm2133_vm7 = vcmp.lt.s32.totalorder %v2114_v18, 1 }
 0x1b3   : > { %v6970_v30 = vmin.u32 %v1652_v53, %v9162_v63  ;;  %vm2135_vm8 = vcmp.lt.s32.totalorder %v2114_v18, 3  ;;  %vm2136_vm9 = vcmp.lt.s32.totalorder %v2114_v18, 4  ;;  %v2149_v11 = vshll.u32 %v2109_v46, 8 }
 0x1b4   : > { %v1853_v0 = vadd.s32 536870912, %v9186_v41  ;;  %v2132_v42 = vor.u32 %v2131_v40, %v2130_v29  ;;  %vm2134_vm10 = vcmp.lt.s32.totalorder %v2114_v18, 2  ;;  %v2138_v5 = vsel %vm2136_vm9, %v2126_v3, 2102212464 }
 0x1b5   : > { %v1958_v25 = vshll.u32 %v9184_v27, 30  ;;  %v2141_v48 = vsel %vm2133_vm7, %v2120_v2, %v2123_v9  ;;  %v2142_v34 = vsel %vm2136_vm9, %v2129_v43, 920167782  ;;  %v2002_v44 = vshrl.u32 %v2001_v20, 23 }
 0x1b6   : > { %v2137_v8 = vsel %vm2133_vm7, %v2117_v22, %v2120_v2  ;;  %v2139_v52 = vsel %vm2135_vm8, %v2123_v9, %v2138_v5  ;;  %v2143_v53 = vsel %vm2135_vm8, %v2126_v3, %v2142_v34  ;;  %v2145_v46 = vsel %vm2133_vm7, %v2123_v9, %v2126_v3 }
 0x1b7   : > { %v1766_v40 = vadd.s32 127, %v1765_v23  ;;  %v1654_v29 = vclz %v6970_v30  ;;  %v2144_v19 = vsel %vm2134_vm10, %v2141_v48, %v2143_v53  ;;  %v2146_v13 = vsel %vm2136_vm9, %v2132_v42, 1326507024  ;;  %v801_v48 = vld [vmem:[%s8435_s25 + $0x90] sm:$0xff] }
 0x1b8   : > { %v9205_v15 = vshrl.u32 %v1853_v0, 30  ;;  %v2147_v60 = vsel %vm2135_vm8, %v2129_v43, %v2146_v13  ;;  %v9208_v20 = vmul.u32.u64.low %v2149_v11, %v2144_v19  ;;  %v9209_v12 = vmul.u32.u64.high %v2149_v11, %v2144_v19, %v9208_v20  ;;  %908 = vperm.xlu0 %7879, %v801_v48  }
 0x1b9   : > { %v13469_v2 = vand.u32 2147483647, %v9115_v10  ;;  %v13470_v22 = vcvt.s32.f32 %v9034_v47  ;;  %v2140_v9 = vsel %vm2134_vm10, %v2137_v8, %v2139_v52  ;;  %v2148_v3 = vsel %vm2134_vm10, %v2145_v46, %v2147_v60 }
 0x1ba   : > { %13468 = vst [vmem:[#allocation29_spill] sm:$0xff] %v9205_v15  ;;  %v6985_v23 = vadd.s32 4294967169, %v2002_v44  ;;  %v1762_v30 = vshll.u32 %v8985_v35, %v9159_v38  ;;  %v9223_v43 = vsub.s32 %v9137_v49, %v1958_v25  ;;  %v13471_v10 = vsub.s32 32, %v9159_v38 }
 0x1bb   : > { %v9216_v5 = vmul.f32 %v13470_v22, %v13469_v2  ;;  %v9225_v0 = vmul.u32.u64.low %v2149_v11, %v2148_v3  ;;  %v9226_v42 = vmul.u32.u64.high %v2149_v11, %v2148_v3, %v9225_v0  ;;  %v1767_v34 = vshll.u32 %v1766_v40, 23 }
 0x1bc   : > { %v1763_v47 = vshrl.u32 %v9154_v59, %v13471_v10  ;;  %v6971_v53 = vadd.s32 4294967294, %v1654_v29  ;;  %v2008_v8 = vadd.s32 1, %v6985_v23  ;;  %v1855_v60 = vshll.u32 %v9205_v15, 30 }
 0x1bd   : > { %v2156_v18 = vmul.u32 %v2149_v11, %v2140_v9  ;;  %v2159_v35 = vadd.s32 1, %v9209_v12  ;;  %v13272_v49 = vand.u32 2147483647, %v9170_v61  ;;  %v13472_v25 = vxor.u32 2147483648, %v8869_v21 }
 0x1be   : > { %vm2009_vm11 = vcmp.gt.s32.totalorder %v2008_v8, 0  ;;  %v1961_v11 = vsub.s32 0, %v9223_v43  ;;  %vm2158_vm12 = vc.u32 %v9226_v42, %v9208_v20  ;;  %v9248_v40 = vor.u32 %v1763_v47, %v1762_v30  ;;  %v8203_v30 = vld [vmem:[%s8435_s25 + $0x58] sm:$0xff] }
 0x1bf   : > { %v9240_v44 = vsel %vm13333_vm6, %v13472_v25, %v8869_v21  ;;  %v2010_v46 = vsel %vm2009_vm11, %v2008_v8, 0  ;;  %v9250_v29 = vor.u32 4788187, %v1767_v34  ;;  %v2160_v21 = vsel %vm2158_vm12, %v2159_v35, %v9209_v12 }
 0x1c0   : > { %13473 = vst [vmem:[#allocation30_spill] sm:$0xff] %v9240_v44  ;;  %v2012_v19 = vand.u32 31, %v2010_v46  ;;  %vm6972_vm13 = vcmp.lt.s32.totalorder %v6971_v53, 0  ;;  %v9254_v13 = vsub.s32 %v9186_v41, %v1855_v60  ;;  %v2161_v2 = vadd.s32 %v2160_v21, %v2156_v18 }
 0x1c1   : > { %v2005_v22 = vand.u32 8388607, %v13272_v49  ;;  %v13474_v3 = vmov 683565275   ;;  %v9261_v48 = vmul.f32 0.62831855, %v8203_v30  ;;  %v6982_v10 = vmin.u32 %v1961_v11, %v9223_v43 }
 0x1c2   : > { %v2013_v9 = vsub.s32 32, %v2012_v19  ;;  %v2015_v23 = vshll.u32 %v13474_v3, %v2012_v19  ;;  %v2018_v0 = vshll.u32 %v13465_v31, %v2012_v19  ;;  %v2162_v12 = vadd.s32 536870912, %v2161_v2 }
 0x1c3   : > { %13475 = vst [vmem:[#allocation31_spill] sm:$0xff] %v9261_v48  ;;  %v2021_v47 = vshll.u32 %v13466_v45, %v2012_v19  ;;  %v2024_v41 = vshll.u32 %v13457_v37, %v2012_v19  ;;  %vm13323_vm14 = vcmp.lt.s32.totalorder %v8521_v28, 0  ;;  %v9267_v34 = vshrl.u32 %v2010_v46, 5 }
 0x1c4   : > { %v2016_v8 = vshrl.u32 %v13465_v31, %v2013_v9  ;;  %v2019_v60 = vshrl.u32 %v13466_v45, %v2013_v9  ;;  %v2022_v18 = vshrl.u32 %v13457_v37, %v2013_v9  ;;  %vm13334_vm15 = vcmp.lt.s32.totalorder %v8526_v32, 0 }
 0x1c5   : > { %v1771_v35 = vcvt.s32.f32 %v9248_v40  ;;  %v1858_v25 = vsub.s32 0, %v9254_v13  ;;  %v2006_v11 = vor.u32 8388608, %v2005_v22  ;;  %v2025_v21 = vshrl.u32 %v13458_v58, %v2013_v9 }
 0x1c6   : > { %v2017_v30 = vor.u32 %v2016_v8, %v2015_v23  ;;  %v2020_v49 = vor.u32 %v2019_v60, %v2018_v0  ;;  %v2027_v46 = vshll.u32 %v13458_v58, %v2012_v19  ;;  %v2310_v52 = vand.u32 2139095040, %v9261_v48 }
 0x1c7   : > { %vm13327_vm0 = vcmp.lt.s32.totalorder %v8554_v57, 0  ;;  %v9280_v38 = vsel %vm6972_vm13, 0, %v6971_v53  ;;  %v9282_v59 = vshrl.u32 %v2162_v12, 30  ;;  %v2023_v44 = vor.u32 %v2022_v18, %v2021_v47 }
 0x1c8   : > { %v2026_v40 = vor.u32 %v2025_v21, %v2024_v41  ;;  %v1963_v7 = vclz %v6982_v10  ;;  %v13477_v26 = vmov 1326507024   ;;  %vm2030_vm1 = vcmp.lt.s32.totalorder %v9267_v34, 1 }
 0x1c9   : > { %13476 = vst [vmem:[#allocation32_spill] sm:$0xff] %v9282_v59  ;;  %v2028_v22 = vshrl.u32 %v13477_v26, %v2013_v9  ;;  %vm2032_vm2 = vcmp.lt.s32.totalorder %v9267_v34, 3  ;;  %v6978_v19 = vmin.u32 %v1858_v25, %v9254_v13  ;;  %vm2031_vm3 = vcmp.lt.s32.totalorder %v9267_v34, 2 }
 0x1ca   : > { %vm2033_vm4 = vcmp.lt.s32.totalorder %v9267_v34, 4  ;;  %v9290_v23 = vshll.u32 %v2006_v11, 8  ;;  %v2038_v0 = vsel %vm2030_vm1, %v2017_v30, %v2020_v49  ;;  %v2311_v12 = vshrl.u32 %v2310_v52, 23  ;;  %v804_v34 = vld [vmem:[%s8435_s25 + $0xa8] sm:$0xff] }
 0x1cb   : > { %v2029_v53 = vor.u32 %v2028_v22, %v2027_v46  ;;  %v2039_v10 = vsel %vm2033_vm4, %v2026_v40, 920167782  ;;  %v1769_v47 = vand.u32 2147483647, %v9250_v29  ;;  %v1662_v41 = vsub.s32 4294967266, %v9280_v38  ;;  %923 = vperm.xlu1 %7880, %v804_v34  }
 0x1cc   : > { %v2164_v8 = vshll.u32 %v9282_v59, 30  ;;  %v2040_v60 = vsel %vm2032_vm2, %v2023_v44, %v2039_v10  ;;  %v6983_v18 = vadd.s32 4294967294, %v1963_v7  ;;  %v2042_v11 = vsel %vm2030_vm1, %v2020_v49, %v2023_v44 }
 0x1cd   : > { %v2041_v25 = vsel %vm2031_vm3, %v2038_v0, %v2040_v60  ;;  %v2043_v21 = vsel %vm2033_vm4, %v2029_v53, 1326507024  ;;  %v1860_v52 = vclz %v6978_v19  ;;  %v2014_v29 = vshrl.u32 %v13474_v3, %v2013_v9 }
 0x1ce   : > { %v2035_v46 = vsel %vm2033_vm4, %v2023_v44, 2102212464  ;;  %v2044_v22 = vsel %vm2032_vm2, %v2026_v40, %v2043_v21  ;;  %v9315_v0 = vmul.u32.u64.low %v9290_v23, %v2041_v25  ;;  %v9316_v10 = vmul.u32.u64.high %v9290_v23, %v2041_v25, %v9315_v0 }
 0x1cf   : > { %v2045_v7 = vsel %vm2031_vm3, %v2042_v11, %v2044_v22  ;;  %v6997_v60 = vadd.s32 4294967169, %v2311_v12  ;;  %v13478_v19 = vxor.u32 2147483648, %v9135_v24  ;;  %v9326_v44 = vsub.s32 %v2161_v2, %v2164_v8 }
 0x1d0   : > { %v9329_v40 = vmul.u32.u64.low %v9290_v23, %v2045_v7  ;;  %v9330_v53 = vmul.u32.u64.high %v9290_v23, %v2045_v7, %v9329_v40  ;;  %v13480_v11 = vxor.u32 2147483648, %v9144_v62  ;;  %v1642_v12 = vadd.s32 %v8957_v39, %v8980_v54 }
 0x1d1   : > { %v9324_v9 = vsel %vm13323_vm14, %v13478_v19, %v9135_v24  ;;  %vm6984_vm5 = vcmp.lt.s32.totalorder %v6983_v18, 0  ;;  %v2317_v21 = vadd.s32 1, %v6997_v60  ;;  %v1658_v24 = vsub.s32 32, %v9280_v38 }
 0x1d2   : > { %13479 = vst [vmem:[#allocation33_spill] sm:$0xff] %v9324_v9  ;;  %v9337_v25 = vsel %vm13334_vm15, %v13480_v11, %v9144_v62  ;;  %v1663_v2 = vadd.s32 127, %v1662_v41  ;;  %v2034_v8 = vsel %vm2030_vm1, %v2014_v29, %v2017_v30  ;;  %v2036_v22 = vsel %vm2032_vm2, %v2020_v49, %v2035_v46 }
 0x1d3   : > { %13481 = vst [vmem:[#allocation34_spill] sm:$0xff] %v9337_v25  ;;  %v13482_v7 = vxor.u32 2147483648, %v9216_v5  ;;  %v9353_v19 = vmul.f32 %v1771_v35, %v1769_v47  ;;  %v6979_v54 = vadd.s32 4294967294, %v1860_v52  ;;  %vm2318_vm7 = vcmp.gt.s32.totalorder %v2317_v21, 0 }
 0x1d4   : > { %v9355_v39 = vsel %vm6984_vm5, 0, %v6983_v18  ;;  %v2167_v41 = vsub.s32 0, %v9326_v44  ;;  %v2056_v30 = vadd.s32 1, %v9316_v10  ;;  %v2319_v49 = vsel %vm2318_vm7, %v2317_v21, 0 }
 0x1d5   : > { %v9351_v62 = vsel %vm13327_vm0, %v13482_v7, %v9216_v5  ;;  %v1659_v29 = vshll.u32 %v9162_v63, %v9280_v38  ;;  %v2037_v5 = vsel %vm2031_vm3, %v2034_v8, %v2036_v22  ;;  %vm2055_vm8 = vc.u32 %v9330_v53, %v9315_v0  ;;  %v8204_v63 = vld [vmem:[%s8435_s25 + $0x50] sm:$0xff] }
 0x1d6   : > { %13483 = vst [vmem:[#allocation35_spill] sm:$0xff] %v9351_v62  ;;  %v2321_v35 = vand.u32 31, %v2319_v49  ;;  %v1660_v47 = vshrl.u32 %v1642_v12, %v1658_v24  ;;  %v1664_v52 = vshll.u32 %v1663_v2, 23  ;;  %v1951_v18 = vadd.s32 %v9054_v50, %v9051_v51 }
 0x1d7   : > { %v13284_v46 = vand.u32 2147483647, %v9261_v48  ;;  %v1971_v60 = vsub.s32 4294967266, %v9355_v39  ;;  %vm6980_vm9 = vcmp.lt.s32.totalorder %v6979_v54, 0  ;;  %v9372_v38 = vmul.f32 0.62831855, %v8204_v63 }
 0x1d8   : > { %v9369_v40 = vsub.s32 32, %v2321_v35  ;;  %v6990_v11 = vmin.u32 %v2167_v41, %v9326_v44  ;;  %v2053_v21 = vmul.u32 %v9290_v23, %v2037_v5  ;;  %v2057_v12 = vsel %vm2055_vm8, %v2056_v30, %v9316_v10 }
 0x1d9   : > { %13484 = vst [vmem:[#allocation36_spill] sm:$0xff] %v9372_v38  ;;  %v2333_v24 = vshll.u32 %v13457_v37, %v2321_v35  ;;  %v9379_v51 = vshrl.u32 %v2319_v49, 5  ;;  %v2324_v50 = vshll.u32 %v13474_v3, %v2321_v35  ;;  %v2327_v2 = vshll.u32 %v13465_v31, %v2321_v35 }
 0x1da   : > { %v2330_v8 = vshll.u32 %v13466_v45, %v2321_v35  ;;  %v2325_v22 = vshrl.u32 %v13465_v31, %v9369_v40  ;;  %v2328_v7 = vshrl.u32 %v13466_v45, %v9369_v40  ;;  %v2331_v23 = vshrl.u32 %v13457_v37, %v9369_v40 }
 0x1db   : > { %v2334_v10 = vshrl.u32 %v13458_v58, %v9369_v40  ;;  %v1661_v41 = vor.u32 %v1660_v47, %v1659_v29  ;;  %v1665_v30 = vor.u32 4788187, %v1664_v52  ;;  %v1967_v49 = vsub.s32 32, %v9355_v39 }
 0x1dc   : > { %v2336_v5 = vshll.u32 %v13458_v58, %v2321_v35  ;;  %v1972_v63 = vadd.s32 127, %v1971_v60  ;;  %v9395_v34 = vsel %vm6980_vm9, 0, %v6979_v54  ;;  %v2314_v9 = vand.u32 8388607, %v13284_v46 }
 0x1dd   : > { %v2335_v28 = vor.u32 %v2334_v10, %v2333_v24  ;;  %v2169_v62 = vclz %v6990_v11  ;;  %v9399_v57 = vadd.s32 %v2057_v12, %v2053_v21  ;;  %v2337_v25 = vshrl.u32 %v13477_v26, %v9369_v40 }
 0x1de   : > { %v2207_v29 = vand.u32 2139095040, %v9372_v38  ;;  %v2326_v47 = vor.u32 %v2325_v22, %v2324_v50  ;;  %v2329_v52 = vor.u32 %v2328_v7, %v2327_v2  ;;  %v2332_v56 = vor.u32 %v2331_v23, %v2330_v8 }
 0x1df   : > { %vm2342_vm10 = vcmp.lt.s32.totalorder %v9379_v51, 4  ;;  %v2338_v35 = vor.u32 %v2337_v25, %v2336_v5  ;;  %vm2339_vm11 = vcmp.lt.s32.totalorder %v9379_v51, 1  ;;  %vm2341_vm12 = vcmp.lt.s32.totalorder %v9379_v51, 3 }
 0x1e0   : > { %v2348_v54 = vsel %vm2342_vm10, %v2335_v28, 920167782  ;;  %v1968_v60 = vshll.u32 %v9223_v43, %v9355_v39  ;;  %v1969_v11 = vshrl.u32 %v1951_v18, %v1967_v49  ;;  %v1973_v21 = vshll.u32 %v1972_v63, 23 }
 0x1e1   : > { %v2315_v12 = vor.u32 8388608, %v2314_v9  ;;  %v1868_v24 = vsub.s32 4294967266, %v9395_v34  ;;  %v2059_v50 = vadd.s32 536870912, %v9399_v57  ;;  %vm2340_vm13 = vcmp.lt.s32.totalorder %v9379_v51, 2 }
 0x1e2   : > { %v2352_v25 = vsel %vm2342_vm10, %v2338_v35, 1326507024  ;;  %v2347_v2 = vsel %vm2339_vm11, %v2326_v47, %v2329_v52  ;;  %v2349_v8 = vsel %vm2341_vm12, %v2332_v56, %v2348_v54  ;;  %v2351_v43 = vsel %vm2339_vm11, %v2329_v52, %v2332_v56 }
 0x1e3   : > { %v2353_v9 = vsel %vm2341_vm12, %v2335_v28, %v2352_v25  ;;  %v1666_v39 = vand.u32 2147483647, %v1665_v30  ;;  %v1668_v18 = vcvt.s32.f32 %v1661_v41  ;;  %v6991_v22 = vadd.s32 4294967294, %v2169_v62  ;;  %v8205_v30 = vld [vmem:[%s8435_s25 + $0x68] sm:$0xff] }
 0x1e4   : > { %v2208_v7 = vshrl.u32 %v2207_v29, 23  ;;  %v9424_v23 = vor.u32 %v1969_v11, %v1968_v60  ;;  %v9426_v10 = vor.u32 4788187, %v1973_v21  ;;  %v1848_v49 = vadd.s32 %v9111_v14, %v9126_v17 }
 0x1e5   : > { %v9430_v5 = vshll.u32 %v2315_v12, 8  ;;  %v2350_v63 = vsel %vm2340_vm13, %v2347_v2, %v2349_v8  ;;  %v2354_v35 = vsel %vm2340_vm13, %v2351_v43, %v2353_v9  ;;  %v9437_v41 = vmul.f32 0.62831855, %v8205_v30 }
 0x1e6   : > { %v6993_v28 = vadd.s32 4294967169, %v2208_v7  ;;  %v1864_v62 = vsub.s32 32, %v9395_v34  ;;  %v9440_v29 = vadd.s32 127, %v1868_v24  ;;  %v9442_v54 = vshrl.u32 %v2059_v50, 30 }
 0x1e7   : > { %13485 = vst [vmem:[#allocation37_spill] sm:$0xff] %v9437_v41  ;;  %v13283_v14 = vand.u32 2147483647, %v9372_v38  ;;  %vm6992_vm1 = vcmp.lt.s32.totalorder %v6991_v22, 0  ;;  %v2323_v17 = vshrl.u32 %v13474_v3, %v9369_v40  ;;  %v2344_v60 = vsel %vm2342_vm10, %v2332_v56, 2102212464 }
 0x1e8   : > { %13486 = vst [vmem:[#allocation38_spill] sm:$0xff] %v9442_v54  ;;  %v2214_v11 = vadd.s32 1, %v6993_v28  ;;  %v9450_v21 = vmul.u32.u64.low %v9430_v5, %v2354_v35  ;;  %v9451_v12 = vmul.u32.u64.high %v9430_v5, %v2354_v35, %v9450_v21  ;;  %v9459_v2 = vmul.f32 %v1668_v18, %v1666_v39 }
 0x1e9   : > { %v9454_v25 = vmul.u32.u64.low %v9430_v5, %v2350_v63  ;;  %v9455_v24 = vmul.u32.u64.high %v9430_v5, %v2350_v63, %v9454_v25  ;;  %v2516_v40 = vand.u32 2139095040, %v9437_v41  ;;  %v2157_v43 = vadd.s32 %v9208_v20, %v9226_v42 }
 0x1ea   : > { %vm2215_vm2 = vcmp.gt.s32.totalorder %v2214_v11, 0  ;;  %v2061_v9 = vshll.u32 %v9442_v54, 30  ;;  %v9467_v7 = vsel %vm6992_vm1, 0, %v6991_v22  ;;  %v2343_v63 = vsel %vm2339_vm11, %v2323_v17, %v2326_v47 }
 0x1eb   : > { %v2345_v39 = vsel %vm2341_vm12, %v2329_v52, %v2344_v60  ;;  %v2216_v18 = vsel %vm2215_vm2, %v2214_v11, 0  ;;  %v9475_v28 = vshrl.u32 %v1848_v49, %v1864_v62  ;;  %v2211_v20 = vand.u32 8388607, %v13283_v14 }
 0x1ec   : > { %v2173_v42 = vsub.s32 32, %v9467_v7  ;;  %v2218_v47 = vand.u32 31, %v2216_v18  ;;  %v2517_v17 = vshrl.u32 %v2516_v40, 23  ;;  %v2177_v52 = vsub.s32 4294967266, %v9467_v7 }
 0x1ed   : > { %v9485_v60 = vsub.s32 %v9399_v57, %v2061_v9  ;;  %v2346_v49 = vsel %vm2340_vm13, %v2343_v63, %v2345_v39  ;;  %v2217_v62 = vshrl.u32 %v2216_v18, 5  ;;  %vm2364_vm3 = vc.u32 %v9451_v12, %v9454_v25  ;;  %v803_v18 = vld [vmem:[%s8435_s25 + $0xa0] sm:$0xff] }
 0x1ee   : > { %v2219_v11 = vsub.s32 32, %v2218_v47  ;;  %v2221_v21 = vshll.u32 %v13474_v3, %v2218_v47  ;;  %v2224_v14 = vshll.u32 %v13465_v31, %v2218_v47  ;;  %v2227_v46 = vshll.u32 %v13466_v45, %v2218_v47  ;;  %918 = vperm.xlu0 %7879, %v803_v18  }
 0x1ef   : > { %v2365_v40 = vadd.s32 1, %v9455_v24  ;;  %v2212_v22 = vor.u32 8388608, %v2211_v20  ;;  %v2230_v57 = vshll.u32 %v13457_v37, %v2218_v47  ;;  %vm13363_vm4 = vcmp.lt.s32.totalorder %v8751_v4, 0 }
 0x1f0   : > { %v2222_v51 = vshrl.u32 %v13465_v31, %v2219_v11  ;;  %v2225_v9 = vshrl.u32 %v13466_v45, %v2219_v11  ;;  %v2228_v63 = vshrl.u32 %v13457_v37, %v2219_v11  ;;  %v7005_v39 = vadd.s32 4294967169, %v2517_v17 }
 0x1f1   : > { %v2220_v30 = vshrl.u32 %v13474_v3, %v2219_v11  ;;  %v2231_v35 = vshrl.u32 %v13458_v58, %v2219_v11  ;;  %v2233_v56 = vshll.u32 %v13458_v58, %v2218_v47  ;;  %vm2236_vm5 = vcmp.lt.s32.totalorder %v2217_v62, 1 }
 0x1f2   : > { %v2223_v20 = vor.u32 %v2222_v51, %v2221_v21  ;;  %v2226_v8 = vor.u32 %v2225_v9, %v2224_v14  ;;  %v2229_v50 = vor.u32 %v2228_v63, %v2227_v46  ;;  %v2234_v32 = vshrl.u32 %v13477_v26, %v2219_v11  ;;  %v8206_v63 = vld [vmem:[%s8435_s25 + $0x60] sm:$0xff] }
 0x1f3   : > { %v2362_v16 = vmul.u32 %v9430_v5, %v2346_v49  ;;  %v2366_v17 = vsel %vm2364_vm3, %v2365_v40, %v9455_v24  ;;  %v2232_v33 = vor.u32 %v2231_v35, %v2230_v57  ;;  %v2252_v15 = vshll.u32 %v2212_v22, 8 }
 0x1f4   : > { %v2235_v27 = vor.u32 %v2234_v32, %v2233_v56  ;;  %vm2238_vm7 = vcmp.lt.s32.totalorder %v2217_v62, 3  ;;  %vm2239_vm8 = vcmp.lt.s32.totalorder %v2217_v62, 4  ;;  %v2523_v47 = vadd.s32 1, %v7005_v39 }
 0x1f5   : > { %vm2237_vm9 = vcmp.lt.s32.totalorder %v2217_v62, 2  ;;  %v2240_v21 = vsel %vm2236_vm5, %v2220_v30, %v2223_v20  ;;  %v2241_v14 = vsel %vm2239_vm8, %v2229_v50, 2102212464  ;;  %v2244_v46 = vsel %vm2236_vm5, %v2223_v20, %v2226_v8 }
 0x1f6   : > { %v2242_v11 = vsel %vm2238_vm7, %v2226_v8, %v2241_v14  ;;  %v2245_v5 = vsel %vm2239_vm8, %v2232_v33, 920167782  ;;  %v2248_v49 = vsel %vm2236_vm5, %v2226_v8, %v2229_v50  ;;  %v2249_v51 = vsel %vm2239_vm8, %v2235_v27, 1326507024 }
 0x1f7   : > { %v2175_v24 = vshrl.u32 %v2157_v43, %v2173_v42  ;;  %v2064_v35 = vsub.s32 0, %v9485_v60  ;;  %v2246_v32 = vsel %vm2238_vm7, %v2229_v50, %v2245_v5  ;;  %v13295_v56 = vand.u32 2147483647, %v9437_v41 }
 0x1f8   : > { %v9517_v22 = vadd.s32 %v2366_v17, %v2362_v16  ;;  %v2247_v30 = vsel %vm2237_vm9, %v2244_v46, %v2246_v32  ;;  %v2250_v40 = vsel %vm2238_vm7, %v2232_v33, %v2249_v51  ;;  %vm2524_vm10 = vcmp.gt.s32.totalorder %v2523_v47, 0 }
 0x1f9   : > { %v2243_v57 = vsel %vm2237_vm9, %v2240_v21, %v2242_v11  ;;  %v2251_v9 = vsel %vm2237_vm9, %v2248_v49, %v2250_v40  ;;  %v9523_v8 = vmul.u32.u64.low %v2252_v15, %v2247_v30  ;;  %v9524_v27 = vmul.u32.u64.high %v2252_v15, %v2247_v30, %v9523_v8 }
 0x1fa   : > { %v9527_v43 = vmul.u32.u64.low %v2252_v15, %v2251_v9  ;;  %v9528_v42 = vmul.u32.u64.high %v2252_v15, %v2251_v9, %v9527_v43  ;;  %v2525_v50 = vsel %vm2524_vm10, %v2523_v47, 0  ;;  %v9531_v16 = vmul.f32 0.62831855, %v8206_v63 }
 0x1fb   : > { %v13488_v39 = vxor.u32 2147483648, %v9353_v19  ;;  %v1670_v62 = vxor.u32 2147483648, %v9459_v2  ;;  %v2178_v18 = vadd.s32 127, %v2177_v52  ;;  %v2527_v20 = vand.u32 31, %v2525_v50 }
 0x1fc   : > { %13487 = vst [vmem:[#allocation39_spill] sm:$0xff] %v9531_v16  ;;  %v13490_v17 = vand.u32 2147483647, %v9426_v10  ;;  %v13491_v21 = vcvt.s32.f32 %v9424_v23  ;;  %v13492_v47 = vshll.u32 %v9254_v13, %v9395_v34  ;;  %v13493_v11 = vshll.u32 %v9440_v29, 23 }
 0x1fd   : > { %v9538_v33 = vsel %vm13363_vm4, %v13488_v39, %v9353_v19  ;;  %v2259_v5 = vmul.u32 %v2252_v15, %v2243_v57  ;;  %v13494_v52 = vshll.u32 %v9326_v44, %v9467_v7  ;;  %v2368_v23 = vadd.s32 536870912, %v9517_v22 }
 0x1fe   : > { %13489 = vst [vmem:[#allocation40_spill] sm:$0xff] %v9538_v33  ;;  %v9545_v14 = vmul.f32 %v13491_v21, %v13490_v17  ;;  %v9551_v46 = vor.u32 %v9475_v28, %v13492_v47  ;;  %v9555_v19 = vor.u32 4788187, %v13493_v11  ;;  %v2262_v10 = vadd.s32 1, %v9524_v27 }
 0x1ff   : > { %v9560_v49 = vor.u32 %v2175_v24, %v13494_v52  ;;  %v2520_v13 = vand.u32 8388607, %v13295_v56  ;;  %v6986_v34 = vmin.u32 %v2064_v35, %v9485_v60  ;;  %vm2261_vm11 = vc.u32 %v9528_v42, %v9523_v8 }
 0x200   : > { %v2528_v29 = vsub.s32 32, %v2527_v20  ;;  %v2413_v15 = vand.u32 2139095040, %v9531_v16  ;;  %v2179_v28 = vshll.u32 %v2178_v18, 23  ;;  %v2263_v44 = vsel %vm2261_vm11, %v2262_v10, %v9524_v27 }
 0x201   : > { %v2530_v7 = vshll.u32 %v13474_v3, %v2527_v20  ;;  %v2533_v51 = vshll.u32 %v13465_v31, %v2527_v20  ;;  %v9573_v24 = vadd.s32 %v2263_v44, %v2259_v5  ;;  %v2526_v32 = vshrl.u32 %v2525_v50, 5 }
 0x202   : > { %v2531_v30 = vshrl.u32 %v13465_v31, %v2528_v29  ;;  %v2534_v35 = vshrl.u32 %v13466_v45, %v2528_v29  ;;  %v9577_v40 = vshrl.u32 %v2368_v23, 30  ;;  %v2521_v57 = vor.u32 8388608, %v2520_v13 }
 0x203   : > { %v2536_v9 = vshll.u32 %v13466_v45, %v2527_v20  ;;  %v2537_v43 = vshrl.u32 %v13457_v37, %v2528_v29  ;;  %vm13340_vm12 = vcmp.lt.s32.totalorder %v8778_v36, 0  ;;  %v2066_v27 = vclz %v6986_v34 }
 0x204   : > { %13495 = vst [vmem:[#allocation41_spill] sm:$0xff] %v9577_v40  ;;  %v2529_v63 = vshrl.u32 %v13474_v3, %v2528_v29  ;;  %v2539_v39 = vshll.u32 %v13457_v37, %v2527_v20  ;;  %v2414_v18 = vshrl.u32 %v2413_v15, 23  ;;  %v2265_v50 = vadd.s32 536870912, %v9573_v24 }
 0x205   : > { %v2532_v17 = vor.u32 %v2531_v30, %v2530_v7  ;;  %v2535_v21 = vor.u32 %v2534_v35, %v2533_v51  ;;  %v2540_v47 = vshrl.u32 %v13458_v58, %v2528_v29  ;;  %v2538_v11 = vor.u32 %v2537_v43, %v2536_v9  ;;  %v806_v43 = vld [vmem:[%s8435_s25 + $0xb8] sm:$0xff] }
 0x206   : > { %v2542_v5 = vshll.u32 %v13458_v58, %v2527_v20  ;;  %v2543_v52 = vshrl.u32 %v13477_v26, %v2528_v29  ;;  %vm2545_vm13 = vcmp.lt.s32.totalorder %v2526_v32, 1  ;;  %v2370_v23 = vshll.u32 %v9577_v40, 30  ;;  %933 = vperm.xlu1 %7880, %v806_v43  }
 0x207   : > { %v2541_v10 = vor.u32 %v2540_v47, %v2539_v39  ;;  %vm2547_vm1 = vcmp.lt.s32.totalorder %v2526_v32, 3  ;;  %v2561_v13 = vshll.u32 %v2521_v57, 8  ;;  %vm2546_vm2 = vcmp.lt.s32.totalorder %v2526_v32, 2 }
 0x208   : > { %v2544_v34 = vor.u32 %v2543_v52, %v2542_v5  ;;  %vm2548_vm3 = vcmp.lt.s32.totalorder %v2526_v32, 4  ;;  %v7001_v15 = vadd.s32 4294967169, %v2414_v18  ;;  %v9589_v44 = vshrl.u32 %v2265_v50, 30 }
 0x209   : > { %v2550_v7 = vsel %vm2548_vm3, %v2538_v11, 2102212464  ;;  %v2553_v51 = vsel %vm2545_vm13, %v2532_v17, %v2535_v21  ;;  %v2554_v30 = vsel %vm2548_vm3, %v2541_v10, 920167782  ;;  %v2549_v20 = vsel %vm2545_vm13, %v2529_v63, %v2532_v17 }
 0x20a   : > { %13496 = vst [vmem:[#allocation42_spill] sm:$0xff] %v9589_v44  ;;  %v2551_v29 = vsel %vm2547_vm1, %v2535_v21, %v2550_v7  ;;  %v2555_v35 = vsel %vm2547_vm1, %v2538_v11, %v2554_v30  ;;  %v2557_v9 = vsel %vm2545_vm13, %v2535_v21, %v2538_v11  ;;  %v2180_v57 = vor.u32 4788187, %v2179_v28 }
 0x20b   : > { %v6987_v39 = vadd.s32 4294967294, %v2066_v27  ;;  %v2556_v47 = vsel %vm2546_vm2, %v2553_v51, %v2555_v35  ;;  %v2558_v18 = vsel %vm2548_vm3, %v2544_v34, 1326507024  ;;  %v1874_v50 = vcvt.s32.f32 %v9551_v46 }
 0x20c   : > { %v2559_v5 = vsel %vm2547_vm1, %v2541_v10, %v2558_v18  ;;  %v9600_v52 = vmul.u32.u64.low %v2561_v13, %v2556_v47  ;;  %v9601_v56 = vmul.u32.u64.high %v2561_v13, %v2556_v47, %v9600_v52  ;;  %v1872_v63 = vand.u32 2147483647, %v9555_v19 }
 0x20d   : > { %v9606_v17 = vsub.s32 %v9517_v22, %v2370_v23  ;;  %v2552_v28 = vsel %vm2546_vm2, %v2549_v20, %v2551_v29  ;;  %v2560_v27 = vsel %vm2546_vm2, %v2557_v9, %v2559_v5  ;;  %v2267_v21 = vshll.u32 %v9589_v44, 30 }
 0x20e   : > { %v9611_v11 = vmul.u32.u64.low %v2561_v13, %v2560_v27  ;;  %v9612_v34 = vmul.u32.u64.high %v2561_v13, %v2560_v27, %v9611_v11  ;;  %v2420_v46 = vadd.s32 1, %v7001_v15  ;;  %v9619_v19 = vsel %vm13340_vm12, %v1670_v62, %v9459_v2 }
 0x20f   : > { %13497 = vst [vmem:[#allocation43_spill] sm:$0xff] %v9619_v19  ;;  %v2181_v22 = vand.u32 2147483647, %v2180_v57  ;;  %v2183_v23 = vcvt.s32.f32 %v9560_v49  ;;  %vm6988_vm5 = vcmp.lt.s32.totalorder %v6987_v39, 0  ;;  %v2568_v32 = vmul.u32 %v2561_v13, %v2552_v28  ;;  %v8207_v49 = vld [vmem:[%s8435_s25 + $0x78] sm:$0xff] }
 0x210   : > { %v2571_v10 = vadd.s32 1, %v9601_v56  ;;  %v13296_v7 = vand.u32 2147483647, %v9531_v16  ;;  %vm2421_vm7 = vcmp.gt.s32.totalorder %v2420_v46, 0  ;;  %v9625_v51 = vmul.f32 %v1874_v50, %v1872_v63 }
 0x211   : > { %v2373_v30 = vsub.s32 0, %v9606_v17  ;;  %v2422_v20 = vsel %vm2421_vm7, %v2420_v46, 0  ;;  %v2054_v2 = vadd.s32 %v9315_v0, %v9330_v53  ;;  %v9631_v62 = vsub.s32 %v9573_v24, %v2267_v21 }
 0x212   : > { %vm2570_vm8 = vc.u32 %v9612_v34, %v9600_v52  ;;  %v9636_v13 = vmul.f32 0.62831855, %v8207_v49  ;;  %v9638_v29 = vmul.f32 %v2183_v23, %v2181_v22  ;;  %v9641_v35 = vsel %vm6988_vm5, 0, %v6987_v39 }
 0x213   : > { %v2572_v9 = vsel %vm2570_vm8, %v2571_v10, %v9601_v56  ;;  %v2424_v43 = vand.u32 31, %v2422_v20  ;;  %v2070_v57 = vsub.s32 32, %v9641_v35  ;;  %v2417_v24 = vand.u32 8388607, %v13296_v7 }
 0x214   : > { %v2573_v53 = vadd.s32 %v2572_v9, %v2568_v32  ;;  %v6998_v47 = vmin.u32 %v2373_v30, %v9606_v17  ;;  %v2270_v5 = vsub.s32 0, %v9631_v62  ;;  %v9653_v63 = vshrl.u32 %v2422_v20, 5 }
 0x215   : > { %v2425_v18 = vsub.s32 32, %v2424_v43  ;;  %v2427_v50 = vshll.u32 %v13474_v3, %v2424_v43  ;;  %v2430_v39 = vshll.u32 %v13465_v31, %v2424_v43  ;;  %v2722_v28 = vand.u32 2139095040, %v9636_v13 }
 0x216   : > { %v2574_v56 = vadd.s32 536870912, %v2573_v53  ;;  %v2074_v27 = vsub.s32 4294967266, %v9641_v35  ;;  %v2433_v46 = vshll.u32 %v13466_v45, %v2424_v43  ;;  %vm13365_vm9 = vcmp.lt.s32.totalorder %v8861_v1, 0 }
 0x217   : > { %v2428_v21 = vshrl.u32 %v13465_v31, %v2425_v18  ;;  %v2431_v11 = vshrl.u32 %v13466_v45, %v2425_v18  ;;  %v2072_v22 = vshrl.u32 %v2054_v2, %v2070_v57  ;;  %v2418_v32 = vor.u32 8388608, %v2417_v24 }
 0x218   : > { %v9661_v23 = vshrl.u32 %v2574_v56, 30  ;;  %v2434_v10 = vshrl.u32 %v13457_v37, %v2425_v18  ;;  %v2436_v49 = vshll.u32 %v13457_v37, %v2424_v43  ;;  %v2437_v9 = vshrl.u32 %v13458_v58, %v2425_v18 }
 0x219   : > { %v2429_v30 = vor.u32 %v2428_v21, %v2427_v50  ;;  %v2432_v20 = vor.u32 %v2431_v11, %v2430_v39  ;;  %v2375_v7 = vclz %v6998_v47  ;;  %v6994_v0 = vmin.u32 %v2270_v5, %v9631_v62 }
 0x21a   : > { %13498 = vst [vmem:[#allocation44_spill] sm:$0xff] %v9661_v23  ;;  %vm2442_vm10 = vcmp.lt.s32.totalorder %v9653_v63, 1  ;;  %v2723_v15 = vshrl.u32 %v2722_v28, 23  ;;  %v2435_v19 = vor.u32 %v2434_v10, %v2433_v46  ;;  %v2438_v36 = vor.u32 %v2437_v9, %v2436_v49 }
 0x21b   : > { %v2439_v2 = vshll.u32 %v13458_v58, %v2424_v43  ;;  %v2440_v57 = vshrl.u32 %v13477_v26, %v2425_v18  ;;  %v2075_v24 = vadd.s32 127, %v2074_v27  ;;  %v2576_v50 = vshll.u32 %v9661_v23, 30 }
 0x21c   : > { %vm2444_vm11 = vcmp.lt.s32.totalorder %v9653_v63, 3  ;;  %vm2445_vm13 = vcmp.lt.s32.totalorder %v9653_v63, 4  ;;  %vm2443_vm1 = vcmp.lt.s32.totalorder %v9653_v63, 2  ;;  %v2450_v47 = vsel %vm2442_vm10, %v2429_v30, %v2432_v20 }
 0x21d   : > { %v2441_v39 = vor.u32 %v2440_v57, %v2439_v2  ;;  %v9676_v5 = vshll.u32 %v2418_v32, 8  ;;  %v6999_v56 = vadd.s32 4294967294, %v2375_v7  ;;  %v2272_v28 = vclz %v6994_v0 }
 0x21e   : > { %v2451_v43 = vsel %vm2445_vm13, %v2438_v36, 920167782  ;;  %v13299_v27 = vand.u32 2147483647, %v9636_v13  ;;  %v2454_v11 = vsel %vm2442_vm10, %v2432_v20, %v2435_v19  ;;  %v7013_v10 = vadd.s32 4294967169, %v2723_v15 }
 0x21f   : > { %v2452_v21 = vsel %vm2444_vm11, %v2435_v19, %v2451_v43  ;;  %v2455_v46 = vsel %vm2445_vm13, %v2441_v39, 1326507024  ;;  %v9687_v49 = vsub.s32 %v2573_v53, %v2576_v50  ;;  %v2426_v7 = vshrl.u32 %v13474_v3, %v2425_v18 }
 0x220   : > { %v2453_v0 = vsel %vm2443_vm1, %v2450_v47, %v2452_v21  ;;  %v2456_v32 = vsel %vm2444_vm11, %v2438_v36, %v2455_v46  ;;  %v2447_v9 = vsel %vm2445_vm13, %v2435_v19, 2102212464  ;;  %v2076_v15 = vshll.u32 %v2075_v24, 23 }
 0x221   : > { %v2457_v2 = vsel %vm2443_vm1, %v2454_v11, %v2456_v32  ;;  %v9699_v57 = vmul.u32.u64.low %v9676_v5, %v2453_v0  ;;  %v9700_v39 = vmul.u32.u64.high %v9676_v5, %v2453_v0, %v9699_v57  ;;  %vm7000_vm2 = vcmp.lt.s32.totalorder %v6999_v56, 0 }
 0x222   : > { %v9704_v53 = vmul.u32.u64.low %v9676_v5, %v2457_v2  ;;  %v9705_v18 = vmul.u32.u64.high %v9676_v5, %v2457_v2, %v9704_v53  ;;  %v13499_v36 = vxor.u32 2147483648, %v9545_v14  ;;  %v2729_v43 = vadd.s32 1, %v7013_v10 }
 0x223   : > { %v6995_v21 = vadd.s32 4294967294, %v2272_v28  ;;  %v2446_v24 = vsel %vm2442_vm10, %v2426_v7, %v2429_v30  ;;  %v2448_v11 = vsel %vm2444_vm11, %v2432_v20, %v2447_v9  ;;  %v2726_v46 = vand.u32 8388607, %v13299_v27  ;;  %v805_v9 = vld [vmem:[%s8435_s25 + $0xb0] sm:$0xff] }
 0x224   : > { %v9712_v19 = vsel %vm13365_vm9, %v13499_v36, %v9545_v14  ;;  %v2363_v14 = vadd.s32 %v9454_v25, %v9451_v12  ;;  %v9724_v0 = vsel %vm7000_vm2, 0, %v6999_v56  ;;  %v2579_v32 = vsub.s32 0, %v9687_v49  ;;  %928 = vperm.xlu0 %7879, %v805_v9  }
 0x225   : > { %13500 = vst [vmem:[#allocation45_spill] sm:$0xff] %v9712_v19  ;;  %vm2730_vm3 = vcmp.gt.s32.totalorder %v2729_v43, 0  ;;  %v13501_v28 = vshll.u32 %v9485_v60, %v9641_v35  ;;  %v9732_v30 = vor.u32 4788187, %v2076_v15  ;;  %v2468_v20 = vadd.s32 1, %v9700_v39  ;;  %v8208_v60 = vld [vmem:[%s8435_s25 + $0x70] sm:$0xff] }
 0x226   : > { %v2731_v7 = vsel %vm2730_vm3, %v2729_v43, 0  ;;  %v2379_v2 = vsub.s32 32, %v9724_v0  ;;  %v2449_v12 = vsel %vm2443_vm1, %v2446_v24, %v2448_v11  ;;  %vm2467_vm5 = vc.u32 %v9705_v18, %v9699_v57 }
 0x227   : > { %v9730_v10 = vor.u32 %v2072_v22, %v13501_v28  ;;  %v2733_v25 = vand.u32 31, %v2731_v7  ;;  %v2383_v35 = vsub.s32 4294967266, %v9724_v0  ;;  %vm6996_vm7 = vcmp.lt.s32.totalorder %v6995_v21, 0 }
 0x228   : > { %v2727_v22 = vor.u32 8388608, %v2726_v46  ;;  %v7006_v56 = vmin.u32 %v2579_v32, %v9687_v49  ;;  %v2465_v36 = vmul.u32 %v9676_v5, %v2449_v12  ;;  %v2469_v43 = vsel %vm2467_vm5, %v2468_v20, %v9700_v39 }
 0x229   : > { %v2734_v15 = vsub.s32 32, %v2733_v25  ;;  %v2736_v53 = vshll.u32 %v13474_v3, %v2733_v25  ;;  %v2739_v63 = vshll.u32 %v13465_v31, %v2733_v25  ;;  %v2742_v24 = vshll.u32 %v13466_v45, %v2733_v25 }
 0x22a   : > { %v2745_v11 = vshll.u32 %v13457_v37, %v2733_v25  ;;  %v2732_v28 = vshrl.u32 %v2731_v7, 5  ;;  %v2384_v27 = vadd.s32 127, %v2383_v35  ;;  %v9757_v5 = vmul.f32 0.62831855, %v8208_v60 }
 0x22b   : > { %v2737_v9 = vshrl.u32 %v13465_v31, %v2734_v15  ;;  %v2740_v46 = vshrl.u32 %v13466_v45, %v2734_v15  ;;  %v2743_v32 = vshrl.u32 %v13457_v37, %v2734_v15  ;;  %v2735_v47 = vshrl.u32 %v13474_v3, %v2734_v15 }
 0x22c   : > { %v2746_v50 = vshrl.u32 %v13458_v58, %v2734_v15  ;;  %v9760_v39 = vsel %vm6996_vm7, 0, %v6995_v21  ;;  %v2748_v7 = vshll.u32 %v13458_v58, %v2733_v25  ;;  %v2581_v33 = vclz %v7006_v56 }
 0x22d   : > { %v2738_v20 = vor.u32 %v2737_v9, %v2736_v53  ;;  %v2741_v12 = vor.u32 %v2740_v46, %v2739_v63  ;;  %v9763_v4 = vadd.s32 %v2469_v43, %v2465_v36  ;;  %v2744_v19 = vor.u32 %v2743_v32, %v2742_v24 }
 0x22e   : > { %v2747_v1 = vor.u32 %v2746_v50, %v2745_v11  ;;  %v2749_v35 = vshrl.u32 %v13477_v26, %v2734_v15  ;;  %vm2751_vm8 = vcmp.lt.s32.totalorder %v2732_v28, 1  ;;  %vm2753_vm10 = vcmp.lt.s32.totalorder %v2732_v28, 3 }
 0x22f   : > { %v2767_v54 = vshll.u32 %v2727_v22, 8  ;;  %vm2752_vm11 = vcmp.lt.s32.totalorder %v2732_v28, 2  ;;  %vm2754_vm13 = vcmp.lt.s32.totalorder %v2732_v28, 4  ;;  %v2755_v60 = vsel %vm2751_vm8, %v2735_v47, %v2738_v20 }
 0x230   : > { %v2619_v21 = vand.u32 2139095040, %v9757_v5  ;;  %vm13364_vm1 = vcmp.lt.s32.totalorder %v8926_v55, 0  ;;  %vm13401_vm2 = vcmp.lt.s32.totalorder %v9028_v6, 0  ;;  %v2750_v25 = vor.u32 %v2749_v35, %v2748_v7 }
 0x231   : > { %v2756_v56 = vsel %vm2754_vm13, %v2744_v19, 2102212464  ;;  %v2759_v50 = vsel %vm2751_vm8, %v2738_v20, %v2741_v12  ;;  %v2760_v15 = vsel %vm2754_vm13, %v2747_v1, 920167782  ;;  %v2381_v53 = vshrl.u32 %v2363_v14, %v2379_v2 }
 0x232   : > { %v2471_v22 = vadd.s32 536870912, %v9763_v4  ;;  %v2757_v63 = vsel %vm2753_vm10, %v2741_v12, %v2756_v56  ;;  %v2761_v47 = vsel %vm2753_vm10, %v2744_v19, %v2760_v15  ;;  %v2385_v36 = vshll.u32 %v2384_v27, 23 }
 0x233   : > { %v2762_v43 = vsel %vm2752_vm11, %v2759_v50, %v2761_v47  ;;  %v2763_v24 = vsel %vm2751_vm8, %v2741_v12, %v2744_v19  ;;  %v2764_v11 = vsel %vm2754_vm13, %v2750_v25, 1326507024  ;;  %v2280_v9 = vsub.s32 4294967266, %v9760_v39  ;;  %v8209_v12 = vld [vmem:[%s8435_s25 + $0x88] sm:$0xff] }
 0x234   : > { %v7007_v46 = vadd.s32 4294967294, %v2581_v33  ;;  %v2758_v32 = vsel %vm2752_vm11, %v2755_v60, %v2757_v63  ;;  %v2765_v14 = vsel %vm2753_vm10, %v2747_v1, %v2764_v11  ;;  %v2620_v27 = vshrl.u32 %v2619_v21, 23 }
 0x235   : > { %v2766_v2 = vsel %vm2752_vm11, %v2763_v24, %v2765_v14  ;;  %v9783_v20 = vmul.u32.u64.low %v2767_v54, %v2762_v43  ;;  %v9784_v7 = vmul.u32.u64.high %v2767_v54, %v2762_v43, %v9783_v20  ;;  %v9787_v35 = vshrl.u32 %v2471_v22, 30 }
 0x236   : > { %v9789_v56 = vmul.u32.u64.low %v2767_v54, %v2766_v2  ;;  %v9790_v19 = vmul.u32.u64.high %v2767_v54, %v2766_v2, %v9789_v56  ;;  %v9793_v25 = vmul.f32 0.62831855, %v8209_v12  ;;  %v2080_v33 = vcvt.s32.f32 %v9730_v10 }
 0x237   : > { %13502 = vst [vmem:[#allocation46_spill] sm:$0xff] %v9787_v35  ;;  %v2260_v1 = vadd.s32 %v9523_v8, %v9528_v42  ;;  %v2276_v28 = vsub.s32 32, %v9760_v39  ;;  %v7009_v60 = vadd.s32 4294967169, %v2620_v27  ;;  %v2078_v50 = vand.u32 2147483647, %v9732_v30 }
 0x238   : > { %13503 = vst [vmem:[#allocation47_spill] sm:$0xff] %v9793_v25  ;;  %v13504_v21 = vshll.u32 %v9606_v17, %v9724_v0  ;;  %v2281_v22 = vadd.s32 127, %v2280_v9  ;;  %v2774_v63 = vmul.u32 %v2767_v54, %v2758_v32  ;;  %v9805_v47 = vor.u32 4788187, %v2385_v36 }
 0x239   : > { %v2777_v43 = vadd.s32 1, %v9784_v7  ;;  %v13306_v10 = vand.u32 2147483647, %v9757_v5  ;;  %v2626_v24 = vadd.s32 1, %v7009_v60  ;;  %vm7008_vm3 = vcmp.lt.s32.totalorder %v7007_v46, 0 }
 0x23a   : > { %v9803_v15 = vor.u32 %v2381_v53, %v13504_v21  ;;  %v2473_v8 = vshll.u32 %v9787_v35, 30  ;;  %vm2776_vm5 = vc.u32 %v9790_v19, %v9783_v20  ;;  %v2928_v42 = vand.u32 2139095040, %v9793_v25 }
 0x23b   : > { %v2277_v17 = vshll.u32 %v9631_v62, %v9760_v39  ;;  %v2278_v0 = vshrl.u32 %v2260_v1, %v2276_v28  ;;  %v2778_v54 = vsel %vm2776_vm5, %v2777_v43, %v9784_v7  ;;  %vm2627_vm7 = vcmp.gt.s32.totalorder %v2626_v24, 0  ;;  %v808_v43 = vld [vmem:[%s8435_s25 + $0xc8] sm:$0xff] }
 0x23c   : > { %v13505_v30 = vxor.u32 2147483648, %v9625_v51  ;;  %v13507_v36 = vxor.u32 2147483648, %v9638_v29  ;;  %v2282_v9 = vshll.u32 %v2281_v22, 23  ;;  %v2779_v62 = vadd.s32 %v2778_v54, %v2774_v63  ;;  %943 = vperm.xlu1 %7880, %v808_v43  }
 0x23d   : > { %v9830_v39 = vmul.f32 %v2080_v33, %v2078_v50  ;;  %v9833_v14 = vsel %vm7008_vm3, 0, %v7007_v46  ;;  %v2628_v2 = vsel %vm2627_vm7, %v2626_v24, 0  ;;  %v2623_v27 = vand.u32 8388607, %v13306_v10 }
 0x23e   : > { %v9821_v53 = vsel %vm13364_vm1, %v13505_v30, %v9625_v51  ;;  %v9828_v11 = vsel %vm13401_vm2, %v13507_v36, %v9638_v29  ;;  %v9837_v51 = vsub.s32 %v9763_v4, %v2473_v8  ;;  %v2929_v29 = vshrl.u32 %v2928_v42, 23 }
 0x23f   : > { %13506 = vst [vmem:[#allocation48_spill] sm:$0xff] %v9821_v53  ;;  %13508 = vst [vmem:[#allocation49_spill] sm:$0xff] %v9828_v11  ;;  %v9841_v56 = vor.u32 %v2278_v0, %v2277_v17  ;;  %v9845_v12 = vadd.s32 %v9600_v52, %v9612_v34  ;;  %v2780_v33 = vadd.s32 536870912, %v2779_v62  ;;  %v2630_v46 = vand.u32 31, %v2628_v2 }
 0x240   : > { %v9847_v1 = vor.u32 4788187, %v2282_v9  ;;  %v2589_v60 = vsub.s32 4294967266, %v9833_v14  ;;  %v2629_v4 = vshrl.u32 %v2628_v2, 5  ;;  %v2476_v52 = vsub.s32 0, %v9837_v51 }
 0x241   : > { %v2631_v50 = vsub.s32 32, %v2630_v46  ;;  %v2633_v21 = vshll.u32 %v13474_v3, %v2630_v46  ;;  %v2636_v22 = vshll.u32 %v13465_v31, %v2630_v46  ;;  %v2639_v63 = vshll.u32 %v13466_v45, %v2630_v46 }
 0x242   : > { %v2624_v34 = vor.u32 8388608, %v2623_v27  ;;  %v2642_v24 = vshll.u32 %v13457_v37, %v2630_v46  ;;  %v7021_v8 = vadd.s32 4294967169, %v2929_v29  ;;  %v9857_v42 = vshrl.u32 %v2780_v33, 30 }
 0x243   : > { %v2634_v17 = vshrl.u32 %v13465_v31, %v2631_v50  ;;  %v2637_v0 = vshrl.u32 %v13466_v45, %v2631_v50  ;;  %v2640_v54 = vshrl.u32 %v13457_v37, %v2631_v50  ;;  %v2632_v30 = vshrl.u32 %v13474_v3, %v2631_v50 }
 0x244   : > { %v2643_v36 = vshrl.u32 %v13458_v58, %v2631_v50  ;;  %v2645_v9 = vshll.u32 %v13458_v58, %v2630_v46  ;;  %vm2648_vm8 = vcmp.lt.s32.totalorder %v2629_v4, 1  ;;  %v2646_v29 = vshrl.u32 %v13477_v26, %v2631_v50 }
 0x245   : > { %v2635_v2 = vor.u32 %v2634_v17, %v2633_v21  ;;  %v2638_v27 = vor.u32 %v2637_v0, %v2636_v22  ;;  %v2641_v10 = vor.u32 %v2640_v54, %v2639_v63  ;;  %v7002_v33 = vmin.u32 %v2476_v52, %v9837_v51 }
 0x246   : > { %v2644_v43 = vor.u32 %v2643_v36, %v2642_v24  ;;  %v2664_v28 = vshll.u32 %v2624_v34, 8  ;;  %v2935_v32 = vadd.s32 1, %v7021_v8  ;;  %v2782_v7 = vshll.u32 %v9857_v42, 30 }
 0x247   : > { %v2647_v53 = vor.u32 %v2646_v29, %v2645_v9  ;;  %vm2650_vm10 = vcmp.lt.s32.totalorder %v2629_v4, 3  ;;  %vm2651_vm11 = vcmp.lt.s32.totalorder %v2629_v4, 4  ;;  %vm2649_vm13 = vcmp.lt.s32.totalorder %v2629_v4, 2  ;;  %v8210_v29 = vld [vmem:[%s8435_s25 + $0x80] sm:$0xff] }
 0x248   : > { %v2652_v55 = vsel %vm2648_vm8, %v2632_v30, %v2635_v2  ;;  %v2653_v46 = vsel %vm2651_vm11, %v2641_v10, 2102212464  ;;  %v2656_v21 = vsel %vm2648_vm8, %v2635_v2, %v2638_v27  ;;  %v2657_v63 = vsel %vm2651_vm11, %v2644_v43, 920167782 }
 0x249   : > { %v2654_v22 = vsel %vm2650_vm10, %v2638_v27, %v2653_v46  ;;  %v2660_v50 = vsel %vm2648_vm8, %v2638_v27, %v2641_v10  ;;  %v2661_v52 = vsel %vm2651_vm11, %v2647_v53, 1326507024  ;;  %v9872_v34 = vadd.s32 127, %v2589_v60 }
 0x24a   : > { %v2478_v24 = vclz %v7002_v33  ;;  %v2658_v8 = vsel %vm2650_vm10, %v2641_v10, %v2657_v63  ;;  %v13309_v17 = vand.u32 2147483647, %v9793_v25  ;;  %v9876_v0 = vsub.s32 %v2779_v62, %v2782_v7 }
 0x24b   : > { %v2659_v54 = vsel %vm2649_vm13, %v2656_v21, %v2658_v8  ;;  %v2662_v30 = vsel %vm2650_vm10, %v2644_v43, %v2661_v52  ;;  %vm2936_vm3 = vcmp.gt.s32.totalorder %v2935_v32, 0  ;;  %v2655_v36 = vsel %vm2649_vm13, %v2652_v55, %v2654_v22 }
 0x24c   : > { %v2663_v9 = vsel %vm2649_vm13, %v2660_v50, %v2662_v30  ;;  %v9882_v2 = vmul.u32.u64.low %v2664_v28, %v2659_v54  ;;  %v9883_v53 = vmul.u32.u64.high %v2664_v28, %v2659_v54, %v9882_v2  ;;  %v2937_v10 = vsel %vm2936_vm3, %v2935_v32, 0 }
 0x24d   : > { %v9886_v60 = vmul.u32.u64.low %v2664_v28, %v2663_v9  ;;  %v9887_v27 = vmul.u32.u64.high %v2664_v28, %v2663_v9, %v9886_v60  ;;  %v9890_v62 = vmul.f32 0.62831855, %v8210_v29  ;;  %v13510_v33 = vand.u32 2147483647, %v9805_v47 }
 0x24e   : > { %v13511_v43 = vcvt.s32.f32 %v9803_v15  ;;  %v7003_v4 = vadd.s32 4294967294, %v2478_v24  ;;  %v2939_v46 = vand.u32 31, %v2937_v10  ;;  %v2284_v21 = vand.u32 2147483647, %v9847_v1 }
 0x24f   : > { %13509 = vst [vmem:[#allocation50_spill] sm:$0xff] %v9890_v62  ;;  %v2286_v22 = vcvt.s32.f32 %v9841_v56  ;;  %v2586_v32 = vshll.u32 %v9687_v49, %v9833_v14  ;;  %v2671_v63 = vmul.u32 %v2664_v28, %v2655_v36  ;;  %v13512_v50 = vsub.s32 32, %v9833_v14 }
 0x250   : > { %v9897_v55 = vmul.f32 %v13511_v43, %v13510_v33  ;;  %v2785_v47 = vsub.s32 0, %v9876_v0  ;;  %v2674_v15 = vadd.s32 1, %v9883_v53  ;;  %v2932_v24 = vand.u32 8388607, %v13309_v17 }
 0x251   : > { %v2587_v52 = vshrl.u32 %v9845_v12, %v13512_v50  ;;  %v2591_v8 = vshll.u32 %v9872_v34, 23  ;;  %vm2673_vm5 = vc.u32 %v9887_v27, %v9882_v2  ;;  %v2940_v56 = vsub.s32 32, %v2939_v46 }
 0x252   : > { %v2825_v49 = vand.u32 2139095040, %v9890_v62  ;;  %vm7004_vm7 = vcmp.lt.s32.totalorder %v7003_v4, 0  ;;  %v2675_v14 = vsel %vm2673_vm5, %v2674_v15, %v9883_v53  ;;  %v2942_v12 = vshll.u32 %v13474_v3, %v2939_v46 }
 0x253   : > { %v2945_v1 = vshll.u32 %v13465_v31, %v2939_v46  ;;  %v2676_v28 = vadd.s32 %v2675_v14, %v2671_v63  ;;  %v2938_v54 = vshrl.u32 %v2937_v10, 5  ;;  %v2943_v30 = vshrl.u32 %v13465_v31, %v2940_v56 }
 0x254   : > { %v2946_v36 = vshrl.u32 %v13466_v45, %v2940_v56  ;;  %v7014_v34 = vmin.u32 %v2785_v47, %v9876_v0  ;;  %v2933_v9 = vor.u32 8388608, %v2932_v24  ;;  %v2948_v60 = vshll.u32 %v13466_v45, %v2939_v46 }
 0x255   : > { %v2949_v29 = vshrl.u32 %v13457_v37, %v2940_v56  ;;  %v2677_v33 = vadd.s32 536870912, %v2676_v28  ;;  %v2941_v53 = vshrl.u32 %v13474_v3, %v2940_v56  ;;  %v2951_v43 = vshll.u32 %v13457_v37, %v2939_v46 }
 0x256   : > { %v2826_v50 = vshrl.u32 %v2825_v49, 23  ;;  %v2944_v15 = vor.u32 %v2943_v30, %v2942_v12  ;;  %v2947_v63 = vor.u32 %v2946_v36, %v2945_v1  ;;  %v2952_v14 = vshrl.u32 %v13458_v58, %v2940_v56 }
 0x257   : > { %v2950_v10 = vor.u32 %v2949_v29, %v2948_v60  ;;  %v9925_v17 = vshrl.u32 %v2677_v33, 30  ;;  %v2954_v47 = vshll.u32 %v13458_v58, %v2939_v46  ;;  %v2955_v24 = vshrl.u32 %v13477_v26, %v2940_v56  ;;  %v807_v29 = vld [vmem:[%s8435_s25 + $0xc0] sm:$0xff] }
 0x258   : > { %vm2957_vm8 = vcmp.lt.s32.totalorder %v2938_v54, 1  ;;  %v2787_v7 = vclz %v7014_v34  ;;  %v2953_v11 = vor.u32 %v2952_v14, %v2951_v43  ;;  %vm2959_vm10 = vcmp.lt.s32.totalorder %v2938_v54, 3  ;;  %938 = vperm.xlu0 %7879, %v807_v29  }
 0x259   : > { %v2973_v59 = vshll.u32 %v2933_v9, 8  ;;  %v2956_v6 = vor.u32 %v2955_v24, %v2954_v47  ;;  %vm2958_vm11 = vcmp.lt.s32.totalorder %v2938_v54, 2  ;;  %vm2960_vm13 = vcmp.lt.s32.totalorder %v2938_v54, 4 }
 0x25a   : > { %v7017_v49 = vadd.s32 4294967169, %v2826_v50  ;;  %v2679_v12 = vshll.u32 %v9925_v17, 30  ;;  %v2962_v1 = vsel %vm2960_vm13, %v2950_v10, 2102212464  ;;  %v2965_v30 = vsel %vm2957_vm8, %v2944_v15, %v2947_v63 }
 0x25b   : > { %v2966_v36 = vsel %vm2960_vm13, %v2953_v11, 920167782  ;;  %v2961_v46 = vsel %vm2957_vm8, %v2941_v53, %v2944_v15  ;;  %v2963_v56 = vsel %vm2959_vm10, %v2947_v63, %v2962_v1  ;;  %v2969_v60 = vsel %vm2957_vm8, %v2947_v63, %v2950_v10 }
 0x25c   : > { %v2967_v34 = vsel %vm2959_vm10, %v2950_v10, %v2966_v36  ;;  %v9936_v9 = vmul.f32 %v2286_v22, %v2284_v21  ;;  %v9938_v33 = vor.u32 %v2587_v52, %v2586_v32  ;;  %v2970_v50 = vsel %vm2960_vm13, %v2956_v6, 1326507024 }
 0x25d   : > { %v2968_v43 = vsel %vm2958_vm11, %v2965_v30, %v2967_v34  ;;  %v9942_v14 = vsel %vm7004_vm7, 0, %v7003_v4  ;;  %v2971_v53 = vsel %vm2959_vm10, %v2953_v11, %v2970_v50  ;;  %v9949_v24 = vor.u32 4788187, %v2591_v8 }
 0x25e   : > { %v9945_v15 = vmul.u32.u64.low %v2973_v59, %v2968_v43  ;;  %v9946_v47 = vmul.u32.u64.high %v2973_v59, %v2968_v43, %v9945_v15  ;;  %v7015_v63 = vadd.s32 4294967294, %v2787_v7  ;;  %v2964_v21 = vsel %vm2958_vm11, %v2961_v46, %v2963_v56 }
 0x25f   : > { %v2972_v22 = vsel %vm2958_vm11, %v2969_v60, %v2971_v53  ;;  %v9953_v32 = vsub.s32 %v2676_v28, %v2679_v12  ;;  %v2832_v4 = vadd.s32 1, %v7017_v49  ;;  %v2466_v10 = vadd.s32 %v9699_v57, %v9705_v18  ;;  %v8211_v18 = vld [vmem:[%s8435_s25 + $0x98] sm:$0xff] }
 0x260   : > { %v9955_v6 = vmul.u32.u64.low %v2973_v59, %v2972_v22  ;;  %v9956_v52 = vmul.u32.u64.high %v2973_v59, %v2972_v22, %v9955_v6  ;;  %v2482_v8 = vsub.s32 32, %v9942_v14  ;;  %v2486_v7 = vsub.s32 4294967266, %v9942_v14 }
 0x261   : > { %v2980_v1 = vmul.u32 %v2973_v59, %v2964_v21  ;;  %v2983_v54 = vadd.s32 1, %v9946_v47  ;;  %v13314_v28 = vand.u32 2147483647, %v9890_v62  ;;  %vm2833_vm3 = vcmp.gt.s32.totalorder %v2832_v4, 0 }
 0x262   : > { %v2834_v36 = vsel %vm2833_vm3, %v2832_v4, 0  ;;  %vm7016_vm5 = vcmp.lt.s32.totalorder %v7015_v63, 0  ;;  %v2682_v57 = vsub.s32 0, %v9953_v32  ;;  %vm2982_vm7 = vc.u32 %v9956_v52, %v9945_v15 }
 0x263   : > { %v9972_v59 = vmul.f32 0.62831855, %v8211_v18  ;;  %v9978_v56 = vadd.s32 %v9783_v20, %v9790_v19  ;;  %v2984_v34 = vsel %vm2982_vm7, %v2983_v54, %v9946_v47  ;;  %v2836_v60 = vand.u32 31, %v2834_v36 }
 0x264   : > { %v2484_v29 = vshrl.u32 %v2466_v10, %v2482_v8  ;;  %v9981_v43 = vadd.s32 127, %v2486_v7  ;;  %v2985_v50 = vadd.s32 %v2984_v34, %v2980_v1  ;;  %v2829_v53 = vand.u32 8388607, %v13314_v28 }
 0x265   : > { %13513 = vst [vmem:[#allocation51_spill] sm:$0xff] %v9972_v59  ;;  %v9985_v21 = vsel %vm7016_vm5, 0, %v7015_v63  ;;  %v2837_v22 = vsub.s32 32, %v2836_v60  ;;  %v2839_v6 = vshll.u32 %v13474_v3, %v2836_v60  ;;  %v2842_v4 = vshll.u32 %v13465_v31, %v2836_v60 }
 0x266   : > { %v7010_v20 = vmin.u32 %v2682_v57, %v9953_v32  ;;  %v2986_v19 = vadd.s32 536870912, %v2985_v50  ;;  %v2835_v18 = vshrl.u32 %v2834_v36, 5  ;;  %v3134_v47 = vand.u32 2139095040, %v9972_v59 }
 0x267   : > { %v2791_v10 = vsub.s32 32, %v9985_v21  ;;  %v2840_v8 = vshrl.u32 %v13465_v31, %v2837_v22  ;;  %v2843_v7 = vshrl.u32 %v13466_v45, %v2837_v22  ;;  %v2845_v63 = vshll.u32 %v13466_v45, %v2836_v60 }
 0x268   : > { %v2795_v1 = vsub.s32 4294967266, %v9985_v21  ;;  %v9996_v54 = vshrl.u32 %v2986_v19, 30  ;;  %v2830_v34 = vor.u32 8388608, %v2829_v53  ;;  %v2846_v28 = vshrl.u32 %v13457_v37, %v2837_v22 }
 0x269   : > { %v2841_v57 = vor.u32 %v2840_v8, %v2839_v6  ;;  %v2844_v12 = vor.u32 %v2843_v7, %v2842_v4  ;;  %v2848_v36 = vshll.u32 %v13457_v37, %v2836_v60  ;;  %v2849_v11 = vshrl.u32 %v13458_v58, %v2837_v22 }
 0x26a   : > { %13514 = vst [vmem:[#allocation52_spill] sm:$0xff] %v9996_v54  ;;  %v2684_v46 = vclz %v7010_v20  ;;  %v2988_v30 = vshll.u32 %v9996_v54, 30  ;;  %vm2854_vm8 = vcmp.lt.s32.totalorder %v2835_v18, 1  ;;  %v3135_v49 = vshrl.u32 %v3134_v47, 23 }
 0x26b   : > { %v2847_v62 = vor.u32 %v2846_v28, %v2845_v63  ;;  %v2850_v44 = vor.u32 %v2849_v11, %v2848_v36  ;;  %v2851_v40 = vshll.u32 %v13458_v58, %v2836_v60  ;;  %v2852_v19 = vshrl.u32 %v13477_v26, %v2837_v22 }
 0x26c   : > { %v2838_v53 = vshrl.u32 %v13474_v3, %v2837_v22  ;;  %vm2856_vm10 = vcmp.lt.s32.totalorder %v2835_v18, 3  ;;  %vm2857_vm11 = vcmp.lt.s32.totalorder %v2835_v18, 4  ;;  %v2870_v6 = vshll.u32 %v2830_v34, 8 }
 0x26d   : > { %v2853_v4 = vor.u32 %v2852_v19, %v2851_v40  ;;  %vm2855_vm13 = vcmp.lt.s32.totalorder %v2835_v18, 2  ;;  %v2859_v8 = vsel %vm2857_vm11, %v2847_v62, 2102212464  ;;  %v2862_v20 = vsel %vm2854_vm8, %v2841_v57, %v2844_v12 }
 0x26e   : > { %v7011_v7 = vadd.s32 4294967294, %v2684_v46  ;;  %v10006_v54 = vsub.s32 %v2985_v50, %v2988_v30  ;;  %v2863_v47 = vsel %vm2857_vm11, %v2850_v44, 920167782  ;;  %v2866_v60 = vsel %vm2854_vm8, %v2844_v12, %v2847_v62 }
 0x26f   : > { %v2864_v28 = vsel %vm2856_vm10, %v2847_v62, %v2863_v47  ;;  %v2867_v22 = vsel %vm2857_vm11, %v2853_v4, 1326507024  ;;  %v7029_v63 = vadd.s32 4294967169, %v3135_v49  ;;  %v2858_v34 = vsel %vm2854_vm8, %v2838_v53, %v2841_v57  ;;  %v810_v57 = vld [vmem:[%s8435_s25 + $0xd8] sm:$0xff] }
 0x270   : > { %v2860_v40 = vsel %vm2856_vm10, %v2844_v12, %v2859_v8  ;;  %v2865_v36 = vsel %vm2855_vm13, %v2862_v20, %v2864_v28  ;;  %v2868_v46 = vsel %vm2856_vm10, %v2850_v44, %v2867_v22  ;;  %v2488_v30 = vshll.u32 %v9981_v43, 23  ;;  %953 = vperm.xlu1 %7880, %v810_v57  }
 0x271   : > { %v2869_v50 = vsel %vm2855_vm13, %v2866_v60, %v2868_v46  ;;  %v10017_v19 = vmul.u32.u64.low %v2870_v6, %v2865_v36  ;;  %v10018_v11 = vmul.u32.u64.high %v2870_v6, %v2865_v36, %v10017_v19  ;;  %vm7012_vm3 = vcmp.lt.s32.totalorder %v7011_v7, 0 }
 0x272   : > { %v2991_v62 = vsub.s32 0, %v10006_v54  ;;  %v10022_v49 = vmul.u32.u64.low %v2870_v6, %v2869_v50  ;;  %v10023_v4 = vmul.u32.u64.high %v2870_v6, %v2869_v50, %v10022_v49  ;;  %v13515_v12 = vand.u32 2147483647, %v9949_v24 }
 0x273   : > { %v13516_v53 = vcvt.s32.f32 %v9938_v33  ;;  %v13517_v43 = vshll.u32 %v9837_v51, %v9942_v14  ;;  %v2861_v20 = vsel %vm2855_vm13, %v2858_v34, %v2860_v40  ;;  %v3141_v47 = vadd.s32 1, %v7029_v63  ;;  %v8212_v40 = vld [vmem:[%s8435_s25 + $0x90] sm:$0xff] }
 0x274   : > { %v2792_v28 = vshll.u32 %v9876_v0, %v9985_v21  ;;  %v2793_v60 = vshrl.u32 %v9978_v56, %v2791_v10  ;;  %v10041_v22 = vadd.s32 127, %v2795_v1  ;;  %v13518_v33 = vand.u32 2147483647, %v9972_v59 }
 0x275   : > { %v10030_v44 = vmul.f32 %v13516_v53, %v13515_v12  ;;  %v10035_v8 = vor.u32 %v2484_v29, %v13517_v43  ;;  %v10045_v36 = vor.u32 4788187, %v2488_v30  ;;  %v10048_v51 = vsel %vm7012_vm3, 0, %v7011_v7 }
 0x276   : > { %v3138_v24 = vand.u32 8388607, %v13518_v33  ;;  %v2880_v14 = vadd.s32 1, %v10018_v11  ;;  %vm3142_vm5 = vcmp.gt.s32.totalorder %v3141_v47, 0  ;;  %v7022_v29 = vmin.u32 %v2991_v62, %v10006_v54 }
 0x277   : > { %v2877_v18 = vmul.u32 %v2870_v6, %v2861_v20  ;;  %vm2879_vm7 = vc.u32 %v10023_v4, %v10017_v19  ;;  %v3143_v0 = vsel %vm3142_vm5, %v3141_v47, 0  ;;  %v2672_v21 = vadd.s32 %v9882_v2, %v9887_v27 }
 0x278   : > { %v2881_v10 = vsel %vm2879_vm7, %v2880_v14, %v10018_v11  ;;  %v3145_v1 = vand.u32 31, %v3143_v0  ;;  %v10058_v7 = vor.u32 %v2793_v60, %v2792_v28  ;;  %v2797_v63 = vshll.u32 %v10041_v22, 23 }
 0x279   : > { %v3139_v34 = vor.u32 8388608, %v3138_v24  ;;  %v10062_v46 = vmul.f32 0.62831855, %v8212_v40  ;;  %v2692_v6 = vsub.s32 4294967266, %v10048_v51  ;;  %v2993_v49 = vclz %v7022_v29 }
 0x27a   : > { %v3146_v30 = vsub.s32 32, %v3145_v1  ;;  %v3148_v50 = vshll.u32 %v13474_v3, %v3145_v1  ;;  %v3151_v62 = vshll.u32 %v13465_v31, %v3145_v1  ;;  %v10067_v2 = vadd.s32 %v2881_v10, %v2877_v18 }
 0x27b   : > { %13519 = vst [vmem:[#allocation53_spill] sm:$0xff] %v10062_v46  ;;  %v3154_v27 = vshll.u32 %v13466_v45, %v3145_v1  ;;  %v3157_v11 = vshll.u32 %v13457_v37, %v3145_v1  ;;  %v3144_v57 = vshrl.u32 %v3143_v0, 5  ;;  %v2688_v20 = vsub.s32 32, %v10048_v51 }
 0x27c   : > { %v3149_v12 = vshrl.u32 %v13465_v31, %v3146_v30  ;;  %v3152_v53 = vshrl.u32 %v13466_v45, %v3146_v30  ;;  %v3155_v43 = vshrl.u32 %v13457_v37, %v3146_v30  ;;  %v2689_v47 = vshll.u32 %v9953_v32, %v10048_v51 }
 0x27d   : > { %v3147_v28 = vshrl.u32 %v13474_v3, %v3146_v30  ;;  %v3158_v60 = vshrl.u32 %v13458_v58, %v3146_v30  ;;  %v2693_v22 = vadd.s32 127, %v2692_v6  ;;  %v3160_v14 = vshll.u32 %v13458_v58, %v3145_v1 }
 0x27e   : > { %v3150_v33 = vor.u32 %v3149_v12, %v3148_v50  ;;  %v3153_v24 = vor.u32 %v3152_v53, %v3151_v62  ;;  %v2883_v29 = vadd.s32 536870912, %v10067_v2  ;;  %v3156_v18 = vor.u32 %v3155_v43, %v3154_v27 }
 0x27f   : > { %v3159_v0 = vor.u32 %v3158_v60, %v3157_v11  ;;  %v3179_v10 = vshll.u32 %v3139_v34, 8  ;;  %v7023_v40 = vadd.s32 4294967294, %v2993_v49  ;;  %v3161_v56 = vshrl.u32 %v13477_v26, %v3146_v30 }
 0x280   : > { %vm3163_vm8 = vcmp.lt.s32.totalorder %v3144_v57, 1  ;;  %vm3165_vm10 = vcmp.lt.s32.totalorder %v3144_v57, 3  ;;  %vm3164_vm11 = vcmp.lt.s32.totalorder %v3144_v57, 2  ;;  %vm3166_vm13 = vcmp.lt.s32.totalorder %v3144_v57, 4 }
 0x281   : > { %v3167_v32 = vsel %vm3163_vm8, %v3147_v28, %v3150_v33  ;;  %v3031_v51 = vand.u32 2139095040, %v10062_v46  ;;  %v3162_v6 = vor.u32 %v3161_v56, %v3160_v14  ;;  %v3168_v50 = vsel %vm3166_vm13, %v3156_v18, 2102212464 }
 0x282   : > { %v3171_v1 = vsel %vm3163_vm8, %v3150_v33, %v3153_v24  ;;  %v3172_v62 = vsel %vm3166_vm13, %v3159_v0, 920167782  ;;  %vm13366_vm3 = vcmp.lt.s32.totalorder %v9170_v61, 0  ;;  %vm13405_vm5 = vcmp.lt.s32.totalorder %v9261_v48, 0 }
 0x283   : > { %vm13404_vm7 = vcmp.lt.s32.totalorder %v9372_v38, 0  ;;  %v2690_v34 = vshrl.u32 %v2672_v21, %v2688_v20  ;;  %v10090_v30 = vshrl.u32 %v2883_v29, 30  ;;  %v3169_v49 = vsel %vm3165_vm10, %v3153_v24, %v3168_v50 }
 0x284   : > { %v3173_v56 = vsel %vm3165_vm10, %v3156_v18, %v3172_v62  ;;  %v2694_v27 = vshll.u32 %v2693_v22, 23  ;;  %v3175_v12 = vsel %vm3163_vm8, %v3153_v24, %v3156_v18  ;;  %v3176_v53 = vsel %vm3166_vm13, %v3162_v6, 1326507024  ;;  %v8213_v24 = vld [vmem:[%s8435_s25 + $0xa8] sm:$0xff] }
 0x285   : > { %13520 = vst [vmem:[#allocation54_spill] sm:$0xff] %v10090_v30  ;;  %v3174_v11 = vsel %vm3164_vm11, %v3171_v1, %v3173_v56  ;;  %v2798_v43 = vor.u32 4788187, %v2797_v63  ;;  %vm7024_vm14 = vcmp.lt.s32.totalorder %v7023_v40, 0  ;;  %v3170_v28 = vsel %vm3164_vm11, %v3167_v32, %v3169_v49 }
 0x286   : > { %v3177_v21 = vsel %vm3165_vm10, %v3159_v0, %v3176_v53  ;;  %v10100_v60 = vmul.u32.u64.low %v3179_v10, %v3174_v11  ;;  %v10101_v33 = vmul.u32.u64.high %v3179_v10, %v3174_v11, %v10100_v60  ;;  %v3032_v14 = vshrl.u32 %v3031_v51, 23 }
 0x287   : > { %v3178_v20 = vsel %vm3164_vm11, %v3175_v12, %v3177_v21  ;;  %v2885_v22 = vshll.u32 %v10090_v30, 30  ;;  %v10109_v18 = vmul.f32 0.62831855, %v8213_v24  ;;  %v2691_v63 = vor.u32 %v2690_v34, %v2689_v47  ;;  %v809_v24 = vld [vmem:[%s8435_s25 + $0xd0] sm:$0xff] }
 0x288   : > { %v10105_v29 = vmul.u32.u64.low %v3179_v10, %v3178_v20  ;;  %v10106_v50 = vmul.u32.u64.high %v3179_v10, %v3178_v20, %v10105_v29  ;;  %v2695_v6 = vor.u32 4788187, %v2694_v27  ;;  %v2996_v32 = vsel %vm7024_vm14, 0, %v7023_v40  ;;  %948 = vperm.xlu0 %7879, %v809_v24  }
 0x289   : > { %13521 = vst [vmem:[#allocation55_spill] sm:$0xff] %v10109_v18  ;;  %v7025_v1 = vadd.s32 4294967169, %v3032_v14  ;;  %v2490_v57 = vand.u32 2147483647, %v10045_v36  ;;  %v2981_v0 = vadd.s32 %v9945_v15, %v9956_v52  ;;  %v2997_v62 = vsub.s32 32, %v2996_v32 }
 0x28a   : > { %v3186_v49 = vmul.u32 %v3179_v10, %v3170_v28  ;;  %v2799_v51 = vand.u32 2147483647, %v2798_v43  ;;  %v2801_v56 = vcvt.s32.f32 %v10058_v7  ;;  %v3189_v11 = vadd.s32 1, %v10101_v33 }
 0x28b   : > { %v3038_v12 = vadd.s32 1, %v7025_v1  ;;  %v10117_v53 = vsub.s32 %v10067_v2, %v2885_v22  ;;  %vm3188_vm14 = vc.u32 %v10106_v50, %v10100_v60  ;;  %v13324_v47 = vand.u32 2147483647, %v10062_v46 }
 0x28c   : > { %v3340_v36 = vand.u32 2139095040, %v10109_v18  ;;  %v2696_v40 = vand.u32 2147483647, %v2695_v6  ;;  %v2698_v15 = vcvt.s32.f32 %v2691_v63  ;;  %v3190_v52 = vsel %vm3188_vm14, %v3189_v11, %v10101_v33 }
 0x28d   : > { %vm3039_vm8 = vcmp.gt.s32.totalorder %v3038_v12, 0  ;;  %v2998_v7 = vshll.u32 %v10006_v54, %v2996_v32  ;;  %v2999_v10 = vshrl.u32 %v2981_v0, %v2997_v62  ;;  %v3001_v34 = vsub.s32 4294967266, %v2996_v32 }
 0x28e   : > { %v3191_v27 = vadd.s32 %v3190_v52, %v3186_v49  ;;  %v13522_v2 = vxor.u32 2147483648, %v9830_v39  ;;  %v13524_v28 = vxor.u32 2147483648, %v9897_v55  ;;  %v13526_v54 = vxor.u32 2147483648, %v9936_v9 }
 0x28f   : > { %v3040_v33 = vsel %vm3039_vm8, %v3038_v12, 0  ;;  %v3035_v22 = vand.u32 8388607, %v13324_v47  ;;  %v3341_v29 = vshrl.u32 %v3340_v36, 23  ;;  %v10155_v6 = vmul.f32 %v2801_v56, %v2799_v51 }
 0x290   : > { %v10130_v43 = vsel %vm13366_vm3, %v13522_v2, %v9830_v39  ;;  %v10137_v21 = vsel %vm13405_vm5, %v13524_v28, %v9897_v55  ;;  %v10144_v20 = vsel %vm13404_vm7, %v13526_v54, %v9936_v9  ;;  %v2888_v39 = vsub.s32 0, %v10117_v53 }
 0x291   : > { %13523 = vst [vmem:[#allocation56_spill] sm:$0xff] %v10130_v43  ;;  %13525 = vst [vmem:[#allocation57_spill] sm:$0xff] %v10137_v21  ;;  %v13528_v55 = vcvt.s32.f32 %v10035_v8  ;;  %v3192_v32 = vadd.s32 536870912, %v3191_v27  ;;  %v3042_v1 = vand.u32 31, %v3040_v33  ;;  %v10157_v9 = vmul.f32 %v2698_v15, %v2696_v40 }
 0x292   : > { %13527 = vst [vmem:[#allocation58_spill] sm:$0xff] %v10144_v20  ;;  %v10159_v0 = vor.u32 %v2999_v10, %v2998_v7  ;;  %v10161_v62 = vadd.s32 127, %v3001_v34  ;;  %v3041_v49 = vshrl.u32 %v3040_v33, 5  ;;  %v3036_v51 = vor.u32 8388608, %v3035_v22 }
 0x293   : > { %v10153_v63 = vmul.f32 %v13528_v55, %v2490_v57  ;;  %v3043_v11 = vsub.s32 32, %v3042_v1  ;;  %v3045_v12 = vshll.u32 %v13474_v3, %v3042_v1  ;;  %v3048_v36 = vshll.u32 %v13465_v31, %v3042_v1 }
 0x294   : > { %v3051_v8 = vshll.u32 %v13466_v45, %v3042_v1  ;;  %v7018_v57 = vmin.u32 %v2888_v39, %v10117_v53  ;;  %v3054_v56 = vshll.u32 %v13457_v37, %v3042_v1  ;;  %v7037_v52 = vadd.s32 4294967169, %v3341_v29 }
 0x295   : > { %vm13409_vm10 = vcmp.lt.s32.totalorder %v9437_v41, 0  ;;  %v10169_v40 = vshrl.u32 %v3192_v32, 30  ;;  %v3046_v15 = vshrl.u32 %v13465_v31, %v3043_v11  ;;  %v3049_v7 = vshrl.u32 %v13466_v45, %v3043_v11 }
 0x296   : > { %v3052_v10 = vshrl.u32 %v13457_v37, %v3043_v11  ;;  %v3044_v34 = vshrl.u32 %v13474_v3, %v3043_v11  ;;  %v3055_v2 = vshrl.u32 %v13458_v58, %v3043_v11  ;;  %v3057_v28 = vshll.u32 %v13458_v58, %v3042_v1 }
 0x297   : > { %13529 = vst [vmem:[#allocation59_spill] sm:$0xff] %v10169_v40  ;;  %vm3060_vm11 = vcmp.lt.s32.totalorder %v3041_v49, 1  ;;  %v3047_v54 = vor.u32 %v3046_v15, %v3045_v12  ;;  %v3050_v33 = vor.u32 %v3049_v7, %v3048_v36  ;;  %v3058_v22 = vshrl.u32 %v13477_v26, %v3043_v11 }
 0x298   : > { %v3053_v39 = vor.u32 %v3052_v10, %v3051_v8  ;;  %v2890_v29 = vclz %v7018_v57  ;;  %v3056_v24 = vor.u32 %v3055_v2, %v3054_v56  ;;  %v3076_v55 = vshll.u32 %v3036_v51, 8 }
 0x299   : > { %v3347_v32 = vadd.s32 1, %v7037_v52  ;;  %v3194_v47 = vshll.u32 %v10169_v40, 30  ;;  %v3059_v14 = vor.u32 %v3058_v22, %v3057_v28  ;;  %vm3062_vm13 = vcmp.lt.s32.totalorder %v3041_v49, 3 }
 0x29a   : > { %vm3063_vm14 = vcmp.lt.s32.totalorder %v3041_v49, 4  ;;  %vm3061_vm8 = vcmp.lt.s32.totalorder %v3041_v49, 2  ;;  %v3064_v30 = vsel %vm3060_vm11, %v3044_v34, %v3047_v54  ;;  %v3068_v1 = vsel %vm3060_vm11, %v3047_v54, %v3050_v33 }
 0x29b   : > { %v3065_v43 = vsel %vm3063_vm14, %v3053_v39, 2102212464  ;;  %v3069_v36 = vsel %vm3063_vm14, %v3056_v24, 920167782  ;;  %v3072_v11 = vsel %vm3060_vm11, %v3050_v33, %v3053_v39  ;;  %v3073_v8 = vsel %vm3063_vm14, %v3059_v14, 1326507024 }
 0x29c   : > { %v3066_v12 = vsel %vm3062_vm13, %v3050_v33, %v3065_v43  ;;  %v3003_v57 = vshll.u32 %v10161_v62, 23  ;;  %v7019_v51 = vadd.s32 4294967294, %v2890_v29  ;;  %v3070_v56 = vsel %vm3062_vm13, %v3053_v39, %v3069_v36  ;;  %v8214_v33 = vld [vmem:[%s8435_s25 + $0xa0] sm:$0xff]  ;;  %v812_v29 = vld [vmem:[%s8435_s25 + $0xe8] sm:$0xff] }
 0x29d   : > { %v13328_v52 = vand.u32 2147483647, %v10109_v18  ;;  %v10186_v15 = vsub.s32 %v3191_v27, %v3194_v47  ;;  %v3071_v7 = vsel %vm3061_vm8, %v3068_v1, %v3070_v56  ;;  %v3074_v10 = vsel %vm3062_vm13, %v3056_v24, %v3073_v8  ;;  %963 = vperm.xlu1 %7880, %v812_v29  }
 0x29e   : > { %vm3348_vm0 = vcmp.gt.s32.totalorder %v3347_v32, 0  ;;  %v3067_v43 = vsel %vm3061_vm8, %v3064_v30, %v3066_v12  ;;  %v3075_v34 = vsel %vm3061_vm8, %v3072_v11, %v3074_v10  ;;  %v10200_v47 = vmul.f32 0.62831855, %v8214_v33 }
 0x29f   : > { %v10192_v14 = vmul.u32.u64.low %v3076_v55, %v3071_v7  ;;  %v10193_v2 = vmul.u32.u64.high %v3076_v55, %v3071_v7, %v10192_v14  ;;  %v10196_v62 = vmul.u32.u64.low %v3076_v55, %v3075_v34  ;;  %v10197_v28 = vmul.u32.u64.high %v3076_v55, %v3075_v34, %v10196_v62 }
 0x2a0   : > { %v3349_v54 = vsel %vm3348_vm0, %v3347_v32, 0  ;;  %13530 = vst [vmem:[#allocation60_spill] sm:$0xff] %v10200_v47  ;;  %v13531_v27 = vxor.u32 2147483648, %v10030_v44  ;;  %v10215_v32 = vadd.s32 %v10017_v19, %v10023_v4  ;;  %vm7020_vm0 = vcmp.lt.s32.totalorder %v7019_v51, 0 }
 0x2a1   : > { %v3351_v22 = vand.u32 31, %v3349_v54  ;;  %v3083_v1 = vmul.u32 %v3076_v55, %v3067_v43  ;;  %v10217_v12 = vor.u32 4788187, %v3003_v57  ;;  %v3086_v36 = vadd.s32 1, %v10193_v2 }
 0x2a2   : > { %v10207_v39 = vsel %vm13409_vm10, %v13531_v27, %v10030_v44  ;;  %v3197_v44 = vsub.s32 0, %v10186_v15  ;;  %v3344_v11 = vand.u32 8388607, %v13328_v52  ;;  %vm3085_vm11 = vc.u32 %v10197_v28, %v10192_v14 }
 0x2a3   : > { %13532 = vst [vmem:[#allocation61_spill] sm:$0xff] %v10207_v39  ;;  %v3352_v56 = vsub.s32 32, %v3351_v22  ;;  %v3237_v19 = vand.u32 2139095040, %v10200_v47  ;;  %v10227_v4 = vsel %vm7020_vm0, 0, %v7019_v51  ;;  %v3087_v55 = vsel %vm3085_vm11, %v3086_v36, %v10193_v2 }
 0x2a4   : > { %v3354_v57 = vshll.u32 %v13474_v3, %v3351_v22  ;;  %v3357_v7 = vshll.u32 %v13465_v31, %v3351_v22  ;;  %v3088_v10 = vadd.s32 %v3087_v55, %v3083_v1  ;;  %v3350_v43 = vshrl.u32 %v3349_v54, 5 }
 0x2a5   : > { %v3355_v34 = vshrl.u32 %v13465_v31, %v3352_v56  ;;  %v3358_v62 = vshrl.u32 %v13466_v45, %v3352_v56  ;;  %v7030_v33 = vmin.u32 %v3197_v44, %v10186_v15  ;;  %v3345_v27 = vor.u32 8388608, %v3344_v11 }
 0x2a6   : > { %v3360_v29 = vshll.u32 %v13466_v45, %v3351_v22  ;;  %v3361_v51 = vshrl.u32 %v13457_v37, %v3352_v56  ;;  %vm13408_vm13 = vcmp.lt.s32.totalorder %v9531_v16, 0  ;;  %vm2721_vm14 = vcmp.lt.s32.totalorder %v9636_v13, 0 }
 0x2a7   : > { %v2898_v2 = vsub.s32 4294967266, %v10227_v4  ;;  %v3089_v36 = vadd.s32 536870912, %v3088_v10  ;;  %v3363_v54 = vshll.u32 %v13457_v37, %v3351_v22  ;;  %v3238_v1 = vshrl.u32 %v3237_v19, 23 }
 0x2a8   : > { %v3353_v55 = vshrl.u32 %v13474_v3, %v3352_v56  ;;  %v3356_v52 = vor.u32 %v3355_v34, %v3354_v57  ;;  %v3359_v24 = vor.u32 %v3358_v62, %v3357_v7  ;;  %v3364_v44 = vshrl.u32 %v13458_v58, %v3352_v56 }
 0x2a9   : > { %v3362_v11 = vor.u32 %v3361_v51, %v3360_v29  ;;  %v3366_v8 = vshll.u32 %v13458_v58, %v3351_v22  ;;  %v3367_v49 = vshrl.u32 %v13477_v26, %v3352_v56  ;;  %vm3369_vm8 = vcmp.lt.s32.totalorder %v3350_v43, 1 }
 0x2aa   : > { %vm2618_vm0 = vcmp.lt.s32.totalorder %v9757_v5, 0  ;;  %v3199_v30 = vclz %v7030_v33  ;;  %v3365_v40 = vor.u32 %v3364_v44, %v3363_v54  ;;  %vm3371_vm11 = vcmp.lt.s32.totalorder %v3350_v43, 3 }
 0x2ab   : > { %v3385_v61 = vshll.u32 %v3345_v27, 8  ;;  %v10246_v20 = vshrl.u32 %v3089_v36, 30  ;;  %v3368_v19 = vor.u32 %v3367_v49, %v3366_v8  ;;  %vm3370_vm6 = vcmp.lt.s32.totalorder %v3350_v43, 2 }
 0x2ac   : > { %vm3372_vm15 = vcmp.lt.s32.totalorder %v3350_v43, 4  ;;  %v3377_v7 = vsel %vm3369_vm8, %v3356_v52, %v3359_v24  ;;  %v7033_v62 = vadd.s32 4294967169, %v3238_v1  ;;  %v3373_v22 = vsel %vm3369_vm8, %v3353_v55, %v3356_v52 }
 0x2ad   : > { %13533 = vst [vmem:[#allocation62_spill] sm:$0xff] %v10246_v20  ;;  %v3374_v57 = vsel %vm3372_vm15, %v3362_v11, 2102212464  ;;  %v3378_v34 = vsel %vm3372_vm15, %v3365_v40, 920167782  ;;  %v3381_v33 = vsel %vm3369_vm8, %v3359_v24, %v3362_v11  ;;  %v3091_v36 = vshll.u32 %v10246_v20, 30 }
 0x2ae   : > { %v3375_v56 = vsel %vm3371_vm11, %v3359_v24, %v3374_v57  ;;  %v3379_v29 = vsel %vm3371_vm11, %v3362_v11, %v3378_v34  ;;  %v3005_v27 = vand.u32 2147483647, %v10217_v12  ;;  %v3382_v49 = vsel %vm3372_vm15, %v3368_v19, 1326507024 }
 0x2af   : > { %v3380_v51 = vsel %vm3370_vm6, %v3377_v7, %v3379_v29  ;;  %v13335_v8 = vand.u32 2147483647, %v10200_v47  ;;  %v3383_v54 = vsel %vm3371_vm11, %v3365_v40, %v3382_v49  ;;  %v2894_v52 = vsub.s32 32, %v10227_v4 }
 0x2b0   : > { %v10258_v1 = vmul.u32.u64.low %v3385_v61, %v3380_v51  ;;  %v10259_v44 = vmul.u32.u64.high %v3385_v61, %v3380_v51, %v10258_v1  ;;  %v7031_v55 = vadd.s32 4294967294, %v3199_v30  ;;  %v3376_v24 = vsel %vm3370_vm6, %v3373_v22, %v3375_v56 }
 0x2b1   : > { %v3384_v12 = vsel %vm3370_vm6, %v3381_v33, %v3383_v54  ;;  %v2899_v11 = vadd.s32 127, %v2898_v2  ;;  %v3244_v7 = vadd.s32 1, %v7033_v62  ;;  %v13534_v34 = vxor.u32 2147483648, %v10153_v63 }
 0x2b2   : > { %v10265_v57 = vmul.u32.u64.low %v3385_v61, %v3384_v12  ;;  %v10266_v19 = vmul.u32.u64.high %v3385_v61, %v3384_v12, %v10265_v57  ;;  %v13536_v30 = vxor.u32 2147483648, %v10155_v6  ;;  %v13537_v2 = vcvt.s32.f32 %v10159_v0 }
 0x2b3   : > { %v10273_v40 = vsel %vm13408_vm13, %v13534_v34, %v10153_v63  ;;  %v3241_v62 = vand.u32 8388607, %v13335_v8  ;;  %v10288_v56 = vsub.s32 %v3088_v10, %v3091_v36  ;;  %v3392_v29 = vmul.u32 %v3385_v61, %v3376_v24  ;;  %v8215_v61 = vld [vmem:[%s8435_s25 + $0xb8] sm:$0xff] }
 0x2b4   : > { %13535 = vst [vmem:[#allocation63_spill] sm:$0xff] %v10273_v40  ;;  %v10280_v43 = vsel %vm2721_vm14, %v13536_v30, %v10155_v6  ;;  %v10284_v22 = vmul.f32 %v13537_v2, %v3005_v27  ;;  %v3395_v63 = vadd.s32 1, %v10259_v44  ;;  %vm3245_vm6 = vcmp.gt.s32.totalorder %v3244_v7, 0 }
 0x2b5   : > { %v2895_v33 = vshll.u32 %v10117_v53, %v10227_v4  ;;  %v2896_v51 = vshrl.u32 %v10215_v32, %v2894_v52  ;;  %vm7032_vm15 = vcmp.lt.s32.totalorder %v7031_v55, 0  ;;  %v3246_v6 = vsel %vm3245_vm6, %v3244_v7, 0 }
 0x2b6   : > { %v13538_v0 = vxor.u32 2147483648, %v10157_v9  ;;  %v2900_v10 = vshll.u32 %v2899_v11, 23  ;;  %vm3394_vm8 = vc.u32 %v10266_v19, %v10258_v1  ;;  %v10304_v49 = vmul.f32 0.62831855, %v8215_v61 }
 0x2b7   : > { %v10309_v32 = vadd.s32 %v10100_v60, %v10106_v50  ;;  %v3396_v4 = vsel %vm3394_vm8, %v3395_v63, %v10259_v44  ;;  %v3248_v36 = vand.u32 31, %v3246_v6  ;;  %v10312_v54 = vsel %vm7032_vm15, 0, %v7031_v55 }
 0x2b8   : > { %v10299_v27 = vsel %vm2618_vm0, %v13538_v0, %v10157_v9  ;;  %13539 = vst [vmem:[#allocation64_spill] sm:$0xff] %v10304_v49  ;;  %v3094_v9 = vsub.s32 0, %v10288_v56  ;;  %v3397_v52 = vadd.s32 %v3396_v4, %v3392_v29  ;;  %v3242_v24 = vor.u32 8388608, %v3241_v62  ;;  %v811_v29 = vld [vmem:[%s8435_s25 + $0xe0] sm:$0xff] }
 0x2b9   : > { %v10315_v12 = vor.u32 %v2896_v51, %v2895_v33  ;;  %v3249_v11 = vsub.s32 32, %v3248_v36  ;;  %v3251_v57 = vshll.u32 %v13474_v3, %v3248_v36  ;;  %v3254_v7 = vshll.u32 %v13465_v31, %v3248_v36  ;;  %958 = vperm.xlu0 %7879, %v811_v29  }
 0x2ba   : > { %v10319_v34 = vor.u32 4788187, %v2900_v10  ;;  %v3398_v60 = vadd.s32 536870912, %v3397_v52  ;;  %v3247_v50 = vshrl.u32 %v3246_v6, 5  ;;  %v3546_v44 = vand.u32 2139095040, %v10304_v49 }
 0x2bb   : > { %v3207_v55 = vsub.s32 4294967266, %v10312_v54  ;;  %v3252_v30 = vshrl.u32 %v13465_v31, %v3249_v11  ;;  %v3255_v2 = vshrl.u32 %v13466_v45, %v3249_v11  ;;  %v3257_v62 = vshll.u32 %v13466_v45, %v3248_v36 }
 0x2bc   : > { %vm13350_vm11 = vcmp.lt.s32.totalorder %v9793_v25, 0  ;;  %v7026_v63 = vmin.u32 %v3094_v9, %v10288_v56  ;;  %v10329_v33 = vshrl.u32 %v3398_v60, 30  ;;  %v3258_v51 = vshrl.u32 %v13457_v37, %v3249_v11 }
 0x2bd   : > { %v10332_v6 = vshll.u32 %v3242_v24, 8  ;;  %v3253_v0 = vor.u32 %v3252_v30, %v3251_v57  ;;  %v3256_v10 = vor.u32 %v3255_v2, %v3254_v7  ;;  %v3260_v61 = vshll.u32 %v13457_v37, %v3248_v36 }
 0x2be   : > { %13540 = vst [vmem:[#allocation65_spill] sm:$0xff] %v10329_v33  ;;  %v3261_v4 = vshrl.u32 %v13458_v58, %v3249_v11  ;;  %v3400_v8 = vshll.u32 %v10329_v33, 30  ;;  %v3250_v53 = vshrl.u32 %v13474_v3, %v3249_v11  ;;  %vm3266_vm6 = vcmp.lt.s32.totalorder %v3247_v50, 1 }
 0x2bf   : > { %v3547_v20 = vshrl.u32 %v3546_v44, 23  ;;  %v3259_v9 = vor.u32 %v3258_v51, %v3257_v62  ;;  %v3263_v38 = vshll.u32 %v13458_v58, %v3248_v36  ;;  %v3264_v24 = vshrl.u32 %v13477_v26, %v3249_v11 }
 0x2c0   : > { %v3262_v60 = vor.u32 %v3261_v4, %v3260_v61  ;;  %v3096_v21 = vclz %v7026_v63  ;;  %v10340_v29 = vsub.s32 %v3397_v52, %v3400_v8  ;;  %vm3268_vm15 = vcmp.lt.s32.totalorder %v3247_v50, 3 }
 0x2c1   : > { %vm3269_vm8 = vcmp.lt.s32.totalorder %v3247_v50, 4  ;;  %v3265_v57 = vor.u32 %v3264_v24, %v3263_v38  ;;  %vm3267_vm12 = vcmp.lt.s32.totalorder %v3247_v50, 2  ;;  %v3274_v30 = vsel %vm3266_vm6, %v3253_v0, %v3256_v10 }
 0x2c2   : > { %v3271_v7 = vsel %vm3269_vm8, %v3259_v9, 2102212464  ;;  %v3403_v2 = vsub.s32 0, %v10340_v29  ;;  %v3270_v44 = vsel %vm3266_vm6, %v3250_v53, %v3253_v0  ;;  %v3275_v51 = vsel %vm3269_vm8, %v3262_v60, 920167782 }
 0x2c3   : > { %v3272_v62 = vsel %vm3268_vm15, %v3256_v10, %v3271_v7  ;;  %v3276_v36 = vsel %vm3268_vm15, %v3259_v9, %v3275_v51  ;;  %v3278_v11 = vsel %vm3266_vm6, %v3256_v10, %v3259_v9  ;;  %v3279_v8 = vsel %vm3269_vm8, %v3265_v57, 1326507024 }
 0x2c4   : > { %v7045_v52 = vadd.s32 4294967169, %v3547_v20  ;;  %v7027_v63 = vadd.s32 4294967294, %v3096_v21  ;;  %v3277_v38 = vsel %vm3267_vm12, %v3274_v30, %v3276_v36  ;;  %v3280_v61 = vsel %vm3268_vm15, %v3262_v60, %v3279_v8 }
 0x2c5   : > { %v13341_v4 = vand.u32 2147483647, %v10304_v49  ;;  %v3273_v24 = vsel %vm3267_vm12, %v3270_v44, %v3272_v62  ;;  %v3281_v53 = vsel %vm3267_vm12, %v3278_v11, %v3280_v61  ;;  %v3203_v10 = vsub.s32 32, %v10312_v54  ;;  %v814_v62 = vld [vmem:[%s8435_s25 + $0xf8] sm:$0xff] }
 0x2c6   : > { %v10354_v0 = vmul.u32.u64.low %v10332_v6, %v3277_v38  ;;  %v10355_v7 = vmul.u32.u64.high %v10332_v6, %v3277_v38, %v10354_v0  ;;  %v7038_v20 = vmin.u32 %v3403_v2, %v10340_v29  ;;  %v13541_v60 = vxor.u32 2147483648, %v10284_v22  ;;  %973 = vperm.xlu1 %7880, %v814_v62  }
 0x2c7   : > { %v10361_v21 = vmul.u32.u64.low %v10332_v6, %v3281_v53  ;;  %v10362_v9 = vmul.u32.u64.high %v10332_v6, %v3281_v53, %v10361_v21  ;;  %v10372_v30 = vadd.s32 127, %v3207_v55  ;;  %v3553_v44 = vadd.s32 1, %v7045_v52 }
 0x2c8   : > { %v10369_v50 = vsel %vm13350_vm11, %v13541_v60, %v10284_v22  ;;  %vm7028_vm12 = vcmp.lt.s32.totalorder %v7027_v63, 0  ;;  %v3289_v2 = vmul.u32 %v10332_v6, %v3273_v24  ;;  %v3550_v36 = vand.u32 8388607, %v13341_v4  ;;  %v8216_v60 = vld [vmem:[%s8435_s25 + $0xb0] sm:$0xff] }
 0x2c9   : > { %13542 = vst [vmem:[#allocation66_spill] sm:$0xff] %v10369_v50  ;;  %v3084_v11 = vadd.s32 %v10192_v14, %v10197_v28  ;;  %v3292_v55 = vadd.s32 1, %v10355_v7  ;;  %vm3554_vm6 = vcmp.gt.s32.totalorder %v3553_v44, 0  ;;  %v10385_v8 = vshrl.u32 %v10309_v32, %v3203_v10 }
 0x2ca   : > { %v3405_v52 = vclz %v7038_v20  ;;  %vm3291_vm15 = vc.u32 %v10362_v9, %v10354_v0  ;;  %v3555_v6 = vsel %vm3554_vm6, %v3553_v44, 0  ;;  %v10390_v61 = vsel %vm7028_vm12, 0, %v7027_v63 }
 0x2cb   : > { %v3293_v24 = vsel %vm3291_vm15, %v3292_v55, %v10355_v7  ;;  %v3557_v53 = vand.u32 31, %v3555_v6  ;;  %v3100_v14 = vsub.s32 32, %v10390_v61  ;;  %v3551_v21 = vor.u32 8388608, %v3550_v36 }
 0x2cc   : > { %v3294_v28 = vadd.s32 %v3293_v24, %v3289_v2  ;;  %v10395_v62 = vmul.f32 0.62831855, %v8216_v60  ;;  %v7039_v63 = vadd.s32 4294967294, %v3405_v52  ;;  %v3556_v38 = vshrl.u32 %v3555_v6, 5 }
 0x2cd   : > { %v3558_v10 = vsub.s32 32, %v3557_v53  ;;  %v3560_v20 = vshll.u32 %v13474_v3, %v3557_v53  ;;  %v3563_v44 = vshll.u32 %v13465_v31, %v3557_v53  ;;  %v3566_v7 = vshll.u32 %v13466_v45, %v3557_v53 }
 0x2ce   : > { %13543 = vst [vmem:[#allocation67_spill] sm:$0xff] %v10395_v62  ;;  %v3295_v4 = vadd.s32 536870912, %v3294_v28  ;;  %v3569_v55 = vshll.u32 %v13457_v37, %v3557_v53  ;;  %v3104_v60 = vsub.s32 4294967266, %v10390_v61  ;;  %v3572_v50 = vshll.u32 %v13458_v58, %v3557_v53 }
 0x2cf   : > { %v3561_v2 = vshrl.u32 %v13465_v31, %v3558_v10  ;;  %v3564_v36 = vshrl.u32 %v13466_v45, %v3558_v10  ;;  %v3567_v24 = vshrl.u32 %v13457_v37, %v3558_v10  ;;  %v3559_v22 = vshrl.u32 %v13474_v3, %v3558_v10 }
 0x2d0   : > { %v10407_v32 = vshrl.u32 %v3295_v4, 30  ;;  %v3570_v52 = vshrl.u32 %v13458_v58, %v3558_v10  ;;  %v3591_v25 = vshll.u32 %v3551_v21, 8  ;;  %v3443_v48 = vand.u32 2139095040, %v10395_v62 }
 0x2d1   : > { %v3562_v57 = vor.u32 %v3561_v2, %v3560_v20  ;;  %v3565_v51 = vor.u32 %v3564_v36, %v3563_v44  ;;  %v3568_v33 = vor.u32 %v3567_v24, %v3566_v7  ;;  %vm7040_vm8 = vcmp.lt.s32.totalorder %v7039_v63, 0 }
 0x2d2   : > { %13544 = vst [vmem:[#allocation68_spill] sm:$0xff] %v10407_v32  ;;  %v3297_v6 = vshll.u32 %v10407_v32, 30  ;;  %v3571_v49 = vor.u32 %v3570_v52, %v3569_v55  ;;  %v3573_v40 = vshrl.u32 %v13477_v26, %v3558_v10  ;;  %vm3575_vm12 = vcmp.lt.s32.totalorder %v3556_v38, 1 }
 0x2d3   : > { %vm3577_vm6 = vcmp.lt.s32.totalorder %v3556_v38, 3  ;;  %vm3576_vm15 = vcmp.lt.s32.totalorder %v3556_v38, 2  ;;  %vm3578_vm11 = vcmp.lt.s32.totalorder %v3556_v38, 4  ;;  %v3579_v20 = vsel %vm3575_vm12, %v3559_v22, %v3562_v57 }
 0x2d4   : > { %v10415_v4 = vsub.s32 %v3294_v28, %v3297_v6  ;;  %v3574_v44 = vor.u32 %v3573_v40, %v3572_v50  ;;  %v3580_v53 = vsel %vm3578_vm11, %v3568_v33, 2102212464  ;;  %v3583_v21 = vsel %vm3575_vm12, %v3562_v57, %v3565_v51 }
 0x2d5   : > { %v3584_v2 = vsel %vm3578_vm11, %v3571_v49, 920167782  ;;  %v3102_v7 = vshrl.u32 %v3084_v11, %v3100_v14  ;;  %v3581_v36 = vsel %vm3577_vm6, %v3565_v51, %v3580_v53  ;;  %v3105_v24 = vadd.s32 127, %v3104_v60 }
 0x2d6   : > { %v3300_v55 = vsub.s32 0, %v10415_v4  ;;  %v3585_v10 = vsel %vm3577_vm6, %v3568_v33, %v3584_v2  ;;  %v3587_v52 = vsel %vm3575_vm12, %v3565_v51, %v3568_v33  ;;  %v3588_v6 = vsel %vm3578_vm11, %v3574_v44, 1326507024  ;;  %v8217_v51 = vld [vmem:[%s8435_s25 + $0xc8] sm:$0xff] }
 0x2d7   : > { %v3586_v28 = vsel %vm3576_vm15, %v3583_v21, %v3585_v10  ;;  %v3408_v40 = vsel %vm7040_vm8, 0, %v7039_v63  ;;  %v3582_v50 = vsel %vm3576_vm15, %v3579_v20, %v3581_v36  ;;  %v3589_v57 = vsel %vm3577_vm6, %v3571_v49, %v3588_v6 }
 0x2d8   : > { %v13351_v22 = vand.u32 2147483647, %v10395_v62  ;;  %v3590_v11 = vsel %vm3576_vm15, %v3587_v52, %v3589_v57  ;;  %v10429_v14 = vmul.u32.u64.low %v3591_v25, %v3586_v28  ;;  %v10430_v53 = vmul.u32.u64.high %v3591_v25, %v3586_v28, %v10429_v14 }
 0x2d9   : > { %v3444_v60 = vshrl.u32 %v3443_v48, 23  ;;  %v7034_v21 = vmin.u32 %v3300_v55, %v10415_v4  ;;  %v10434_v2 = vmul.u32.u64.low %v3591_v25, %v3590_v11  ;;  %v10435_v33 = vmul.u32.u64.high %v3591_v25, %v3590_v11, %v10434_v2 }
 0x2da   : > { %v10438_v63 = vmul.f32 0.62831855, %v8217_v51  ;;  %v13545_v20 = vand.u32 2147483647, %v10319_v34  ;;  %v13546_v49 = vcvt.s32.f32 %v10315_v12  ;;  %v3393_v38 = vadd.s32 %v10258_v1, %v10266_v19 }
 0x2db   : > { %v3409_v36 = vsub.s32 32, %v3408_v40  ;;  %v7041_v10 = vadd.s32 4294967169, %v3444_v60  ;;  %v13548_v48 = vshll.u32 %v10186_v15, %v10312_v54  ;;  %v3413_v28 = vsub.s32 4294967266, %v3408_v40 }
 0x2dc   : > { %v10444_v44 = vmul.f32 %v13546_v49, %v13545_v20  ;;  %v3598_v52 = vmul.u32 %v3591_v25, %v3582_v50  ;;  %v3447_v34 = vand.u32 8388607, %v13351_v22  ;;  %v13549_v12 = vshll.u32 %v10372_v30, 23 }
 0x2dd   : > { %v10452_v55 = vor.u32 %v10385_v8, %v13548_v48  ;;  %v13550_v1 = vshll.u32 %v10288_v56, %v10390_v61  ;;  %v3601_v57 = vadd.s32 1, %v10430_v53  ;;  %v3450_v15 = vadd.s32 1, %v7041_v10  ;;  %v813_v48 = vld [vmem:[%s8435_s25 + $0xf0] sm:$0xff] }
 0x2de   : > { %13547 = vst [vmem:[#allocation69_spill] sm:$0xff] %v10444_v44  ;;  %v10458_v6 = vor.u32 4788187, %v13549_v12  ;;  %v3106_v54 = vshll.u32 %v3105_v24, 23  ;;  %v3302_v8 = vclz %v7034_v21  ;;  %vm3600_vm11 = vc.u32 %v10435_v33, %v10429_v14  ;;  %968 = vperm.xlu0 %7879, %v813_v48  }
 0x2df   : > { %v10463_v19 = vor.u32 %v3102_v7, %v13550_v1  ;;  %v3752_v25 = vand.u32 2139095040, %v10438_v63  ;;  %v3410_v50 = vshll.u32 %v10340_v29, %v3408_v40  ;;  %v3411_v30 = vshrl.u32 %v3393_v38, %v3409_v36 }
 0x2e0   : > { %v3602_v11 = vsel %vm3600_vm11, %v3601_v57, %v10430_v53  ;;  %vm3451_vm8 = vcmp.gt.s32.totalorder %v3450_v15, 0  ;;  %v3414_v60 = vadd.s32 127, %v3413_v28  ;;  %v3448_v61 = vor.u32 8388608, %v3447_v34 }
 0x2e1   : > { %v3603_v56 = vadd.s32 %v3602_v11, %v3598_v52  ;;  %v13352_v7 = vand.u32 2147483647, %v10438_v63  ;;  %v3452_v51 = vsel %vm3451_vm8, %v3450_v15, 0  ;;  %v10475_v20 = vor.u32 4788187, %v3106_v54 }
 0x2e2   : > { %v7035_v29 = vadd.s32 4294967294, %v3302_v8  ;;  %v3753_v49 = vshrl.u32 %v3752_v25, 23  ;;  %v10478_v38 = vor.u32 %v3411_v30, %v3410_v50  ;;  %v3453_v36 = vshrl.u32 %v3452_v51, 5 }
 0x2e3   : > { %v3604_v40 = vadd.s32 536870912, %v3603_v56  ;;  %v3454_v10 = vand.u32 31, %v3452_v51  ;;  %v3415_v28 = vshll.u32 %v3414_v60, 23  ;;  %v10483_v34 = vshll.u32 %v3448_v61, 8 }
 0x2e4   : > { %v10487_v12 = vand.u32 8388607, %v13352_v7  ;;  %vm7036_vm12 = vcmp.lt.s32.totalorder %v7035_v29, 0  ;;  %v7053_v50 = vadd.s32 4294967169, %v3753_v49  ;;  %vm3472_vm6 = vcmp.lt.s32.totalorder %v3453_v36, 1 }
 0x2e5   : > { %v10481_v52 = vshrl.u32 %v3604_v40, 30  ;;  %v3455_v1 = vsub.s32 32, %v3454_v10  ;;  %v3457_v57 = vshll.u32 %v13474_v3, %v3454_v10  ;;  %v3460_v15 = vshll.u32 %v13465_v31, %v3454_v10 }
 0x2e6   : > { %v3463_v54 = vshll.u32 %v13466_v45, %v3454_v10  ;;  %v3466_v25 = vshll.u32 %v13457_v37, %v3454_v10  ;;  %v3469_v48 = vshll.u32 %v13458_v58, %v3454_v10  ;;  %v10504_v53 = vsel %vm7036_vm12, 0, %v7035_v29 }
 0x2e7   : > { %13551 = vst [vmem:[#allocation70_spill] sm:$0xff] %v10481_v52  ;;  %v3606_v8 = vshll.u32 %v10481_v52, 30  ;;  %v3458_v30 = vshrl.u32 %v13465_v31, %v3455_v1  ;;  %v3461_v11 = vshrl.u32 %v13466_v45, %v3455_v1  ;;  %v3464_v60 = vshrl.u32 %v13457_v37, %v3455_v1 }
 0x2e8   : > { %v3456_v51 = vshrl.u32 %v13474_v3, %v3455_v1  ;;  %v3467_v40 = vshrl.u32 %v13458_v58, %v3455_v1  ;;  %v3470_v49 = vshrl.u32 %v13477_v26, %v3455_v1  ;;  %v3759_v44 = vadd.s32 1, %v7053_v50 }
 0x2e9   : > { %v10497_v61 = vsub.s32 %v3603_v56, %v3606_v8  ;;  %v3459_v24 = vor.u32 %v3458_v30, %v3457_v57  ;;  %v3462_v22 = vor.u32 %v3461_v11, %v3460_v15  ;;  %v3465_v7 = vor.u32 %v3464_v60, %v3463_v54  ;;  %v8218_v60 = vld [vmem:[%s8435_s25 + $0xc0] sm:$0xff] }
 0x2ea   : > { %v3468_v21 = vor.u32 %v3467_v40, %v3466_v25  ;;  %v3471_v56 = vor.u32 %v3470_v49, %v3469_v48  ;;  %vm3473_vm15 = vcmp.lt.s32.totalorder %v3453_v36, 2  ;;  %vm3474_vm11 = vcmp.lt.s32.totalorder %v3453_v36, 3 }
 0x2eb   : > { %v3609_v2 = vsub.s32 0, %v10497_v61  ;;  %vm3475_vm8 = vcmp.lt.s32.totalorder %v3453_v36, 4  ;;  %v3476_v10 = vsel %vm3472_vm6, %v3456_v51, %v3459_v24  ;;  %v3480_v15 = vsel %vm3472_vm6, %v3459_v24, %v3462_v22 }
 0x2ec   : > { %v3477_v57 = vsel %vm3475_vm8, %v3465_v7, 2102212464  ;;  %v3481_v29 = vsel %vm3475_vm8, %v3468_v21, 920167782  ;;  %v3484_v54 = vsel %vm3472_vm6, %v3462_v22, %v3465_v7  ;;  %v3485_v30 = vsel %vm3475_vm8, %v3471_v56, 1326507024 }
 0x2ed   : > { %v7046_v8 = vmin.u32 %v3609_v2, %v10497_v61  ;;  %v3478_v1 = vsel %vm3474_vm11, %v3462_v22, %v3477_v57  ;;  %v10512_v25 = vor.u32 4788187, %v3415_v28  ;;  %v3482_v50 = vsel %vm3474_vm11, %v3465_v7, %v3481_v29 }
 0x2ee   : > { %v3757_v11 = vor.u32 8388608, %v10487_v12  ;;  %v10517_v40 = vmul.f32 0.62831855, %v8218_v60  ;;  %v3310_v2 = vsub.s32 4294967266, %v10504_v53  ;;  %v3483_v51 = vsel %vm3473_vm15, %v3480_v15, %v3482_v50 }
 0x2ef   : > { %v3486_v24 = vsel %vm3474_vm11, %v3468_v21, %v3485_v30  ;;  %vm3760_vm12 = vcmp.gt.s32.totalorder %v3759_v44, 0  ;;  %v3479_v48 = vsel %vm3473_vm15, %v3476_v10, %v3478_v1  ;;  %v3611_v7 = vclz %v7046_v8 }
 0x2f0   : > { %v3487_v22 = vsel %vm3473_vm15, %v3484_v54, %v3486_v24  ;;  %v10525_v28 = vmul.u32.u64.low %v10483_v34, %v3483_v51  ;;  %v10526_v49 = vmul.u32.u64.high %v10483_v34, %v3483_v51, %v10525_v28  ;;  %v3761_v57 = vsel %vm3760_vm12, %v3759_v44, 0 }
 0x2f1   : > { %v10530_v12 = vmul.u32.u64.low %v10483_v34, %v3487_v22  ;;  %v10531_v56 = vmul.u32.u64.high %v10483_v34, %v3487_v22, %v10530_v12  ;;  %v3290_v21 = vadd.s32 %v10354_v0, %v10362_v9  ;;  %v3306_v10 = vsub.s32 32, %v10504_v53 }
 0x2f2   : > { %v3763_v36 = vand.u32 31, %v3761_v57  ;;  %v3307_v8 = vshll.u32 %v10415_v4, %v10504_v53  ;;  %v3495_v54 = vmul.u32 %v10483_v34, %v3479_v48  ;;  %v3311_v30 = vadd.s32 127, %v3310_v2 }
 0x2f3   : > { %v3498_v44 = vadd.s32 1, %v10526_v49  ;;  %v10543_v50 = vshll.u32 %v3757_v11, 8  ;;  %v3649_v60 = vand.u32 2139095040, %v10517_v40  ;;  %v7047_v0 = vadd.s32 4294967294, %v3611_v7 }
 0x2f4   : > { %vm3497_vm6 = vc.u32 %v10531_v56, %v10525_v28  ;;  %v3764_v9 = vsub.s32 32, %v3763_v36  ;;  %v3308_v24 = vshrl.u32 %v3290_v21, %v3306_v10  ;;  %v3766_v4 = vshll.u32 %v13474_v3, %v3763_v36 }
 0x2f5   : > { %v3499_v22 = vsel %vm3497_vm6, %v3498_v44, %v10526_v49  ;;  %v3769_v53 = vshll.u32 %v13465_v31, %v3763_v36  ;;  %v3762_v2 = vshrl.u32 %v3761_v57, 5  ;;  %v3312_v7 = vshll.u32 %v3311_v30, 23 }
 0x2f6   : > { %v3500_v34 = vadd.s32 %v3499_v22, %v3495_v54  ;;  %v3767_v11 = vshrl.u32 %v13465_v31, %v3764_v9  ;;  %v3770_v48 = vshrl.u32 %v13466_v45, %v3764_v9  ;;  %v3772_v12 = vshll.u32 %v13466_v45, %v3763_v36 }
 0x2f7   : > { %v3773_v29 = vshrl.u32 %v13457_v37, %v3764_v9  ;;  %v3650_v1 = vshrl.u32 %v3649_v60, 23  ;;  %vm7048_vm15 = vcmp.lt.s32.totalorder %v7047_v0, 0  ;;  %v3765_v49 = vshrl.u32 %v13474_v3, %v3764_v9 }
 0x2f8   : > { %v3501_v21 = vadd.s32 536870912, %v3500_v34  ;;  %v3775_v10 = vshll.u32 %v13457_v37, %v3763_v36  ;;  %v3768_v44 = vor.u32 %v3767_v11, %v3766_v4  ;;  %v3771_v51 = vor.u32 %v3770_v48, %v3769_v53 }
 0x2f9   : > { %v3774_v54 = vor.u32 %v3773_v29, %v3772_v12  ;;  %v3776_v57 = vshrl.u32 %v13458_v58, %v3764_v9  ;;  %v3778_v30 = vshll.u32 %v13458_v58, %v3763_v36  ;;  %v3779_v15 = vshrl.u32 %v13477_v26, %v3764_v9 }
 0x2fa   : > { %v10559_v22 = vshrl.u32 %v3501_v21, 30  ;;  %vm3781_vm11 = vcmp.lt.s32.totalorder %v3762_v2, 1  ;;  %v10563_v32 = vsel %vm7048_vm15, 0, %v7047_v0  ;;  %vm3783_vm8 = vcmp.lt.s32.totalorder %v3762_v2, 3 }
 0x2fb   : > { %v3777_v60 = vor.u32 %v3776_v57, %v3775_v10  ;;  %v7049_v52 = vadd.s32 4294967169, %v3650_v1  ;;  %v3780_v35 = vor.u32 %v3779_v15, %v3778_v30  ;;  %vm3782_vm12 = vcmp.lt.s32.totalorder %v3762_v2, 2 }
 0x2fc   : > { %13552 = vst [vmem:[#allocation71_spill] sm:$0xff] %v10559_v22  ;;  %v3503_v62 = vshll.u32 %v10559_v22, 30  ;;  %vm3784_vm6 = vcmp.lt.s32.totalorder %v3762_v2, 4  ;;  %v3785_v29 = vsel %vm3781_vm11, %v3765_v49, %v3768_v44  ;;  %v3789_v53 = vsel %vm3781_vm11, %v3768_v44, %v3771_v51 }
 0x2fd   : > { %v3786_v4 = vsel %vm3784_vm6, %v3774_v54, 2102212464  ;;  %v3790_v11 = vsel %vm3784_vm6, %v3777_v60, 920167782  ;;  %v3793_v48 = vsel %vm3781_vm11, %v3771_v51, %v3774_v54  ;;  %v3309_v1 = vor.u32 %v3308_v24, %v3307_v8 }
 0x2fe   : > { %v10568_v36 = vsub.s32 %v3500_v34, %v3503_v62  ;;  %v3787_v9 = vsel %vm3783_vm8, %v3771_v51, %v3786_v4  ;;  %v3791_v0 = vsel %vm3783_vm8, %v3774_v54, %v3790_v11  ;;  %v3313_v12 = vor.u32 4788187, %v3312_v7 }
 0x2ff   : > { %v3792_v15 = vsel %vm3782_vm12, %v3789_v53, %v3791_v0  ;;  %v3794_v21 = vsel %vm3784_vm6, %v3780_v35, 1326507024  ;;  %v13553_v10 = vand.u32 2147483647, %v10458_v6  ;;  %v13554_v49 = vcvt.s32.f32 %v10452_v55 }
 0x300   : > { %v3795_v62 = vsel %vm3783_vm8, %v3777_v60, %v3794_v21  ;;  %v10582_v34 = vmul.u32.u64.low %v10543_v50, %v3792_v15  ;;  %v10583_v44 = vmul.u32.u64.high %v10543_v50, %v3792_v15, %v10582_v34  ;;  %v13555_v8 = vand.u32 2147483647, %v10475_v20 }
 0x301   : > { %v10578_v57 = vmul.f32 %v13554_v49, %v13553_v10  ;;  %v13556_v51 = vcvt.s32.f32 %v10463_v19  ;;  %v3619_v35 = vsub.s32 4294967266, %v10563_v32  ;;  %v3788_v55 = vsel %vm3782_vm12, %v3785_v29, %v3787_v9 }
 0x302   : > { %v3796_v6 = vsel %vm3782_vm12, %v3793_v48, %v3795_v62  ;;  %v3506_v7 = vsub.s32 0, %v10568_v36  ;;  %v3656_v60 = vadd.s32 1, %v7049_v52  ;;  %v13557_v4 = vand.u32 2147483647, %v10512_v25  ;;  %v8219_v48 = vld [vmem:[%s8435_s25 + $0xd8] sm:$0xff] }
 0x303   : > { %v10590_v24 = vmul.f32 %v13556_v51, %v13555_v8  ;;  %v10597_v54 = vmul.u32.u64.low %v10543_v50, %v3796_v6  ;;  %v10598_v30 = vmul.u32.u64.high %v10543_v50, %v3796_v6, %v10597_v54  ;;  %v13558_v20 = vcvt.s32.f32 %v10478_v38 }
 0x304   : > { %v3314_v53 = vand.u32 2147483647, %v3313_v12  ;;  %v3316_v11 = vcvt.s32.f32 %v3309_v1  ;;  %v13559_v0 = vand.u32 2147483647, %v10517_v40  ;;  %v3804_v2 = vmul.u32 %v10543_v50, %v3788_v55 }
 0x305   : > { %v10604_v19 = vmul.f32 %v13558_v20, %v13557_v4  ;;  %v3807_v9 = vadd.s32 1, %v10583_v44  ;;  %vm3657_vm15 = vcmp.gt.s32.totalorder %v3656_v60, 0  ;;  %v10611_v15 = vmul.f32 0.62831855, %v8219_v48  ;;  %v5947_v48 = vld [vmem:[%s8444_s16] sm:$0xff] }
 0x306   : > { %v3653_v29 = vand.u32 8388607, %v13559_v0  ;;  %v3599_v38 = vadd.s32 %v10429_v14, %v10435_v33  ;;  %v3615_v25 = vsub.s32 32, %v10563_v32  ;;  %v3658_v12 = vsel %vm3657_vm15, %v3656_v60, 0  ;;  %5980 = vperm.xlu0 %7879, %v5947_v48  }
 0x307   : > { %v10618_v21 = vadd.s32 127, %v3619_v35  ;;  %v7042_v50 = vmin.u32 %v3506_v7, %v10568_v36  ;;  %vm3806_vm11 = vc.u32 %v10598_v30, %v10582_v34  ;;  %v3660_v8 = vand.u32 31, %v3658_v12 }
 0x308   : > { %v3808_v49 = vsel %vm3806_vm11, %v3807_v9, %v10583_v44  ;;  %v3654_v62 = vor.u32 8388608, %v3653_v29  ;;  %v10625_v51 = vmul.f32 %v3316_v11, %v3314_v53  ;;  %v3958_v35 = vand.u32 2139095040, %v10611_v15 }
 0x309   : > { %v3809_v33 = vadd.s32 %v3808_v49, %v3804_v2  ;;  %v10630_v55 = vshrl.u32 %v3599_v38, %v3615_v25  ;;  %v3661_v6 = vsub.s32 32, %v3660_v8  ;;  %v3663_v7 = vshll.u32 %v13474_v3, %v3660_v8 }
 0x30a   : > { %v3666_v54 = vshll.u32 %v13465_v31, %v3660_v8  ;;  %v3621_v60 = vshll.u32 %v10618_v21, 23  ;;  %v3508_v44 = vclz %v7042_v50  ;;  %v3659_v20 = vshrl.u32 %v3658_v12, 5 }
 0x30b   : > { %v3810_v4 = vadd.s32 536870912, %v3809_v33  ;;  %v3664_v53 = vshrl.u32 %v13465_v31, %v3661_v6  ;;  %v3667_v11 = vshrl.u32 %v13466_v45, %v3661_v6  ;;  %v3669_v0 = vshll.u32 %v13466_v45, %v3660_v8 }
 0x30c   : > { %v10638_v29 = vshll.u32 %v3654_v62, 8  ;;  %vm13398_vm8 = vcmp.lt.s32.totalorder %v9972_v59, 0  ;;  %v3670_v9 = vshrl.u32 %v13457_v37, %v3661_v6  ;;  %v3959_v38 = vshrl.u32 %v3958_v35, 23  ;;  %v5958_v59 = vld [vmem:[%s8444_s16 + $0x58] sm:$0xff] }
 0x30d   : > { %v10641_v2 = vshrl.u32 %v3810_v4, 30  ;;  %vm13397_vm12 = vcmp.lt.s32.totalorder %v10062_v46, 0  ;;  %vm13400_vm6 = vcmp.lt.s32.totalorder %v10109_v18, 0  ;;  %v3665_v25 = vor.u32 %v3664_v53, %v3663_v7 }
 0x30e   : > { %v3668_v12 = vor.u32 %v3667_v11, %v3666_v54  ;;  %v3672_v21 = vshll.u32 %v13457_v37, %v3660_v8  ;;  %v3673_v50 = vshrl.u32 %v13458_v58, %v3661_v6  ;;  %vm13399_vm15 = vcmp.lt.s32.totalorder %v10200_v47, 0 }
 0x30f   : > { %13560 = vst [vmem:[#allocation72_spill] sm:$0xff] %v10641_v2  ;;  %v7043_v49 = vadd.s32 4294967294, %v3508_v44  ;;  %v3812_v62 = vshll.u32 %v10641_v2, 30  ;;  %v3662_v4 = vshrl.u32 %v13474_v3, %v3661_v6  ;;  %vm3678_vm11 = vcmp.lt.s32.totalorder %v3659_v20, 1  ;;  %v5968_v2 = vld [vmem:[%s8444_s16 + $0xa8] sm:$0xff] }
 0x310   : > { %v3671_v10 = vor.u32 %v3670_v9, %v3669_v0  ;;  %v3674_v35 = vor.u32 %v3673_v50, %v3672_v21  ;;  %v3675_v1 = vshll.u32 %v13458_v58, %v3660_v8  ;;  %v3676_v14 = vshrl.u32 %v13477_v26, %v3661_v6 }
 0x311   : > { %v10654_v7 = vsub.s32 %v3809_v33, %v3812_v62  ;;  %vm3680_vm4 = vcmp.lt.s32.totalorder %v3659_v20, 3  ;;  %vm3681_vm1 = vcmp.lt.s32.totalorder %v3659_v20, 4  ;;  %v7061_v54 = vadd.s32 4294967169, %v3959_v38  ;;  %v5948_v62 = vld [vmem:[%s8444_s16 + $0x8] sm:$0xff] }
 0x312   : > { %v3677_v53 = vor.u32 %v3676_v14, %v3675_v1  ;;  %vm3679_vm9 = vcmp.lt.s32.totalorder %v3659_v20, 2  ;;  %v3683_v44 = vsel %vm3681_vm1, %v3671_v10, 2102212464  ;;  %v3686_v11 = vsel %vm3678_vm11, %v3665_v25, %v3668_v12  ;;  %5983 = vperm.xlu1 %7880, %v5948_v62  }
 0x313   : > { %v3815_v52 = vsub.s32 0, %v10654_v7  ;;  %v3682_v0 = vsel %vm3678_vm11, %v3662_v4, %v3665_v25  ;;  %v3684_v8 = vsel %vm3680_vm4, %v3668_v12, %v3683_v44  ;;  %v3687_v9 = vsel %vm3681_vm1, %v3674_v35, 920167782 }
 0x314   : > { %vm7044_vm3 = vcmp.lt.s32.totalorder %v7043_v49, 0  ;;  %v3688_v33 = vsel %vm3680_vm4, %v3671_v10, %v3687_v9  ;;  %v3690_v6 = vsel %vm3678_vm11, %v3668_v12, %v3671_v10  ;;  %v3691_v38 = vsel %vm3681_vm1, %v3677_v53, 1326507024 }
 0x315   : > { %v3318_v1 = vxor.u32 2147483648, %v10625_v51  ;;  %v7054_v14 = vmin.u32 %v3815_v52, %v10654_v7  ;;  %v3689_v21 = vsel %vm3679_vm9, %v3686_v11, %v3688_v33  ;;  %v3692_v50 = vsel %vm3680_vm4, %v3674_v35, %v3691_v38 }
 0x316   : > { %v3685_v25 = vsel %vm3679_vm9, %v3682_v0, %v3684_v8  ;;  %v3693_v4 = vsel %vm3679_vm9, %v3690_v6, %v3692_v50  ;;  %v10671_v44 = vmul.u32.u64.low %v10638_v29, %v3689_v21  ;;  %v10672_v10 = vmul.u32.u64.high %v10638_v29, %v3689_v21, %v10671_v44 }
 0x317   : > { %v10675_v52 = vsel %vm7044_vm3, 0, %v7043_v49  ;;  %v10678_v12 = vmul.u32.u64.low %v10638_v29, %v3693_v4  ;;  %v10679_v35 = vmul.u32.u64.high %v10638_v29, %v3693_v4, %v10678_v12  ;;  %v13561_v53 = vand.u32 2147483647, %v10611_v15 }
 0x318   : > { %v13562_v20 = vxor.u32 2147483648, %v10578_v57  ;;  %v13564_v8 = vshll.u32 %v10497_v61, %v10563_v32  ;;  %v10696_v49 = vor.u32 4788187, %v3621_v60  ;;  %v3965_v9 = vadd.s32 1, %v7061_v54  ;;  %v5949_v60 = vld [vmem:[%s8444_s16 + $0x10] sm:$0xff] }
 0x319   : > { %v3962_v11 = vand.u32 8388607, %v13561_v53  ;;  %v13565_v33 = vxor.u32 2147483648, %v10590_v24  ;;  %v3817_v32 = vclz %v7054_v14  ;;  %v3701_v61 = vmul.u32 %v10638_v29, %v3685_v25  ;;  %5986 = vperm.xlu0 %7879, %v5949_v60   ;;  %v5952_v53 = vld [vmem:[%s8444_s16 + $0x28] sm:$0xff] }
 0x31a   : > { %v10688_v0 = vsel %vm13398_vm8, %v13562_v20, %v10578_v57  ;;  %v10694_v48 = vor.u32 %v10630_v55, %v13564_v8  ;;  %v13567_v57 = vxor.u32 2147483648, %v10604_v19  ;;  %v5950_v55 = vld [vmem:[%s8444_s16 + $0x18] sm:$0xff]  ;;  %v10718_v54 = vsel %vm13399_vm15, %v3318_v1, %v10625_v51  ;;  %v5951_v20 = vld [vmem:[%s8444_s16 + $0x20] sm:$0xff] }
 0x31b   : > { %13563 = vst [vmem:[#allocation73_spill] sm:$0xff] %v10688_v0  ;;  %v10703_v6 = vsel %vm13397_vm12, %v13565_v33, %v10590_v24  ;;  %13569 = vst [vmem:[#allocation76_spill] sm:$0xff] %v10718_v54  ;;  %v3516_v24 = vsub.s32 4294967266, %v10675_v52  ;;  %v3704_v21 = vadd.s32 1, %v10672_v10  ;;  %vm3966_vm4 = vcmp.gt.s32.totalorder %v3965_v9, 0  ;;  %5989 = vperm.xlu1 %7880, %v5950_v55   ;;  %v5966_v54 = vld [vmem:[%s8444_s16 + $0x98] sm:$0xff] }
 0x31c   : > { %13566 = vst [vmem:[#allocation74_spill] sm:$0xff] %v10703_v6  ;;  %v10710_v38 = vsel %vm13400_vm6, %v13567_v57, %v10604_v19  ;;  %v10724_v19 = vadd.s32 %v10525_v28, %v10531_v56  ;;  %vm3703_vm9 = vc.u32 %v10679_v35, %v10671_v44  ;;  %v3963_v29 = vor.u32 8388608, %v3962_v11  ;;  %v8220_v28 = vld [vmem:[%s8435_s25 + $0xd0] sm:$0xff] }
 0x31d   : > { %13568 = vst [vmem:[#allocation75_spill] sm:$0xff] %v10710_v38  ;;  %v3967_v51 = vsel %vm3966_vm4, %v3965_v9, 0  ;;  %v3705_v50 = vsel %vm3703_vm9, %v3704_v21, %v10672_v10  ;;  %v10733_v25 = vadd.s32 %v10582_v34, %v10598_v30  ;;  %v7055_v4 = vadd.s32 4294967294, %v3817_v32  ;;  %5992 = vperm.xlu0 %7879, %v5951_v20  }
 0x31e   : > { %v3969_v62 = vand.u32 31, %v3967_v51  ;;  %v3706_v12 = vadd.s32 %v3705_v50, %v3701_v61  ;;  %v10736_v56 = vmul.f32 0.62831855, %v8220_v28  ;;  %v10740_v11 = vadd.s32 127, %v3516_v24  ;;  %v5954_v28 = vld [vmem:[%s8444_s16 + $0x38] sm:$0xff] }
 0x31f   : > { %5995 = vperm.xlu1 %7880, %v5952_v53   ;;  %v10746_v57 = vshll.u32 %v3963_v29, 8  ;;  %v3968_v32 = vshrl.u32 %v3967_v51, 5  ;;  %vm7056_vm1 = vcmp.lt.s32.totalorder %v7055_v4, 0  ;;  %v5953_v53 = vld [vmem:[%s8444_s16 + $0x30] sm:$0xff]  ;;  %vm13407_vm8 = vcmp.lt.s32.totalorder %v10611_v15, 0 }
 0x320   : > { %v3970_v8 = vsub.s32 32, %v3969_v62  ;;  %v3972_v9 = vshll.u32 %v13474_v3, %v3969_v62  ;;  %v3975_v10 = vshll.u32 %v13465_v31, %v3969_v62  ;;  %v3707_v34 = vadd.s32 536870912, %v3706_v12 }
 0x321   : > { %v3978_v30 = vshll.u32 %v13466_v45, %v3969_v62  ;;  %v3981_v33 = vshll.u32 %v13457_v37, %v3969_v62  ;;  %v3984_v29 = vshll.u32 %v13458_v58, %v3969_v62  ;;  %v3855_v46 = vand.u32 2139095040, %v10736_v56  ;;  %5998 = vperm.xlu0 %7879, %v5953_v53  }
 0x322   : > { %v3973_v61 = vshrl.u32 %v13465_v31, %v3970_v8  ;;  %v3976_v55 = vshrl.u32 %v13466_v45, %v3970_v8  ;;  %v3979_v60 = vshrl.u32 %v13457_v37, %v3970_v8  ;;  %v10751_v24 = vshrl.u32 %v3707_v34, 30 }
 0x323   : > { %v3971_v21 = vshrl.u32 %v13474_v3, %v3970_v8  ;;  %v3982_v50 = vshrl.u32 %v13458_v58, %v3970_v8  ;;  %6001 = vperm.xlu1 %7880, %v5954_v28   ;;  %v10762_v0 = vsel %vm7056_vm1, 0, %v7055_v4  ;;  %vm3987_vm3 = vcmp.lt.s32.totalorder %v3968_v32, 1 }
 0x324   : > { %13570 = vst [vmem:[#allocation77_spill] sm:$0xff] %v10751_v24  ;;  %v3974_v20 = vor.u32 %v3973_v61, %v3972_v9  ;;  %v3977_v14 = vor.u32 %v3976_v55, %v3975_v10  ;;  %v3709_v1 = vshll.u32 %v10751_v24, 30  ;;  %v3980_v6 = vor.u32 %v3979_v60, %v3978_v30  ;;  %v5956_v61 = vld [vmem:[%s8444_s16 + $0x48] sm:$0xff]  ;;  %v5955_v30 = vld [vmem:[%s8444_s16 + $0x40] sm:$0xff] }
 0x325   : > { %v3983_v34 = vor.u32 %v3982_v50, %v3981_v33  ;;  %v3985_v9 = vshrl.u32 %v13477_v26, %v3970_v8  ;;  %vm3989_vm11 = vcmp.lt.s32.totalorder %v3968_v32, 3  ;;  %vm3988_vm4 = vcmp.lt.s32.totalorder %v3968_v32, 2  ;;  %6004 = vperm.xlu0 %7879, %v5955_v30  }
 0x326   : > { %v10765_v62 = vsub.s32 %v3706_v12, %v3709_v1  ;;  %vm3990_vm9 = vcmp.lt.s32.totalorder %v3968_v32, 4  ;;  %v3991_v10 = vsel %vm3987_vm3, %v3971_v21, %v3974_v20  ;;  %v3995_v60 = vsel %vm3987_vm3, %v3974_v20, %v3977_v14  ;;  %v8221_v20 = vld [vmem:[%s8435_s25 + $0xe8] sm:$0xff] }
 0x327   : > { %v3986_v33 = vor.u32 %v3985_v9, %v3984_v29  ;;  %v3992_v55 = vsel %vm3990_vm9, %v3980_v6, 2102212464  ;;  %v3996_v4 = vsel %vm3990_vm9, %v3983_v34, 920167782  ;;  %6007 = vperm.xlu1 %7880, %v5956_v61   ;;  %v3825_v1 = vsub.s32 4294967266, %v10762_v0 }
 0x328   : > { %v3712_v12 = vsub.s32 0, %v10765_v62  ;;  %v3993_v8 = vsel %vm3989_vm11, %v3977_v14, %v3992_v55  ;;  %v3997_v21 = vsel %vm3989_vm11, %v3980_v6, %v3996_v4  ;;  %v3999_v28 = vsel %vm3987_vm3, %v3977_v14, %v3980_v6  ;;  %v5957_v4 = vld [vmem:[%s8444_s16 + $0x50] sm:$0xff] }
 0x329   : > { %v3998_v50 = vsel %vm3988_vm4, %v3995_v60, %v3997_v21  ;;  %v4000_v53 = vsel %vm3990_vm9, %v3986_v33, 1326507024  ;;  %v10781_v29 = vmul.f32 0.62831855, %v8221_v20  ;;  %v3821_v9 = vsub.s32 32, %v10762_v0  ;;  %6010 = vperm.xlu0 %7879, %v5957_v4  }
 0x32a   : > { %v7050_v61 = vmin.u32 %v3712_v12, %v10765_v62  ;;  %v3994_v51 = vsel %vm3988_vm4, %v3991_v10, %v3993_v8  ;;  %v4001_v55 = vsel %vm3989_vm11, %v3983_v34, %v4000_v53  ;;  %v3856_v33 = vshrl.u32 %v3855_v46, 23 }
 0x32b   : > { %v4002_v30 = vsel %vm3988_vm4, %v3999_v28, %v4001_v55  ;;  %v10791_v6 = vmul.u32.u64.low %v10746_v57, %v3998_v50  ;;  %v10792_v14 = vmul.u32.u64.high %v10746_v57, %v3998_v50, %v10791_v6  ;;  %6013 = vperm.xlu1 %7880, %v5958_v59   ;;  %v3826_v60 = vadd.s32 127, %v3825_v1  ;;  %v5960_v55 = vld [vmem:[%s8444_s16 + $0x68] sm:$0xff] }
 0x32c   : > { %v3714_v21 = vclz %v7050_v61  ;;  %v10796_v12 = vmul.u32.u64.low %v10746_v57, %v4002_v30  ;;  %v10797_v20 = vmul.u32.u64.high %v10746_v57, %v4002_v30, %v10796_v12  ;;  %v13571_v34 = vand.u32 2147483647, %v10696_v49 }
 0x32d   : > { %v13572_v32 = vcvt.s32.f32 %v10694_v48  ;;  %v3512_v8 = vsub.s32 32, %v10675_v52  ;;  %v7057_v50 = vadd.s32 4294967169, %v3856_v33  ;;  %v13574_v46 = vand.u32 2147483647, %v10736_v56  ;;  %v5959_v33 = vld [vmem:[%s8444_s16 + $0x60] sm:$0xff] }
 0x32e   : > { %v3518_v1 = vshll.u32 %v10740_v11, 23  ;;  %v7051_v28 = vadd.s32 4294967294, %v3714_v21  ;;  %v4010_v53 = vmul.u32 %v10746_v57, %v3994_v51  ;;  %v13371_v61 = vand.u32 2147483647, %v10781_v29  ;;  %6016 = vperm.xlu0 %7879, %v5959_v33   ;;  %v5962_v21 = vld [vmem:[%s8444_s16 + $0x78] sm:$0xff]  ;;  %v5964_v33 = vld [vmem:[%s8444_s16 + $0x88] sm:$0xff] }
 0x32f   : > { %v10803_v10 = vmul.f32 %v13572_v32, %v13571_v34  ;;  %v3859_v59 = vand.u32 8388607, %v13574_v46  ;;  %v3822_v49 = vshll.u32 %v10654_v7, %v10762_v0  ;;  %v3823_v48 = vshrl.u32 %v10733_v25, %v3821_v9  ;;  %6019 = vperm.xlu1 %7880, %v5960_v55   ;;  %v5961_v34 = vld [vmem:[%s8444_s16 + $0x70] sm:$0xff] }
 0x330   : > { %v4013_v4 = vadd.s32 1, %v10792_v14  ;;  %v3862_v30 = vadd.s32 1, %v7057_v50  ;;  %v3827_v12 = vshll.u32 %v3826_v60, 23  ;;  %vm7052_vm1 = vcmp.lt.s32.totalorder %v7051_v28, 0 }
 0x331   : > { %13573 = vst [vmem:[#allocation78_spill] sm:$0xff] %v10803_v10  ;;  %vm4012_vm3 = vc.u32 %v10797_v20, %v10791_v6  ;;  %v4164_v11 = vand.u32 2139095040, %v10781_v29  ;;  %v3860_v25 = vor.u32 8388608, %v3859_v59  ;;  %v10824_v57 = vshrl.u32 %v10724_v19, %v3512_v8 }
 0x332   : > { %v4014_v0 = vsel %vm4012_vm3, %v4013_v4, %v10792_v14  ;;  %vm3863_vm11 = vcmp.gt.s32.totalorder %v3862_v30, 0  ;;  %v10826_v51 = vor.u32 4788187, %v3518_v1  ;;  %v10830_v60 = vand.u32 8388607, %v13371_v61  ;;  %6022 = vperm.xlu0 %7879, %v5961_v34  }
 0x333   : > { %v4015_v9 = vadd.s32 %v4014_v0, %v4010_v53  ;;  %v10834_v32 = vor.u32 %v3823_v48, %v3822_v49  ;;  %v3702_v14 = vadd.s32 %v10671_v44, %v10679_v35  ;;  %v10839_v50 = vsel %vm7052_vm1, 0, %v7051_v28  ;;  %6025 = vperm.xlu1 %7880, %v5962_v21   ;;  %v8222_v44 = vld [vmem:[%s8435_s25 + $0xe0] sm:$0xff] }
 0x334   : > { %v3864_v19 = vsel %vm3863_vm11, %v3862_v30, 0  ;;  %v10841_v8 = vor.u32 4788187, %v3827_v12  ;;  %v3718_v46 = vsub.s32 32, %v10839_v50  ;;  %v4165_v1 = vshrl.u32 %v4164_v11, 23  ;;  %v5963_v12 = vld [vmem:[%s8444_s16 + $0x80] sm:$0xff] }
 0x335   : > { %v4016_v59 = vadd.s32 536870912, %v4015_v9  ;;  %v10844_v53 = vshrl.u32 %v3864_v19, 5  ;;  %v3866_v55 = vand.u32 31, %v3864_v19  ;;  %v10846_v49 = vshll.u32 %v3860_v25, 8 }
 0x336   : > { %v10849_v35 = vmul.f32 0.62831855, %v8222_v44  ;;  %v3722_v48 = vsub.s32 4294967266, %v10839_v50  ;;  %v3720_v34 = vshrl.u32 %v3702_v14, %v3718_v46  ;;  %v7069_v44 = vadd.s32 4294967169, %v4165_v1  ;;  %6028 = vperm.xlu0 %7879, %v5963_v12   ;;  %v5965_v1 = vld [vmem:[%s8444_s16 + $0x90] sm:$0xff] }
 0x337   : > { %v10854_v4 = vshrl.u32 %v4016_v59, 30  ;;  %v3867_v11 = vsub.s32 32, %v3866_v55  ;;  %v3869_v0 = vshll.u32 %v13474_v3, %v3866_v55  ;;  %v3872_v25 = vshll.u32 %v13465_v31, %v3866_v55  ;;  %6031 = vperm.xlu1 %7880, %v5964_v33  }
 0x338   : > { %v3875_v21 = vshll.u32 %v13466_v45, %v3866_v55  ;;  %v3878_v59 = vshll.u32 %v13457_v37, %v3866_v55  ;;  %vm3884_vm4 = vcmp.lt.s32.totalorder %v10844_v53, 1  ;;  %v3881_v46 = vshll.u32 %v13458_v58, %v3866_v55 }
 0x339   : > { %13575 = vst [vmem:[#allocation79_spill] sm:$0xff] %v10854_v4  ;;  %v4018_v19 = vshll.u32 %v10854_v4, 30  ;;  %v3870_v61 = vshrl.u32 %v13465_v31, %v3867_v11  ;;  %v3873_v30 = vshrl.u32 %v13466_v45, %v3867_v11  ;;  %v3876_v7 = vshrl.u32 %v13457_v37, %v3867_v11 }
 0x33a   : > { %v3868_v33 = vshrl.u32 %v13474_v3, %v3867_v11  ;;  %v3879_v14 = vshrl.u32 %v13458_v58, %v3867_v11  ;;  %v3882_v18 = vshrl.u32 %v13477_v26, %v3867_v11  ;;  %v3723_v22 = vadd.s32 127, %v3722_v48  ;;  %6034 = vperm.xlu0 %7879, %v5965_v1  }
 0x33b   : > { %v10868_v28 = vsub.s32 %v4015_v9, %v4018_v19  ;;  %v3871_v12 = vor.u32 %v3870_v61, %v3869_v0  ;;  %v3874_v47 = vor.u32 %v3873_v30, %v3872_v25  ;;  %v3877_v38 = vor.u32 %v3876_v7, %v3875_v21  ;;  %6037 = vperm.xlu1 %7880, %v5966_v54   ;;  %v5967_v61 = vld [vmem:[%s8444_s16 + $0xa0] sm:$0xff] }
 0x33c   : > { %v3880_v19 = vor.u32 %v3879_v14, %v3878_v59  ;;  %v4171_v24 = vadd.s32 1, %v7069_v44  ;;  %v3883_v4 = vor.u32 %v3882_v18, %v3881_v46  ;;  %vm3885_vm9 = vcmp.lt.s32.totalorder %v10844_v53, 2 }
 0x33d   : > { %v4021_v9 = vsub.s32 0, %v10868_v28  ;;  %vm3886_vm1 = vcmp.lt.s32.totalorder %v10844_v53, 3  ;;  %vm3887_vm3 = vcmp.lt.s32.totalorder %v10844_v53, 4  ;;  %v3888_v54 = vsel %vm3884_vm4, %v3868_v33, %v3871_v12  ;;  %v5970_v33 = vld [vmem:[%s8444_s16 + $0xb8] sm:$0xff] }
 0x33e   : > { %v3889_v55 = vsel %vm3887_vm3, %v3877_v38, 2102212464  ;;  %v3892_v48 = vsel %vm3884_vm4, %v3871_v12, %v3874_v47  ;;  %v3893_v30 = vsel %vm3887_vm3, %v3880_v19, 920167782  ;;  %v3896_v11 = vsel %vm3884_vm4, %v3874_v47, %v3877_v38  ;;  %6040 = vperm.xlu0 %7879, %v5967_v61  }
 0x33f   : > { %v7062_v7 = vmin.u32 %v4021_v9, %v10868_v28  ;;  %v3890_v18 = vsel %vm3886_vm1, %v3874_v47, %v3889_v55  ;;  %v3897_v0 = vsel %vm3887_vm3, %v3883_v4, 1326507024  ;;  %6043 = vperm.xlu1 %7880, %v5968_v2   ;;  %v3724_v25 = vshll.u32 %v3723_v22, 23  ;;  %v5969_v22 = vld [vmem:[%s8444_s16 + $0xb0] sm:$0xff] }
 0x340   : > { %v3894_v59 = vsel %vm3886_vm1, %v3877_v38, %v3893_v30  ;;  %v4061_v44 = vand.u32 2139095040, %v10849_v35  ;;  %v3891_v14 = vsel %vm3885_vm9, %v3888_v54, %v3890_v18  ;;  %v3898_v47 = vsel %vm3886_vm1, %v3880_v19, %v3897_v0 }
 0x341   : > { %v4023_v21 = vclz %v7062_v7  ;;  %v3895_v46 = vsel %vm3885_vm9, %v3892_v48, %v3894_v59  ;;  %vm4172_vm11 = vcmp.gt.s32.totalorder %v4171_v24, 0  ;;  %v3899_v38 = vsel %vm3885_vm9, %v3896_v11, %v3898_v47 }
 0x342   : > { %v10905_v4 = vmul.u32.u64.low %v10846_v49, %v3895_v46  ;;  %v10906_v1 = vmul.u32.u64.high %v10846_v49, %v3895_v46, %v10905_v4  ;;  %v13576_v12 = vshll.u32 %v10765_v62, %v10839_v50  ;;  %v4173_v7 = vsel %vm4172_vm11, %v4171_v24, 0  ;;  %6046 = vperm.xlu0 %7879, %v5969_v22   ;;  %v5972_v62 = vld [vmem:[%s8444_s16 + $0xc8] sm:$0xff]  ;;  %v5973_v22 = vld [vmem:[%s8444_s16 + $0xd0] sm:$0xff]  ;;  %v5975_v50 = vld [vmem:[%s8444_s16 + $0xe0] sm:$0xff] }
 0x343   : > { %v7063_v2 = vadd.s32 4294967294, %v4023_v21  ;;  %v10915_v61 = vmul.u32.u64.low %v10846_v49, %v3899_v38  ;;  %v10916_v19 = vmul.u32.u64.high %v10846_v49, %v3899_v38, %v10915_v61  ;;  %6049 = vperm.xlu1 %7880, %v5970_v33   ;;  %v13577_v53 = vshll.u32 %v10568_v36, %v10675_v52  ;;  %v5971_v36 = vld [vmem:[%s8444_s16 + $0xc0] sm:$0xff] }
 0x344   : > { %v10912_v9 = vor.u32 %v3720_v34, %v13576_v12  ;;  %v10924_v55 = vor.u32 4788187, %v3724_v25  ;;  %v4175_v48 = vand.u32 31, %v4173_v7  ;;  %v10931_v24 = vadd.s32 %v10791_v6, %v10797_v20  ;;  %v5976_v25 = vld [vmem:[%s8444_s16 + $0xe8] sm:$0xff] }
 0x345   : > { %v10922_v54 = vor.u32 %v10824_v57, %v13577_v53  ;;  %vm7064_vm4 = vcmp.lt.s32.totalorder %v7063_v2, 0  ;;  %v3907_v18 = vmul.u32 %v10846_v49, %v3891_v14  ;;  %v3910_v52 = vadd.s32 1, %v10906_v1 }
 0x346   : > { %v13578_v57 = vor.u32 8388608, %v10830_v60  ;;  %v4062_v0 = vshrl.u32 %v4061_v44, 23  ;;  %v10943_v21 = vsel %vm7064_vm4, 0, %v7063_v2  ;;  %vm3909_vm9 = vc.u32 %v10916_v19, %v10905_v4  ;;  %6052 = vperm.xlu0 %7879, %v5971_v36   ;;  %v5974_v44 = vld [vmem:[%s8444_s16 + $0xd8] sm:$0xff] }
 0x347   : > { %v4176_v6 = vsub.s32 32, %v4175_v48  ;;  %6055 = vperm.xlu1 %7880, %v5972_v62   ;;  %v3911_v60 = vsel %vm3909_vm9, %v3910_v52, %v10906_v1  ;;  %v4178_v49 = vshll.u32 %v13474_v3, %v4175_v48  ;;  %v4181_v59 = vshll.u32 %v13465_v31, %v4175_v48 }
 0x348   : > { %v10938_v30 = vshll.u32 %v13578_v57, 8  ;;  %v3912_v33 = vadd.s32 %v3911_v60, %v3907_v18  ;;  %v4174_v14 = vshrl.u32 %v4173_v7, 5  ;;  %v4031_v2 = vsub.s32 4294967266, %v10943_v21  ;;  %v10961_v7 = vld [vmem:[%s8435_s25 + $0xf8] sm:$0xff] }
 0x349   : > { %v4179_v46 = vshrl.u32 %v13465_v31, %v4176_v6  ;;  %v4182_v47 = vshrl.u32 %v13466_v45, %v4176_v6  ;;  %v4184_v38 = vshll.u32 %v13466_v45, %v4175_v48  ;;  %v4185_v1 = vshrl.u32 %v13457_v37, %v4176_v6 }
 0x34a   : > { %v7065_v12 = vadd.s32 4294967169, %v4062_v0  ;;  %v3913_v61 = vadd.s32 536870912, %v3912_v33  ;;  %v4177_v53 = vshrl.u32 %v13474_v3, %v4176_v6  ;;  %v4187_v62 = vshll.u32 %v13457_v37, %v4175_v48  ;;  %6058 = vperm.xlu0 %7879, %v5973_v22   ;;  %v5978_v22 = vld [vmem:[%s8444_s16 + $0xf8] sm:$0xff] }
 0x34b   : > { %v10964_v18 = vmul.f32 0.62831855, %v10961_v7  ;;  %6061 = vperm.xlu1 %7880, %v5974_v44   ;;  %v4180_v36 = vor.u32 %v4179_v46, %v4178_v49  ;;  %v4183_v52 = vor.u32 %v4182_v47, %v4181_v59  ;;  %v4186_v57 = vor.u32 %v4185_v1, %v4184_v38 }
 0x34c   : > { %v4188_v60 = vshrl.u32 %v13458_v58, %v4176_v6  ;;  %v10968_v0 = vshrl.u32 %v3913_v61, 30  ;;  %v4190_v20 = vshll.u32 %v13458_v58, %v4175_v48  ;;  %v4191_v34 = vshrl.u32 %v13477_v26, %v4176_v6 }
 0x34d   : > { %vm4193_vm1 = vcmp.lt.s32.totalorder %v4174_v14, 1  ;;  %v4027_v11 = vsub.s32 32, %v10943_v21  ;;  %v4032_v16 = vadd.s32 127, %v4031_v2  ;;  %vm4195_vm3 = vcmp.lt.s32.totalorder %v4174_v14, 3 }
 0x34e   : > { %13579 = vst [vmem:[#allocation80_spill] sm:$0xff] %v10968_v0  ;;  %v4189_v44 = vor.u32 %v4188_v60, %v4187_v62  ;;  %v3915_v49 = vshll.u32 %v10968_v0, 30  ;;  %v4192_v59 = vor.u32 %v4191_v34, %v4190_v20  ;;  %vm4194_vm11 = vcmp.lt.s32.totalorder %v4174_v14, 2  ;;  %6064 = vperm.xlu0 %7879, %v5975_v50   ;;  %v5977_v20 = vld [vmem:[%s8444_s16 + $0xf0] sm:$0xff] }
 0x34f   : > { %vm4196_vm4 = vcmp.lt.s32.totalorder %v4174_v14, 4  ;;  %6067 = vperm.xlu1 %7880, %v5976_v25   ;;  %v4197_v46 = vsel %vm4193_vm1, %v4177_v53, %v4180_v36  ;;  %v4201_v6 = vsel %vm4193_vm1, %v4180_v36, %v4183_v52  ;;  %v4205_v34 = vsel %vm4193_vm1, %v4183_v52, %v4186_v57 }
 0x350   : > { %v4198_v48 = vsel %vm4196_vm4, %v4186_v57, 2102212464  ;;  %v4202_v47 = vsel %vm4196_vm4, %v4189_v44, 920167782  ;;  %v10980_v2 = vsub.s32 %v3912_v33, %v3915_v49  ;;  %v4028_v25 = vshll.u32 %v10868_v28, %v10943_v21 }
 0x351   : > { %v4199_v38 = vsel %vm4195_vm3, %v4183_v52, %v4198_v48  ;;  %v4203_v1 = vsel %vm4195_vm3, %v4186_v57, %v4202_v47  ;;  %v4029_v61 = vshrl.u32 %v10931_v24, %v4027_v11  ;;  %v4206_v62 = vsel %vm4196_vm4, %v4192_v59, 1326507024 }
 0x352   : > { %v4204_v53 = vsel %vm4194_vm11, %v4201_v6, %v4203_v1  ;;  %v3918_v50 = vsub.s32 0, %v10980_v2  ;;  %v4207_v33 = vsel %vm4195_vm3, %v4189_v44, %v4206_v62  ;;  %v4033_v52 = vshll.u32 %v4032_v16, 23  ;;  %6070 = vperm.xlu0 %7879, %v5977_v20  }
 0x353   : > { %v10994_v36 = vmul.u32.u64.low %v10938_v30, %v4204_v53  ;;  %v10995_v60 = vmul.u32.u64.high %v10938_v30, %v4204_v53, %v10994_v36  ;;  %6073 = vperm.xlu1 %7880, %v5978_v22   ;;  %v4200_v57 = vsel %vm4194_vm11, %v4197_v46, %v4199_v38  ;;  %v4208_v28 = vsel %vm4194_vm11, %v4205_v34, %v4207_v33 }
 0x354   : > { %v13580_v24 = vand.u32 2147483647, %v10849_v35  ;;  %v7058_v21 = vmin.u32 %v3918_v50, %v10980_v2  ;;  %v11004_v49 = vmul.u32.u64.low %v10938_v30, %v4208_v28  ;;  %v11005_v44 = vmul.u32.u64.high %v10938_v30, %v4208_v28, %v11004_v49 }
 0x355   : > { %v4068_v59 = vadd.s32 1, %v7065_v12  ;;  %v11009_v16 = vor.u32 %v4029_v61, %v4028_v25  ;;  %v4370_v14 = vand.u32 2139095040, %v10964_v18  ;;  %v4216_v47 = vmul.u32 %v10938_v30, %v4200_v57 }
 0x356   : > { %v4065_v11 = vand.u32 8388607, %v13580_v24  ;;  %v3920_v46 = vclz %v7058_v21  ;;  %v4219_v22 = vadd.s32 1, %v10995_v60  ;;  %v13581_v38 = vand.u32 2147483647, %v10841_v8 }
 0x357   : > { %vm4069_vm9 = vcmp.gt.s32.totalorder %v4068_v59, 0  ;;  %v13582_v1 = vcvt.s32.f32 %v10834_v32  ;;  %v13583_v12 = vand.u32 2147483647, %v10924_v55  ;;  %v13584_v20 = vcvt.s32.f32 %v10912_v9 }
 0x358   : > { %v11026_v61 = vor.u32 4788187, %v4033_v52  ;;  %v4070_v53 = vsel %vm4069_vm9, %v4068_v59, 0  ;;  %v7059_v62 = vadd.s32 4294967294, %v3920_v46  ;;  %vm4218_vm1 = vc.u32 %v11005_v44, %v10994_v36 }
 0x359   : > { %v11018_v34 = vmul.f32 %v13582_v1, %v13581_v38  ;;  %v11024_v25 = vmul.f32 %v13584_v20, %v13583_v12  ;;  %v4066_v30 = vor.u32 8388608, %v4065_v11  ;;  %v13386_v8 = vand.u32 2147483647, %v10964_v18 }
 0x35a   : > { %v3908_v32 = vadd.s32 %v10905_v4, %v10916_v19  ;;  %v4220_v50 = vsel %vm4218_vm1, %v4219_v22, %v10995_v60  ;;  %v4072_v55 = vand.u32 31, %v4070_v53  ;;  %v4371_v33 = vshrl.u32 %v4370_v14, 23 }
 0x35b   : > { %vm7060_vm3 = vcmp.lt.s32.totalorder %v7059_v62, 0  ;;  %v4221_v52 = vadd.s32 %v4220_v50, %v4216_v47  ;;  %v4071_v57 = vshrl.u32 %v4070_v53, 5  ;;  %v4035_v49 = vand.u32 2147483647, %v11026_v61 }
 0x35c   : > { %v3923_v28 = vsel %vm7060_vm3, 0, %v7059_v62  ;;  %v4073_v24 = vsub.s32 32, %v4072_v55  ;;  %v4075_v21 = vshll.u32 %v13474_v3, %v4072_v55  ;;  %v4078_v11 = vshll.u32 %v13465_v31, %v4072_v55 }
 0x35d   : > { %v4222_v59 = vadd.s32 536870912, %v4221_v52  ;;  %v11038_v46 = vshll.u32 %v4066_v30, 8  ;;  %v11042_v4 = vand.u32 8388607, %v13386_v8  ;;  %v4081_v14 = vshll.u32 %v13466_v45, %v4072_v55 }
 0x35e   : > { %v4076_v19 = vshrl.u32 %v13465_v31, %v4073_v24  ;;  %v4079_v60 = vshrl.u32 %v13466_v45, %v4073_v24  ;;  %v7077_v47 = vadd.s32 4294967169, %v4371_v33  ;;  %v3928_v22 = vsub.s32 4294967266, %v3923_v28 }
 0x35f   : > { %v11047_v38 = vshrl.u32 %v4222_v59, 30  ;;  %v4082_v1 = vshrl.u32 %v13457_v37, %v4073_v24  ;;  %vm4090_vm11 = vcmp.lt.s32.totalorder %v4071_v57, 1  ;;  %v4084_v61 = vshll.u32 %v13457_v37, %v4072_v55 }
 0x360   : > { %v4077_v12 = vor.u32 %v4076_v19, %v4075_v21  ;;  %v4080_v20 = vor.u32 %v4079_v60, %v4078_v11  ;;  %v4085_v53 = vshrl.u32 %v13458_v58, %v4073_v24  ;;  %v3924_v62 = vsub.s32 32, %v3923_v28 }
 0x361   : > { %13585 = vst [vmem:[#allocation81_spill] sm:$0xff] %v11047_v38  ;;  %v4224_v30 = vshll.u32 %v11047_v38, 30  ;;  %v4074_v50 = vshrl.u32 %v13474_v3, %v4073_v24  ;;  %vm4091_vm4 = vcmp.lt.s32.totalorder %v4071_v57, 2  ;;  %v4083_v8 = vor.u32 %v4082_v1, %v4081_v14 }
 0x362   : > { %v4086_v33 = vor.u32 %v4085_v53, %v4084_v61  ;;  %v4087_v59 = vshll.u32 %v13458_v58, %v4072_v55  ;;  %v4088_v9 = vshrl.u32 %v13477_v26, %v4073_v24  ;;  %v3929_v6 = vadd.s32 127, %v3928_v22 }
 0x363   : > { %v11056_v48 = vsub.s32 %v4221_v52, %v4224_v30  ;;  %vm4092_vm9 = vcmp.lt.s32.totalorder %v4071_v57, 3  ;;  %vm4093_vm1 = vcmp.lt.s32.totalorder %v4071_v57, 4  ;;  %v3925_v21 = vshll.u32 %v10980_v2, %v3923_v28 }
 0x364   : > { %v4089_v11 = vor.u32 %v4088_v9, %v4087_v59  ;;  %v4095_v19 = vsel %vm4093_vm1, %v4083_v8, 2102212464  ;;  %v4098_v60 = vsel %vm4090_vm11, %v4077_v12, %v4080_v20  ;;  %v4094_v14 = vsel %vm4090_vm11, %v4074_v50, %v4077_v12 }
 0x365   : > { %v4227_v0 = vsub.s32 0, %v11056_v48  ;;  %v4096_v1 = vsel %vm4092_vm9, %v4080_v20, %v4095_v19  ;;  %v4099_v55 = vsel %vm4093_vm1, %v4086_v33, 920167782  ;;  %v3926_v61 = vshrl.u32 %v3908_v32, %v3924_v62 }
 0x366   : > { %v4100_v24 = vsel %vm4092_vm9, %v4083_v8, %v4099_v55  ;;  %v4102_v52 = vsel %vm4090_vm11, %v4080_v20, %v4083_v8  ;;  %v4103_v22 = vsel %vm4093_vm1, %v4089_v11, 1326507024  ;;  %v3930_v53 = vshll.u32 %v3929_v6, 23 }
 0x367   : > { %v7070_v2 = vmin.u32 %v4227_v0, %v11056_v48  ;;  %v4101_v9 = vsel %vm4091_vm4, %v4098_v60, %v4100_v24  ;;  %v4104_v28 = vsel %vm4092_vm9, %v4086_v33, %v4103_v22  ;;  %v4097_v30 = vsel %vm4091_vm4, %v4094_v14, %v4096_v1 }
 0x368   : > { %v4105_v12 = vsel %vm4091_vm4, %v4102_v52, %v4104_v28  ;;  %v11071_v50 = vmul.u32.u64.low %v11038_v46, %v4101_v9  ;;  %v11072_v59 = vmul.u32.u64.high %v11038_v46, %v4101_v9, %v11071_v50  ;;  %v13586_v0 = vand.u32 2147483647, %v10826_v51 }
 0x369   : > { %v4229_v8 = vclz %v7070_v2  ;;  %v11077_v6 = vmul.u32.u64.low %v11038_v46, %v4105_v12  ;;  %v11078_v20 = vmul.u32.u64.high %v11038_v46, %v4105_v12, %v11077_v6  ;;  %v13587_v62 = vcvt.s32.f32 %v10922_v54 }
 0x36a   : > { %v4375_v11 = vor.u32 8388608, %v11042_v4  ;;  %v4377_v19 = vadd.s32 1, %v7077_v47  ;;  %v11088_v60 = vor.u32 %v3926_v61, %v3925_v21  ;;  %v11090_v14 = vor.u32 4788187, %v3930_v53  ;;  %v11102_v47 = vld [vmem:[%s8435_s25 + $0xf0] sm:$0xff] }
 0x36b   : > { %v11084_v33 = vmul.f32 %v13587_v62, %v13586_v0  ;;  %v7071_v1 = vadd.s32 4294967294, %v4229_v8  ;;  %v4113_v55 = vmul.u32 %v11038_v46, %v4097_v30  ;;  %v13588_v51 = vcvt.s32.f32 %v11009_v16 }
 0x36c   : > { %v4116_v52 = vadd.s32 1, %v11072_v59  ;;  %vm4378_vm3 = vcmp.gt.s32.totalorder %v4377_v19, 0  ;;  %vm4115_vm4 = vc.u32 %v11078_v20, %v11071_v50  ;;  %v11105_v21 = vmul.f32 0.62831855, %v11102_v47 }
 0x36d   : > { %v11096_v54 = vmul.f32 %v13588_v51, %v4035_v49  ;;  %vm7072_vm11 = vcmp.lt.s32.totalorder %v7071_v1, 0  ;;  %v4379_v4 = vsel %vm4378_vm3, %v4377_v19, 0  ;;  %v4217_v46 = vadd.s32 %v10994_v36, %v11005_v44 }
 0x36e   : > { %v4232_v61 = vsel %vm7072_vm11, 0, %v7071_v1  ;;  %v4117_v16 = vsel %vm4115_vm4, %v4116_v52, %v11072_v59  ;;  %v4381_v49 = vand.u32 31, %v4379_v4  ;;  %v11112_v9 = vshll.u32 %v4375_v11, 8  ;;  %v4663_v1 = vld [vmem:[%s8459_s19 + $0x8] sm:$0xff] }
 0x36f   : > { %v4118_v2 = vadd.s32 %v4117_v16, %v4113_v55  ;;  %v4380_v28 = vshrl.u32 %v4379_v4, 5  ;;  %v4237_v36 = vsub.s32 4294967266, %v4232_v61  ;;  %v4233_v0 = vsub.s32 32, %v4232_v61  ;;  %v4662_v55 = vld [vmem:[%s8459_s19] sm:$0xff]  ;;  %7465 = vmatprep.subr.mxu0 %v4663_v1 }
 0x370   : > { %v4382_v30 = vsub.s32 32, %v4381_v49  ;;  %v4384_v12 = vshll.u32 %v13474_v3, %v4381_v49  ;;  %v4387_v8 = vshll.u32 %v13465_v31, %v4381_v49  ;;  %v4390_v59 = vshll.u32 %v13466_v45, %v4381_v49  ;;  %7466 = vmatpush3.msra.mxu0 %v4663_v1 }
 0x371   : > { %v4119_v44 = vadd.s32 536870912, %v4118_v2  ;;  %v4393_v6 = vshll.u32 %v13457_v37, %v4381_v49  ;;  %vm13403_vm9 = vcmp.lt.s32.totalorder %v10438_v63, 0  ;;  %vm13402_vm1 = vcmp.lt.s32.totalorder %v10517_v40, 0  ;;  %7467 = vmatprep.subr.mxu0 %v4662_v55 }
 0x372   : > { %v4385_v62 = vshrl.u32 %v13465_v31, %v4382_v30  ;;  %v4388_v19 = vshrl.u32 %v13466_v45, %v4382_v30  ;;  %v4391_v11 = vshrl.u32 %v13457_v37, %v4382_v30  ;;  %v4383_v52 = vshrl.u32 %v13474_v3, %v4382_v30  ;;  %7468 = vmatpush3.msra.mxu0 %v4662_v55 }
 0x373   : > { %v11125_v51 = vshrl.u32 %v4119_v44, 30  ;;  %v4394_v4 = vshrl.u32 %v13458_v58, %v4382_v30  ;;  %v4267_v16 = vand.u32 2139095040, %v11105_v21  ;;  %v4234_v32 = vshll.u32 %v11056_v48, %v4232_v61 }
 0x374   : > { %v4386_v53 = vor.u32 %v4385_v62, %v4384_v12  ;;  %v4389_v22 = vor.u32 %v4388_v19, %v4387_v8  ;;  %v4396_v24 = vshll.u32 %v13458_v58, %v4381_v49  ;;  %v4238_v57 = vadd.s32 127, %v4237_v36 }
 0x375   : > { %v4121_v10 = vshll.u32 %v11125_v51, 30  ;;  %v4392_v39 = vor.u32 %v4391_v11, %v4390_v59  ;;  %v4395_v44 = vor.u32 %v4394_v4, %v4393_v6  ;;  %v4235_v23 = vshrl.u32 %v4217_v46, %v4233_v0 }
 0x376   : > { %v4397_v41 = vshrl.u32 %v13477_v26, %v4382_v30  ;;  %vm4399_vm3 = vcmp.lt.s32.totalorder %v4380_v28, 1  ;;  %vm4401_vm11 = vcmp.lt.s32.totalorder %v4380_v28, 3  ;;  %vm4400_vm4 = vcmp.lt.s32.totalorder %v4380_v28, 2 }
 0x377   : > { %v11134_v38 = vsub.s32 %v4118_v2, %v4121_v10  ;;  %vm4402_vm12 = vcmp.lt.s32.totalorder %v4380_v28, 4  ;;  %v4403_v48 = vsel %vm4399_vm3, %v4383_v52, %v4386_v53  ;;  %v4407_v12 = vsel %vm4399_vm3, %v4386_v53, %v4389_v22 }
 0x378   : > { %v4398_v61 = vor.u32 %v4397_v41, %v4396_v24  ;;  %v4404_v49 = vsel %vm4402_vm12, %v4392_v39, 2102212464  ;;  %v4408_v8 = vsel %vm4402_vm12, %v4395_v44, 920167782  ;;  %v4239_v36 = vshll.u32 %v4238_v57, 23 }
 0x379   : > { %v4124_v46 = vsub.s32 0, %v11134_v38  ;;  %v4405_v30 = vsel %vm4401_vm11, %v4389_v22, %v4404_v49  ;;  %v4409_v59 = vsel %vm4401_vm11, %v4392_v39, %v4408_v8  ;;  %v4411_v2 = vsel %vm4399_vm3, %v4389_v22, %v4392_v39 }
 0x37a   : > { %v4410_v10 = vsel %vm4400_vm4, %v4407_v12, %v4409_v59  ;;  %v4412_v6 = vsel %vm4402_vm12, %v4398_v61, 1326507024  ;;  %v4264_v41 = vand.u32 2147483647, %v11105_v21  ;;  %v4236_v24 = vor.u32 %v4235_v23, %v4234_v32  ;;  %v829_v23 = vpop.permute.xlu1 %828  ;;  %v11176_v61 = vld [vmem:[%s13228_s2] ss:$0 sm:$0xff] }
 0x37b   : > { %v7066_v53 = vmin.u32 %v4124_v46, %v11134_v38  ;;  %v4406_v0 = vsel %vm4400_vm4, %v4403_v48, %v4405_v30  ;;  %v4413_v57 = vsel %vm4401_vm11, %v4395_v44, %v4412_v6  ;;  %v4268_v1 = vshrl.u32 %v4267_v16, 23 }
 0x37c   : > { %v4414_v62 = vsel %vm4400_vm4, %v4411_v2, %v4413_v57  ;;  %v11150_v19 = vmul.u32.u64.low %v11112_v9, %v4410_v10  ;;  %v11151_v11 = vmul.u32.u64.high %v11112_v9, %v4410_v10, %v11150_v19  ;;  %v4240_v55 = vor.u32 4788187, %v4239_v36  ;;  %v819_v36 = vpop.permute.xlu0 %818 }
 0x37d   : > { %v4126_v39 = vclz %v7066_v53  ;;  %v11155_v22 = vmul.u32.u64.low %v11112_v9, %v4414_v62  ;;  %v11156_v52 = vmul.u32.u64.high %v11112_v9, %v4414_v62, %v11155_v22  ;;  %v13589_v4 = vxor.u32 2147483648, %v11018_v34 }
 0x37e   : > { %v13590_v44 = vxor.u32 2147483648, %v11024_v25  ;;  %v7073_v48 = vadd.s32 4294967169, %v4268_v1  ;;  %v4422_v12 = vmul.u32 %v11112_v9, %v4406_v0  ;;  %v984_v8 = vsub.f32 %v829_v23, %v11176_v61 }
 0x37f   : > { %v11164_v28 = vsel %vm13403_vm9, %v13589_v4, %v11018_v34  ;;  %v7067_v49 = vadd.s32 4294967294, %v4126_v39  ;;  %v4271_v34 = vand.u32 8388607, %v4264_v41  ;;  %v4039_v46 = vxor.u32 2147483648, %v11096_v54  ;;  %v834_v39 = vpop.permute.xlu1 %833 }
 0x380   : > { %v11171_v16 = vsel %vm13402_vm1, %v13590_v44, %v11024_v25  ;;  %v13591_v25 = vand.u32 2147483647, %v11090_v14  ;;  %v13592_v30 = vcvt.s32.f32 %v11088_v60  ;;  %v4425_v10 = vadd.s32 1, %v11151_v11 }
 0x381   : > { %v4274_v2 = vadd.s32 1, %v7073_v48  ;;  %v4241_v6 = vand.u32 2147483647, %v4240_v55  ;;  %v4243_v53 = vcvt.s32.f32 %v4236_v24  ;;  %vm7068_vm12 = vcmp.lt.s32.totalorder %v7067_v49, 0 }
 0x382   : > { %v11187_v59 = vmul.f32 %v13592_v30, %v13591_v25  ;;  %vm4424_vm3 = vc.u32 %v11156_v52, %v11150_v19  ;;  %v4129_v9 = vsel %vm7068_vm12, 0, %v7067_v49  ;;  %v982_v57 = vsub.f32 %v819_v36, %v11176_v61 }
 0x383   : > { %v4426_v0 = vsel %vm4424_vm3, %v4425_v10, %v11151_v11  ;;  %vm4275_vm11 = vcmp.gt.s32.totalorder %v4274_v2, 0  ;;  %v4134_v14 = vsub.s32 4294967266, %v4129_v9  ;;  %v4272_v60 = vor.u32 8388608, %v4271_v34 }
 0x384   : > { %v4427_v62 = vadd.s32 %v4426_v0, %v4422_v12  ;;  %v1016_v1 = vmul.f32 %v984_v8, %v984_v8  ;;  %v11197_v55 = vsel %vm13407_vm8, %v4039_v46, %v11096_v54  ;;  %v3936_v24 = vxor.u32 2147483648, %v11187_v59 }
 0x385   : > { %v4114_v22 = vadd.s32 %v11071_v50, %v11078_v20  ;;  %v4276_v23 = vsel %vm4275_vm11, %v4274_v2, 0  ;;  %v11202_v11 = vmul.f32 %v4243_v53, %v4241_v6  ;;  %v4130_v4 = vsub.s32 32, %v4129_v9 }
 0x386   : > { %v4135_v44 = vadd.s32 127, %v4134_v14  ;;  %v4428_v48 = vadd.s32 536870912, %v4427_v62  ;;  %v4277_v49 = vshrl.u32 %v4276_v23, 5  ;;  %v4278_v12 = vand.u32 31, %v4276_v23 }
 0x387   : > { %v1014_v34 = vmul.f32 %v982_v57, %v982_v57  ;;  %v11205_v8 = vsub.f32 %v834_v39, %v11176_v61  ;;  %v4131_v54 = vshll.u32 %v11134_v38, %v4129_v9  ;;  %v11210_v46 = vshll.u32 %v4272_v60, 8 }
 0x388   : > { %v11208_v36 = vshrl.u32 %v4428_v48, 30  ;;  %v1048_v25 = vmul.f32 -4.4999995, %v1016_v1  ;;  %v4279_v50 = vsub.s32 32, %v4278_v12  ;;  %v4281_v20 = vshll.u32 %v13474_v3, %v4278_v12 }
 0x389   : > { %v4284_v30 = vshll.u32 %v13465_v31, %v4278_v12  ;;  %v4287_v10 = vshll.u32 %v13466_v45, %v4278_v12  ;;  %v4132_v2 = vshrl.u32 %v4114_v22, %v4130_v4  ;;  %v4136_v6 = vshll.u32 %v4135_v44, 23 }
 0x38a   : > { %v4430_v53 = vshll.u32 %v11208_v36, 30  ;;  %v4290_v0 = vshll.u32 %v13457_v37, %v4278_v12  ;;  %vm13406_vm4 = vcmp.lt.s32.totalorder %v10736_v56, 0  ;;  %v4282_v38 = vshrl.u32 %v13465_v31, %v4279_v50 }
 0x38b   : > { %v4285_v9 = vshrl.u32 %v13466_v45, %v4279_v50  ;;  %v4288_v57 = vshrl.u32 %v13457_v37, %v4279_v50  ;;  %vm4296_vm12 = vcmp.lt.s32.totalorder %v4277_v49, 1  ;;  %v4280_v60 = vshrl.u32 %v13474_v3, %v4279_v50 }
 0x38c   : > { %v11221_v14 = vsub.s32 %v4427_v62, %v4430_v53  ;;  %v4291_v1 = vshrl.u32 %v13458_v58, %v4279_v50  ;;  %v4293_v39 = vshll.u32 %v13458_v58, %v4278_v12  ;;  %v4283_v22 = vor.u32 %v4282_v38, %v4281_v20  ;;  %v824_v62 = vpop.permute.xlu0 %823 }
 0x38d   : > { %v4286_v23 = vor.u32 %v4285_v9, %v4284_v30  ;;  %v4289_v4 = vor.u32 %v4288_v57, %v4287_v10  ;;  %v4294_v44 = vshrl.u32 %v13477_v26, %v4279_v50  ;;  %v4133_v48 = vor.u32 %v4132_v2, %v4131_v54 }
 0x38e   : > { %v4137_v31 = vor.u32 4788187, %v4136_v6  ;;  %v4433_v45 = vsub.s32 0, %v11221_v14  ;;  %v4292_v32 = vor.u32 %v4291_v1, %v4290_v0  ;;  %vm4297_vm3 = vcmp.lt.s32.totalorder %v4277_v49, 2 }
 0x38f   : > { %v4295_v37 = vor.u32 %v4294_v44, %v4293_v39  ;;  %vm4298_vm11 = vcmp.lt.s32.totalorder %v4277_v49, 3  ;;  %vm4299_vm15 = vcmp.lt.s32.totalorder %v4277_v49, 4  ;;  %vm4163_vm6 = vcmp.lt.s32.totalorder %v10781_v29, 0 }
 0x390   : > { %v7078_v3 = vmin.u32 %v4433_v45, %v11221_v14  ;;  %v4300_v58 = vsel %vm4296_vm12, %v4280_v60, %v4283_v22  ;;  %v4301_v12 = vsel %vm4299_vm15, %v4289_v4, 2102212464  ;;  %v4304_v20 = vsel %vm4296_vm12, %v4283_v22, %v4286_v23 }
 0x391   : > { %v4302_v26 = vsel %vm4298_vm11, %v4286_v23, %v4301_v12  ;;  %v4305_v54 = vsel %vm4299_vm15, %v4292_v32, 920167782  ;;  %v4308_v50 = vsel %vm4296_vm12, %v4286_v23, %v4289_v4  ;;  %v4309_v30 = vsel %vm4299_vm15, %v4295_v37, 1326507024 }
 0x392   : > { %v4435_v10 = vclz %v7078_v3  ;;  %v4306_v2 = vsel %vm4298_vm11, %v4289_v4, %v4305_v54  ;;  %v1046_v6 = vmul.f32 -4.4999995, %v1014_v34  ;;  %v983_v53 = vsub.f32 %v824_v62, %v11176_v61  ;;  %v844_v3 = vpop.permute.xlu1 %843 }
 0x393   : > { %v4303_v0 = vsel %vm4297_vm3, %v4300_v58, %v4302_v26  ;;  %v4307_v38 = vsel %vm4297_vm3, %v4304_v20, %v4306_v2  ;;  %v4310_v9 = vsel %vm4298_vm11, %v4292_v32, %v4309_v30  ;;  %v1082_v57 = vmul.f32 1.442695, %v1048_v25  ;;  %v839_v58 = vpop.permute.xlu0 %838  ;;  %v8227_v30 = vld [vmem:[%s8435_s25 + $0xe8] sm:$0xff] }
 0x394   : > { %v7079_v60 = vadd.s32 4294967294, %v4435_v10  ;;  %v4311_v1 = vsel %vm4297_vm3, %v4308_v50, %v4310_v9  ;;  %v11241_v39 = vmul.u32.u64.low %v11210_v46, %v4307_v38  ;;  %v11242_v22 = vmul.u32.u64.high %v11210_v46, %v4307_v38, %v11241_v39 }
 0x395   : > { %v4138_v23 = vand.u32 2147483647, %v4137_v31  ;;  %v4140_v4 = vcvt.s32.f32 %v4133_v48  ;;  %v11246_v34 = vmul.u32.u64.low %v11210_v46, %v4311_v1  ;;  %v11247_v44 = vmul.u32.u64.high %v11210_v46, %v4311_v1, %v11246_v34 }
 0x396   : > { %v11254_v32 = vsel %vm13406_vm4, %v3936_v24, %v11187_v59  ;;  %v4423_v49 = vadd.s32 %v11150_v19, %v11156_v52  ;;  %vm7080_vm15 = vcmp.lt.s32.totalorder %v7079_v60, 0  ;;  %v1017_v25 = vmul.f32 %v11205_v8, %v11205_v8 }
 0x397   : > { %v4245_v48 = vxor.u32 2147483648, %v11202_v11  ;;  %vm4060_vm12 = vcmp.lt.s32.totalorder %v10849_v35, 0  ;;  %v4438_v31 = vsel %vm7080_vm15, 0, %v7079_v60  ;;  %v4319_v45 = vmul.u32 %v11210_v46, %v4303_v0 }
 0x398   : > { %v1078_v37 = vmul.f32 1.442695, %v1046_v6  ;;  %vm4369_vm3 = vcmp.lt.s32.totalorder %v10964_v18, 0  ;;  %v4439_v62 = vsub.s32 32, %v4438_v31  ;;  %v4440_v59 = vshll.u32 %v11221_v14, %v4438_v31 }
 0x399   : > { %v4443_v24 = vsub.s32 4294967266, %v4438_v31  ;;  %v4322_v19 = vadd.s32 1, %v11242_v22  ;;  %v4141_v52 = vmul.f32 %v4140_v4, %v4138_v23  ;;  %vm4565_vm11 = vcmp.lt.f32.partialorder %v10961_v7, 5.0 }
 0x39a   : > { %vm4321_vm2 = vc.u32 %v11247_v44, %v11241_v39  ;;  %7882 = vpow2.f32 %v1082_v57  ;;  %v1015_v8 = vmul.f32 %v983_v53, %v983_v53  ;;  %v4441_v46 = vshrl.u32 %v4423_v49, %v4439_v62 }
 0x39b   : > { %v4444_v12 = vadd.s32 127, %v4443_v24  ;;  %v4323_v20 = vsel %vm4321_vm2, %v4322_v19, %v11242_v22  ;;  %v1049_v26 = vmul.f32 -4.4999995, %v1017_v25  ;;  %v11273_v14 = vsel %vm4163_vm6, %v4245_v48, %v11202_v11 }
 0x39c   : > { %v4324_v54 = vadd.s32 %v4323_v20, %v4319_v45  ;;  %7884 = vpow2.f32 %v1078_v37  ;;  %v13593_v50 = vand.u32 2147483647, %v10964_v18  ;;  %v4442_v10 = vor.u32 %v4441_v46, %v4440_v59  ;;  %v8225_v37 = vld [vmem:[%s8435_s25 + $0x78] sm:$0xff] }
 0x39d   : > { %v4445_v2 = vshll.u32 %v4444_v12, 23  ;;  %v987_v6 = vsub.f32 %v844_v3, %v11176_v61  ;;  %v986_v53 = vsub.f32 %v839_v58, %v11176_v61  ;;  %v4142_v0 = vxor.u32 2147483648, %v4141_v52 }
 0x39e   : > { %vm11277_vm15 = vcmp.le.f32.partialorder %v13593_v50, 0.7853982  ;;  %vm13410_vm2 = vcmp.lt.s32.totalorder %v11105_v21, 0  ;;  %v4325_v11 = vadd.s32 536870912, %v4324_v54  ;;  %v1047_v38 = vmul.f32 -4.4999995, %v1015_v8 }
 0x39f   : > { %v4453_v9 = vsub.s32 4, %v11208_v36  ;;  %v4446_v57 = vor.u32 4788187, %v4445_v2  ;;  %v4449_v60 = vcvt.s32.f32 %v4442_v10  ;;  %v1084_v1 = vmul.f32 1.442695, %v1049_v26 }
 0x3a0   : > { %v1019_v22 = vmul.f32 %v987_v6, %v987_v6  ;;  %v4326_v23 = vshrl.u32 %v4325_v11, 30  ;;  %v13596_v4 = vand.u32 2147483647, %v9636_v13  ;;  %v2805_v49 = vsub.s32 4, %v9857_v42  ;;  %v854_v11 = vpop.permute.xlu1 %853 }
 0x3a1   : > { %v4447_v25 = vand.u32 2147483647, %v4446_v57  ;;  %vm4564_vm9 = vcmp.lt.f32.partialorder %v11102_v47, 5.0  ;;  %v1018_v31 = vmul.f32 %v986_v53, %v986_v53  ;;  %vm4549_vm7 = vcmp.lt.f32.partialorder %v8225_v37, 5.0 }
 0x3a2   : > { %vm11287_vm1 = vcmp.le.f32.partialorder %v13596_v4, 0.7853982  ;;  %v1051_v48 = vmul.f32 -4.4999995, %v1019_v22  ;;  %v4327_v62 = vshll.u32 %v4326_v23, 30  ;;  %v4454_v24 = vsel %vm4369_vm3, %v4453_v9, %v11208_v36  ;;  %v8226_v22 = vld [vmem:[%s8435_s25 + $0x70] sm:$0xff] }
 0x3a3   : > { %v2807_v45 = vsel %vm11287_vm1, %v9636_v13, %v10280_v43  ;;  %v1080_v59 = vmul.f32 1.442695, %v1047_v38  ;;  %v11303_v19 = vsel %vm4060_vm12, %v4142_v0, %v4141_v52  ;;  %v4450_v8 = vmul.f32 %v4449_v60, %v4447_v25  ;;  %v849_v38 = vpop.permute.xlu0 %848 }
 0x3a4   : > { %7886 = vcosq.f32 %v2807_v45  ;;  %v4350_v3 = vsub.s32 4, %v4326_v23  ;;  %v11305_v58 = vsub.s32 %v4324_v54, %v4327_v62  ;;  %v1088_v46 = vmul.f32 1.442695, %v1051_v48 }
 0x3a5   : > { %7888 = vpow2.f32 %v1084_v1  ;;  %v2806_v43 = vsel %vm2721_vm14, %v2805_v49, %v9857_v42  ;;  %v4451_v12 = vxor.u32 2147483648, %v4450_v8  ;;  %v4456_v36 = vsel %vm11277_vm15, 0, %v4454_v24 }
 0x3a6   : > { %7890 = vsinq.f32 %v2807_v45  ;;  %v8314_v20 = vmov 0.0   ;;  %v1050_v26 = vmul.f32 -4.4999995, %v1018_v31  ;;  %v11319_v54 = vadd.s32 %v11241_v39, %v11247_v44 }
 0x3a7   : > { %v11315_v52 = vsel %vm4565_vm11, 1.0, %v8314_v20  ;;  %v4330_v50 = vsub.s32 0, %v11305_v58  ;;  %7892 = vpow2.f32 %v1080_v59  ;;  %vm11324_vm14 = vcmp.le.f32.partialorder %v4264_v41, 0.7853982  ;;  %v11328_v10 = vpop.eup %7882 }
 0x3a8   : > { %v4452_v7 = vsel %vm4369_vm3, %v4451_v12, %v4450_v8  ;;  %v4351_v2 = vsel %vm13410_vm2, %v4350_v3, %v4326_v23  ;;  %v2808_v39 = vsel %vm11287_vm1, 0, %v2806_v43  ;;  %v13601_v44 = vand.u32 2147483647, %v9757_v5  ;;  %v13607_v43 = vld [vmem:[#allocation81_spill] sm:$0xff] }
 0x3a9   : > { %v7074_v6 = vmin.u32 %v4330_v50, %v11305_v58  ;;  %v4455_v53 = vsel %vm11277_vm15, %v10964_v18, %v4452_v7  ;;  %v11346_v0 = vand.u32 3, %v4456_v36  ;;  %7894 = vpow2.f32 %v1088_v46  ;;  %v11348_v9 = vpop.eup %7884 }
 0x3aa   : > { %vm11338_vm11 = vcmp.le.f32.partialorder %v13601_v44, 0.7853982  ;;  %7896 = vcosq.f32 %v4455_v53  ;;  %v1086_v57 = vmul.f32 1.442695, %v1050_v26  ;;  %v2702_v60 = vsub.s32 4, %v9925_v17 }
 0x3ab   : > { %v2704_v1 = vsel %vm11338_vm11, %v9757_v5, %v10299_v27  ;;  %vm4548_vm1 = vcmp.lt.f32.partialorder %v8226_v22, 5.0  ;;  %vm4563_vm3 = vcmp.lt.f32.partialorder %v8227_v30, 5.0  ;;  %v4332_v23 = vclz %v7074_v6 }
 0x3ac   : > { %7898 = vsinq.f32 %v4455_v53  ;;  %v4353_v4 = vsel %vm11324_vm14, 0, %v4351_v2  ;;  %v2812_v34 = vand.u32 3, %v2808_v39  ;;  %v2703_v49 = vsel %vm2618_vm0, %v2702_v60, %v9925_v17 }
 0x3ad   : > { %7900 = vcosq.f32 %v2704_v1  ;;  %v989_v25 = vsub.f32 %v854_v11, %v11176_v61  ;;  %v988_v48 = vsub.f32 %v849_v38, %v11176_v61  ;;  %v7075_v27 = vadd.s32 4294967294, %v4332_v23 }
 0x3ae   : > { %v11367_v31 = vsel %vm4564_vm9, 1.0, %v8314_v20  ;;  %7902 = vsinq.f32 %v2704_v1  ;;  %v13604_v45 = vand.u32 2147483647, %v10781_v29  ;;  %v11375_v59 = vand.u32 3, %v4353_v4 }
 0x3af   : > { %7904 = vpow2.f32 %v1086_v57  ;;  %vm2811_vm0 = vweird.f32 %v9636_v13  ;;  %v11380_v17 = vsel %vm4549_vm7, 1.0, %v8314_v20  ;;  %vm7076_vm5 = vcmp.lt.s32.totalorder %v7075_v27, 0 }
 0x3b0   : > { %vm11371_vm15 = vcmp.le.f32.partialorder %v13604_v45, 0.7853982  ;;  %vm4465_vm9 = vcmp.eq.s32.totalorder %v11346_v0, 2  ;;  %vm2817_vm4 = vcmp.eq.s32.totalorder %v2812_v34, 2  ;;  %v2705_v47 = vsel %vm11338_vm11, 0, %v2703_v49 }
 0x3b1   : > { %v4249_v24 = vsel %vm11371_vm15, %v10781_v29, %v11273_v14  ;;  %v7887_v8 = vpop.eup %7886  ;;  %v4335_v3 = vsel %vm7076_vm5, 0, %v7075_v27  ;;  %vm4462_vm8 = vcmp.eq.s32.totalorder %v11346_v0, 0  ;;  %v1021_v46 = vmul.f32 %v989_v25, %v989_v25 }
 0x3b2   : > { %v1020_v37 = vmul.f32 %v988_v48, %v988_v48  ;;  %v4247_v12 = vsub.s32 4, %v13607_v43  ;;  %v11391_v36 = vpop.eup %7888  ;;  %v4336_v26 = vsub.s32 32, %v4335_v3  ;;  %v4337_v50 = vshll.u32 %v11305_v58, %v4335_v3 }
 0x3b3   : > { %v4340_v7 = vsub.s32 4294967266, %v4335_v3  ;;  %vm4461_vm7 = vcmp.lt.s32.totalorder %v11346_v0, 2  ;;  %v2818_v2 = vxor.u32 2147483648, %v7887_v8  ;;  %v7891_v39 = vpop.eup %7890  ;;  %vm4459_vm11 = vweird.f32 %v10964_v18 }
 0x3b4   : > { %vm2813_vm13 = vcmp.lt.s32.totalorder %v2812_v34, 2  ;;  %vm2814_vm5 = vcmp.eq.s32.totalorder %v2812_v34, 0  ;;  %v2709_v14 = vand.u32 3, %v2705_v47  ;;  %7906 = vcosq.f32 %v4249_v24  ;;  %v11398_v11 = vpop.eup %7892 }
 0x3b5   : > { %v4338_v44 = vshrl.u32 %v11319_v54, %v4336_v26  ;;  %v4341_v41 = vadd.s32 127, %v4340_v7  ;;  %v2815_v6 = vxor.u32 2147483648, %v7891_v39  ;;  %v2819_v53 = vsel %vm2817_vm4, %v2818_v2, %v7891_v39 }
 0x3b6   : > { %vm2708_vm10 = vweird.f32 %v9757_v5  ;;  %v1053_v58 = vmul.f32 -4.4999995, %v1021_v46  ;;  %v1052_v38 = vmul.f32 -4.4999995, %v1020_v37  ;;  %7908 = vsinq.f32 %v4249_v24  ;;  %v11404_v4 = vpop.eup %7894  ;;  %v11461_v5 = vld [vmem:[%s8435_s25 + $0x68] sm:$0xff] }
 0x3b7   : > { %v4339_v57 = vor.u32 %v4338_v44, %v4337_v50  ;;  %v4342_v60 = vshll.u32 %v4341_v41, 23  ;;  %v2816_v1 = vsel %vm2814_vm5, %v7887_v8, %v2815_v6  ;;  %v4248_v23 = vsel %vm4163_vm6, %v4247_v12, %v13607_v43  ;;  %v7897_v48 = vpop.eup %7896 }
 0x3b8   : > { %v2820_v54 = vsel %vm2813_vm13, %v2816_v1, %v2819_v53  ;;  %vm2710_vm2 = vcmp.lt.s32.totalorder %v2709_v14, 2  ;;  %v11409_v49 = vsel %vm4548_vm1, 1.0, %v8314_v20  ;;  %v11413_v25 = vsel %vm4563_vm3, 1.0, %v8314_v20 }
 0x3b9   : > { %v4343_v27 = vor.u32 4788187, %v4342_v60  ;;  %v4346_v45 = vcvt.s32.f32 %v4339_v57  ;;  %vm2711_vm4 = vcmp.eq.s32.totalorder %v2709_v14, 0  ;;  %v13608_v47 = vand.u32 2147483647, %v10849_v35  ;;  %v7899_v34 = vpop.eup %7898  ;;  %v864_v57 = vpop.permute.xlu1 %863  ;;  %v8228_v60 = vld [vmem:[%s8435_s25 + $0xe0] sm:$0xff] }
 0x3ba   : > { %v4466_v8 = vxor.u32 2147483648, %v7897_v48  ;;  %vm2714_vm13 = vcmp.eq.s32.totalorder %v2709_v14, 2  ;;  %v1092_v22 = vmul.f32 1.442695, %v1053_v58  ;;  %v4250_v3 = vsel %vm11371_vm15, 0, %v4248_v23  ;;  %v7901_v30 = vpop.eup %7900 }
 0x3bb   : > { %vm11417_vm6 = vcmp.le.f32.partialorder %v13608_v47, 0.7853982  ;;  %v4344_v46 = vand.u32 2147483647, %v4343_v27  ;;  %v4463_v37 = vxor.u32 2147483648, %v7899_v34  ;;  %v2821_v43 = vsel %vm2811_vm0, nan, %v2820_v54  ;;  %v7903_v26 = vpop.eup %7902 }
 0x3bc   : > { %v11425_v12 = vmul.f32 1.442695, %v1052_v38  ;;  %v4467_v50 = vsel %vm4465_vm9, %v4466_v8, %v7899_v34  ;;  %v2715_v7 = vxor.u32 2147483648, %v7901_v30  ;;  %v4144_v2 = vsub.s32 4, %v11125_v51  ;;  %v11434_v39 = vpop.eup %7904 }
 0x3bd   : > { %v4146_v62 = vsel %vm11417_vm6, %v10849_v35, %v11303_v19  ;;  %v4347_v44 = vmul.f32 %v4346_v45, %v4344_v46  ;;  %v4464_v13 = vsel %vm4462_vm8, %v7897_v48, %v4463_v37  ;;  %v2712_v41 = vxor.u32 2147483648, %v7903_v26 }
 0x3be   : > { %vm4253_vm1 = vweird.f32 %v10781_v29  ;;  %v4254_v6 = vand.u32 3, %v4250_v3  ;;  %v4468_v53 = vsel %vm4461_vm7, %v4464_v13, %v4467_v50  ;;  %v4485_v58 = vadd.f32 1.0, %v2821_v43  ;;  %v859_v3 = vpop.permute.xlu0 %858  ;;  %v13616_v13 = vld [vmem:[#allocation44_spill] sm:$0xff] }
 0x3bf   : > { %v2716_v38 = vsel %vm2714_vm13, %v2715_v7, %v7903_v26  ;;  %7910 = vcosq.f32 %v4146_v62  ;;  %vm4562_vm3 = vcmp.lt.f32.partialorder %v8228_v60, 5.0  ;;  %v4348_v19 = vxor.u32 2147483648, %v4347_v44  ;;  %v13612_v7 = vld [vmem:[#allocation37_spill] sm:$0xff]  ;;  %v13624_v60 = vld [vmem:[#allocation63_spill] sm:$0xff] }
 0x3c0   : > { %v4469_v1 = vsel %vm4459_vm11, nan, %v4468_v53  ;;  %v2713_v23 = vsel %vm2711_vm4, %v7901_v30, %v2712_v41  ;;  %7912 = vsinq.f32 %v4146_v62  ;;  %v4145_v0 = vsel %vm4060_vm12, %v4144_v2, %v11125_v51  ;;  %v13617_v41 = vld [vmem:[#allocation61_spill] sm:$0xff] }
 0x3c1   : > { %v4501_v54 = vadd.f32 1.0, %v4469_v1  ;;  %v2717_v48 = vsel %vm2710_vm2, %v2713_v23, %v2716_v38  ;;  %7914 = vpow2.f32 %v1092_v22  ;;  %v7907_v27 = vpop.eup %7906  ;;  %vm13611_vm8 = vcmp.lt.s32.totalorder %v11105_v21, 0 }
 0x3c2   : > { %v4349_v45 = vsel %vm13611_vm8, %v4348_v19, %v4347_v44  ;;  %v2718_v18 = vsel %vm2708_vm10, nan, %v2717_v48  ;;  %vm4259_vm15 = vcmp.eq.s32.totalorder %v4254_v6, 2  ;;  %v991_v47 = vsub.f32 %v864_v57, %v11176_v61  ;;  %v13619_v48 = vld [vmem:[#allocation39_spill] sm:$0xff] }
 0x3c3   : > { %v4533_v34 = vmul.f32 0.5, %v4501_v54  ;;  %v4352_v14 = vsel %vm11324_vm14, %v11105_v21, %v4349_v45  ;;  %v4517_v8 = vmul.f32 0.5, %v4485_v58  ;;  %v4260_v22 = vxor.u32 2147483648, %v7907_v27  ;;  %v7909_v51 = vpop.eup %7908 }
 0x3c4   : > { %7916 = vcosq.f32 %v4352_v14  ;;  %vm4255_vm12 = vcmp.lt.s32.totalorder %v4254_v6, 2  ;;  %vm4256_vm2 = vcmp.eq.s32.totalorder %v4254_v6, 0  ;;  %v4147_v30 = vsel %vm11417_vm6, 0, %v4145_v0 }
 0x3c5   : > { %vm4547_vm10 = vcmp.lt.f32.partialorder %v11461_v5, 5.0  ;;  %v4661_v46 = vmul.f32 %v11315_v52, %v4533_v34  ;;  %7918 = vsinq.f32 %v4352_v14  ;;  %v4484_v37 = vadd.f32 1.0, %v2718_v18 }
 0x3c6   : > { %v4257_v42 = vxor.u32 2147483648, %v7909_v51  ;;  %v4261_v43 = vsel %vm4259_vm15, %v4260_v22, %v7909_v51  ;;  %v1023_v26 = vmul.f32 %v991_v47, %v991_v47  ;;  %v990_v50 = vsub.f32 %v859_v3, %v11176_v61 }
 0x3c7   : > { %v13613_v2 = vand.u32 2147483647, %v13612_v7  ;;  %5910 = vperm.xlu1 %7880, %v4661_v46   ;;  %v4645_v24 = vmul.f32 %v11380_v17, %v4517_v8  ;;  %v2599_v52 = vsub.s32 4, %v13616_v13  ;;  %v4151_v38 = vand.u32 3, %v4147_v30  ;;  %v8230_v30 = vld [vmem:[%s8435_s25 + $0x60] sm:$0xff] }
 0x3c8   : > { %v4258_v44 = vsel %vm4256_vm2, %v7907_v27, %v4257_v42  ;;  %v1055_v57 = vmul.f32 -4.4999995, %v1023_v26  ;;  %vm4362_vm0 = vcmp.eq.s32.totalorder %v11375_v59, 2  ;;  %v4516_v19 = vmul.f32 0.5, %v4484_v37  ;;  %v869_v26 = vpop.permute.xlu0 %868 }
 0x3c9   : > { %vm11469_vm14 = vcmp.le.f32.partialorder %v13613_v2, 0.7853982  ;;  %v4262_v58 = vsel %vm4255_vm12, %v4258_v44, %v4261_v43  ;;  %vm13618_vm9 = vcmp.lt.s32.totalorder %v13612_v7, 0  ;;  %vm4359_vm7 = vcmp.eq.s32.totalorder %v11375_v59, 0  ;;  %v874_v43 = vpop.permute.xlu1 %873 }
 0x3ca   : > { %v2601_v53 = vsel %vm11469_vm14, %v13612_v7, %v13617_v41  ;;  %v4263_v1 = vsel %vm4253_vm1, nan, %v4262_v58  ;;  %v2600_v17 = vsel %vm13618_vm9, %v2599_v52, %v13616_v13  ;;  %v1096_v23 = vmul.f32 1.442695, %v1055_v57 }
 0x3cb   : > { %7920 = vcosq.f32 %v2601_v53  ;;  %v4499_v6 = vadd.f32 1.0, %v4263_v1  ;;  %v1022_v54 = vmul.f32 %v990_v50, %v990_v50  ;;  %vm4358_vm11 = vcmp.lt.s32.totalorder %v11375_v59, 2  ;;  %5830 = vperm.xlu1 %7880, %v4645_v24  }
 0x3cc   : > { %7922 = vsinq.f32 %v2601_v53  ;;  %vm4150_vm5 = vweird.f32 %v10849_v35  ;;  %v11492_v29 = vsel %vm4562_vm3, 1.0, %v8314_v20  ;;  %v13620_v0 = vand.u32 2147483647, %v13619_v48  ;;  %v7911_v18 = vpop.eup %7910 }
 0x3cd   : > { %7924 = vpow2.f32 %v11425_v12  ;;  %v13623_v12 = vld [vmem:[#allocation46_spill] sm:$0xff]  ;;  %vm4356_vm6 = vweird.f32 %v11105_v21  ;;  %v4531_v47 = vmul.f32 0.5, %v4499_v6  ;;  %vm4156_vm13 = vcmp.eq.s32.totalorder %v4151_v38, 2  ;;  %v7913_v8 = vpop.eup %7912 }
 0x3ce   : > { %vm11496_vm4 = vcmp.le.f32.partialorder %v13620_v0, 0.7853982  ;;  %v2496_v45 = vsub.s32 4, %v13623_v12  ;;  %v2602_v34 = vsel %vm11469_vm14, 0, %v2600_v17  ;;  %v11509_v22 = vmul.f32 %v11409_v49, %v4516_v19  ;;  %v11511_v51 = vpop.eup %7914 }
 0x3cf   : > { %v2498_v14 = vsel %vm11496_vm4, %v13619_v48, %v13624_v60  ;;  %vm4152_vm1 = vcmp.lt.s32.totalorder %v4151_v38, 2  ;;  %vm4153_vm3 = vcmp.eq.s32.totalorder %v4151_v38, 0  ;;  %v4157_v3 = vxor.u32 2147483648, %v7911_v18 }
 0x3d0   : > { %vm4546_vm8 = vcmp.lt.f32.partialorder %v8230_v30, 5.0  ;;  %v4659_v46 = vmul.f32 %v11413_v25, %v4531_v47  ;;  %v4154_v37 = vxor.u32 2147483648, %v7913_v8  ;;  %7926 = vpow2.f32 %v1096_v23 }
 0x3d1   : > { %v1054_v42 = vmul.f32 -4.4999995, %v1022_v54  ;;  %v4158_v50 = vsel %vm4156_vm13, %v4157_v3, %v7913_v8  ;;  %v2606_v2 = vand.u32 3, %v2602_v34  ;;  %vm13625_vm15 = vcmp.lt.s32.totalorder %v13619_v48, 0  ;;  %v7917_v24 = vpop.eup %7916  ;;  %v13629_v54 = vld [vmem:[#allocation79_spill] sm:$0xff] }
 0x3d2   : > { %v2497_v49 = vsel %vm13625_vm15, %v2496_v45, %v13623_v12  ;;  %7928 = vcosq.f32 %v2498_v14  ;;  %5900 = vperm.xlu1 %7880, %v4659_v46   ;;  %v4155_v62 = vsel %vm4153_vm3, %v7911_v18, %v4154_v37  ;;  %vm2605_vm12 = vweird.f32 %v13612_v7  ;;  %v7919_v58 = vpop.eup %7918  ;;  %v11556_v46 = vld [vmem:[%s8435_s25 + $0xd8] sm:$0xff] }
 0x3d3   : > { %v11524_v25 = vsel %vm4547_vm10, 1.0, %v8314_v20  ;;  %7930 = vsinq.f32 %v2498_v14  ;;  %v4159_v44 = vsel %vm4152_vm1, %v4155_v62, %v4158_v50  ;;  %v993_v13 = vsub.f32 %v874_v43, %v11176_v61 }
 0x3d4   : > { %v992_v52 = vsub.f32 %v869_v26, %v11176_v61  ;;  %v13626_v41 = vand.u32 2147483647, %v10611_v15  ;;  %v4363_v57 = vxor.u32 2147483648, %v7917_v24  ;;  %v4160_v5 = vsel %vm4150_vm5, nan, %v4159_v44 }
 0x3d5   : > { %v1094_v19 = vmul.f32 1.442695, %v1054_v42  ;;  %v2499_v38 = vsel %vm11496_vm4, 0, %v2497_v49  ;;  %v4360_v1 = vxor.u32 2147483648, %v7919_v58  ;;  %v4498_v17 = vadd.f32 1.0, %v4160_v5 }
 0x3d6   : > { %vm11531_vm2 = vcmp.le.f32.partialorder %v13626_v41, 0.7853982  ;;  %vm2607_vm10 = vcmp.lt.s32.totalorder %v2606_v2, 2  ;;  %vm2611_vm14 = vcmp.eq.s32.totalorder %v2606_v2, 2  ;;  %v4364_v6 = vsel %vm4362_vm0, %v4363_v57, %v7919_v58 }
 0x3d7   : > { %v1024_v23 = vmul.f32 %v992_v52, %v992_v52  ;;  %v4041_v0 = vsub.s32 4, %v13629_v54  ;;  %v4043_v35 = vsel %vm11531_vm2, %v10611_v15, %v11197_v55  ;;  %v4361_v27 = vsel %vm4359_vm7, %v7917_v24, %v4360_v1 }
 0x3d8   : > { %v7921_v12 = vpop.eup %7920  ;;  %v2503_v45 = vand.u32 3, %v2499_v38  ;;  %v1025_v18 = vmul.f32 %v993_v13, %v993_v13  ;;  %7932 = vcosq.f32 %v4043_v35  ;;  %v4365_v34 = vsel %vm4358_vm11, %v4361_v27, %v4364_v6  ;;  %v13634_v38 = vld [vmem:[#allocation80_spill] sm:$0xff] }
 0x3d9   : > { %v7923_v47 = vpop.eup %7922  ;;  %7934 = vpow2.f32 %v1094_v19  ;;  %vm2608_vm0 = vcmp.eq.s32.totalorder %v2606_v2, 0  ;;  %v2612_v60 = vxor.u32 2147483648, %v7921_v12  ;;  %v4366_v55 = vsel %vm4356_vm6, nan, %v4365_v34 }
 0x3da   : > { %v11550_v14 = vpop.eup %7924  ;;  %v4530_v8 = vmul.f32 0.5, %v4498_v17  ;;  %v2609_v3 = vxor.u32 2147483648, %v7923_v47  ;;  %vm2502_vm9 = vweird.f32 %v13619_v48  ;;  %vm4561_vm7 = vcmp.lt.f32.partialorder %v11556_v46, 5.0  ;;  %v884_v17 = vpop.permute.xlu1 %883 }
 0x3db   : > { %v4500_v37 = vadd.f32 1.0, %v4366_v55  ;;  %v2613_v59 = vsel %vm2611_vm14, %v2612_v60, %v7923_v47  ;;  %v1056_v42 = vmul.f32 -4.4999995, %v1024_v23  ;;  %vm13630_vm11 = vcmp.lt.s32.totalorder %v10611_v15, 0  ;;  %v13636_v55 = vld [vmem:[#allocation31_spill] sm:$0xff] }
 0x3dc   : > { %v4042_v43 = vsel %vm13630_vm11, %v4041_v0, %v13629_v54  ;;  %v2610_v26 = vsel %vm2608_vm0, %v7921_v12, %v2609_v3  ;;  %vm2504_vm5 = vcmp.lt.s32.totalorder %v2503_v45, 2  ;;  %v11565_v21 = vsel %vm4546_vm8, 1.0, %v8314_v20  ;;  %v879_v0 = vpop.permute.xlu0 %878  ;;  %v11713_v3 = vld [vmem:[%s13228_s2] ss:$0 sm:$0xff] }
 0x3dd   : > { %v1057_v50 = vmul.f32 -4.4999995, %v1025_v18  ;;  %v4532_v49 = vmul.f32 0.5, %v4500_v37  ;;  %v2614_v62 = vsel %vm2607_vm10, %v2610_v26, %v2613_v59  ;;  %vm2505_vm4 = vcmp.eq.s32.totalorder %v2503_v45, 0  ;;  %v11568_v24 = vpop.eup %7926  ;;  %v13640_v59 = vld [vmem:[#allocation41_spill] sm:$0xff] }
 0x3de   : > { %vm2508_vm6 = vcmp.eq.s32.totalorder %v2503_v45, 2  ;;  %v4658_v44 = vmul.f32 %v11492_v29, %v4530_v8  ;;  %v2615_v13 = vsel %vm2605_vm12, nan, %v2614_v62  ;;  %v4044_v52 = vsel %vm11531_vm2, 0, %v4042_v43  ;;  %v11583_v29 = vld [vmem:[%s8435_s25 + $0xd0] sm:$0xff] }
 0x3df   : > { %7936 = vsinq.f32 %v4043_v35  ;;  %v7929_v30 = vpop.eup %7928  ;;  %v4660_v41 = vmul.f32 %v11367_v31, %v4532_v49  ;;  %v4483_v58 = vadd.f32 1.0, %v2615_v13  ;;  %v1098_v57 = vmul.f32 1.442695, %v1056_v42  ;;  %v13641_v43 = vld [vmem:[#allocation57_spill] sm:$0xff] }
 0x3e0   : > { %v13631_v2 = vand.u32 2147483647, %v10736_v56  ;;  %v7931_v19 = vpop.eup %7930  ;;  %vm4560_vm1 = vcmp.lt.f32.partialorder %v11583_v29, 5.0  ;;  %v2509_v7 = vxor.u32 2147483648, %v7929_v30  ;;  %v1100_v53 = vmul.f32 1.442695, %v1057_v50 }
 0x3e1   : > { %v3938_v1 = vsub.s32 4, %v13634_v38  ;;  %5905 = vperm.xlu0 %7879, %v4660_v41   ;;  %v4515_v6 = vmul.f32 0.5, %v4483_v58  ;;  %v2506_v23 = vxor.u32 2147483648, %v7931_v19  ;;  %v11591_v54 = vand.u32 3, %v4044_v52  ;;  %v13648_v29 = vld [vmem:[#allocation58_spill] sm:$0xff] }
 0x3e2   : > { %vm11578_vm13 = vcmp.le.f32.partialorder %v13631_v2, 0.7853982  ;;  %v2510_v35 = vsel %vm2508_vm6, %v2509_v7, %v7931_v19  ;;  %vm13635_vm3 = vcmp.lt.s32.totalorder %v10736_v56, 0  ;;  %vm4671_vm8 = vcmask 130048  }
 0x3e3   : > { %v3940_v31 = vsel %vm11578_vm13, %v10736_v56, %v11254_v32  ;;  %v3939_v12 = vsel %vm13635_vm3, %v3938_v1, %v13634_v38  ;;  %v4643_v27 = vmul.f32 %v11524_v25, %v4515_v6  ;;  %v2507_v32 = vsel %vm2505_vm4, %v7929_v30, %v2506_v23  ;;  %7469 = vmatprep.mubr.msk.f32.mxu0 %vm4671_vm8, %v11348_v9  ;;  %v11615_v9 = vld [vmem:[%s8435_s25 + $0x58] sm:$0xff]  ;;  %v894_v1 = vpop.permute.xlu1 %893  ;;  %v11679_v6 = vld [vmem:[%s8435_s25 + $0x50] sm:$0xff] }
 0x3e4   : > { %7938 = vcosq.f32 %v3940_v31  ;;  %v995_v18 = vsub.f32 %v884_v17, %v11176_v61  ;;  %v2511_v47 = vsel %vm2504_vm5, %v2507_v32, %v2510_v35  ;;  %v3941_v34 = vsel %vm11578_vm13, 0, %v3939_v12  ;;  %7470 = vmatmul.mubr.msk.f32.vlgmr.msra.gmra.mxu0 %vm4671_vm8, %v11398_v11 }
 0x3e5   : > { %7940 = vsinq.f32 %v3940_v31  ;;  %v994_v60 = vsub.f32 %v879_v0, %v11176_v61  ;;  %v13637_v8 = vand.u32 2147483647, %v13636_v55  ;;  %v7933_v25 = vpop.eup %7932  ;;  %vm4545_vm12 = vcmp.lt.f32.partialorder %v11615_v9, 5.0  ;;  %5825 = vperm.xlu0 %7879, %v11509_v22   ;;  %5820 = vperm.xlu1 %7880, %v4643_v27   ;;  %v889_v27 = vpop.permute.xlu0 %888 }
 0x3e6   : > { %7942 = vpow2.f32 %v1098_v57  ;;  %v2512_v45 = vsel %vm2502_vm9, nan, %v2511_v47  ;;  %v1027_v37 = vmul.f32 %v995_v18, %v995_v18  ;;  %v2393_v42 = vsub.s32 4, %v13640_v59  ;;  %v11626_v11 = vpop.eup %7934  ;;  %7472 = vmatprep.mubr.msk.f32.mxu0 %vm4671_vm8, %v11328_v10  ;;  %v13643_v57 = vld [vmem:[#allocation36_spill] sm:$0xff] }
 0x3e7   : > { %vm11608_vm15 = vcmp.le.f32.partialorder %v13637_v8, 0.7853982  ;;  %v4482_v50 = vadd.f32 1.0, %v2512_v45  ;;  %7944 = vpow2.f32 %v1100_v53  ;;  %vm4047_vm2 = vweird.f32 %v10611_v15  ;;  %v13653_v45 = vld [vmem:[#allocation72_spill] sm:$0xff] }
 0x3e8   : > { %v2395_v26 = vsel %vm11608_vm15, %v13636_v55, %v13641_v43  ;;  %v11632_v22 = vsel %vm4561_vm7, 1.0, %v8314_v20  ;;  %vm4053_vm10 = vcmp.eq.s32.totalorder %v11591_v54, 2  ;;  %v1059_v48 = vmul.f32 -4.4999995, %v1027_v37  ;;  %7473 = vmatmul.mubr.msk.f32.gmra.mxu0 %vm4671_vm8, %v11391_v36  ;;  %v13647_v36 = vld [vmem:[#allocation42_spill] sm:$0xff] }
 0x3e9   : > { %v1026_v49 = vmul.f32 %v994_v60, %v994_v60  ;;  %vm13642_vm14 = vcmp.lt.s32.totalorder %v13636_v55, 0  ;;  %v4514_v13 = vmul.f32 0.5, %v4482_v50  ;;  %v4054_v52 = vxor.u32 2147483648, %v7933_v25  ;;  %5895 = vperm.xlu0 %7879, %v4658_v44   ;;  %7475 = vmatprep.mubr.msk.f32.mxu0 %vm4671_vm8, %v11434_v39 }
 0x3ea   : > { %v2394_v62 = vsel %vm13642_vm14, %v2393_v42, %v13640_v59  ;;  %v11640_v30 = vand.u32 3, %v3941_v34  ;;  %7946 = vcosq.f32 %v2395_v26  ;;  %v1104_v46 = vmul.f32 1.442695, %v1059_v48 }
 0x3eb   : > { %v1058_v41 = vmul.f32 -4.4999995, %v1026_v49  ;;  %v2396_v10 = vsel %vm11608_vm15, 0, %v2394_v62  ;;  %7948 = vsinq.f32 %v2395_v26  ;;  %v4642_v58 = vmul.f32 %v11565_v21, %v4514_v13 }
 0x3ec   : > { %vm4049_vm0 = vcmp.lt.s32.totalorder %v11591_v54, 2  ;;  %v13644_v2 = vand.u32 2147483647, %v13643_v57  ;;  %v2290_v44 = vsub.s32 4, %v13647_v36  ;;  %v7937_v19 = vpop.eup %7936  ;;  %vm4050_vm7 = vcmp.eq.s32.totalorder %v11591_v54, 0  ;;  %7476 = vmatmul.mubr.msk.f32.gmra.mxu0 %vm4671_vm8, %v11404_v4 }
 0x3ed   : > { %vm3944_vm11 = vweird.f32 %v10736_v56  ;;  %v11662_v39 = vsel %vm4560_vm1, 1.0, %v8314_v20  ;;  %v1102_v21 = vmul.f32 1.442695, %v1058_v41  ;;  %v4051_v7 = vxor.u32 2147483648, %v7937_v19  ;;  %5815 = vperm.xlu0 %7879, %v4642_v58   ;;  %7478 = vmatprep.mubr.msk.f32.mxu0 %vm4671_vm8, %v11550_v14 }
 0x3ee   : > { %vm11652_vm9 = vcmp.le.f32.partialorder %v13644_v2, 0.7853982  ;;  %v4055_v53 = vsel %vm4053_vm10, %v4054_v52, %v7937_v19  ;;  %7950 = vpow2.f32 %v1104_v46  ;;  %v11666_v38 = vand.u32 3, %v2396_v10 }
 0x3ef   : > { %vm3946_vm5 = vcmp.lt.s32.totalorder %v11640_v30, 2  ;;  %vm3947_vm4 = vcmp.eq.s32.totalorder %v11640_v30, 0  ;;  %7952 = vpow2.f32 %v1102_v21  ;;  %v2292_v31 = vsel %vm11652_vm9, %v13643_v57, %v13648_v29  ;;  %v13659_v29 = vld [vmem:[#allocation67_spill] sm:$0xff] }
 0x3f0   : > { %vm4544_vm6 = vcmp.lt.f32.partialorder %v11679_v6, 5.0  ;;  %v4052_v4 = vsel %vm4050_vm7, %v7933_v25, %v4051_v7  ;;  %vm3950_vm13 = vcmp.eq.s32.totalorder %v11640_v30, 2  ;;  %vm13649_vm1 = vcmp.lt.s32.totalorder %v13643_v57, 0  ;;  %7479 = vmatmul.mubr.msk.f32.gmra.mxu0 %vm4671_vm8, %v11511_v51 }
 0x3f1   : > { %v7939_v17 = vpop.eup %7938  ;;  %v2291_v23 = vsel %vm13649_vm1, %v2290_v44, %v13647_v36  ;;  %7954 = vcosq.f32 %v2292_v31  ;;  %v4056_v35 = vsel %vm4049_vm0, %v4052_v4, %v4055_v53  ;;  %v997_v12 = vsub.f32 %v894_v1, %v11176_v61  ;;  %7481 = vmatprep.mubr.msk.f32.mxu0 %vm4671_vm8, %v11626_v11  ;;  %v13658_v1 = vld [vmem:[#allocation64_spill] sm:$0xff]  ;;  %v904_v4 = vpop.permute.xlu1 %903 }
 0x3f2   : > { %v7941_v0 = vpop.eup %7940  ;;  %v3951_v14 = vxor.u32 2147483648, %v7939_v17  ;;  %7956 = vsinq.f32 %v2292_v31  ;;  %v4057_v18 = vsel %vm4047_vm2, nan, %v4056_v35  ;;  %vm2399_vm3 = vweird.f32 %v13636_v55 }
 0x3f3   : > { %v7943_v32 = vpop.eup %7942  ;;  %v3948_v47 = vxor.u32 2147483648, %v7941_v0  ;;  %vm2401_vm15 = vcmp.lt.s32.totalorder %v11666_v38, 2  ;;  %v11698_v34 = vsel %vm4545_vm12, 1.0, %v8314_v20  ;;  %v4497_v54 = vadd.f32 1.0, %v4057_v18 }
 0x3f4   : > { %v3952_v61 = vsel %vm3950_vm13, %v3951_v14, %v7941_v0  ;;  %v2293_v15 = vsel %vm11652_vm9, 0, %v2291_v23  ;;  %v1029_v60 = vmul.f32 %v997_v12, %v997_v12  ;;  %v996_v51 = vsub.f32 %v889_v27, %v11713_v3  ;;  %v7945_v59 = vpop.eup %7944  ;;  %7482 = vmatmul.mubr.msk.f32.gmra.mxu0 %vm4671_vm8, %v11568_v24  ;;  %v899_v14 = vpop.permute.xlu0 %898  ;;  %v8236_v12 = vld [vmem:[%s8435_s25 + $0xc8] sm:$0xff] }
 0x3f5   : > { %v3949_v8 = vsel %vm3947_vm4, %v7939_v17, %v3948_v47  ;;  %v13650_v25 = vand.u32 2147483647, %v10438_v63  ;;  %v3835_v37 = vsub.s32 4, %v13653_v45  ;;  %v4529_v42 = vmul.f32 0.5, %v4497_v54  ;;  %7484 = vmatprep.mubr.msk.f32.mxu0 %vm4671_vm8, %v7943_v32 }
 0x3f6   : > { %v3953_v43 = vsel %vm3946_vm5, %v3949_v8, %v3952_v61  ;;  %v1061_v26 = vmul.f32 -4.4999995, %v1029_v60  ;;  %vm2405_vm2 = vcmp.eq.s32.totalorder %v11666_v38, 2  ;;  %v1028_v48 = vmul.f32 %v996_v51, %v996_v51  ;;  %v13662_v51 = vld [vmem:[#allocation25_spill] sm:$0xff] }
 0x3f7   : > { %vm11718_vm12 = vcmp.le.f32.partialorder %v13650_v25, 0.7853982  ;;  %v3954_v50 = vsel %vm3944_vm11, nan, %v3953_v43  ;;  %v7947_v49 = vpop.eup %7946  ;;  %v4657_v62 = vmul.f32 %v11632_v22, %v4529_v42  ;;  %v2297_v52 = vand.u32 3, %v2293_v15 }
 0x3f8   : > { %v3837_v11 = vsel %vm11718_vm12, %v10438_v63, %v11164_v28  ;;  %v4496_v13 = vadd.f32 1.0, %v3954_v50  ;;  %vm13654_vm10 = vcmp.lt.s32.totalorder %v10438_v63, 0  ;;  %v7949_v56 = vpop.eup %7948  ;;  %vm2402_vm14 = vcmp.eq.s32.totalorder %v11666_v38, 0  ;;  %7485 = vmatmul.mubr.msk.f32.gmra.mxu0 %vm4671_vm8, %v7945_v59 }
 0x3f9   : > { %7958 = vcosq.f32 %v3837_v11  ;;  %v3836_v30 = vsel %vm13654_vm10, %v3835_v37, %v13653_v45  ;;  %v2406_v28 = vxor.u32 2147483648, %v7947_v49  ;;  %v1060_v46 = vmul.f32 -4.4999995, %v1028_v48  ;;  %5890 = vperm.xlu1 %7880, %v4657_v62   ;;  %v13666_v45 = vld [vmem:[#allocation32_spill] sm:$0xff] }
 0x3fa   : > { %7960 = vsinq.f32 %v3837_v11  ;;  %v4528_v41 = vmul.f32 0.5, %v4496_v13  ;;  %v2403_v24 = vxor.u32 2147483648, %v7949_v56  ;;  %vm2296_vm0 = vweird.f32 %v13643_v57  ;;  %v13667_v13 = vld [vmem:[#allocation49_spill] sm:$0xff] }
 0x3fb   : > { %v1108_v22 = vmul.f32 1.442695, %v1061_v26  ;;  %v2407_v10 = vsel %vm2405_vm2, %v2406_v28, %v7949_v56  ;;  %v1106_v58 = vmul.f32 1.442695, %v1060_v46  ;;  %v3838_v2 = vsel %vm11718_vm12, 0, %v3836_v30  ;;  %v7951_v44 = vpop.eup %7950  ;;  %v8237_v30 = vld [vmem:[%s8435_s25 + $0xc0] sm:$0xff] }
 0x3fc   : > { %v13655_v5 = vand.u32 2147483647, %v10517_v40  ;;  %v4656_v19 = vmul.f32 %v11662_v39, %v4528_v41  ;;  %v2404_v21 = vsel %vm2402_vm14, %v7947_v49, %v2403_v24  ;;  %vm2299_vm7 = vcmp.eq.s32.totalorder %v2297_v52, 0  ;;  %v7953_v53 = vpop.eup %7952  ;;  %v13660_v39 = vld [vmem:[#allocation77_spill] sm:$0xff] }
 0x3fd   : > { %v11758_v7 = vsel %vm4544_vm6, 1.0, %v8314_v20  ;;  %vm3545_vm11 = vcmp.lt.s32.totalorder %v13658_v1, 0  ;;  %vm3442_vm5 = vcmp.lt.s32.totalorder %v13659_v29, 0  ;;  %v2408_v31 = vsel %vm2401_vm15, %v2404_v21, %v2407_v10  ;;  %7487 = vmatprep.mubr.msk.f32.mxu0 %vm4671_vm8, %v7953_v53  ;;  %v13672_v53 = vld [vmem:[#allocation27_spill] sm:$0xff] }
 0x3fe   : > { %vm11747_vm9 = vcmp.le.f32.partialorder %v13655_v5, 0.7853982  ;;  %vm2302_vm4 = vcmp.eq.s32.totalorder %v2297_v52, 2  ;;  %7962 = vpow2.f32 %v1106_v58  ;;  %v3732_v17 = vsub.s32 4, %v13660_v39  ;;  %v7955_v23 = vpop.eup %7954  ;;  %5885 = vperm.xlu0 %7879, %v4656_v19   ;;  %7488 = vmatmul.mubr.msk.f32.gmra.mxu0 %vm4671_vm8, %v7951_v44 }
 0x3ff   : > { %v2409_v6 = vsel %vm2399_vm3, nan, %v2408_v31  ;;  %7964 = vpow2.f32 %v1108_v22  ;;  %v3842_v0 = vand.u32 3, %v3838_v2  ;;  %v3734_v35 = vsel %vm11747_vm9, %v10517_v40, %v11171_v16  ;;  %v7957_v38 = vpop.eup %7956  ;;  %v13669_v22 = vld [vmem:[#allocation78_spill] sm:$0xff] }
 0x400   : > { %vm4559_vm6 = vcmp.lt.f32.partialorder %v8236_v12, 5.0  ;;  %v4481_v27 = vadd.f32 1.0, %v2409_v6  ;;  %v2303_v32 = vxor.u32 2147483648, %v7955_v23  ;;  %vm13661_vm13 = vcmp.lt.s32.totalorder %v10517_v40, 0  ;;  %v11831_v6 = vld [vmem:[%s8435_s25 + $0x48] sm:$0xff] }
 0x401   : > { %v3733_v55 = vsel %vm13661_vm13, %v3732_v17, %v13660_v39  ;;  %7966 = vcosq.f32 %v3734_v35  ;;  %vm2298_vm1 = vcmp.lt.s32.totalorder %v2297_v52, 2  ;;  %v2300_v18 = vxor.u32 2147483648, %v7957_v38 }
 0x402   : > { %7968 = vsinq.f32 %v3734_v35  ;;  %v999_v16 = vsub.f32 %v904_v4, %v11713_v3  ;;  %v4513_v47 = vmul.f32 0.5, %v4481_v27  ;;  %v2304_v54 = vsel %vm2302_vm4, %v2303_v32, %v7957_v38  ;;  %v909_v27 = vpop.permute.xlu0 %908 }
 0x403   : > { %v3735_v61 = vsel %vm11747_vm9, 0, %v3733_v55  ;;  %v998_v15 = vsub.f32 %v899_v14, %v11713_v3  ;;  %v2301_v60 = vsel %vm2299_vm7, %v7955_v23, %v2300_v18  ;;  %v13663_v25 = vand.u32 2147483647, %v13662_v51  ;;  %v13676_v14 = vld [vmem:[#allocation38_spill] sm:$0xff] }
 0x404   : > { %v1031_v8 = vmul.f32 %v999_v16, %v999_v16  ;;  %v2187_v37 = vsub.s32 4, %v13666_v45  ;;  %v4641_v59 = vmul.f32 %v11698_v34, %v4513_v47  ;;  %v2305_v42 = vsel %vm2298_vm1, %v2301_v60, %v2304_v54 }
 0x405   : > { %vm11785_vm3 = vcmp.le.f32.partialorder %v13663_v25, 0.7853982  ;;  %vm3843_vm15 = vcmp.lt.s32.totalorder %v3842_v0, 2  ;;  %vm3844_vm12 = vcmp.eq.s32.totalorder %v3842_v0, 0  ;;  %v2306_v26 = vsel %vm2296_vm0, nan, %v2305_v42 }
 0x406   : > { %v7959_v43 = vpop.eup %7958  ;;  %vm3847_vm2 = vcmp.eq.s32.totalorder %v3842_v0, 2  ;;  %v1063_v11 = vmul.f32 -4.4999995, %v1031_v8  ;;  %v1030_v50 = vmul.f32 %v998_v15, %v998_v15  ;;  %5810 = vperm.xlu1 %7880, %v4641_v59   ;;  %v4480_v48 = vadd.f32 1.0, %v2306_v26  ;;  %v13677_v0 = vld [vmem:[#allocation56_spill] sm:$0xff] }
 0x407   : > { %v3848_v49 = vxor.u32 2147483648, %v7959_v43  ;;  %v3739_v62 = vand.u32 3, %v3735_v61  ;;  %v2189_v52 = vsel %vm11785_vm3, %v13662_v51, %v13667_v13  ;;  %v7961_v34 = vpop.eup %7960  ;;  %vm4558_vm10 = vcmp.lt.f32.partialorder %v8237_v30, 5.0 }
 0x408   : > { %v1112_v56 = vmul.f32 1.442695, %v1063_v11  ;;  %v1062_v28 = vmul.f32 -4.4999995, %v1030_v50  ;;  %vm13668_vm14 = vcmp.lt.s32.totalorder %v13662_v51, 0  ;;  %7970 = vcosq.f32 %v2189_v52  ;;  %v7881_v11 = vld [vmem:[#allocation3] sm:$0xff]  }
 0x409   : > { %v2188_v57 = vsel %vm13668_vm14, %v2187_v37, %v13666_v45  ;;  %v4512_v46 = vmul.f32 0.5, %v4480_v48  ;;  %v3845_v41 = vxor.u32 2147483648, %v7961_v34  ;;  %v3849_v24 = vsel %vm3847_vm2, %v3848_v49, %v7961_v34  ;;  %v11863_v34 = vld [vmem:[%s8435_s25 + $0x40] sm:$0xff]  ;;  %7597 = vmatprep.subr.bf16.mxu0 %v7881_v11 }
 0x40a   : > { %7972 = vsinq.f32 %v2189_v52  ;;  %v13670_v10 = vxor.u32 2147483648, %v13669_v22  ;;  %v13671_v2 = vxor.u32 2147483648, %v11084_v33  ;;  %vm3841_vm0 = vweird.f32 %v10438_v63  ;;  %7598 = vmatpush3.bf16.msra.mxu0 %v7881_v11 }
 0x40b   : > { %v1110_v36 = vmul.f32 1.442695, %v1062_v28  ;;  %v4640_v44 = vmul.f32 %v11758_v7, %v4512_v46  ;;  %v3846_v19 = vsel %vm3844_vm12, %v7959_v43, %v3845_v41  ;;  %v2190_v21 = vsel %vm11785_vm3, 0, %v2188_v57  ;;  %v7963_v17 = vpop.eup %7962  ;;  %v914_v7 = vpop.permute.xlu1 %913  ;;  %v8240_v46 = vld [vmem:[%s8435_s25 + $0xb8] sm:$0xff] }
 0x40c   : > { %v11807_v58 = vsel %vm3545_vm11, %v13670_v10, %v13669_v22  ;;  %v11814_v5 = vsel %vm3442_vm5, %v13671_v2, %v11084_v33  ;;  %v13673_v31 = vand.u32 2147483647, %v13672_v53  ;;  %v3850_v33 = vsel %vm3843_vm15, %v3846_v19, %v3849_v24  ;;  %v7965_v23 = vpop.eup %7964  ;;  %7490 = vmatprep.mubr.msk.f32.mxu0 %vm4671_vm8, %v7963_v17 }
 0x40d   : > { %v7106_v4 = vsel %vm4559_vm6, 1.0, %v8314_v20  ;;  %vm3741_vm7 = vcmp.eq.s32.totalorder %v3739_v62, 0  ;;  %7974 = vpow2.f32 %v1110_v36  ;;  %vm4543_vm4 = vcmp.lt.f32.partialorder %v11831_v6, 5.0  ;;  %5805 = vperm.xlu0 %7879, %v4640_v44   ;;  %7491 = vmatmul.mubr.msk.f32.gmra.mxu0 %vm4671_vm8, %v7965_v23 }
 0x40e   : > { %vm11823_vm9 = vcmp.le.f32.partialorder %v13673_v31, 0.7853982  ;;  %v3851_v35 = vsel %vm3841_vm0, nan, %v3850_v33  ;;  %7976 = vpow2.f32 %v1112_v56  ;;  %v2084_v38 = vsub.s32 4, %v13676_v14  ;;  %v7967_v32 = vpop.eup %7966 }
 0x40f   : > { %v2086_v12 = vsel %vm11823_vm9, %v13672_v53, %v13677_v0  ;;  %v4495_v55 = vadd.f32 1.0, %v3851_v35  ;;  %vm3744_vm6 = vcmp.eq.s32.totalorder %v3739_v62, 2  ;;  %v2194_v18 = vand.u32 3, %v2190_v21  ;;  %v7969_v63 = vpop.eup %7968  ;;  %v924_v6 = vpop.permute.xlu1 %923 }
 0x410   : > { %7978 = vcosq.f32 %v2086_v12  ;;  %v3745_v16 = vxor.u32 2147483648, %v7967_v32  ;;  %vm13678_vm13 = vcmp.lt.s32.totalorder %v13672_v53, 0  ;;  %v1001_v54 = vsub.f32 %v914_v7, %v11713_v3  ;;  %v13686_v7 = vld [vmem:[#allocation71_spill] sm:$0xff] }
 0x411   : > { %v2085_v47 = vsel %vm13678_vm13, %v2084_v38, %v13676_v14  ;;  %7980 = vsinq.f32 %v2086_v12  ;;  %v4527_v61 = vmul.f32 0.5, %v4495_v55  ;;  %vm3740_vm1 = vcmp.lt.s32.totalorder %v3739_v62, 2  ;;  %v13682_v62 = vld [vmem:[#allocation70_spill] sm:$0xff]  ;;  %v919_v12 = vpop.permute.xlu0 %918 }
 0x412   : > { %v3742_v15 = vxor.u32 2147483648, %v7969_v63  ;;  %v1000_v60 = vsub.f32 %v909_v27, %v11713_v3  ;;  %vm3738_vm3 = vweird.f32 %v10517_v40  ;;  %v3746_v8 = vsel %vm3744_vm6, %v3745_v16, %v7969_v63 }
 0x413   : > { %v2087_v25 = vsel %vm11823_vm9, 0, %v2085_v47  ;;  %v1033_v9 = vmul.f32 %v1001_v54, %v1001_v54  ;;  %v4655_v45 = vmul.f32 %v7106_v4, %v4527_v61  ;;  %v13679_v42 = vand.u32 2147483647, %v13658_v1 }
 0x414   : > { %v3743_v37 = vsel %vm3741_vm7, %v7967_v32, %v3742_v15  ;;  %v1032_v59 = vmul.f32 %v1000_v60, %v1000_v60  ;;  %v7105_v40 = vsel %vm4558_vm10, 1.0, %v8314_v20  ;;  %vm2193_vm12 = vweird.f32 %v13662_v51 }
 0x415   : > { %vm11854_vm15 = vcmp.le.f32.partialorder %v13679_v42, 0.7853982  ;;  %v3747_v26 = vsel %vm3740_vm1, %v3743_v37, %v3746_v8  ;;  %vm2196_vm2 = vcmp.eq.s32.totalorder %v2194_v18, 0  ;;  %5880 = vperm.xlu1 %7880, %v4655_v45   ;;  %v1065_v48 = vmul.f32 -4.4999995, %v1033_v9  ;;  %v7971_v52 = vpop.eup %7970  ;;  %v13687_v8 = vld [vmem:[#allocation22_spill] sm:$0xff] }
 0x416   : > { %v3748_v50 = vsel %vm3738_vm3, nan, %v3747_v26  ;;  %v1064_v49 = vmul.f32 -4.4999995, %v1032_v59  ;;  %v3629_v13 = vsub.s32 4, %v13682_v62  ;;  %vm4542_vm14 = vcmp.lt.f32.partialorder %v11863_v34, 5.0  ;;  %v11916_v42 = vld [vmem:[%s8435_s25 + $0xb0] sm:$0xff] }
 0x417   : > { %v4494_v56 = vadd.f32 1.0, %v3748_v50  ;;  %vm2199_vm0 = vcmp.eq.s32.totalorder %v2194_v18, 2  ;;  %v2091_v30 = vand.u32 3, %v2087_v25  ;;  %v3631_v28 = vsel %vm11854_vm15, %v13658_v1, %v11807_v58  ;;  %v7973_v57 = vpop.eup %7972 }
 0x418   : > { %vm4557_vm10 = vcmp.lt.f32.partialorder %v8240_v46, 5.0  ;;  %v2200_v41 = vxor.u32 2147483648, %v7971_v52  ;;  %v1116_v24 = vmul.f32 1.442695, %v1065_v48  ;;  %v1114_v22 = vmul.f32 1.442695, %v1064_v49 }
 0x419   : > { %7982 = vcosq.f32 %v3631_v28  ;;  %v4526_v10 = vmul.f32 0.5, %v4494_v56  ;;  %vm2195_vm9 = vcmp.lt.s32.totalorder %v2194_v18, 2  ;;  %v2197_v2 = vxor.u32 2147483648, %v7973_v57  ;;  %v13691_v49 = vld [vmem:[#allocation28_spill] sm:$0xff] }
 0x41a   : > { %7984 = vsinq.f32 %v3631_v28  ;;  %v2201_v36 = vsel %vm2199_vm0, %v2200_v41, %v7973_v57  ;;  %v7090_v44 = vsel %vm4543_vm4, 1.0, %v8314_v20  ;;  %v3630_v58 = vsel %vm3545_vm11, %v3629_v13, %v13682_v62  ;;  %v7975_v31 = vpop.eup %7974  ;;  %v13692_v13 = vld [vmem:[#allocation45_spill] sm:$0xff] }
 0x41b   : > { %v13683_v19 = vand.u32 2147483647, %v13659_v29  ;;  %v4654_v39 = vmul.f32 %v7105_v40, %v4526_v10  ;;  %v2198_v17 = vsel %vm2196_vm2, %v7971_v52, %v2197_v2  ;;  %vm2090_vm6 = vweird.f32 %v13672_v53  ;;  %v7977_v33 = vpop.eup %7976  ;;  %7493 = vmatprep.mubr.msk.f32.mxu0 %vm4671_vm8, %v7975_v31  ;;  %v13712_v31 = vld [vmem:[#allocation68_spill] sm:$0xff] }
 0x41c   : > { %7986 = vpow2.f32 %v1114_v22  ;;  %v2202_v4 = vsel %vm2195_vm9, %v2198_v17, %v2201_v36  ;;  %vm2093_vm4 = vcmp.eq.s32.totalorder %v2091_v30, 0  ;;  %v3526_v23 = vsub.s32 4, %v13686_v7  ;;  %7494 = vmatmul.mubr.msk.f32.gmra.mxu0 %vm4671_vm8, %v7977_v33  ;;  %v934_v36 = vpop.permute.xlu1 %933  ;;  %v13698_v17 = vld [vmem:[#allocation29_spill] sm:$0xff] }
 0x41d   : > { %vm11880_vm7 = vcmp.le.f32.partialorder %v13683_v19, 0.7853982  ;;  %7988 = vpow2.f32 %v1116_v24  ;;  %v7979_v35 = vpop.eup %7978  ;;  %5875 = vperm.xlu0 %7879, %v4654_v39   ;;  %v2203_v14 = vsel %vm2193_vm12, nan, %v2202_v4  ;;  %vm2096_vm11 = vcmp.eq.s32.totalorder %v2091_v30, 2  ;;  %v13694_v19 = vld [vmem:[#allocation23_spill] sm:$0xff]  ;;  %v13699_v4 = vld [vmem:[#allocation48_spill] sm:$0xff] }
 0x41e   : > { %v3632_v38 = vsel %vm11854_vm15, 0, %v3630_v58  ;;  %v3528_v0 = vsel %vm11880_vm7, %v13659_v29, %v11814_v5  ;;  %v7981_v27 = vpop.eup %7980  ;;  %v4479_v32 = vadd.f32 1.0, %v2203_v14  ;;  %v2097_v55 = vxor.u32 2147483648, %v7979_v35 }
 0x41f   : > { %v3527_v51 = vsel %vm3442_vm5, %v3526_v23, %v13686_v7  ;;  %7990 = vcosq.f32 %v3528_v0  ;;  %vm2092_vm13 = vcmp.lt.s32.totalorder %v2091_v30, 2  ;;  %v2094_v18 = vxor.u32 2147483648, %v7981_v27  ;;  %v929_v23 = vpop.permute.xlu0 %928 }
 0x420   : > { %7992 = vsinq.f32 %v3528_v0  ;;  %v1003_v63 = vsub.f32 %v924_v6, %v11713_v3  ;;  %v4511_v16 = vmul.f32 0.5, %v4479_v32  ;;  %v2098_v47 = vsel %vm2096_vm11, %v2097_v55, %v7981_v27 }
 0x421   : > { %v3636_v5 = vand.u32 3, %v3632_v38  ;;  %v1002_v54 = vsub.f32 %v919_v12, %v11713_v3  ;;  %v2095_v61 = vsel %vm2093_vm4, %v7979_v35, %v2094_v18  ;;  %v3529_v15 = vsel %vm11880_vm7, 0, %v3527_v51  ;;  %v8242_v35 = vld [vmem:[%s8435_s25 + $0x38] sm:$0xff] }
 0x422   : > { %v1035_v60 = vmul.f32 %v1003_v63, %v1003_v63  ;;  %v13688_v25 = vand.u32 2147483647, %v13687_v8  ;;  %v4639_v45 = vmul.f32 %v7090_v44, %v4511_v16  ;;  %v2099_v37 = vsel %vm2092_vm13, %v2095_v61, %v2098_v47 }
 0x423   : > { %v7089_v59 = vsel %vm4542_vm14, 1.0, %v8314_v20  ;;  %vm3635_vm1 = vweird.f32 %v13658_v1  ;;  %vm4556_vm3 = vcmp.lt.f32.partialorder %v11916_v42, 5.0  ;;  %v2100_v43 = vsel %vm2090_vm6, nan, %v2099_v37 }
 0x424   : > { %vm11907_vm5 = vcmp.le.f32.partialorder %v13688_v25, 0.7853982  ;;  %v11923_v26 = vsel %vm4557_vm10, 1.0, %v8314_v20  ;;  %v1067_v40 = vmul.f32 -4.4999995, %v1035_v60  ;;  %v1034_v11 = vmul.f32 %v1002_v54, %v1002_v54  ;;  %5800 = vperm.xlu1 %7880, %v4639_v45   ;;  %v13701_v60 = vld [vmem:[#allocation55_spill] sm:$0xff] }
 0x425   : > { %v4478_v50 = vadd.f32 1.0, %v2100_v43  ;;  %v11925_v48 = vand.u32 3, %v3529_v15  ;;  %v1981_v62 = vsub.s32 4, %v13691_v49  ;;  %v1983_v52 = vsel %vm11907_vm5, %v13687_v8, %v13692_v13 }
 0x426   : > { %v7983_v34 = vpop.eup %7982  ;;  %vm3638_vm15 = vcmp.eq.s32.totalorder %v3636_v5, 0  ;;  %vm3641_vm12 = vcmp.eq.s32.totalorder %v3636_v5, 2  ;;  %v1066_v53 = vmul.f32 -4.4999995, %v1034_v11  ;;  %7994 = vcosq.f32 %v1983_v52  ;;  %v13705_v11 = vld [vmem:[#allocation65_spill] sm:$0xff] }
 0x427   : > { %v7985_v56 = vpop.eup %7984  ;;  %v4510_v30 = vmul.f32 0.5, %v4478_v50  ;;  %v3642_v28 = vxor.u32 2147483648, %v7983_v34  ;;  %v1120_v57 = vmul.f32 1.442695, %v1067_v40  ;;  %7996 = vsinq.f32 %v1983_v52 }
 0x428   : > { %vm3637_vm2 = vcmp.lt.s32.totalorder %v3636_v5, 2  ;;  %v3639_v46 = vxor.u32 2147483648, %v7985_v56  ;;  %vm3532_vm14 = vweird.f32 %v13659_v29  ;;  %v1118_v41 = vmul.f32 1.442695, %v1066_v53 }
 0x429   : > { %v7987_v24 = vpop.eup %7986  ;;  %v4638_v22 = vmul.f32 %v7089_v59, %v4510_v30  ;;  %v3643_v10 = vsel %vm3641_vm12, %v3642_v28, %v7985_v56  ;;  %vm3534_vm0 = vcmp.lt.s32.totalorder %v11925_v48, 2  ;;  %vm13693_vm10 = vcmp.lt.s32.totalorder %v13687_v8, 0  ;;  %v8244_v56 = vld [vmem:[%s8435_s25 + $0xa8] sm:$0xff] }
 0x42a   : > { %v1982_v2 = vsel %vm13693_vm10, %v1981_v62, %v13691_v49  ;;  %v7989_v44 = vpop.eup %7988  ;;  %v3640_v58 = vsel %vm3638_vm15, %v7983_v34, %v3639_v46  ;;  %vm3538_vm9 = vcmp.eq.s32.totalorder %v11925_v48, 2  ;;  %7998 = vpow2.f32 %v1118_v41  ;;  %7496 = vmatprep.mubr.msk.f32.mxu0 %vm4671_vm8, %v7987_v24  ;;  %v8243_v62 = vld [vmem:[%s8435_s25 + $0x30] sm:$0xff]  ;;  %v13708_v41 = vld [vmem:[#allocation60_spill] sm:$0xff] }
 0x42b   : > { %v13695_v21 = vand.u32 2147483647, %v13694_v19  ;;  %5795 = vperm.xlu0 %7879, %v4638_v22   ;;  %v3644_v39 = vsel %vm3637_vm2, %v3640_v58, %v3643_v10  ;;  %8000 = vpow2.f32 %v1120_v57  ;;  %v1878_v33 = vsub.s32 4, %v13698_v17  ;;  %7497 = vmatmul.mubr.msk.f32.gmra.mxu0 %vm4671_vm8, %v7989_v44 }
 0x42c   : > { %v7991_v6 = vpop.eup %7990  ;;  %vm4541_vm6 = vcmp.lt.f32.partialorder %v8242_v35, 5.0  ;;  %v3645_v14 = vsel %vm3635_vm1, nan, %v3644_v39  ;;  %v1984_v38 = vsel %vm11907_vm5, 0, %v1982_v2  ;;  %v1005_v0 = vsub.f32 %v934_v36, %v11713_v3  ;;  %v939_v35 = vpop.permute.xlu0 %938 }
 0x42d   : > { %vm11941_vm7 = vcmp.le.f32.partialorder %v13695_v21, 0.7853982  ;;  %v7993_v12 = vpop.eup %7992  ;;  %v4493_v27 = vadd.f32 1.0, %v3645_v14  ;;  %vm3535_vm4 = vcmp.eq.s32.totalorder %v11925_v48, 0  ;;  %v3539_v32 = vxor.u32 2147483648, %v7991_v6  ;;  %v13706_v48 = vld [vmem:[#allocation75_spill] sm:$0xff] }
 0x42e   : > { %v1880_v7 = vsel %vm11941_vm7, %v13694_v19, %v13699_v4  ;;  %v3536_v55 = vxor.u32 2147483648, %v7993_v12  ;;  %vm13700_vm11 = vcmp.lt.s32.totalorder %v13694_v19, 0  ;;  %v1037_v18 = vmul.f32 %v1005_v0, %v1005_v0 }
 0x42f   : > { %8002 = vcosq.f32 %v1880_v7  ;;  %v1879_v51 = vsel %vm13700_vm11, %v1878_v33, %v13698_v17  ;;  %v1004_v1 = vsub.f32 %v929_v23, %v11713_v3  ;;  %v4525_v63 = vmul.f32 0.5, %v4493_v27  ;;  %v944_v17 = vpop.permute.xlu1 %943  ;;  %v13713_v23 = vld [vmem:[#allocation76_spill] sm:$0xff] }
 0x430   : > { %8004 = vsinq.f32 %v1880_v7  ;;  %v3540_v16 = vsel %vm3538_vm9, %v3539_v32, %v7993_v12  ;;  %v7103_v47 = vsel %vm4556_vm3, 1.0, %v8314_v20  ;;  %v1988_v5 = vand.u32 3, %v1984_v38 }
 0x431   : > { %v3537_v54 = vsel %vm3535_vm4, %v7991_v6, %v3536_v55  ;;  %v1069_v61 = vmul.f32 -4.4999995, %v1037_v18  ;;  %v1036_v15 = vmul.f32 %v1004_v1, %v1004_v1  ;;  %v13702_v25 = vand.u32 2147483647, %v13701_v60 }
 0x432   : > { %v4653_v45 = vmul.f32 %v11923_v26, %v4525_v63  ;;  %v3541_v37 = vsel %vm3534_vm0, %v3537_v54, %v3540_v16  ;;  %vm1987_vm5 = vweird.f32 %v13687_v8  ;;  %v1881_v59 = vsel %vm11941_vm7, 0, %v1879_v51 }
 0x433   : > { %vm11971_vm13 = vcmp.le.f32.partialorder %v13702_v25, 0.7853982  ;;  %v3542_v42 = vsel %vm3532_vm14, nan, %v3541_v37  ;;  %v1124_v43 = vmul.f32 1.442695, %v1069_v61  ;;  %v3423_v50 = vsub.s32 4, %v13705_v11  ;;  %v7995_v49 = vpop.eup %7994 }
 0x434   : > { %v1068_v40 = vmul.f32 -4.4999995, %v1036_v15  ;;  %vm4540_vm1 = vcmp.lt.f32.partialorder %v8243_v62, 5.0  ;;  %5870 = vperm.xlu1 %7880, %v4653_v45   ;;  %v4492_v26 = vadd.f32 1.0, %v3542_v42  ;;  %vm1990_vm3 = vcmp.eq.s32.totalorder %v1988_v5, 0  ;;  %v7997_v52 = vpop.eup %7996 }
 0x435   : > { %vm1993_vm15 = vcmp.eq.s32.totalorder %v1988_v5, 2  ;;  %v3425_v13 = vsel %vm11971_vm13, %v13701_v60, %v13706_v48  ;;  %v1994_v29 = vxor.u32 2147483648, %v7995_v49  ;;  %v1885_v34 = vand.u32 3, %v1881_v59  ;;  %v13719_v59 = vld [vmem:[#allocation24_spill] sm:$0xff] }
 0x436   : > { %8006 = vpow2.f32 %v1124_v43  ;;  %v1122_v53 = vmul.f32 1.442695, %v1068_v40  ;;  %vm4555_vm12 = vcmp.lt.f32.partialorder %v8244_v56, 5.0  ;;  %v4524_v30 = vmul.f32 0.5, %v4492_v26  ;;  %v12037_v43 = vld [vmem:[%s8435_s25 + $0xa0] sm:$0xff] }
 0x437   : > { %vm1989_vm2 = vcmp.lt.s32.totalorder %v1988_v5, 2  ;;  %v1991_v28 = vxor.u32 2147483648, %v7997_v52  ;;  %8008 = vcosq.f32 %v3425_v13  ;;  %v1995_v57 = vsel %vm1993_vm15, %v1994_v29, %v7997_v52  ;;  %v7999_v10 = vpop.eup %7998 }
 0x438   : > { %8010 = vpow2.f32 %v1122_v53  ;;  %vm13707_vm14 = vcmp.lt.s32.totalorder %v13701_v60, 0  ;;  %v13709_v24 = vand.u32 2147483647, %v13708_v41  ;;  %v4652_v2 = vmul.f32 %v7103_v47, %v4524_v30  ;;  %v8001_v58 = vpop.eup %8000  ;;  %7499 = vmatprep.mubr.msk.f32.mxu0 %vm4671_vm8, %v7999_v10  ;;  %v13715_v47 = vld [vmem:[#allocation18_spill] sm:$0xff]  ;;  %v13722_v30 = vld [vmem:[#allocation20_spill] sm:$0xff]  ;;  %v949_v10 = vpop.permute.xlu0 %948 }
 0x439   : > { %v3424_v46 = vsel %vm13707_vm14, %v3423_v50, %v13705_v11  ;;  %v1992_v36 = vsel %vm1990_vm3, %v7995_v49, %v1991_v28  ;;  %v7088_v44 = vsel %vm4541_vm6, 1.0, %v8314_v20  ;;  %8012 = vsinq.f32 %v3425_v13  ;;  %7500 = vmatmul.mubr.msk.f32.gmra.mxu0 %vm4671_vm8, %v8001_v58  ;;  %v13720_v49 = vld [vmem:[#allocation40_spill] sm:$0xff] }
 0x43a   : > { %vm11995_vm0 = vcmp.le.f32.partialorder %v13709_v24, 0.7853982  ;;  %v1996_v21 = vsel %vm1989_vm2, %v1992_v36, %v1995_v57  ;;  %vm1884_vm10 = vweird.f32 %v13694_v19  ;;  %vm1887_vm9 = vcmp.eq.s32.totalorder %v1885_v34, 0  ;;  %5865 = vperm.xlu0 %7879, %v4652_v2  }
 0x43b   : > { %v3320_v39 = vsub.s32 4, %v13712_v31  ;;  %v1997_v4 = vsel %vm1987_vm5, nan, %v1996_v21  ;;  %vm1890_vm7 = vcmp.eq.s32.totalorder %v1885_v34, 2  ;;  %v3426_v7 = vsel %vm11971_vm13, 0, %v3424_v46  ;;  %v954_v46 = vpop.permute.xlu1 %953 }
 0x43c   : > { %v8003_v33 = vpop.eup %8002  ;;  %v3322_v6 = vsel %vm11995_vm0, %v13708_v41, %v13713_v23  ;;  %v4477_v38 = vadd.f32 1.0, %v1997_v4  ;;  %vm13714_vm6 = vcmp.lt.s32.totalorder %v13708_v41, 0  ;;  %vm1886_vm4 = vcmp.lt.s32.totalorder %v1885_v34, 2  ;;  %v12103_v54 = vpop.permute.xlu0 %958 }
 0x43d   : > { %v8005_v14 = vpop.eup %8004  ;;  %v1891_v0 = vxor.u32 2147483648, %v8003_v33  ;;  %v3321_v8 = vsel %vm13714_vm6, %v3320_v39, %v13712_v31  ;;  %8014 = vcosq.f32 %v3322_v6  ;;  %v1007_v27 = vsub.f32 %v944_v17, %v11713_v3  ;;  %v13727_v31 = vld [vmem:[#allocation43_spill] sm:$0xff] }
 0x43e   : > { %v1888_v12 = vxor.u32 2147483648, %v8005_v14  ;;  %8016 = vsinq.f32 %v3322_v6  ;;  %v4509_v32 = vmul.f32 0.5, %v4477_v38  ;;  %v12018_v51 = vand.u32 3, %v3426_v7  ;;  %v12082_v6 = vld [vmem:[%s8435_s25 + $0x28] sm:$0xff] }
 0x43f   : > { %v1892_v55 = vsel %vm1890_vm7, %v1891_v0, %v8005_v14  ;;  %v1006_v18 = vsub.f32 %v939_v35, %v11713_v3  ;;  %v3323_v63 = vsel %vm11995_vm0, 0, %v3321_v8  ;;  %v1039_v16 = vmul.f32 %v1007_v27, %v1007_v27  ;;  %v13728_v35 = vld [vmem:[#allocation50_spill] sm:$0xff] }
 0x440   : > { %v1889_v1 = vsel %vm1887_vm9, %v8003_v33, %v1888_v12  ;;  %v13716_v5 = vand.u32 2147483647, %v13715_v47  ;;  %v4637_v61 = vmul.f32 %v7088_v44, %v4509_v32  ;;  %v7087_v25 = vsel %vm4540_vm1, 1.0, %v8314_v20  ;;  %v13726_v44 = vld [vmem:[#allocation26_spill] sm:$0xff] }
 0x441   : > { %v1893_v15 = vsel %vm1886_vm4, %v1889_v1, %v1892_v55  ;;  %vm3429_vm13 = vweird.f32 %v13701_v60  ;;  %v1071_v45 = vmul.f32 -4.4999995, %v1039_v16  ;;  %v1038_v37 = vmul.f32 %v1006_v18, %v1006_v18 }
 0x442   : > { %vm12026_vm11 = vcmp.le.f32.partialorder %v13716_v5, 0.7853982  ;;  %v1894_v9 = vsel %vm1884_vm10, nan, %v1893_v15  ;;  %v1775_v42 = vsub.s32 4, %v13719_v59  ;;  %vm4554_vm5 = vcmp.lt.f32.partialorder %v12037_v43, 5.0  ;;  %5790 = vperm.xlu1 %7880, %v4637_v61   ;;  %v12101_v5 = vpop.permute.xlu1 %963  ;;  %v13734_v43 = vld [vmem:[#allocation59_spill] sm:$0xff] }
 0x443   : > { %v4476_v40 = vadd.f32 1.0, %v1894_v9  ;;  %v12042_v11 = vsel %vm4555_vm12, 1.0, %v8314_v20  ;;  %v12044_v50 = vand.u32 3, %v3323_v63  ;;  %v1777_v19 = vsel %vm12026_vm11, %v13715_v47, %v13720_v49  ;;  %v8007_v62 = vpop.eup %8006  ;;  %v13735_v49 = vld [vmem:[#allocation73_spill] sm:$0xff] }
 0x444   : > { %vm3431_vm1 = vcmp.lt.s32.totalorder %v12018_v51, 2  ;;  %vm3432_vm3 = vcmp.eq.s32.totalorder %v12018_v51, 0  ;;  %v1070_v26 = vmul.f32 -4.4999995, %v1038_v37  ;;  %8018 = vcosq.f32 %v1777_v19  ;;  %v8009_v48 = vpop.eup %8008 }
 0x445   : > { %v4508_v13 = vmul.f32 0.5, %v4476_v40  ;;  %vm3435_vm15 = vcmp.eq.s32.totalorder %v12018_v51, 2  ;;  %v1128_v52 = vmul.f32 1.442695, %v1071_v45  ;;  %8020 = vsinq.f32 %v1777_v19  ;;  %v8011_v29 = vpop.eup %8010  ;;  %v13730_v51 = vld [vmem:[#allocation51_spill] sm:$0xff] }
 0x446   : > { %v3436_v34 = vxor.u32 2147483648, %v8009_v48  ;;  %v1126_v53 = vmul.f32 1.442695, %v1070_v26  ;;  %vm13721_vm12 = vcmp.lt.s32.totalorder %v13715_v47, 0  ;;  %v13723_v28 = vand.u32 2147483647, %v13722_v30  ;;  %v8013_v24 = vpop.eup %8012  ;;  %7502 = vmatprep.mubr.msk.f32.mxu0 %vm4671_vm8, %v8011_v29 }
 0x447   : > { %v1776_v56 = vsel %vm13721_vm12, %v1775_v42, %v13719_v59  ;;  %v4636_v22 = vmul.f32 %v7087_v25, %v4508_v13  ;;  %vm3326_vm14 = vweird.f32 %v13708_v41  ;;  %vm3328_vm0 = vcmp.lt.s32.totalorder %v12044_v50, 2  ;;  %7503 = vmatmul.mubr.msk.f32.gmra.mxu0 %vm4671_vm8, %v8007_v62  ;;  %v12116_v59 = vld [vmem:[%s8435_s25 + $0x20] sm:$0xff] }
 0x448   : > { %vm12058_vm2 = vcmp.le.f32.partialorder %v13723_v28, 0.7853982  ;;  %vm3329_vm10 = vcmp.eq.s32.totalorder %v12044_v50, 0  ;;  %v3433_v2 = vxor.u32 2147483648, %v8013_v24  ;;  %v3437_v36 = vsel %vm3435_vm15, %v3436_v34, %v8013_v24  ;;  %v12129_v28 = vpop.permute.xlu0 %968 }
 0x449   : > { %8022 = vpow2.f32 %v1126_v53  ;;  %v1672_v58 = vsub.s32 4, %v13726_v44  ;;  %5785 = vperm.xlu0 %7879, %v4636_v22   ;;  %v1778_v21 = vsel %vm12026_vm11, 0, %v1776_v56  ;;  %v1674_v39 = vsel %vm12058_vm2, %v13722_v30, %v13727_v31  ;;  %v12127_v56 = vpop.permute.xlu1 %973  ;;  %v13742_v31 = vld [vmem:[#allocation69_spill] sm:$0xff] }
 0x44a   : > { %8024 = vpow2.f32 %v1128_v52  ;;  %v1009_v17 = vsub.f32 %v954_v46, %v11713_v3  ;;  %v8015_v33 = vpop.eup %8014  ;;  %v3434_v4 = vsel %vm3432_vm3, %v8009_v48, %v3433_v2  ;;  %vm3332_vm9 = vcmp.eq.s32.totalorder %v12044_v50, 2  ;;  %v13737_v46 = vld [vmem:[#allocation53_spill] sm:$0xff] }
 0x44b   : > { %8026 = vcosq.f32 %v1674_v39  ;;  %v1008_v7 = vsub.f32 %v949_v10, %v11713_v3  ;;  %v8017_v23 = vpop.eup %8016  ;;  %vm4539_vm7 = vcmp.lt.f32.partialorder %v12082_v6, 5.0  ;;  %vm2824_vm6 = vcmp.lt.s32.totalorder %v13728_v35, 0 }
 0x44c   : > { %v3438_v14 = vsel %vm3431_vm1, %v3434_v4, %v3437_v36  ;;  %v3333_v38 = vxor.u32 2147483648, %v8015_v33  ;;  %vm13729_vm4 = vcmp.lt.s32.totalorder %v13722_v30, 0  ;;  %8028 = vsinq.f32 %v1674_v39 }
 0x44d   : > { %v1673_v0 = vsel %vm13729_vm4, %v1672_v58, %v13726_v44  ;;  %v3439_v8 = vsel %vm3429_vm13, nan, %v3438_v14  ;;  %v3330_v12 = vxor.u32 2147483648, %v8017_v23  ;;  %v1782_v27 = vand.u32 3, %v1778_v21  ;;  %v13741_v44 = vld [vmem:[#allocation62_spill] sm:$0xff] }
 0x44e   : > { %v1041_v32 = vmul.f32 %v1009_v17, %v1009_v17  ;;  %v4491_v55 = vadd.f32 1.0, %v3439_v8  ;;  %v3334_v18 = vsel %vm3332_vm9, %v3333_v38, %v8017_v23  ;;  %v1040_v1 = vmul.f32 %v1008_v7, %v1008_v7 }
 0x44f   : > { %v13731_v63 = vand.u32 2147483647, %v13730_v51  ;;  %v3331_v60 = vsel %vm3329_vm10, %v8015_v33, %v3330_v12  ;;  %v7101_v61 = vsel %vm4554_vm5, 1.0, %v8314_v20  ;;  %vm1781_vm13 = vweird.f32 %v13715_v47  ;;  %v8248_v33 = vld [vmem:[%s8435_s25 + $0x98] sm:$0xff]  ;;  %v8249_v47 = vld [vmem:[%s8435_s25 + $0x90] sm:$0xff] }
 0x450   : > { %v1675_v15 = vsel %vm12058_vm2, 0, %v1673_v0  ;;  %v4523_v25 = vmul.f32 0.5, %v4491_v55  ;;  %v3335_v9 = vsel %vm3328_vm0, %v3331_v60, %v3334_v18  ;;  %v1073_v45 = vmul.f32 -4.4999995, %v1041_v32  ;;  %v13744_v0 = vld [vmem:[#allocation74_spill] sm:$0xff]  ;;  %v12170_v18 = vpop.permute.xlu1 %5983 }
 0x451   : > { %vm12097_vm11 = vcmp.le.f32.partialorder %v13731_v63, 0.7853982  ;;  %v1072_v37 = vmul.f32 -4.4999995, %v1040_v1  ;;  %vm4538_vm1 = vcmp.lt.f32.partialorder %v12116_v59, 5.0  ;;  %v3336_v42 = vsel %vm3326_vm14, nan, %v3335_v9  ;;  %v8019_v62 = vpop.eup %8018  ;;  %v12172_v1 = vpop.permute.xlu0 %5980 }
 0x452   : > { %vm1787_vm3 = vcmp.eq.s32.totalorder %v1782_v27, 2  ;;  %v3217_v40 = vsub.s32 4, %v13734_v43  ;;  %v3219_v19 = vsel %vm12097_vm11, %v13730_v51, %v13735_v49  ;;  %v4651_v50 = vmul.f32 %v12042_v11, %v4523_v25  ;;  %v8021_v52 = vpop.eup %8020  ;;  %v13750_v59 = vld [vmem:[#allocation19_spill] sm:$0xff] }
 0x453   : > { %v4490_v26 = vadd.f32 1.0, %v3336_v42  ;;  %v1132_v48 = vmul.f32 1.442695, %v1073_v45  ;;  %v1130_v13 = vmul.f32 1.442695, %v1072_v37  ;;  %vm1784_vm5 = vcmp.eq.s32.totalorder %v1782_v27, 0 }
 0x454   : > { %v1788_v29 = vxor.u32 2147483648, %v8019_v62  ;;  %v1679_v34 = vand.u32 3, %v1675_v15  ;;  %8030 = vcosq.f32 %v3219_v19  ;;  %5860 = vperm.xlu1 %7880, %v4651_v50   ;;  %vm1783_vm15 = vcmp.lt.s32.totalorder %v1782_v27, 2 }
 0x455   : > { %v4522_v41 = vmul.f32 0.5, %v4490_v26  ;;  %v1785_v53 = vxor.u32 2147483648, %v8021_v52  ;;  %8032 = vpow2.f32 %v1132_v48  ;;  %vm13736_vm12 = vcmp.lt.s32.totalorder %v13730_v51, 0  ;;  %v13751_v48 = vld [vmem:[#allocation34_spill] sm:$0xff] }
 0x456   : > { %v1789_v11 = vsel %vm1787_vm3, %v1788_v29, %v8021_v52  ;;  %8034 = vpow2.f32 %v1130_v13  ;;  %v3218_v57 = vsel %vm13736_vm12, %v3217_v40, %v13734_v43  ;;  %v13738_v24 = vand.u32 2147483647, %v13737_v46  ;;  %v8023_v10 = vpop.eup %8022  ;;  %v13752_v29 = vld [vmem:[#allocation12_spill] sm:$0xff] }
 0x457   : > { %v4650_v2 = vmul.f32 %v7101_v61, %v4522_v41  ;;  %v1786_v36 = vsel %vm1784_vm5, %v8019_v62, %v1785_v53  ;;  %8036 = vsinq.f32 %v3219_v19  ;;  %v3114_v58 = vsub.s32 4, %v13741_v44  ;;  %v8025_v21 = vpop.eup %8024  ;;  %7505 = vmatprep.mubr.msk.f32.mxu0 %vm4671_vm8, %v8023_v10  ;;  %v12205_v53 = vpop.permute.xlu1 %5989 }
 0x458   : > { %vm12137_vm2 = vcmp.le.f32.partialorder %v13738_v24, 0.7853982  ;;  %v13743_v39 = vxor.u32 2147483648, %v13742_v31  ;;  %vm4553_vm14 = vcmp.lt.f32.partialorder %v8248_v33, 5.0  ;;  %v1790_v4 = vsel %vm1783_vm15, %v1786_v36, %v1789_v11  ;;  %v8027_v23 = vpop.eup %8026  ;;  %7506 = vmatmul.mubr.msk.f32.gmra.mxu0 %vm4671_vm8, %v8025_v21  ;;  %v12207_v11 = vpop.permute.xlu0 %5986  ;;  %v13757_v21 = vld [vmem:[#allocation16_spill] sm:$0xff] }
 0x459   : > { %v7086_v7 = vsel %vm4539_vm7, 1.0, %v8314_v20  ;;  %vm1681_vm0 = vcmp.eq.s32.totalorder %v1679_v34, 0  ;;  %5855 = vperm.xlu0 %7879, %v4650_v2   ;;  %v1791_v14 = vsel %vm1781_vm13, nan, %v1790_v4  ;;  %vm1684_vm10 = vcmp.eq.s32.totalorder %v1679_v34, 2  ;;  %v8029_v6 = vpop.eup %8028 }
 0x45a   : > { %v12148_v17 = vsel %vm2824_vm6, %v13743_v39, %v13742_v31  ;;  %v3220_v38 = vsel %vm12097_vm11, 0, %v3218_v57  ;;  %v3116_v8 = vsel %vm12137_vm2, %v13737_v46, %v13744_v0  ;;  %v4475_v12 = vadd.f32 1.0, %v1791_v14 }
 0x45b   : > { %v1685_v27 = vxor.u32 2147483648, %v8027_v23  ;;  %vm13745_vm9 = vcmp.lt.s32.totalorder %v13737_v46, 0  ;;  %8038 = vcosq.f32 %v3116_v8  ;;  %vm4552_vm7 = vcmp.lt.f32.partialorder %v8249_v47, 5.0 }
 0x45c   : > { %v3115_v32 = vsel %vm13745_vm9, %v3114_v58, %v13741_v44  ;;  %vm1678_vm4 = vweird.f32 %v13722_v30  ;;  %vm1680_vm11 = vcmp.lt.s32.totalorder %v1679_v34, 2  ;;  %v1682_v55 = vxor.u32 2147483648, %v8029_v6 }
 0x45d   : > { %8040 = vsinq.f32 %v3116_v8  ;;  %v4507_v63 = vmul.f32 0.5, %v4475_v12  ;;  %v1686_v16 = vsel %vm1684_vm10, %v1685_v27, %v8029_v6  ;;  %v1011_v60 = vsub.f32 %v12101_v5, %v11713_v3  ;;  %v12230_v27 = vpop.permute.xlu1 %5995 }
 0x45e   : > { %v1010_v61 = vsub.f32 %v12103_v54, %v11713_v3  ;;  %v1683_v15 = vsel %vm1681_vm0, %v8027_v23, %v1682_v55  ;;  %v7085_v25 = vsel %vm4538_vm1, 1.0, %v8314_v20  ;;  %v3224_v9 = vand.u32 3, %v3220_v38  ;;  %v13746_v3 = vld [vmem:[#allocation14_spill] sm:$0xff] }
 0x45f   : > { %v3117_v45 = vsel %vm12137_vm2, 0, %v3115_v32  ;;  %v4635_v37 = vmul.f32 %v7086_v7, %v4507_v63  ;;  %v1687_v42 = vsel %vm1680_vm11, %v1683_v15, %v1686_v16  ;;  %v1043_v43 = vmul.f32 %v1011_v60, %v1011_v60  ;;  %v13758_v7 = vld [vmem:[#allocation30_spill] sm:$0xff]  ;;  %v12232_v32 = vpop.permute.xlu0 %5992  ;;  %v8250_v16 = vld [vmem:[%s13228_s2] ss:$0 sm:$0xff] }
 0x460   : > { %v1042_v40 = vmul.f32 %v1010_v61, %v1010_v61  ;;  %v1688_v5 = vsel %vm1678_vm4, nan, %v1687_v42  ;;  %vm3223_vm13 = vweird.f32 %v13730_v51  ;;  %v13747_v54 = vand.u32 2147483647, %v13746_v3 }
 0x461   : > { %v1569_v19 = vsub.s32 4, %v13750_v59  ;;  %5780 = vperm.xlu1 %7880, %v4635_v37   ;;  %v4474_v62 = vadd.f32 1.0, %v1688_v5  ;;  %v1075_v50 = vmul.f32 -4.4999995, %v1043_v43  ;;  %v8031_v13 = vpop.eup %8030  ;;  %vm3229_vm1 = vcmp.eq.s32.totalorder %v3224_v9, 2  ;;  %v13760_v5 = vld [vmem:[#allocation47_spill] sm:$0xff] }
 0x462   : > { %vm12190_vm3 = vcmp.le.f32.partialorder %v13747_v54, 0.7853982  ;;  %v1074_v26 = vmul.f32 -4.4999995, %v1042_v40  ;;  %v3121_v52 = vand.u32 3, %v3117_v45  ;;  %v8033_v57 = vpop.eup %8032  ;;  %v3230_v22 = vxor.u32 2147483648, %v8031_v13 }
 0x463   : > { %v1571_v30 = vsel %vm12190_vm3, %v13746_v3, %v13751_v48  ;;  %v13753_v34 = vand.u32 2147483647, %v13752_v29  ;;  %v4506_v24 = vmul.f32 0.5, %v4474_v62  ;;  %v1136_v10 = vmul.f32 1.442695, %v1075_v50  ;;  %v8035_v36 = vpop.eup %8034  ;;  %v13764_v54 = vld [vmem:[#allocation52_spill] sm:$0xff] }
 0x464   : > { %8042 = vcosq.f32 %v1571_v30  ;;  %v1134_v2 = vmul.f32 1.442695, %v1074_v26  ;;  %v7100_v44 = vsel %vm4553_vm14, 1.0, %v8314_v20  ;;  %vm13756_vm15 = vcmp.lt.s32.totalorder %v13746_v3, 0  ;;  %v8037_v39 = vpop.eup %8036  ;;  %7508 = vmatprep.mubr.msk.f32.mxu0 %vm4671_vm8, %v8035_v36  ;;  %v13765_v26 = vld [vmem:[#allocation66_spill] sm:$0xff]  ;;  %v12262_v48 = vld [vmem:[%s8435_s25 + $0x10] sm:$0xff] }
 0x465   : > { %vm12201_vm5 = vcmp.le.f32.partialorder %v13753_v34, 0.7853982  ;;  %v1570_v58 = vsel %vm13756_vm15, %v1569_v19, %v13750_v59  ;;  %8044 = vsinq.f32 %v1571_v30  ;;  %v1466_v31 = vsub.s32 4, %v13757_v21  ;;  %7509 = vmatmul.mubr.msk.f32.gmra.mxu0 %vm4671_vm8, %v8033_v57  ;;  %v12254_v59 = vld [vmem:[%s8435_s25 + $0x18] sm:$0xff]  ;;  %v12269_v34 = vpop.permute.xlu0 %5998 }
 0x466   : > { %v4634_v4 = vmul.f32 %v7085_v25, %v4506_v24  ;;  %vm3225_vm12 = vcmp.lt.s32.totalorder %v3224_v9, 2  ;;  %vm3226_vm2 = vcmp.eq.s32.totalorder %v3224_v9, 0  ;;  %v1468_v23 = vsel %vm12201_vm5, %v13752_v29, %v13758_v7 }
 0x467   : > { %v3227_v33 = vxor.u32 2147483648, %v8037_v39  ;;  %v3231_v14 = vsel %vm3229_vm1, %v3230_v22, %v8037_v39  ;;  %vm3120_vm14 = vweird.f32 %v13737_v46  ;;  %8046 = vpow2.f32 %v1134_v2 }
 0x468   : > { %5775 = vperm.xlu0 %7879, %v4634_v4   ;;  %vm3123_vm0 = vcmp.eq.s32.totalorder %v3121_v52, 0  ;;  %v7099_v38 = vsel %vm4552_vm7, 1.0, %v8314_v20  ;;  %8048 = vpow2.f32 %v1136_v10  ;;  %v1572_v0 = vsel %vm12190_vm3, 0, %v1570_v58  ;;  %v8039_v8 = vpop.eup %8038 }
 0x469   : > { %v3228_v6 = vsel %vm3226_vm2, %v8031_v13, %v3227_v33  ;;  %vm3126_vm10 = vcmp.eq.s32.totalorder %v3121_v52, 2  ;;  %vm13759_vm9 = vcmp.lt.s32.totalorder %v13752_v29, 0  ;;  %8050 = vcosq.f32 %v1468_v23 }
 0x46a   : > { %v1467_v12 = vsel %vm13759_vm9, %v1466_v31, %v13757_v21  ;;  %v8041_v55 = vpop.eup %8040  ;;  %v3232_v47 = vsel %vm3225_vm12, %v3228_v6, %v3231_v14  ;;  %v3127_v63 = vxor.u32 2147483648, %v8039_v8  ;;  %8052 = vsinq.f32 %v1468_v23  ;;  %v13770_v6 = vld [vmem:[#allocation54_spill] sm:$0xff] }
 0x46b   : > { %v1013_v60 = vsub.f32 %v12127_v56, %v8250_v16  ;;  %v3233_v61 = vsel %vm3223_vm13, nan, %v3232_v47  ;;  %vm3122_vm7 = vcmp.lt.s32.totalorder %v3121_v52, 2  ;;  %v3124_v15 = vxor.u32 2147483648, %v8041_v55  ;;  %v12267_v52 = vpop.permute.xlu1 %6001 }
 0x46c   : > { %v1576_v25 = vand.u32 3, %v1572_v0  ;;  %v4489_v45 = vadd.f32 1.0, %v3233_v61  ;;  %v3128_v9 = vsel %vm3126_vm10, %v3127_v63, %v8041_v55  ;;  %v1469_v37 = vsel %vm12201_vm5, 0, %v1467_v12  ;;  %v8253_v61 = vld [vmem:[%s8435_s25 + $0x88] sm:$0xff] }
 0x46d   : > { %v1045_v42 = vmul.f32 %v1013_v60, %v1013_v60  ;;  %v3125_v43 = vsel %vm3123_vm0, %v8039_v8, %v3124_v15  ;;  %v1012_v40 = vsub.f32 %v12129_v28, %v8250_v16  ;;  %v13761_v56 = vand.u32 2147483647, %v13760_v5 }
 0x46e   : > { %v3011_v49 = vsub.s32 4, %v13764_v54  ;;  %vm4537_vm11 = vcmp.lt.f32.partialorder %v12254_v59, 5.0  ;;  %v4521_v19 = vmul.f32 0.5, %v4489_v45  ;;  %v3129_v62 = vsel %vm3122_vm7, %v3125_v43, %v3128_v9 }
 0x46f   : > { %vm12248_vm4 = vcmp.le.f32.partialorder %v13761_v56, 0.7853982  ;;  %v1077_v50 = vmul.f32 -4.4999995, %v1045_v42  ;;  %vm4536_vm13 = vcmp.lt.f32.partialorder %v12262_v48, 5.0  ;;  %v3130_v30 = vsel %vm3120_vm14, nan, %v3129_v62  ;;  %v12289_v47 = vpop.permute.xlu1 %6007 }
 0x470   : > { %v3013_v28 = vsel %vm12248_vm4, %v13760_v5, %v13765_v26  ;;  %vm1581_vm3 = vcmp.eq.s32.totalorder %v1576_v25, 2  ;;  %v1044_v13 = vmul.f32 %v1012_v40, %v1012_v40  ;;  %v4649_v57 = vmul.f32 %v7100_v44, %v4521_v19 }
 0x471   : > { %8054 = vcosq.f32 %v3013_v28  ;;  %v8043_v41 = vpop.eup %8042  ;;  %v4488_v24 = vadd.f32 1.0, %v3130_v30  ;;  %v1473_v22 = vand.u32 3, %v1469_v37  ;;  %v1140_v10 = vmul.f32 1.442695, %v1077_v50  ;;  %v13775_v50 = vld [vmem:[#allocation35_spill] sm:$0xff] }
 0x472   : > { %v1582_v2 = vxor.u32 2147483648, %v8043_v41  ;;  %v1076_v36 = vmul.f32 -4.4999995, %v1044_v13  ;;  %vm13766_vm1 = vcmp.lt.s32.totalorder %v13760_v5, 0  ;;  %8056 = vsinq.f32 %v3013_v28  ;;  %v8045_v46 = vpop.eup %8044  ;;  %5850 = vperm.xlu1 %7880, %v4649_v57   ;;  %v13776_v57 = vld [vmem:[#allocation21_spill] sm:$0xff] }
 0x473   : > { %v3012_v58 = vsel %vm13766_vm1, %v3011_v49, %v13764_v54  ;;  %v4520_v21 = vmul.f32 0.5, %v4488_v24  ;;  %vm1575_vm5 = vweird.f32 %v13746_v3  ;;  %vm1577_vm15 = vcmp.lt.s32.totalorder %v1576_v25, 2  ;;  %v13771_v3 = vld [vmem:[#allocation15_spill] sm:$0xff]  ;;  %v12327_v28 = vpop.permute.xlu1 %6013 }
 0x474   : > { %vm1578_vm12 = vcmp.eq.s32.totalorder %v1576_v25, 0  ;;  %v1579_v31 = vxor.u32 2147483648, %v8045_v46  ;;  %v1583_v44 = vsel %vm1581_vm3, %v1582_v2, %v8045_v46  ;;  %v1138_v39 = vmul.f32 1.442695, %v1076_v36  ;;  %v8047_v23 = vpop.eup %8046 }
 0x475   : > { %v13767_v4 = vand.u32 2147483647, %v13728_v35  ;;  %v4648_v33 = vmul.f32 %v7099_v38, %v4520_v21  ;;  %vm1474_vm14 = vcmp.lt.s32.totalorder %v1473_v22, 2  ;;  %8058 = vpow2.f32 %v1140_v10  ;;  %v8049_v0 = vpop.eup %8048  ;;  %7511 = vmatprep.mubr.msk.f32.mxu0 %vm4671_vm8, %v8047_v23  ;;  %v12292_v38 = vpop.permute.xlu0 %6004 }
 0x476   : > { %v3014_v14 = vsel %vm12248_vm4, 0, %v3012_v58  ;;  %v1580_v8 = vsel %vm1578_vm12, %v8043_v41, %v1579_v31  ;;  %8060 = vpow2.f32 %v1138_v39  ;;  %v2908_v12 = vsub.s32 4, %v13770_v6  ;;  %v8051_v63 = vpop.eup %8050  ;;  %7512 = vmatmul.mubr.msk.f32.gmra.mxu0 %vm4671_vm8, %v8049_v0 }
 0x477   : > { %vm12278_vm2 = vcmp.le.f32.partialorder %v13767_v4, 0.7853982  ;;  %5845 = vperm.xlu0 %7879, %v4648_v33   ;;  %v1584_v16 = vsel %vm1577_vm15, %v1580_v8, %v1583_v44  ;;  %vm1475_vm0 = vcmp.eq.s32.totalorder %v1473_v22, 0  ;;  %vm1478_vm10 = vcmp.eq.s32.totalorder %v1473_v22, 2  ;;  %v8053_v60 = vpop.eup %8052  ;;  %v13783_v8 = vld [vmem:[#allocation33_spill] sm:$0xff]  ;;  %v8255_v4 = vld [vmem:[%s8435_s25 + $0x8] sm:$0xff] }
 0x478   : > { %v2910_v55 = vsel %vm12278_vm2, %v13728_v35, %v12148_v17  ;;  %vm4551_vm9 = vcmp.lt.f32.partialorder %v8253_v61, 5.0  ;;  %v1585_v17 = vsel %vm1575_vm5, nan, %v1584_v16  ;;  %v1479_v15 = vxor.u32 2147483648, %v8051_v63 }
 0x479   : > { %8062 = vcosq.f32 %v2910_v55  ;;  %v3018_v45 = vand.u32 3, %v3014_v14  ;;  %v4473_v9 = vadd.f32 1.0, %v1585_v17  ;;  %v1476_v37 = vxor.u32 2147483648, %v8053_v60  ;;  %v12329_v30 = vpop.permute.xlu0 %6010  ;;  %v13782_v14 = vld [vmem:[#allocation17_spill] sm:$0xff] }
 0x47a   : > { %8064 = vsinq.f32 %v2910_v55  ;;  %v2909_v25 = vsel %vm2824_vm6, %v2908_v12, %v13770_v6  ;;  %v5945_v42 = vlaneseq  ;;  %v7084_v43 = vsel %vm4537_vm11, 1.0, %v8314_v20  ;;  %v12354_v12 = vpop.permute.xlu1 %6019 }
 0x47b   : > { %vm1472_vm7 = vweird.f32 %v13752_v29  ;;  %v1480_v40 = vsel %vm1478_vm10, %v1479_v15, %v8053_v60  ;;  %v13772_v56 = vand.u32 2147483647, %v13771_v3  ;;  %v4505_v54 = vmul.f32 0.5, %v4473_v9 }
 0x47c   : > { %v1477_v49 = vsel %vm1475_vm0, %v8051_v63, %v1476_v37  ;;  %v7083_v19 = vsel %vm4536_vm13, 1.0, %v8314_v20  ;;  %v12318_v59 = vand.u32 127, %v5945_v42  ;;  %vm3023_vm6 = vcmp.eq.s32.totalorder %v3018_v45, 2 }
 0x47d   : > { %vm12309_vm4 = vcmp.le.f32.partialorder %v13772_v56, 0.7853982  ;;  %v1481_v29 = vsel %vm1474_vm14, %v1477_v49, %v1480_v40  ;;  %v2911_v62 = vsel %vm12278_vm2, 0, %v2909_v25  ;;  %v4633_v13 = vmul.f32 %v7084_v43, %v4505_v54  ;;  %v12356_v55 = vpop.permute.xlu0 %6016  ;;  %v8254_v54 = vld [vmem:[%s8435_s25 + $0x80] sm:$0xff] }
 0x47e   : > { %v1365_v26 = vsel %vm12309_vm4, %v13771_v3, %v13775_v50  ;;  %v8055_v48 = vpop.eup %8054  ;;  %v1482_v41 = vsel %vm1472_vm7, nan, %v1481_v29  ;;  %vm6076_vm11 = vcmp.eq.s32.totalorder %v12318_v59, %v12170_v18  ;;  %v1363_v24 = vsub.s32 4, %v13776_v57 }
 0x47f   : > { %v4472_v22 = vadd.f32 1.0, %v1482_v41  ;;  %vm3017_vm13 = vweird.f32 %v13760_v5  ;;  %v3024_v10 = vxor.u32 2147483648, %v8055_v48  ;;  %vm6075_vm3 = vcmp.eq.s32.totalorder %v12318_v59, %v12172_v1  ;;  %v8057_v2 = vpop.eup %8056  ;;  %5770 = vperm.xlu1 %7880, %v4633_v13   ;;  %v13778_v1 = vld [vmem:[#allocation13_spill] sm:$0xff] }
 0x480   : > { %vm3019_vm1 = vcmp.lt.s32.totalorder %v3018_v45, 2  ;;  %vm3020_vm5 = vcmp.eq.s32.totalorder %v3018_v45, 0  ;;  %v2915_v36 = vand.u32 3, %v2911_v62  ;;  %8066 = vcosq.f32 %v1365_v26  ;;  %v12382_v62 = vpop.permute.xlu1 %6025 }
 0x481   : > { %v4504_v58 = vmul.f32 0.5, %v4472_v22  ;;  %v3021_v46 = vxor.u32 2147483648, %v8057_v2  ;;  %v3025_v21 = vsel %vm3023_vm6, %v3024_v10, %v8057_v2  ;;  %v7180_v18 = vsel %vm6076_vm11, 1.0, %v8314_v20 }
 0x482   : > { %v7179_v31 = vsel %vm6075_vm3, 1.0, %v8314_v20  ;;  %vm13777_vm15 = vcmp.lt.s32.totalorder %v13771_v3, 0  ;;  %8068 = vsinq.f32 %v1365_v26  ;;  %v13779_v39 = vand.u32 2147483647, %v13778_v1  ;;  %v8059_v7 = vpop.eup %8058 }
 0x483   : > { %v1364_v44 = vsel %vm13777_vm15, %v1363_v24, %v13776_v57  ;;  %v4632_v23 = vmul.f32 %v7083_v19, %v4504_v58  ;;  %v3022_v33 = vsel %vm3020_vm5, %v8055_v48, %v3021_v46  ;;  %v1260_v0 = vsub.s32 4, %v13782_v14  ;;  %v8061_v63 = vpop.eup %8060 }
 0x484   : > { %vm12345_vm12 = vcmp.le.f32.partialorder %v13779_v39, 0.7853982  ;;  %v3026_v16 = vsel %vm3019_vm1, %v3022_v33, %v3025_v21  ;;  %v7098_v60 = vsel %vm4551_vm9, 1.0, %v8314_v20  ;;  %vm2917_vm2 = vcmp.eq.s32.totalorder %v2915_v36, 0  ;;  %7514 = vmatprep.mubr.msk.f32.mxu0 %vm4671_vm8, %v8061_v63  ;;  %v12409_v58 = vpop.permute.xlu1 %6031 }
 0x485   : > { %v1262_v6 = vsel %vm12345_vm12, %v13778_v1, %v13783_v8  ;;  %vm2920_vm14 = vcmp.eq.s32.totalorder %v2915_v36, 2  ;;  %5765 = vperm.xlu0 %7879, %v4632_v23   ;;  %v3027_v15 = vsel %vm3017_vm13, nan, %v3026_v16  ;;  %v6171_v9 = vpack.c.bf16 %v7180_v18, %v7179_v31  ;;  %7515 = vmatmul.mubr.msk.f32.gmra.mxu0 %vm4671_vm8, %v8059_v7 }
 0x486   : > { %v8063_v17 = vpop.eup %8062  ;;  %v1366_v37 = vsel %vm12309_vm4, 0, %v1364_v44  ;;  %8070 = vcosq.f32 %v1262_v6  ;;  %v4487_v25 = vadd.f32 1.0, %v3027_v15  ;;  %vm13784_vm0 = vcmp.lt.s32.totalorder %v13778_v1, 0 }
 0x487   : > { %v8065_v45 = vpop.eup %8064  ;;  %v2921_v43 = vxor.u32 2147483648, %v8063_v17  ;;  %v1261_v61 = vsel %vm13784_vm0, %v1260_v0, %v13782_v14  ;;  %8072 = vsinq.f32 %v1262_v6  ;;  %vm2914_vm10 = vweird.f32 %v13728_v35  ;;  %7599 = vmatprep.mubr.msk.bf16.mxu0 %vm4671_vm8, %v6171_v9 }
 0x488   : > { %vm2916_vm9 = vcmp.lt.s32.totalorder %v2915_v36, 2  ;;  %v2918_v5 = vxor.u32 2147483648, %v8065_v45  ;;  %vm6078_vm7 = vcmp.eq.s32.totalorder %v12318_v59, %v12205_v53  ;;  %v4519_v40 = vmul.f32 0.5, %v4487_v25  ;;  %v12384_v53 = vpop.permute.xlu0 %6022  ;;  %v12430_v16 = vpop.permute.xlu1 %6037 }
 0x489   : > { %v2922_v56 = vsel %vm2920_vm14, %v2921_v43, %v8065_v45  ;;  %v7182_v51 = vsel %vm6078_vm7, 1.0, %v8314_v20  ;;  %vm6077_vm4 = vcmp.eq.s32.totalorder %v12318_v59, %v12207_v11  ;;  %vm4550_vm6 = vcmp.lt.f32.partialorder %v8254_v54, 5.0 }
 0x48a   : > { %v2919_v49 = vsel %vm2917_vm2, %v8063_v17, %v2918_v5  ;;  %v1370_v19 = vand.u32 3, %v1366_v37  ;;  %v1263_v29 = vsel %vm12345_vm12, 0, %v1261_v61  ;;  %v4647_v50 = vmul.f32 %v7098_v60, %v4519_v40  ;;  %v5520_v40 = vld [vmem:[%s8470_s30 + $0x78] sm:$0xff] }
 0x48b   : > { %v2923_v26 = vsel %vm2916_vm9, %v2919_v49, %v2922_v56  ;;  %v7181_v48 = vsel %vm6077_vm4, 1.0, %v8314_v20  ;;  %vm6080_vm11 = vcmp.eq.s32.totalorder %v12318_v59, %v12230_v27  ;;  %vm6079_vm13 = vcmp.eq.s32.totalorder %v12318_v59, %v12232_v32  ;;  %v5519_v56 = vld [vmem:[%s8470_s30 + $0x70] sm:$0xff]  ;;  %7517 = vmatprep.subr.mxu1 %v5520_v40 }
 0x48c   : > { %v2924_v11 = vsel %vm2914_vm10, nan, %v2923_v26  ;;  %v6172_v13 = vpack.c.bf16 %v7182_v51, %v7181_v48  ;;  %v7184_v41 = vsel %vm6080_vm11, 1.0, %v8314_v20  ;;  %5840 = vperm.xlu1 %7880, %v4647_v50   ;;  %v7183_v24 = vsel %vm6079_vm13, 1.0, %v8314_v20  ;;  %v12411_v46 = vpop.permute.xlu0 %6028  ;;  %7518 = vmatpush3.msra.mxu1 %v5520_v40  ;;  %v5518_v50 = vld [vmem:[%s8470_s30 + $0x68] sm:$0xff] }
 0x48d   : > { %v4486_v57 = vadd.f32 1.0, %v2924_v11  ;;  %vm6082_vm3 = vcmp.eq.s32.totalorder %v12318_v59, %v12267_v52  ;;  %v8067_v22 = vpop.eup %8066  ;;  %v7097_v27 = vsel %vm4550_vm6, 1.0, %v8314_v20  ;;  %vm1375_vm1 = vcmp.eq.s32.totalorder %v1370_v19, 2  ;;  %7519 = vmatprep.subr.mxu1 %v5519_v56 }
 0x48e   : > { %v6173_v35 = vpack.c.bf16 %v7184_v41, %v7183_v24  ;;  %vm6081_vm5 = vcmp.eq.s32.totalorder %v12318_v59, %v12269_v34  ;;  %7600 = vmatmul.mubr.msk.bf16.vlgmr.msra.gmra.mxu0 %vm4671_vm8, %v6172_v13  ;;  %v1376_v32 = vxor.u32 2147483648, %v8067_v22  ;;  %v1267_v2 = vand.u32 3, %v1263_v29  ;;  %7520 = vmatpush3.msra.mxu1 %v5519_v56 }
 0x48f   : > { %v4518_v10 = vmul.f32 0.5, %v4486_v57  ;;  %vm6084_vm15 = vcmp.eq.s32.totalorder %v12318_v59, %v12289_v47  ;;  %v8069_v36 = vpop.eup %8068  ;;  %vm1371_vm12 = vcmp.lt.s32.totalorder %v1370_v19, 2  ;;  %vm1372_vm2 = vcmp.eq.s32.totalorder %v1370_v19, 0  ;;  %7521 = vmatprep.subr.mxu1 %v5518_v50  ;;  %v5516_v57 = vld [vmem:[%s8470_s30 + $0x58] sm:$0xff] }
 0x490   : > { %v7186_v52 = vsel %vm6082_vm3, 1.0, %v8314_v20  ;;  %vm6083_vm14 = vcmp.eq.s32.totalorder %v12318_v59, %v12292_v38  ;;  %7603 = vmatprep.mubr.msk.bf16.mxu0 %vm4671_vm8, %v6173_v35  ;;  %v1373_v18 = vxor.u32 2147483648, %v8069_v36  ;;  %v1377_v31 = vsel %vm1375_vm1, %v1376_v32, %v8069_v36  ;;  %v12432_v60 = vpop.permute.xlu0 %6034  ;;  %7522 = vmatpush3.msra.mxu1 %v5518_v50  ;;  %v5514_v35 = vld [vmem:[%s8470_s30 + $0x48] sm:$0xff] }
 0x491   : > { %v4646_v21 = vmul.f32 %v7097_v27, %v4518_v10  ;;  %v7185_v47 = vsel %vm6081_vm5, 1.0, %v8314_v20  ;;  %vm1369_vm0 = vweird.f32 %v13771_v3  ;;  %v7188_v44 = vsel %vm6084_vm15, 1.0, %v8314_v20 }
 0x492   : > { %v7187_v38 = vsel %vm6083_vm14, 1.0, %v8314_v20  ;;  %vm4535_vm10 = vcmp.lt.f32.partialorder %v8255_v4, 5.0  ;;  %v1374_v7 = vsel %vm1372_vm2, %v8067_v22, %v1373_v18  ;;  %vm1266_vm9 = vweird.f32 %v13778_v1  ;;  %v6044_v1 = vpop.permute.xlu1 %6043  ;;  %v5515_v22 = vld [vmem:[%s8470_s30 + $0x50] sm:$0xff]  ;;  %v5509_v4 = vld [vmem:[%s8470_s30 + $0x20] sm:$0xff] }
 0x493   : > { %v8071_v39 = vpop.eup %8070  ;;  %5835 = vperm.xlu0 %7879, %v4646_v21   ;;  %vm1272_vm7 = vcmp.eq.s32.totalorder %v1267_v2, 2  ;;  %v1378_v33 = vsel %vm1371_vm12, %v1374_v7, %v1377_v31  ;;  %vm1269_vm4 = vcmp.eq.s32.totalorder %v1267_v2, 0  ;;  %v6174_v14 = vpack.c.bf16 %v7186_v52, %v7185_v47  ;;  %v5512_v21 = vld [vmem:[%s8470_s30 + $0x38] sm:$0xff]  ;;  %v5511_v31 = vld [vmem:[%s8470_s30 + $0x30] sm:$0xff] }
 0x494   : > { %v8073_v23 = vpop.eup %8072  ;;  %v1273_v34 = vxor.u32 2147483648, %v8071_v39  ;;  %v1379_v3 = vsel %vm1369_vm0, nan, %v1378_v33  ;;  %vm1268_vm6 = vcmp.lt.s32.totalorder %v1267_v2, 2  ;;  %v6175_v8 = vpack.c.bf16 %v7188_v44, %v7187_v38  ;;  %v6041_v49 = vpop.permute.xlu0 %6040  ;;  %v5513_v2 = vld [vmem:[%s8470_s30 + $0x40] sm:$0xff] }
 0x495   : > { %v1270_v0 = vxor.u32 2147483648, %v8073_v23  ;;  %v4471_v6 = vadd.f32 1.0, %v1379_v3  ;;  %vm6086_vm11 = vcmp.eq.s32.totalorder %v12318_v59, %v12327_v28  ;;  %vm6085_vm13 = vcmp.eq.s32.totalorder %v12318_v59, %v12329_v30  ;;  %v8256_v28 = vld [vmem:[%s8435_s25] sm:$0xff]  ;;  %s13817_s25 = sld [smem:[#allocation11_spill]] }
 0x496   : > { %v1274_v63 = vsel %vm1272_vm7, %v1273_v34, %v8073_v23  ;;  %7604 = vmatmul.mubr.msk.bf16.gmra.mxu0 %vm4671_vm8, %v6174_v14  ;;  %v7082_v17 = vsel %vm4535_vm10, 1.0, %v8314_v20  ;;  %vm6088_vm3 = vcmp.eq.s32.totalorder %v12318_v59, %v12354_v12  ;;  %vm6087_vm1 = vcmp.eq.s32.totalorder %v12318_v59, %v12356_v55  ;;  %v6050_v13 = vpop.permute.xlu1 %6049  ;;  %v5508_v14 = vld [vmem:[%s8470_s30 + $0x18] sm:$0xff] }
 0x497   : > { %v1271_v15 = vsel %vm1269_vm4, %v8071_v39, %v1270_v0  ;;  %7607 = vmatprep.mubr.msk.bf16.mxu0 %vm4671_vm8, %v6175_v8  ;;  %vm4534_vm5 = vcmp.lt.f32.partialorder %v8256_v28, 5.0  ;;  %v4503_v30 = vmul.f32 0.5, %v4471_v6  ;;  %v7190_v45 = vsel %vm6086_vm11, 1.0, %v8314_v20  ;;  %v5510_v39 = vld [vmem:[%s8470_s30 + $0x28] sm:$0xff]  ;;  %v12500_v6 = vld [vmem:[%s8465_s4] ss:$0 sm:$0xff] }
 0x498   : > { %v1275_v9 = vsel %vm1268_vm6, %v1271_v15, %v1274_v63  ;;  %v7189_v25 = vsel %vm6085_vm13, 1.0, %v8314_v20  ;;  %v7192_v61 = vsel %vm6088_vm3, 1.0, %v8314_v20  ;;  %v7191_v55 = vsel %vm6087_vm1, 1.0, %v8314_v20  ;;  %v6047_v41 = vpop.permute.xlu0 %6046  ;;  %v5507_v63 = vld [vmem:[%s8470_s30 + $0x10] sm:$0xff] }
 0x499   : > { %v1276_v37 = vsel %vm1266_vm9, nan, %v1275_v9  ;;  %v4631_v43 = vmul.f32 %v7082_v17, %v4503_v30  ;;  %v7081_v5 = vsel %vm4534_vm5, 1.0, %v8314_v20  ;;  %v6176_v54 = vpack.c.bf16 %v7190_v45, %v7189_v25  ;;  %v5506_v17 = vld [vmem:[%s8470_s30 + $0x8] sm:$0xff]  ;;  %v5505_v30 = vld [vmem:[%s8470_s30] sm:$0xff] }
 0x49a   : > { %v4470_v12 = vadd.f32 1.0, %v1276_v37  ;;  %v6177_v19 = vpack.c.bf16 %v7192_v61, %v7191_v55  ;;  %vm6090_vm15 = vcmp.eq.s32.totalorder %v12318_v59, %v12382_v62  ;;  %vm6089_vm12 = vcmp.eq.s32.totalorder %v12318_v59, %v12384_v53  ;;  %v5517_v62 = vld [vmem:[%s8470_s30 + $0x60] sm:$0xff]  ;;  %v6056_v10 = vpop.permute.xlu1 %6055 }
 0x49b   : > { %5760 = vperm.xlu1 %7880, %v4631_v43   ;;  %vm6092_vm2 = vcmp.eq.s32.totalorder %v12318_v59, %v12409_v58  ;;  %vm6091_vm14 = vcmp.eq.s32.totalorder %v12318_v59, %v12411_v46  ;;  %v7194_v26 = vsel %vm6090_vm15, 1.0, %v8314_v20  ;;  %v7193_v53 = vsel %vm6089_vm12, 1.0, %v8314_v20  ;;  %7523 = vmatprep.subr.mxu1 %v5517_v62  ;;  %s13823_s14 = scalar_lea.vmem %s13822_s22, %s13817_s25 }
 0x49c   : > { %v4502_v51 = vmul.f32 0.5, %v4470_v12  ;;  %v7196_v48 = vsel %vm6092_vm2, 1.0, %v8314_v20  ;;  %v7195_v11 = vsel %vm6091_vm14, 1.0, %v8314_v20  ;;  %v6178_v24 = vpack.c.bf16 %v7194_v26, %v7193_v53  ;;  %7524 = vmatpush3.msra.mxu1 %v5517_v62  ;;  %v6053_v32 = vpop.permute.xlu0 %6052 }
 0x49d   : > { %v6179_v27 = vpack.c.bf16 %v7196_v48, %v7195_v11  ;;  %7525 = vmatprep.subr.mxu1 %v5516_v57  ;;  %vm6094_vm0 = vcmp.eq.s32.totalorder %v12318_v59, %v12430_v16  ;;  %vm6093_vm10 = vcmp.eq.s32.totalorder %v12318_v59, %v12432_v60  ;;  %vm6096_vm9 = vcmp.eq.s32.totalorder %v12318_v59, %v6044_v1 }
 0x49e   : > { %v4630_v29 = vmul.f32 %v7081_v5, %v4502_v51  ;;  %7608 = vmatmul.mubr.msk.bf16.gmra.mxu0 %vm4671_vm8, %v6176_v54  ;;  %7526 = vmatpush3.msra.mxu1 %v5516_v57  ;;  %vm6095_vm7 = vcmp.eq.s32.totalorder %v12318_v59, %v6041_v49  ;;  %v7198_v36 = vsel %vm6094_vm0, 1.0, %v8314_v20  ;;  %v7197_v52 = vsel %vm6093_vm10, 1.0, %v8314_v20  ;;  %v6062_v44 = vpop.permute.xlu1 %6061 }
 0x49f   : > { %7611 = vmatprep.mubr.msk.bf16.mxu0 %vm4671_vm8, %v6177_v19  ;;  %7527 = vmatprep.subr.mxu1 %v5515_v22  ;;  %v7200_v58 = vsel %vm6096_vm9, 1.0, %v8314_v20  ;;  %v7199_v46 = vsel %vm6095_vm7, 1.0, %v8314_v20  ;;  %v6180_v18 = vpack.c.bf16 %v7198_v36, %v7197_v52  ;;  %vm6098_vm4 = vcmp.eq.s32.totalorder %v12318_v59, %v6050_v13 }
 0x4a0   : > { %5755 = vperm.xlu0 %7879, %v4630_v29   ;;  %7528 = vmatpush3.msra.mxu1 %v5515_v22  ;;  %v6181_v47 = vpack.c.bf16 %v7200_v58, %v7199_v46  ;;  %vm6097_vm6 = vcmp.eq.s32.totalorder %v12318_v59, %v6047_v41  ;;  %v6059_v38 = vpop.permute.xlu0 %6058  ;;  %vm6100_vm11 = vcmp.eq.s32.totalorder %v12318_v59, %v6056_v10  ;;  %v7202_v7 = vsel %vm6098_vm4, 1.0, %v8314_v20 }
 0x4a1   : > { %7529 = vmatprep.subr.mxu1 %v5514_v35  ;;  %vm6099_vm13 = vcmp.eq.s32.totalorder %v12318_v59, %v6053_v32  ;;  %v7201_v23 = vsel %vm6097_vm6, 1.0, %v8314_v20  ;;  %v7204_v33 = vsel %vm6100_vm11, 1.0, %v8314_v20  ;;  %vm6102_vm3 = vcmp.eq.s32.totalorder %v12318_v59, %v6062_v44 }
 0x4a2   : > { %7530 = vmatpush3.msra.mxu1 %v5514_v35  ;;  %v7203_v34 = vsel %vm6099_vm13, 1.0, %v8314_v20  ;;  %v6182_v3 = vpack.c.bf16 %v7202_v7, %v7201_v23  ;;  %v6068_v0 = vpop.permute.xlu1 %6067  ;;  %vm6101_vm1 = vcmp.eq.s32.totalorder %v12318_v59, %v6059_v38  ;;  %v7206_v9 = vsel %vm6102_vm3, 1.0, %v8314_v20 }
 0x4a3   : > { %7531 = vmatprep.subr.mxu1 %v5513_v2  ;;  %v6183_v16 = vpack.c.bf16 %v7204_v33, %v7203_v34  ;;  %vm6104_vm5 = vcmp.eq.s32.totalorder %v12318_v59, %v6068_v0  ;;  %v7205_v37 = vsel %vm6101_vm1, 1.0, %v8314_v20 }
 0x4a4   : > { %7532 = vmatpush3.msra.mxu1 %v5513_v2  ;;  %v6065_v8 = vpop.permute.xlu0 %6064  ;;  %v7471_v60 = vpop.f32.mrf.mxu0  ;;  %v7208_v43 = vsel %vm6104_vm5, 1.0, %v8314_v20  ;;  %v6184_v54 = vpack.c.bf16 %v7206_v9, %v7205_v37 }
 0x4a5   : > { %7533 = vmatprep.subr.mxu1 %v5512_v21  ;;  %vm6103_vm15 = vcmp.eq.s32.totalorder %v12318_v59, %v6065_v8  ;;  %v12511_v15 = vadd.f32 %v7471_v60, %v12500_v6 }
 0x4a6   : > { %7612 = vmatmul.mubr.msk.bf16.gmra.mxu0 %vm4671_vm8, %v6178_v24  ;;  %7534 = vmatpush3.msra.mxu1 %v5512_v21  ;;  %v4834_v28 = vpop.f32.mrf.mxu0  ;;  %v7207_v12 = vsel %vm6103_vm15, 1.0, %v8314_v20  ;;  %v6074_v55 = vpop.permute.xlu1 %6073 }
 0x4a7   : > { %7615 = vmatprep.mubr.msk.bf16.mxu0 %vm4671_vm8, %v6179_v27  ;;  %7535 = vmatprep.subr.mxu1 %v5511_v31  ;;  %v5026_v45 = vand.u32 2147483647, %v12511_v15  ;;  %v12518_v25 = vadd.f32 %v12500_v6, %v4834_v28  ;;  %v6185_v49 = vpack.c.bf16 %v7208_v43, %v7207_v12  ;;  %vm6106_vm12 = vcmp.eq.s32.totalorder %v12318_v59, %v6074_v55 }
 0x4a8   : > { %7536 = vmatpush3.msra.mxu1 %v5511_v31  ;;  %v7474_v61 = vpop.f32.mrf.mxu0  ;;  %v6071_v5 = vpop.permute.xlu0 %6070  ;;  %v7210_v57 = vsel %vm6106_vm12, 1.0, %v8314_v20 }
 0x4a9   : > { %7537 = vmatprep.subr.mxu1 %v5510_v39  ;;  %v5058_v40 = vsub.f32 0.0, %v5026_v45  ;;  %v5025_v56 = vand.u32 2147483647, %v12518_v25  ;;  %v12524_v51 = vadd.f32 %v7474_v61, %v12500_v6  ;;  %vm6105_vm2 = vcmp.eq.s32.totalorder %v12318_v59, %v6071_v5 }
 0x4aa   : > { %7538 = vmatpush3.msra.mxu1 %v5510_v39  ;;  %v4844_v1 = vpop.f32.mrf.mxu0  ;;  %v7209_v59 = vsel %vm6105_vm2, 1.0, %v8314_v20 }
 0x4ab   : > { %7539 = vmatprep.subr.mxu1 %v5509_v4  ;;  %v5091_v19 = vmul.f32 1.442695, %v5058_v40  ;;  %v5057_v29 = vsub.f32 0.0, %v5025_v56  ;;  %v5028_v50 = vand.u32 2147483647, %v12524_v51  ;;  %v12531_v62 = vadd.f32 %v12500_v6, %v4844_v1 }
 0x4ac   : > { %7540 = vmatpush3.msra.mxu1 %v5509_v4  ;;  %v7477_v26 = vpop.f32.mrf.mxu0  ;;  %v6186_v36 = vpack.c.bf16 %v7210_v57, %v7209_v59  ;;  %v4996_v59 = vmax.f32 %v12524_v51, 0.0 }
 0x4ad   : > { %7541 = vmatprep.subr.mxu1 %v5508_v14  ;;  %8074 = vpow2.f32 %v5091_v19  ;;  %v5089_v53 = vmul.f32 1.442695, %v5057_v29  ;;  %v5060_v48 = vsub.f32 0.0, %v5028_v50  ;;  %v12535_v11 = vadd.f32 %v7477_v26, %v12500_v6 }
 0x4ae   : > { %7616 = vmatmul.mubr.msk.bf16.gmra.mxu0 %vm4671_vm8, %v6180_v18  ;;  %7542 = vmatpush3.msra.mxu1 %v5508_v14  ;;  %v5027_v13 = vand.u32 2147483647, %v12531_v62  ;;  %v4854_v41 = vpop.f32.mrf.mxu0 }
 0x4af   : > { %7619 = vmatprep.mubr.msk.bf16.mxu0 %vm4671_vm8, %v6181_v47  ;;  %7543 = vmatprep.subr.mxu1 %v5507_v63  ;;  %8076 = vpow2.f32 %v5089_v53  ;;  %v5030_v24 = vand.u32 2147483647, %v12535_v11  ;;  %v12542_v27 = vadd.f32 %v12500_v6, %v4854_v41  ;;  %v5095_v10 = vmul.f32 1.442695, %v5060_v48 }
 0x4b0   : > { %7544 = vmatpush3.msra.mxu1 %v5507_v63  ;;  %v5059_v22 = vsub.f32 0.0, %v5027_v13  ;;  %v7480_v35 = vpop.f32.mrf.mxu0  ;;  %v4994_v48 = vmax.f32 %v12511_v15, 0.0  ;;  %v4993_v41 = vmax.f32 %v12518_v25, 0.0 }
 0x4b1   : > { %7545 = vmatprep.subr.mxu1 %v5506_v17  ;;  %v5062_v32 = vsub.f32 0.0, %v5030_v24  ;;  %v12545_v2 = vadd.f32 %v7480_v35, %v12500_v6  ;;  %v5029_v58 = vand.u32 2147483647, %v12542_v27  ;;  %v4995_v24 = vmax.f32 %v12531_v62, 0.0 }
 0x4b2   : > { %7546 = vmatpush3.msra.mxu1 %v5506_v17  ;;  %v5093_v52 = vmul.f32 1.442695, %v5059_v22  ;;  %v4864_v46 = vpop.f32.mrf.mxu0  ;;  %v4998_v35 = vmax.f32 %v12535_v11, 0.0 }
 0x4b3   : > { %7547 = vmatprep.subr.mxu1 %v5505_v30  ;;  %v5032_v20 = vand.u32 2147483647, %v12545_v2  ;;  %v12550_v21 = vadd.f32 %v12500_v6, %v4864_v46  ;;  %v5061_v18 = vsub.f32 0.0, %v5029_v58  ;;  %v5099_v47 = vmul.f32 1.442695, %v5062_v32 }
 0x4b4   : > { %7548 = vmatpush3.msra.mxu1 %v5505_v30  ;;  %8078 = vpow2.f32 %v5093_v52  ;;  %v7483_v31 = vpop.f32.mrf.mxu0 }
 0x4b5   : > { %8080 = vpow2.f32 %v5095_v10  ;;  %v5031_v44 = vand.u32 2147483647, %v12550_v21  ;;  %v5097_v38 = vmul.f32 1.442695, %v5061_v18  ;;  %v12555_v39 = vadd.f32 %v7483_v31, %v12500_v6 }
 0x4b6   : > { %7620 = vmatmul.mubr.msk.bf16.gmra.mxu0 %vm4671_vm8, %v6182_v3  ;;  %v4874_v4 = vpop.f32.mrf.mxu0  ;;  %v5064_v7 = vsub.f32 0.0, %v5032_v20  ;;  %v4997_v18 = vmax.f32 %v12542_v27, 0.0  ;;  %v5000_v31 = vmax.f32 %v12545_v2, 0.0 }
 0x4b7   : > { %7623 = vmatprep.mubr.msk.bf16.mxu0 %vm4671_vm8, %v6183_v16  ;;  %v5063_v23 = vsub.f32 0.0, %v5031_v44  ;;  %v12558_v33 = vadd.f32 %v12500_v6, %v4874_v4  ;;  %8082 = vpow2.f32 %v5097_v38  ;;  %v5034_v34 = vand.u32 2147483647, %v12555_v39 }
 0x4b8   : > { %v7486_v14 = vpop.f32.mrf.mxu0  ;;  %8084 = vpow2.f32 %v5099_v47  ;;  %v5103_v60 = vmul.f32 1.442695, %v5064_v7  ;;  %v4999_v7 = vmax.f32 %v12550_v21, 0.0 }
 0x4b9   : > { %v5101_v3 = vmul.f32 1.442695, %v5063_v23  ;;  %v5033_v0 = vand.u32 2147483647, %v12558_v33  ;;  %v12565_v63 = vadd.f32 %v7486_v14, %v12500_v6  ;;  %v5066_v17 = vsub.f32 0.0, %v5034_v34 }
 0x4ba   : > { %v12562_v8 = vpop.eup %8074  ;;  %v4884_v16 = vpop.f32.mrf.mxu0 }
 0x4bb   : > { %v12568_v28 = vadd.f32 %v12500_v6, %v4884_v16  ;;  %v5065_v9 = vsub.f32 0.0, %v5033_v0  ;;  %v5036_v37 = vand.u32 2147483647, %v12565_v63  ;;  %8086 = vpow2.f32 %v5101_v3 }
 0x4bc   : > { %v12570_v30 = vpop.eup %8076  ;;  %v5162_v61 = vadd.f32 1.0, %v12562_v8  ;;  %8088 = vpow2.f32 %v5103_v60  ;;  %v5107_v56 = vmul.f32 1.442695, %v5066_v17  ;;  %v5165_v22 = vmul.f32 -0.5, %v12562_v8 }
 0x4bd   : > { %v5035_v43 = vand.u32 2147483647, %v12568_v28  ;;  %v5068_v55 = vsub.f32 0.0, %v5036_v37  ;;  %v5153_v40 = vadd.f32 1.0, %v12570_v30  ;;  %v5105_v1 = vmul.f32 1.442695, %v5065_v9 }
 0x4be   : > { %7624 = vmatmul.mubr.msk.bf16.gmra.mxu0 %vm4671_vm8, %v6184_v54  ;;  %v7489_v45 = vpop.f32.mrf.mxu0  ;;  %v5156_v57 = vmul.f32 -0.5, %v12570_v30  ;;  %v5159_v44 = vand.u32 2147483647, %v12570_v30  ;;  %v5166_v38 = vadd.f32 1.0, %v5165_v22  ;;  %v5168_v23 = vand.u32 2147483647, %v12562_v8 }
 0x4bf   : > { %7627 = vmatprep.mubr.msk.bf16.mxu0 %vm4671_vm8, %v6185_v49  ;;  %v12575_v12 = vadd.f32 %v7489_v45, %v12500_v6  ;;  %v5067_v49 = vsub.f32 0.0, %v5035_v43  ;;  %8090 = vlog2.f32 %v5153_v40  ;;  %v5111_v50 = vmul.f32 1.442695, %v5068_v55 }
 0x4c0   : > { %v4894_v5 = vpop.f32.mrf.mxu0  ;;  %8092 = vlog2.f32 %v5162_v61  ;;  %v5157_v47 = vadd.f32 1.0, %v5156_v57  ;;  %v5002_v17 = vmax.f32 %v12555_v39, 0.0  ;;  %v5001_v9 = vmax.f32 %v12558_v33, 0.0 }
 0x4c1   : > { %v5038_v54 = vand.u32 2147483647, %v12575_v12  ;;  %v12581_v19 = vadd.f32 %v12500_v6, %v4894_v5  ;;  %v12583_v29 = vpop.eup %8078  ;;  %8094 = vpow2.f32 %v5107_v56  ;;  %v5109_v10 = vmul.f32 1.442695, %v5067_v49 }
 0x4c2   : > { %v12585_v53 = vpop.eup %8080  ;;  %8096 = vpow2.f32 %v5105_v1  ;;  %v5171_v32 = vadd.f32 1.0, %v12583_v29  ;;  %v5174_v4 = vmul.f32 -0.5, %v12583_v29  ;;  %v5177_v0 = vand.u32 2147483647, %v12583_v29 }
 0x4c3   : > { %v5070_v26 = vsub.f32 0.0, %v5038_v54  ;;  %v5037_v13 = vand.u32 2147483647, %v12581_v19  ;;  %8098 = vpow2.f32 %v5111_v50  ;;  %v5180_v46 = vadd.f32 1.0, %v12585_v53 }
 0x4c4   : > { %8100 = vlog2.f32 %v5171_v32  ;;  %v5158_v37 = vmul.f32 %v12570_v30, %v5157_v47  ;;  %v5167_v61 = vmul.f32 %v12562_v8, %v5166_v38  ;;  %v5175_v55 = vadd.f32 1.0, %v5174_v4 }
 0x4c5   : > { %v5115_v52 = vmul.f32 1.442695, %v5070_v26  ;;  %v5069_v58 = vsub.f32 0.0, %v5037_v13  ;;  %8102 = vlog2.f32 %v5180_v46  ;;  %vm12625_vm14 = vcmp.lt.f32.partialorder %v5168_v23, 0.0004427343 }
 0x4c6   : > { %7628 = vmatmul.mubr.msk.bf16.gmra.mxu0 %vm4671_vm8, %v6186_v36  ;;  %v12596_v36 = vpop.eup %8082  ;;  %8104 = vpow2.f32 %v5109_v10  ;;  %vm12615_vm8 = vcmp.lt.f32.partialorder %v5159_v44, 0.0004427343  ;;  %v5183_v30 = vmul.f32 -0.5, %v12585_v53  ;;  %vm12631_vm0 = vcmp.lt.f32.partialorder %v5177_v0, 0.0004427343 }
 0x4c7   : > { %v12599_v20 = vpop.eup %8084  ;;  %v5189_v34 = vadd.f32 1.0, %v12596_v36  ;;  %8106 = vpow2.f32 %v5115_v52  ;;  %v5113_v14 = vmul.f32 1.442695, %v5069_v58  ;;  %v5192_v54 = vmul.f32 -0.5, %v12596_v36 }
 0x4c8   : > { %v5198_v16 = vadd.f32 1.0, %v12599_v20  ;;  %v12610_v60 = vpop.eup %8086  ;;  %v5186_v8 = vand.u32 2147483647, %v12585_v53  ;;  %v5201_v10 = vmul.f32 -0.5, %v12599_v20  ;;  %v5176_v52 = vmul.f32 %v12583_v29, %v5175_v55 }
 0x4c9   : > { %8108 = vlog2.f32 %v5189_v34  ;;  %v12620_v5 = vpop.eup %8088  ;;  %v5207_v50 = vadd.f32 1.0, %v12610_v60  ;;  %v5195_v58 = vand.u32 2147483647, %v12596_v36  ;;  %v5184_v44 = vadd.f32 1.0, %v5183_v30 }
 0x4ca   : > { %8110 = vlog2.f32 %v5198_v16  ;;  %v5193_v38 = vadd.f32 1.0, %v5192_v54  ;;  %v5204_v4 = vand.u32 2147483647, %v12599_v20  ;;  %vm12661_vm10 = vcmp.lt.f32.partialorder %v5186_v8, 0.0004427343 }
 0x4cb   : > { %8112 = vpow2.f32 %v5113_v14  ;;  %v5202_v43 = vadd.f32 1.0, %v5201_v10  ;;  %vm12665_vm9 = vcmp.lt.f32.partialorder %v5195_v58, 0.0004427343  ;;  %v5185_v15 = vmul.f32 %v12585_v53, %v5184_v44 }
 0x4cc   : > { %v8091_v1 = vpop.eup %8090  ;;  %8114 = vlog2.f32 %v5207_v50  ;;  %vm12675_vm7 = vcmp.lt.f32.partialorder %v5204_v4, 0.0004427343 }
 0x4cd   : > { %v7492_v3 = vpop.f32.mrf.mxu0  ;;  %v8093_v26 = vpop.eup %8092  ;;  %v5155_v22 = vmul.f32 0.6931472, %v8091_v1  ;;  %v5203_v58 = vmul.f32 %v12599_v20, %v5202_v43  ;;  %v5219_v20 = vmul.f32 -0.5, %v12620_v5 }
 0x4ce   : > { %v12638_v13 = vadd.f32 %v7492_v3, %v12500_v6  ;;  %v5164_v32 = vmul.f32 0.6931472, %v8093_v26  ;;  %v12644_v46 = vpop.eup %8094  ;;  %v5216_v3 = vadd.f32 1.0, %v12620_v5  ;;  %v5194_v26 = vmul.f32 %v12596_v36, %v5193_v38 }
 0x4cf   : > { %v4904_v45 = vpop.f32.mrf.mxu0  ;;  %v5161_v47 = vsel %vm12615_vm8, %v5158_v37, %v5155_v22  ;;  %v12649_v23 = vpop.eup %8096 }
 0x4d0   : > { %v12623_v40 = vadd.f32 %v12500_v6, %v4904_v45  ;;  %v5441_v14 = vadd.f32 %v5161_v47, %v4993_v41  ;;  %v5170_v29 = vsel %vm12625_vm14, %v5167_v61, %v5164_v32  ;;  %v12656_v0 = vpop.eup %8098  ;;  %v5040_v16 = vand.u32 2147483647, %v12638_v13 }
 0x4d1   : > { %v5442_v37 = vadd.f32 %v5170_v29, %v4994_v48  ;;  %v8101_v55 = vpop.eup %8100  ;;  %v5210_v61 = vmul.f32 -0.5, %v12610_v60  ;;  %8116 = vlog2.f32 %v5216_v3  ;;  %v5225_v48 = vadd.f32 1.0, %v12649_v23 }
 0x4d2   : > { %v5039_v57 = vand.u32 2147483647, %v12623_v40  ;;  %v7146_v25 = vadd.f32 -0.6931472, %v5441_v14  ;;  %v8103_v56 = vpop.eup %8102  ;;  %v5173_v54 = vmul.f32 0.6931472, %v8101_v55 }
 0x4d3   : > { %v7147_v30 = vadd.f32 -0.6931472, %v5442_v37  ;;  %v12672_v1 = vpop.eup %8104  ;;  %v5182_v50 = vmul.f32 0.6931472, %v8103_v56  ;;  %v5072_v10 = vsub.f32 0.0, %v5040_v16  ;;  %8118 = vlog2.f32 %v5225_v48 }
 0x4d4   : > { %v5071_v34 = vsub.f32 0.0, %v5039_v57  ;;  %7549 = vmatprep.mubr.f32.mxu1 %v7146_v25  ;;  %v12679_v22 = vpop.eup %8106  ;;  %v5179_v53 = vsel %vm12631_vm0, %v5176_v52, %v5173_v54  ;;  %v5211_v4 = vadd.f32 1.0, %v5210_v61  ;;  %v5234_v29 = vadd.f32 1.0, %v12644_v46 }
 0x4d5   : > { %7550 = vmatmul.mubr.f32.vlgmr.msra.gmra.mxu1 %v7147_v30  ;;  %v5443_v36 = vadd.f32 %v5179_v53, %v4995_v24  ;;  %v5188_v38 = vsel %vm12661_vm10, %v5185_v15, %v5182_v50  ;;  %v5213_v24 = vand.u32 2147483647, %v12610_v60  ;;  %v5119_v43 = vmul.f32 1.442695, %v5072_v10 }
 0x4d6   : > { %v5117_v8 = vmul.f32 1.442695, %v5071_v34  ;;  %v8109_v47 = vpop.eup %8108  ;;  %v5444_v49 = vadd.f32 %v5188_v38, %v4996_v59  ;;  %v5212_v61 = vmul.f32 %v12610_v60, %v5211_v4  ;;  %v5220_v54 = vadd.f32 1.0, %v5219_v20 }
 0x4d7   : > { %v8111_v34 = vpop.eup %8110  ;;  %v5191_v52 = vmul.f32 0.6931472, %v8109_v47  ;;  %v7148_v62 = vadd.f32 -0.6931472, %v5443_v36  ;;  %v5222_v15 = vand.u32 2147483647, %v12620_v5 }
 0x4d8   : > { %8120 = vpow2.f32 %v5117_v8  ;;  %v12699_v16 = vpop.eup %8112  ;;  %v7149_v45 = vadd.f32 -0.6931472, %v5444_v49  ;;  %v5200_v59 = vmul.f32 0.6931472, %v8111_v34  ;;  %v5228_v50 = vmul.f32 -0.5, %v12649_v23 }
 0x4d9   : > { %v5197_v51 = vsel %vm12665_vm9, %v5194_v26, %v5191_v52  ;;  %7552 = vmatprep.mubr.f32.mxu1 %v7148_v62  ;;  %v8115_v56 = vpop.eup %8114  ;;  %8122 = vlog2.f32 %v5234_v29  ;;  %vm5214_vm4 = vcmp.lt.f32.partialorder %v5213_v24, 0.0004427343  ;;  %v5243_v60 = vadd.f32 1.0, %v12672_v1 }
 0x4da   : > { %v5445_v25 = vadd.f32 %v5197_v51, %v4997_v18  ;;  %7553 = vmatmul.mubr.f32.gmra.mxu1 %v7149_v45  ;;  %v5206_v30 = vsel %vm12675_vm7, %v5203_v58, %v5200_v59  ;;  %v5209_v18 = vmul.f32 0.6931472, %v8115_v56  ;;  %8124 = vpow2.f32 %v5119_v43 }
 0x4db   : > { %v5446_v8 = vadd.f32 %v5206_v30, %v4998_v35  ;;  %v5237_v10 = vmul.f32 -0.5, %v12644_v46  ;;  %v5221_v58 = vmul.f32 %v12620_v5, %v5220_v54  ;;  %vm12717_vm6 = vcmp.lt.f32.partialorder %v5222_v15, 0.0004427343 }
 0x4dc   : > { %v7495_v32 = vpop.f32.mrf.mxu0  ;;  %v7150_v48 = vadd.f32 -0.6931472, %v5445_v25  ;;  %v5215_v53 = vsel %vm5214_vm4, %v5212_v61, %v5209_v18  ;;  %8126 = vlog2.f32 %v5243_v60  ;;  %v5229_v36 = vadd.f32 1.0, %v5228_v50 }
 0x4dd   : > { %v12685_v44 = vadd.f32 %v7495_v32, %v12500_v6  ;;  %v7151_v57 = vadd.f32 -0.6931472, %v5446_v8  ;;  %v5447_v35 = vadd.f32 %v5215_v53, %v4999_v7  ;;  %v5004_v38 = vmax.f32 %v12565_v63, 0.0 }
 0x4de   : > { %v4914_v14 = vpop.f32.mrf.mxu0  ;;  %7555 = vmatprep.mubr.f32.mxu1 %v7150_v48  ;;  %v8117_v32 = vpop.eup %8116  ;;  %v5231_v34 = vand.u32 2147483647, %v12649_v23  ;;  %v5238_v29 = vadd.f32 1.0, %v5237_v10  ;;  %v5261_v62 = vadd.f32 1.0, %v12699_v16  ;;  %v5230_v51 = vmul.f32 %v12649_v23, %v5229_v36 }
 0x4df   : > { %v12696_v3 = vadd.f32 %v12500_v6, %v4914_v14  ;;  %v5042_v37 = vand.u32 2147483647, %v12685_v44  ;;  %7556 = vmatmul.mubr.f32.gmra.mxu1 %v7151_v57  ;;  %v5218_v47 = vmul.f32 0.6931472, %v8117_v32  ;;  %v5252_v14 = vadd.f32 1.0, %v12656_v0 }
 0x4e0   : > { %v8119_v5 = vpop.eup %8118  ;;  %v7152_v52 = vadd.f32 -0.6931472, %v5447_v35  ;;  %v5246_v59 = vmul.f32 -0.5, %v12672_v1  ;;  %vm5232_vm11 = vcmp.lt.f32.partialorder %v5231_v34, 0.0004427343  ;;  %v5239_v54 = vmul.f32 %v12644_v46, %v5238_v29 }
 0x4e1   : > { %v5041_v55 = vand.u32 2147483647, %v12696_v3  ;;  %v5074_v27 = vsub.f32 0.0, %v5042_v37  ;;  %v5224_v20 = vsel %vm12717_vm6, %v5221_v58, %v5218_v47  ;;  %v5227_v24 = vmul.f32 0.6931472, %v8119_v5 }
 0x4e2   : > { %v5448_v7 = vadd.f32 %v5224_v20, %v5000_v31  ;;  %v5003_v37 = vmax.f32 %v12568_v28, 0.0  ;;  %7558 = vmatprep.mubr.f32.mxu1 %v7152_v52  ;;  %v5006_v31 = vmax.f32 %v12575_v12, 0.0  ;;  %v5240_v61 = vand.u32 2147483647, %v12644_v46 }
 0x4e3   : > { %v5073_v41 = vsub.f32 0.0, %v5041_v55  ;;  %v5123_v4 = vmul.f32 1.442695, %v5074_v27  ;;  %v5233_v28 = vsel %vm5232_vm11, %v5230_v51, %v5227_v24  ;;  %v5249_v48 = vand.u32 2147483647, %v12672_v1 }
 0x4e4   : > { %v7153_v2 = vadd.f32 -0.6931472, %v5448_v7  ;;  %v5449_v30 = vadd.f32 %v5233_v28, %v5001_v9  ;;  %v5255_v8 = vmul.f32 -0.5, %v12656_v0  ;;  %v5270_v50 = vadd.f32 1.0, %v12679_v22 }
 0x4e5   : > { %v5121_v26 = vmul.f32 1.442695, %v5073_v41  ;;  %v12737_v43 = vpop.eup %8120  ;;  %v5247_v41 = vadd.f32 1.0, %v5246_v59  ;;  %v5258_v10 = vand.u32 2147483647, %v12656_v0  ;;  %v5264_v33 = vmul.f32 -0.5, %v12699_v16 }
 0x4e6   : > { %7559 = vmatmul.mubr.f32.gmra.mxu1 %v7153_v2  ;;  %v8123_v15 = vpop.eup %8122  ;;  %v7154_v60 = vadd.f32 -0.6931472, %v5449_v30  ;;  %v5005_v46 = vmax.f32 %v12581_v19, 0.0  ;;  %vm5241_vm13 = vcmp.lt.f32.partialorder %v5240_v61, 0.0004427343  ;;  %v5256_v11 = vadd.f32 1.0, %v5255_v8 }
 0x4e7   : > { %8128 = vpow2.f32 %v5121_v26  ;;  %v5279_v26 = vadd.f32 1.0, %v12737_v43  ;;  %v5236_v57 = vmul.f32 0.6931472, %v8123_v15  ;;  %v12755_v9 = vpop.eup %8124  ;;  %v5267_v35 = vand.u32 2147483647, %v12699_v16 }
 0x4e8   : > { %8130 = vlog2.f32 %v5252_v14  ;;  %7561 = vmatprep.mubr.f32.mxu1 %v7154_v60  ;;  %v5248_v34 = vmul.f32 %v12672_v1, %v5247_v41  ;;  %vm5250_vm3 = vcmp.lt.f32.partialorder %v5249_v48, 0.0004427343  ;;  %vm12764_vm1 = vcmp.lt.f32.partialorder %v5258_v10, 0.0004427343 }
 0x4e9   : > { %8132 = vlog2.f32 %v5261_v62  ;;  %v8127_v53 = vpop.eup %8126  ;;  %v5242_v58 = vsel %vm5241_vm13, %v5239_v54, %v5236_v57  ;;  %v5265_v14 = vadd.f32 1.0, %v5264_v33  ;;  %v5288_v5 = vadd.f32 1.0, %v12755_v9 }
 0x4ea   : > { %8134 = vpow2.f32 %v5123_v4  ;;  %v5450_v36 = vadd.f32 %v5242_v58, %v5002_v17  ;;  %v5245_v4 = vmul.f32 0.6931472, %v8127_v53  ;;  %v5273_v20 = vmul.f32 -0.5, %v12679_v22 }
 0x4eb   : > { %v7498_v49 = vpop.f32.mrf.mxu0  ;;  %8136 = vlog2.f32 %v5270_v50  ;;  %v5257_v7 = vmul.f32 %v12656_v0, %v5256_v11  ;;  %vm12772_vm5 = vcmp.lt.f32.partialorder %v5267_v35, 0.0004427343  ;;  %v5276_v59 = vand.u32 2147483647, %v12679_v22 }
 0x4ec   : > { %v12730_v21 = vadd.f32 %v7498_v49, %v12500_v6  ;;  %v7155_v49 = vadd.f32 -0.6931472, %v5450_v36  ;;  %v5251_v52 = vsel %vm5250_vm3, %v5248_v34, %v5245_v4  ;;  %v5282_v0 = vmul.f32 -0.5, %v12737_v43 }
 0x4ed   : > { %v4924_v45 = vpop.f32.mrf.mxu0  ;;  %v5451_v17 = vadd.f32 %v5251_v52, %v5003_v37  ;;  %v5266_v37 = vmul.f32 %v12699_v16, %v5265_v14  ;;  %v5274_v54 = vadd.f32 1.0, %v5273_v20  ;;  %v5007_v15 = vmax.f32 %v12623_v40, 0.0 }
 0x4ee   : > { %v5044_v55 = vand.u32 2147483647, %v12730_v21  ;;  %v12741_v25 = vadd.f32 %v12500_v6, %v4924_v45  ;;  %7562 = vmatmul.mubr.f32.gmra.mxu1 %v7155_v49  ;;  %v5285_v48 = vand.u32 2147483647, %v12737_v43  ;;  %vm12797_vm15 = vcmp.lt.f32.partialorder %v5276_v59, 0.0004427343 }
 0x4ef   : > { %v7156_v2 = vadd.f32 -0.6931472, %v5451_v17  ;;  %v5291_v40 = vmul.f32 -0.5, %v12755_v9  ;;  %v5294_v4 = vand.u32 2147483647, %v12755_v9  ;;  %v5009_v59 = vmax.f32 %v12696_v3, 0.0 }
 0x4f0   : > { %v5076_v56 = vsub.f32 0.0, %v5044_v55  ;;  %v5043_v23 = vand.u32 2147483647, %v12741_v25  ;;  %vm12806_vm12 = vcmp.lt.f32.partialorder %v5285_v48, 0.0004427343 }
 0x4f1   : > { %7564 = vmatprep.mubr.f32.mxu1 %v7156_v2  ;;  %v5292_v49 = vadd.f32 1.0, %v5291_v40  ;;  %vm5295_vm2 = vcmp.lt.f32.partialorder %v5294_v4, 0.0004427343 }
 0x4f2   : > { %v5127_v27 = vmul.f32 1.442695, %v5076_v56  ;;  %v5075_v18 = vsub.f32 0.0, %v5043_v23 }
 0x4f4   : > { %8138 = vpow2.f32 %v5127_v27  ;;  %v5125_v32 = vmul.f32 1.442695, %v5075_v18  ;;  %v12759_v47 = vpop.eup %8128 }
 0x4f5   : > { %8140 = vlog2.f32 %v5279_v26  ;;  %v5297_v29 = vadd.f32 1.0, %v12759_v47  ;;  %v8131_v62 = vpop.eup %8130  ;;  %v5283_v26 = vadd.f32 1.0, %v5282_v0  ;;  %v5300_v11 = vmul.f32 -0.5, %v12759_v47 }
 0x4f6   : > { %8142 = vpow2.f32 %v5125_v32  ;;  %v8133_v24 = vpop.eup %8132  ;;  %v5254_v51 = vmul.f32 0.6931472, %v8131_v62  ;;  %v5275_v32 = vmul.f32 %v12679_v22, %v5274_v54  ;;  %v5303_v20 = vand.u32 2147483647, %v12759_v47 }
 0x4f7   : > { %8144 = vlog2.f32 %v5288_v5  ;;  %v5263_v28 = vmul.f32 0.6931472, %v8133_v24  ;;  %v12782_v61 = vpop.eup %8134  ;;  %v5284_v5 = vmul.f32 %v12737_v43, %v5283_v26  ;;  %v5301_v17 = vadd.f32 1.0, %v5300_v11 }
 0x4f8   : > { %8146 = vlog2.f32 %v5297_v29  ;;  %v5260_v30 = vsel %vm12764_vm1, %v5257_v7, %v5254_v51  ;;  %v5306_v63 = vadd.f32 1.0, %v12782_v61  ;;  %v5309_v7 = vmul.f32 -0.5, %v12782_v61 }
 0x4f9   : > { %v7501_v39 = vpop.f32.mrf.mxu0  ;;  %v5452_v41 = vadd.f32 %v5260_v30, %v5004_v38  ;;  %v5269_v16 = vsel %vm12772_vm5, %v5266_v37, %v5263_v28  ;;  %v8137_v38 = vpop.eup %8136  ;;  %v5293_v28 = vmul.f32 %v12755_v9, %v5292_v49  ;;  %vm5304_vm8 = vcmp.lt.f32.partialorder %v5303_v20, 0.0004427343 }
 0x4fa   : > { %v12777_v45 = vadd.f32 %v7501_v39, %v12500_v6  ;;  %v5453_v27 = vadd.f32 %v5269_v16, %v5005_v46  ;;  %v5272_v46 = vmul.f32 0.6931472, %v8137_v38  ;;  %8148 = vlog2.f32 %v5306_v63 }
 0x4fb   : > { %v4934_v55 = vpop.f32.mrf.mxu0  ;;  %v7157_v60 = vadd.f32 -0.6931472, %v5452_v41  ;;  %v5310_v16 = vadd.f32 1.0, %v5309_v7  ;;  %v5312_v48 = vand.u32 2147483647, %v12782_v61 }
 0x4fc   : > { %v5046_v56 = vand.u32 2147483647, %v12777_v45  ;;  %v12786_v23 = vadd.f32 %v12500_v6, %v4934_v55  ;;  %v7158_v33 = vadd.f32 -0.6931472, %v5453_v27  ;;  %v5278_v19 = vsel %vm12797_vm15, %v5275_v32, %v5272_v46 }
 0x4fd   : > { %7565 = vmatmul.mubr.f32.gmra.mxu1 %v7157_v60  ;;  %v5454_v52 = vadd.f32 %v5278_v19, %v5006_v31  ;;  %v5008_v31 = vmax.f32 %v12638_v13, 0.0  ;;  %vm5313_vm14 = vcmp.lt.f32.partialorder %v5312_v48, 0.0004427343 }
 0x4fe   : > { %v5078_v8 = vsub.f32 0.0, %v5046_v56  ;;  %v5045_v50 = vand.u32 2147483647, %v12786_v23  ;;  %7567 = vmatprep.mubr.f32.mxu1 %v7158_v33  ;;  %v5311_v33 = vmul.f32 %v12782_v61, %v5310_v16 }
 0x4ff   : > { %v7159_v24 = vadd.f32 -0.6931472, %v5454_v52 }
 0x500   : > { %v5131_v57 = vmul.f32 1.442695, %v5078_v8  ;;  %v5077_v10 = vsub.f32 0.0, %v5045_v50 }
 0x501   : > { %v12804_v53 = vpop.eup %8138  ;;  %7568 = vmatmul.mubr.f32.gmra.mxu1 %v7159_v24 }
 0x502   : > { %v8141_v35 = vpop.eup %8140  ;;  %8150 = vpow2.f32 %v5131_v57  ;;  %v5129_v36 = vmul.f32 1.442695, %v5077_v10  ;;  %v5324_v34 = vadd.f32 1.0, %v12804_v53  ;;  %v5327_v50 = vmul.f32 -0.5, %v12804_v53 }
 0x503   : > { %v12813_v22 = vpop.eup %8142  ;;  %v5281_v14 = vmul.f32 0.6931472, %v8141_v35  ;;  %v5330_v58 = vand.u32 2147483647, %v12804_v53 }
 0x504   : > { %8152 = vpow2.f32 %v5129_v36  ;;  %v5315_v29 = vadd.f32 1.0, %v12813_v22  ;;  %v8145_v1 = vpop.eup %8144  ;;  %v5318_v8 = vmul.f32 -0.5, %v12813_v22  ;;  %v5328_v46 = vadd.f32 1.0, %v5327_v50 }
 0x505   : > { %v5287_v39 = vsel %vm12806_vm12, %v5284_v5, %v5281_v14  ;;  %8154 = vlog2.f32 %v5324_v34  ;;  %v8147_v12 = vpop.eup %8146  ;;  %v5290_v2 = vmul.f32 0.6931472, %v8145_v1  ;;  %v5321_v36 = vand.u32 2147483647, %v12813_v22 }
 0x506   : > { %v5455_v51 = vadd.f32 %v5287_v39, %v5007_v15  ;;  %8156 = vlog2.f32 %v5315_v29  ;;  %v5299_v54 = vmul.f32 0.6931472, %v8147_v12  ;;  %v5302_v15 = vmul.f32 %v12759_v47, %v5301_v17 }
 0x507   : > { %v7504_v62 = vpop.f32.mrf.mxu0  ;;  %v5296_v30 = vsel %vm5295_vm2, %v5293_v28, %v5290_v2  ;;  %v8149_v40 = vpop.eup %8148  ;;  %v5010_v47 = vmax.f32 %v12685_v44, 0.0  ;;  %v5319_v32 = vadd.f32 1.0, %v5318_v8  ;;  %v5012_v34 = vmax.f32 %v12730_v21, 0.0 }
 0x508   : > { %v12826_v43 = vadd.f32 %v7504_v62, %v12500_v6  ;;  %v7160_v56 = vadd.f32 -0.6931472, %v5455_v51  ;;  %v5456_v41 = vadd.f32 %v5296_v30, %v5008_v31  ;;  %v5305_v9 = vsel %vm5304_vm8, %v5302_v15, %v5299_v54 }
 0x509   : > { %v4944_v55 = vpop.f32.mrf.mxu0  ;;  %v5457_v26 = vadd.f32 %v5305_v9, %v5009_v59  ;;  %v5308_v10 = vmul.f32 0.6931472, %v8149_v40  ;;  %v5320_v5 = vmul.f32 %v12813_v22, %v5319_v32  ;;  %v5329_v52 = vmul.f32 %v12804_v53, %v5328_v46 }
 0x50a   : > { %v5048_v37 = vand.u32 2147483647, %v12826_v43  ;;  %v12833_v0 = vadd.f32 %v12500_v6, %v4944_v55  ;;  %7570 = vmatprep.mubr.f32.mxu1 %v7160_v56  ;;  %v7161_v60 = vadd.f32 -0.6931472, %v5456_v41  ;;  %vm5331_vm0 = vcmp.lt.f32.partialorder %v5330_v58, 0.0004427343 }
 0x50b   : > { %v7162_v38 = vadd.f32 -0.6931472, %v5457_v26  ;;  %v5314_v44 = vsel %vm5313_vm14, %v5311_v33, %v5308_v10  ;;  %v5011_v39 = vmax.f32 %v12741_v25, 0.0  ;;  %vm5322_vm10 = vcmp.lt.f32.partialorder %v5321_v36, 0.0004427343 }
 0x50c   : > { %v5080_v13 = vsub.f32 0.0, %v5048_v37  ;;  %v5047_v3 = vand.u32 2147483647, %v12833_v0  ;;  %7571 = vmatmul.mubr.f32.gmra.mxu1 %v7161_v60  ;;  %v5458_v19 = vadd.f32 %v5314_v44, %v5010_v47  ;;  %v5014_v50 = vmax.f32 %v12777_v45, 0.0 }
 0x50d   : > { %7573 = vmatprep.mubr.f32.mxu1 %v7162_v38  ;;  %v5013_v40 = vmax.f32 %v12786_v23, 0.0 }
 0x50e   : > { %v5135_v27 = vmul.f32 1.442695, %v5080_v13  ;;  %v5079_v18 = vsub.f32 0.0, %v5047_v3  ;;  %v7163_v29 = vadd.f32 -0.6931472, %v5458_v19 }
 0x50f   : > { %v12841_v57 = vpop.eup %8150 }
 0x510   : > { %8158 = vpow2.f32 %v5135_v27  ;;  %v5133_v63 = vmul.f32 1.442695, %v5079_v18  ;;  %v5342_v11 = vadd.f32 1.0, %v12841_v57  ;;  %7574 = vmatmul.mubr.f32.gmra.mxu1 %v7163_v29  ;;  %v5345_v25 = vmul.f32 -0.5, %v12841_v57  ;;  %v12871_v27 = vld [vmem:[%s8465_s4] ss:$0 sm:$0xff] }
 0x511   : > { %v12846_v35 = vpop.eup %8152  ;;  %v5348_v3 = vand.u32 2147483647, %v12841_v57 }
 0x512   : > { %8160 = vpow2.f32 %v5133_v63  ;;  %v8155_v4 = vpop.eup %8154  ;;  %v5333_v61 = vadd.f32 1.0, %v12846_v35  ;;  %v5336_v2 = vmul.f32 -0.5, %v12846_v35  ;;  %v5346_v15 = vadd.f32 1.0, %v5345_v25 }
 0x513   : > { %v8157_v14 = vpop.eup %8156  ;;  %v5326_v49 = vmul.f32 0.6931472, %v8155_v4  ;;  %8162 = vlog2.f32 %v5342_v11  ;;  %v5339_v16 = vand.u32 2147483647, %v12846_v35  ;;  %vm5349_vm9 = vcmp.lt.f32.partialorder %v5348_v3, 0.0004427343 }
 0x514   : > { %v5317_v62 = vmul.f32 0.6931472, %v8157_v14  ;;  %8164 = vlog2.f32 %v5333_v61  ;;  %v5337_v13 = vadd.f32 1.0, %v5336_v2  ;;  %v5347_v26 = vmul.f32 %v12841_v57, %v5346_v15 }
 0x515   : > { %v5332_v21 = vsel %vm5331_vm0, %v5329_v52, %v5326_v49  ;;  %vm5340_vm7 = vcmp.lt.f32.partialorder %v5339_v16, 0.0004427343 }
 0x516   : > { %v5323_v1 = vsel %vm5322_vm10, %v5320_v5, %v5317_v62  ;;  %v5460_v22 = vadd.f32 %v5332_v21, %v5012_v34  ;;  %v5338_v38 = vmul.f32 %v12846_v35, %v5337_v13 }
 0x517   : > { %v5459_v51 = vadd.f32 %v5323_v1, %v5011_v39 }
 0x518   : > { %v7507_v20 = vpop.f32.mrf.mxu0  ;;  %v7165_v55 = vadd.f32 -0.6931472, %v5460_v22  ;;  %v5016_v22 = vmax.f32 %v12826_v43, 0.0 }
 0x519   : > { %v12855_v17 = vadd.f32 %v7507_v20, %v12500_v6  ;;  %v7164_v59 = vadd.f32 -0.6931472, %v5459_v51 }
 0x51a   : > { %v4954_v7 = vpop.f32.mrf.mxu0 }
 0x51b   : > { %v5050_v24 = vand.u32 2147483647, %v12855_v17  ;;  %v12859_v53 = vadd.f32 %v12500_v6, %v4954_v7  ;;  %7576 = vmatprep.mubr.f32.mxu1 %v7164_v59 }
 0x51c   : > { %7577 = vmatmul.mubr.f32.gmra.mxu1 %v7165_v55 }
 0x51d   : > { %v5082_v12 = vsub.f32 0.0, %v5050_v24  ;;  %v5049_v31 = vand.u32 2147483647, %v12859_v53  ;;  %v8159_v28 = vpop.eup %8158 }
 0x51e   : > { %v5360_v30 = vadd.f32 1.0, %v8159_v28  ;;  %v5363_v58 = vmul.f32 -0.5, %v8159_v28  ;;  %v5366_v14 = vand.u32 2147483647, %v8159_v28 }
 0x51f   : > { %v5139_v37 = vmul.f32 1.442695, %v5082_v12  ;;  %v5081_v56 = vsub.f32 0.0, %v5049_v31  ;;  %v12864_v54 = vpop.eup %8160  ;;  %v5015_v31 = vmax.f32 %v12833_v0, 0.0 }
 0x520   : > { %v5351_v41 = vadd.f32 1.0, %v12864_v54  ;;  %v8163_v9 = vpop.eup %8162  ;;  %v5354_v23 = vmul.f32 -0.5, %v12864_v54  ;;  %v5364_v19 = vadd.f32 1.0, %v5363_v58  ;;  %v5357_v20 = vand.u32 2147483647, %v12864_v54 }
 0x521   : > { %8166 = vpow2.f32 %v5139_v37  ;;  %v5137_v6 = vmul.f32 1.442695, %v5081_v56  ;;  %v8165_v8 = vpop.eup %8164  ;;  %v5344_v60 = vmul.f32 0.6931472, %v8163_v9  ;;  %vm5367_vm4 = vcmp.lt.f32.partialorder %v5366_v14, 0.0004427343 }
 0x522   : > { %8168 = vlog2.f32 %v5360_v30  ;;  %v5335_v63 = vmul.f32 0.6931472, %v8165_v8  ;;  %v5355_v49 = vadd.f32 1.0, %v5354_v23  ;;  %v5365_v21 = vmul.f32 %v8159_v28, %v5364_v19 }
 0x523   : > { %8170 = vpow2.f32 %v5137_v6  ;;  %v5350_v45 = vsel %vm5349_vm9, %v5347_v26, %v5344_v60  ;;  %vm5358_vm6 = vcmp.lt.f32.partialorder %v5357_v20, 0.0004427343 }
 0x524   : > { %8172 = vlog2.f32 %v5351_v41  ;;  %v5341_v32 = vsel %vm5340_vm7, %v5338_v38, %v5335_v63  ;;  %v5462_v46 = vadd.f32 %v5350_v45, %v5014_v50  ;;  %v5356_v51 = vmul.f32 %v12864_v54, %v5355_v49 }
 0x525   : > { %v7510_v48 = vpop.f32.mrf.mxu0  ;;  %v5461_v44 = vadd.f32 %v5341_v32, %v5013_v40  ;;  %v5018_v32 = vmax.f32 %v12855_v17, 0.0 }
 0x526   : > { %v12874_v18 = vadd.f32 %v12871_v27, %v7510_v48  ;;  %v7167_v34 = vadd.f32 -0.6931472, %v5462_v46 }
 0x527   : > { %v4964_v47 = vpop.f32.mrf.mxu0  ;;  %v7166_v35 = vadd.f32 -0.6931472, %v5461_v44  ;;  %v5017_v44 = vmax.f32 %v12859_v53, 0.0 }
 0x528   : > { %v5052_v10 = vand.u32 2147483647, %v12874_v18  ;;  %v12881_v33 = vadd.f32 %v12871_v27, %v4964_v47 }
 0x529   : > { %7579 = vmatprep.mubr.f32.mxu1 %v7166_v35 }
 0x52a   : > { %v5084_v11 = vsub.f32 0.0, %v5052_v10  ;;  %v5051_v57 = vand.u32 2147483647, %v12881_v33  ;;  %7580 = vmatmul.mubr.f32.gmra.mxu1 %v7167_v34 }
 0x52c   : > { %v5143_v36 = vmul.f32 1.442695, %v5084_v11  ;;  %v5083_v4 = vsub.f32 0.0, %v5051_v57 }
 0x52e   : > { %8174 = vpow2.f32 %v5143_v36  ;;  %v5141_v61 = vmul.f32 1.442695, %v5083_v4  ;;  %v8167_v5 = vpop.eup %8166 }
 0x52f   : > { %v8169_v52 = vpop.eup %8168  ;;  %v5378_v29 = vadd.f32 1.0, %v8167_v5  ;;  %v5381_v54 = vmul.f32 -0.5, %v8167_v5  ;;  %v5384_v60 = vand.u32 2147483647, %v8167_v5 }
 0x530   : > { %8176 = vpow2.f32 %v5141_v61  ;;  %v8171_v62 = vpop.eup %8170  ;;  %v5362_v39 = vmul.f32 0.6931472, %v8169_v52 }
 0x531   : > { %v8173_v7 = vpop.eup %8172  ;;  %v5369_v1 = vadd.f32 1.0, %v8171_v62  ;;  %8178 = vlog2.f32 %v5378_v29  ;;  %v5372_v13 = vmul.f32 -0.5, %v8171_v62  ;;  %v5382_v9 = vadd.f32 1.0, %v5381_v54 }
 0x532   : > { %v5353_v24 = vmul.f32 0.6931472, %v8173_v7  ;;  %v5368_v12 = vsel %vm5367_vm4, %v5365_v21, %v5362_v39  ;;  %v5375_v63 = vand.u32 2147483647, %v8171_v62  ;;  %vm5385_vm11 = vcmp.lt.f32.partialorder %v5384_v60, 0.0004427343 }
 0x533   : > { %8180 = vlog2.f32 %v5369_v1  ;;  %v5464_v2 = vadd.f32 %v5368_v12, %v5016_v22  ;;  %v5373_v26 = vadd.f32 1.0, %v5372_v13  ;;  %v5383_v10 = vmul.f32 %v8167_v5, %v5382_v9  ;;  %v12911_v22 = vpop.permute.xlu1 %5910 }
 0x534   : > { %v5359_v55 = vsel %vm5358_vm6, %v5356_v51, %v5353_v24  ;;  %vm5376_vm13 = vcmp.lt.f32.partialorder %v5375_v63, 0.0004427343 }
 0x535   : > { %v5463_v37 = vadd.f32 %v5359_v55, %v5015_v31  ;;  %v7169_v15 = vadd.f32 -0.6931472, %v5464_v2  ;;  %v5374_v11 = vmul.f32 %v8171_v62, %v5373_v26  ;;  %v12914_v2 = vpop.permute.xlu0 %5905 }
 0x536   : > { %v7513_v59 = vpop.f32.mrf.mxu0 }
 0x537   : > { %v12890_v25 = vadd.f32 %v12871_v27, %v7513_v59  ;;  %v7168_v30 = vadd.f32 -0.6931472, %v5463_v37  ;;  %v12919_v13 = vpop.permute.xlu1 %5830 }
 0x538   : > { %v4974_v28 = vpop.f32.mrf.mxu0 }
 0x539   : > { %v5054_v56 = vand.u32 2147483647, %v12890_v25  ;;  %v12894_v43 = vadd.f32 %v12871_v27, %v4974_v28  ;;  %7582 = vmatprep.mubr.f32.mxu1 %v7168_v30  ;;  %v5020_v28 = vmax.f32 %v12874_v18, 0.0 }
 0x53a   : > { %7583 = vmatmul.mubr.f32.gmra.mxu1 %v7169_v15 }
 0x53b   : > { %v5086_v6 = vsub.f32 0.0, %v5054_v56  ;;  %v5053_v0 = vand.u32 2147483647, %v12894_v43  ;;  %v8175_v3 = vpop.eup %8174 }
 0x53c   : > { %v5396_v48 = vadd.f32 1.0, %v8175_v3  ;;  %v5399_v34 = vmul.f32 -0.5, %v8175_v3  ;;  %v5402_v39 = vand.u32 2147483647, %v8175_v3 }
 0x53d   : > { %v5147_v41 = vmul.f32 1.442695, %v5086_v6  ;;  %v5085_v16 = vsub.f32 0.0, %v5053_v0  ;;  %v12897_v8 = vpop.eup %8176  ;;  %v5019_v6 = vmax.f32 %v12881_v33, 0.0 }
 0x53e   : > { %v5387_v40 = vadd.f32 1.0, %v12897_v8  ;;  %v8179_v47 = vpop.eup %8178  ;;  %v5390_v14 = vmul.f32 -0.5, %v12897_v8  ;;  %v5400_v20 = vadd.f32 1.0, %v5399_v34  ;;  %v5393_v24 = vand.u32 2147483647, %v12897_v8 }
 0x53f   : > { %8182 = vpow2.f32 %v5147_v41  ;;  %v5145_v50 = vmul.f32 1.442695, %v5085_v16  ;;  %v5380_v38 = vmul.f32 0.6931472, %v8179_v47  ;;  %vm5403_vm3 = vcmp.lt.f32.partialorder %v5402_v39, 0.0004427343  ;;  %v12921_v41 = vpop.permute.xlu0 %5825 }
 0x540   : > { %8184 = vlog2.f32 %v5396_v48  ;;  %v8181_v45 = vpop.eup %8180  ;;  %v5391_v7 = vadd.f32 1.0, %v5390_v14  ;;  %v5401_v59 = vmul.f32 %v8175_v3, %v5400_v20  ;;  %vm5394_vm1 = vcmp.lt.f32.partialorder %v5393_v24, 0.0004427343 }
 0x541   : > { %8186 = vpow2.f32 %v5145_v50  ;;  %v5371_v58 = vmul.f32 0.6931472, %v8181_v45  ;;  %v5386_v57 = vsel %vm5385_vm11, %v5383_v10, %v5380_v38 }
 0x542   : > { %8188 = vlog2.f32 %v5387_v40  ;;  %v5466_v35 = vadd.f32 %v5386_v57, %v5018_v32  ;;  %v5392_v30 = vmul.f32 %v12897_v8, %v5391_v7  ;;  %v12923_v8 = vpop.permute.xlu1 %5900 }
 0x543   : > { %v5377_v4 = vsel %vm5376_vm13, %v5374_v11, %v5371_v58  ;;  %v12925_v33 = vpop.permute.xlu0 %5895 }
 0x544   : > { %v5465_v17 = vadd.f32 %v5377_v4, %v5017_v44  ;;  %v7171_v52 = vadd.f32 -0.6931472, %v5466_v35  ;;  %v5021_v4 = vmax.f32 %v12894_v43, 0.0 }
 0x545   : > { %v7516_v46 = vpop.f32.mrf.mxu0 }
 0x546   : > { %v12903_v23 = vadd.f32 %v12871_v27, %v7516_v46  ;;  %v7170_v53 = vadd.f32 -0.6931472, %v5465_v17  ;;  %v5022_v46 = vmax.f32 %v12890_v25, 0.0  ;;  %v12928_v57 = vpop.permute.xlu1 %5820 }
 0x547   : > { %v4984_v36 = vpop.f32.mrf.mxu0  ;;  %v12931_v34 = vpop.permute.xlu0 %5815 }
 0x548   : > { %v5056_v19 = vand.u32 2147483647, %v12903_v23  ;;  %v12907_v61 = vadd.f32 %v12871_v27, %v4984_v36  ;;  %7585 = vmatprep.mubr.f32.mxu1 %v7170_v53 }
 0x549   : > { %7586 = vmatmul.mubr.f32.gmra.mxu1 %v7171_v52 }
 0x54a   : > { %v5088_v5 = vsub.f32 0.0, %v5056_v19  ;;  %v5055_v49 = vand.u32 2147483647, %v12907_v61  ;;  %v12933_v25 = vpop.permute.xlu1 %5890 }
 0x54b   : > { %v12935_v20 = vpop.permute.xlu0 %5885 }
 0x54c   : > { %v5151_v29 = vmul.f32 1.442695, %v5088_v5  ;;  %v5087_v62 = vsub.f32 0.0, %v5055_v49  ;;  %v8183_v21 = vpop.eup %8182 }
 0x54d   : > { %v8185_v1 = vpop.eup %8184  ;;  %v5414_v51 = vadd.f32 1.0, %v8183_v21  ;;  %v5417_v9 = vmul.f32 -0.5, %v8183_v21  ;;  %v5420_v40 = vand.u32 2147483647, %v8183_v21 }
 0x54e   : > { %8190 = vpow2.f32 %v5151_v29  ;;  %v5149_v27 = vmul.f32 1.442695, %v5087_v62  ;;  %v8187_v12 = vpop.eup %8186  ;;  %v5398_v31 = vmul.f32 0.6931472, %v8185_v1  ;;  %v12937_v7 = vpop.permute.xlu1 %5810 }
 0x54f   : > { %v8189_v55 = vpop.eup %8188  ;;  %v5405_v37 = vadd.f32 1.0, %v8187_v12  ;;  %v5408_v48 = vmul.f32 -0.5, %v8187_v12  ;;  %v5418_v60 = vadd.f32 1.0, %v5417_v9  ;;  %v5411_v38 = vand.u32 2147483647, %v8187_v12 }
 0x550   : > { %8192 = vpow2.f32 %v5149_v27  ;;  %v5389_v56 = vmul.f32 0.6931472, %v8189_v55  ;;  %v5404_v54 = vsel %vm5403_vm3, %v5401_v59, %v5398_v31  ;;  %vm5421_vm5 = vcmp.lt.f32.partialorder %v5420_v40, 0.0004427343 }
 0x551   : > { %8194 = vlog2.f32 %v5414_v51  ;;  %v5468_v15 = vadd.f32 %v5404_v54, %v5020_v28  ;;  %v5409_v26 = vadd.f32 1.0, %v5408_v48  ;;  %v5419_v11 = vmul.f32 %v8183_v21, %v5418_v60  ;;  %v12939_v51 = vpop.permute.xlu0 %5805 }
 0x552   : > { %8196 = vlog2.f32 %v5405_v37  ;;  %v5395_v0 = vsel %vm5394_vm1, %v5392_v30, %v5389_v56  ;;  %vm5412_vm15 = vcmp.lt.f32.partialorder %v5411_v38, 0.0004427343  ;;  %v5023_v28 = vmax.f32 %v12907_v61, 0.0  ;;  %v12943_v54 = vpop.permute.xlu1 %5880 }
 0x553   : > { %v5467_v3 = vadd.f32 %v5395_v0, %v5019_v6  ;;  %v7173_v16 = vadd.f32 -0.6931472, %v5468_v15  ;;  %v5410_v36 = vmul.f32 %v8187_v12, %v5409_v26  ;;  %v5024_v12 = vmax.f32 %v12903_v23, 0.0 }
 0x555   : > { %v7172_v18 = vadd.f32 -0.6931472, %v5467_v3  ;;  %v12945_v0 = vpop.permute.xlu0 %5875 }
 0x556   : > { %v12947_v3 = vpop.permute.xlu1 %5800 }
 0x557   : > { %7588 = vmatprep.mubr.f32.mxu1 %v7172_v18 }
 0x558   : > { %7589 = vmatmul.mubr.f32.gmra.mxu1 %v7173_v16 }
 0x559   : > { %v12949_v23 = vpop.permute.xlu0 %5795 }
 0x55a   : > { %v12951_v18 = vpop.permute.xlu1 %5870 }
 0x55b   : > { %v8191_v50 = vpop.eup %8190 }
 0x55c   : > { %v5432_v47 = vadd.f32 1.0, %v8191_v50  ;;  %v5435_v5 = vmul.f32 -0.5, %v8191_v50  ;;  %v5438_v62 = vand.u32 2147483647, %v8191_v50 }
 0x55d   : > { %v8193_v63 = vpop.eup %8192  ;;  %v12953_v16 = vpop.permute.xlu0 %5865 }
 0x55e   : > { %v8195_v10 = vpop.eup %8194  ;;  %v5423_v45 = vadd.f32 1.0, %v8193_v63  ;;  %8198 = vlog2.f32 %v5432_v47  ;;  %v5426_v52 = vmul.f32 -0.5, %v8193_v63  ;;  %v5436_v29 = vadd.f32 1.0, %v5435_v5  ;;  %v5791_v61 = vpop.permute.xlu1 %5790 }
 0x55f   : > { %v8197_v32 = vpop.eup %8196  ;;  %v5416_v58 = vmul.f32 0.6931472, %v8195_v10  ;;  %v5429_v21 = vand.u32 2147483647, %v8193_v63  ;;  %vm5439_vm12 = vcmp.lt.f32.partialorder %v5438_v62, 0.0004427343 }
 0x560   : > { %v5407_v44 = vmul.f32 0.6931472, %v8197_v32  ;;  %8200 = vlog2.f32 %v5423_v45  ;;  %v5427_v43 = vadd.f32 1.0, %v5426_v52  ;;  %v5437_v27 = vmul.f32 %v8191_v50, %v5436_v29 }
 0x561   : > { %v5422_v35 = vsel %vm5421_vm5, %v5419_v11, %v5416_v58  ;;  %vm5430_vm2 = vcmp.lt.f32.partialorder %v5429_v21, 0.0004427343  ;;  %v5786_v9 = vpop.permute.xlu0 %5785  ;;  %v12972_v11 = vld [vmem:[%s647_s1] ss:$0 sm:$0xff] }
 0x562   : > { %v5413_v19 = vsel %vm5412_vm15, %v5410_v36, %v5407_v44  ;;  %v5470_v17 = vadd.f32 %v5422_v35, %v5022_v46  ;;  %v5428_v59 = vmul.f32 %v8193_v63, %v5427_v43  ;;  %v12955_v48 = vpop.permute.xlu1 %5860  ;;  %v7601_v63 = vpop.f32.mrf.mxu0 }
 0x563   : > { %v5469_v14 = vadd.f32 %v5413_v19, %v5021_v4  ;;  %13807 = vst [vmem:[#allocation81_spill] sm:$0xff] %v12955_v48 }
 0x564   : > { %v7175_v53 = vadd.f32 -0.6931472, %v5470_v17  ;;  %v6277_v45 = vpop.f32.mrf.mxu0 }
 0x565   : > { %v7174_v49 = vadd.f32 -0.6931472, %v5469_v14  ;;  %v12957_v50 = vpop.permute.xlu0 %5855 }
 0x566   : > { %13808 = vst [vmem:[#allocation37_spill] sm:$0xff] %v12957_v50  ;;  %v5781_v60 = vpop.permute.xlu1 %5780  ;;  %v7602_v46 = vpop.f32.mrf.mxu0 }
 0x567   : > { %7591 = vmatprep.mubr.f32.mxu1 %v7174_v49 }
 0x568   : > { %7592 = vmatmul.mubr.f32.gmra.mxu1 %v7175_v53  ;;  %v6280_v36 = vpop.f32.mrf.mxu0 }
 0x569   : > { %v5776_v26 = vpop.permute.xlu0 %5775 }
 0x56a   : > { %v12959_v40 = vpop.permute.xlu1 %5850  ;;  %v7605_v49 = vpop.f32.mrf.mxu0 }
 0x56b   : > { %v8199_v39 = vpop.eup %8198  ;;  %13809 = vst [vmem:[#allocation44_spill] sm:$0xff] %v12959_v40 }
 0x56c   : > { %v5434_v1 = vmul.f32 0.6931472, %v8199_v39  ;;  %v6293_v21 = vpop.f32.mrf.mxu0 }
 0x56d   : > { %v8201_v24 = vpop.eup %8200  ;;  %v12961_v47 = vpop.permute.xlu0 %5845 }
 0x56e   : > { %v5425_v31 = vmul.f32 0.6931472, %v8201_v24  ;;  %v5440_v55 = vsel %vm5439_vm12, %v5437_v27, %v5434_v1  ;;  %13810 = vst [vmem:[#allocation61_spill] sm:$0xff] %v12961_v47  ;;  %v5771_v38 = vpop.permute.xlu1 %5770 }
 0x56f   : > { %v5472_v56 = vadd.f32 %v5440_v55, %v5024_v12  ;;  %v7606_v55 = vpop.f32.mrf.mxu0 }
 0x570   : > { %v5431_v37 = vsel %vm5430_vm2, %v5428_v59, %v5425_v31 }
 0x571   : > { %v5471_v30 = vadd.f32 %v5431_v37, %v5023_v28  ;;  %v7177_v15 = vadd.f32 -0.6931472, %v5472_v56  ;;  %v5766_v10 = vpop.permute.xlu0 %5765 }
 0x572   : > { %v12963_v32 = vpop.permute.xlu1 %5840 }
 0x573   : > { %v7176_v6 = vadd.f32 -0.6931472, %v5471_v30  ;;  %13811 = vst [vmem:[#allocation39_spill] sm:$0xff] %v12963_v32 }
 0x575   : > { %7594 = vmatprep.mubr.f32.mxu1 %v7176_v6  ;;  %v12965_v58 = vpop.permute.xlu0 %5835 }
 0x576   : > { %7595 = vmatmul.mubr.f32.gmra.mxu1 %v7177_v15  ;;  %13812 = vst [vmem:[#allocation46_spill] sm:$0xff] %v12965_v58  ;;  %v5761_v35 = vpop.permute.xlu1 %5760 }
 0x579   : > { %v5756_v5 = vpop.permute.xlu0 %5755 }
 0x595   : > { %v7551_v44 = vpop.f32.mrf.mxu1 }
 0x596   : > { %v5600_v4 = vadd.f32 %v7551_v44, %v12972_v11 }
 0x597   : > { %v5594_v19 = vpop.f32.mrf.mxu1 }
 0x598   : > { %v5914_v17 = vmul.f32 %v5761_v35, %v5600_v4  ;;  %v5595_v14 = vadd.f32 %v12972_v11, %v5594_v19 }
 0x59a   : > { %v5913_v53 = vmul.f32 %v5756_v5, %v5595_v14  ;;  %v7554_v52 = vpop.f32.mrf.mxu1  ;;  %v12976_v29 = vmul.f32 %v6280_v36, %v5914_v17 }
 0x59b   : > { %v5610_v43 = vadd.f32 %v7554_v52, %v12972_v11  ;;  %v6439_v52 = vld [vmem:[%s13823_s14] sm:$0x3] }
 0x59c   : > { %13813 = vst [vmem:[#allocation63_spill] sm:$0xff] %v12976_v29  ;;  %v12978_v62 = vmul.f32 %v6277_v45, %v5913_v53  ;;  %v5604_v39 = vpop.f32.mrf.mxu1  ;;  %v6437_v53 = vshrl.u32 %v5945_v42, 7 }
 0x59d   : > { %v5916_v27 = vmul.f32 %v5771_v38, %v5610_v43  ;;  %v5605_v24 = vadd.f32 %v12972_v11, %v5604_v39  ;;  %v6296_v38 = vpop.f32.mrf.mxu0 }
 0x59e   : > { %13814 = vst [vmem:[#allocation79_spill] sm:$0xff] %v12978_v62  ;;  %v6442_v43 = vsub.s32 0, %v6437_v53  ;;  %v6446_v39 = vsub.s32 1, %v6437_v53 }
 0x59f   : > { %v5915_v12 = vmul.f32 %v5766_v10, %v5605_v24  ;;  %v7557_v31 = vpop.f32.mrf.mxu1  ;;  %v12985_v28 = vmul.f32 %v7602_v46, %v5916_v27 }
 0x5a0   : > { %v5620_v59 = vadd.f32 %v7557_v31, %v12972_v11  ;;  %v6447_v27 = vrot.slane %v6439_v52, %v6446_v39  ;;  %v13824_v31 = vmov 0 }
 0x5a1   : > { %13815 = vst [vmem:[#allocation80_spill] sm:$0xff] %v12985_v28  ;;  %v12987_v37 = vmul.f32 %v7601_v63, %v5915_v12  ;;  %v5614_v56 = vpop.f32.mrf.mxu1  ;;  %v13411_v12 = vmov 1.0|1.0  }
 0x5a2   : > { %v5918_v30 = vmul.f32 %v5781_v60, %v5620_v59  ;;  %v5615_v6 = vadd.f32 %v12972_v11, %v5614_v56  ;;  %vm6449_vm8 = vcmp.eq.s32.totalorder %v6437_v53, %v6447_v27 }
 0x5a3   : > { %13816 = vst [vmem:[#allocation31_spill] sm:$0xff] %v12987_v37 }
 0x5a4   : > { %v5917_v45 = vmul.f32 %v5776_v26, %v5615_v6  ;;  %v12992_v44 = vmul.f32 %v6296_v38, %v5918_v30 }
 0x5a6   : > { %13818 = vst [vmem:[#allocation41_spill] sm:$0xff] %v12992_v44  ;;  %v12994_v10 = vmul.f32 %v6293_v21, %v5917_v45  ;;  %v7560_v36 = vpop.f32.mrf.mxu1  ;;  %v13014_v21 = vpop.f32.mrf.mxu0 }
 0x5a7   : > { %v5630_v46 = vadd.f32 %v7560_v36, %v12972_v11 }
 0x5a8   : > { %13819 = vst [vmem:[#allocation57_spill] sm:$0xff] %v12994_v10  ;;  %v5624_v4 = vpop.f32.mrf.mxu1  ;;  %v13018_v42 = vpop.f32.mrf.mxu0 }
 0x5a9   : > { %v5920_v60 = vmul.f32 %v5791_v61, %v5630_v46  ;;  %v5625_v35 = vadd.f32 %v12972_v11, %v5624_v4  ;;  %v6438_v61 = vadd.s32 8, %v6437_v53 }
 0x5aa   : > { %v13027_v59 = vpop.f32.mrf.mxu0 }
 0x5ab   : > { %v13000_v19 = vmul.f32 %v7606_v55, %v5920_v60  ;;  %v5919_v17 = vmul.f32 %v5786_v9, %v5625_v35  ;;  %vm6451_vm0 = vcmp.eq.s32.totalorder %v6438_v61, %v6447_v27 }
 0x5ac   : > { %vm7232_vm9 = vmpackc.low %vm6451_vm0, %vm6449_vm8  ;;  %v13029_v56 = vpop.f32.mrf.mxu0 }
 0x5ad   : > { %13820 = vst [vmem:[#allocation36_spill] sm:$0xff] %v13000_v19  ;;  %v13002_v26 = vmul.f32 %v7605_v49, %v5919_v17  ;;  %v6443_v49 = vrot.slane %v6439_v52, %v6442_v43  ;;  %7233 = vmatprep.mubr.msk.bf16.mxu1 %vm7232_vm9, %v13411_v12  ;;  %13827 = vst [vmem:[#allocation72_spill] sm:$0xff] %v13029_v56 }
 0x5ae   : > { %v13006_v5 = vpop.f32.mrf.mxu1  ;;  %v7613_v6 = vpop.f32.mrf.mxu0 }
 0x5af   : > { %13821 = vst [vmem:[#allocation42_spill] sm:$0xff] %v13002_v26  ;;  %vm6450_vm14 = vcmp.eq.s32.totalorder %v6438_v61, %v6443_v49  ;;  %vm6448_vm10 = vcmp.eq.s32.totalorder %v6437_v53, %v6443_v49 }
 0x5b0   : > { %v13016_v9 = vpop.f32.mrf.mxu1  ;;  %vm13023_vm7 = vmpackc.low %vm6450_vm14, %vm6448_vm10  ;;  %v13031_v38 = vpop.f32.mrf.mxu0 }
 0x5b1   : > { %v13825_v31 = vsel %vm13023_vm7, 4294967295, %v13824_v31 }
 0x5b2   : > { %13826 = vst [vmem:[#allocation58_spill] sm:$0xff] %v13825_v31  ;;  %v7614_v46 = vpop.f32.mrf.mxu0 }
 0x5b4   : > { %v13033_v60 = vpop.f32.mrf.mxu0 }
 0x5b6   : > { %v13037_v17 = vpop.f32.mrf.mxu0 }
 0x5b7   : > { %13829 = vst [vmem:[#allocation67_spill] sm:$0xff] %v13037_v17 }
 0x5b8   : > { %v13041_v52 = vpop.f32.mrf.mxu0 }
 0x5b9   : > { %13831 = vst [vmem:[#allocation25_spill] sm:$0xff] %v13041_v52 }
 0x5ba   : > { %v13045_v43 = vpop.f32.mrf.mxu0 }
 0x5bb   : > { %13833 = vst [vmem:[#allocation49_spill] sm:$0xff] %v13045_v43 }
 0x5bc   : > { %v13049_v49 = vpop.f32.mrf.mxu0 }
 0x5bd   : > { %v13020_v24 = vpop.f32.mrf.mxu1  ;;  %13834 = vst [vmem:[#allocation78_spill] sm:$0xff] %v13049_v49 }
 0x5be   : > { %v13053_v12 = vpop.f32.mrf.mxu0 }
 0x5bf   : > { %v5644_v55 = vpop.f32.mrf.mxu1  ;;  %13835 = vst [vmem:[#allocation27_spill] sm:$0xff] %v13053_v12 }
 0x5c0   : > { %v13057_v15 = vpop.f32.mrf.mxu0 }
 0x5c1   : > { %v7569_v30 = vpop.f32.mrf.mxu1  ;;  %13836 = vst [vmem:[#allocation38_spill] sm:$0xff] %v13057_v15 }
 0x5c2   : > { %v13061_v14 = vpop.f32.mrf.mxu0 }
 0x5c3   : > { %v5654_v45 = vpop.f32.mrf.mxu1  ;;  %13837 = vst [vmem:[#allocation56_spill] sm:$0xff] %v13061_v14 }
 0x5c4   : > { %v13063_v62 = vpop.f32.mrf.mxu0 }
 0x5c5   : > { %13838 = vst [vmem:[#allocation70_spill] sm:$0xff] %v13063_v62 }
 0x5c6   : > { %v7625_v37 = vpop.f32.mrf.mxu0 }
 0x5c8   : > { %v13065_v10 = vpop.f32.mrf.mxu0 }
 0x5ca   : > { %v7626_v44 = vpop.f32.mrf.mxu0 }
 0x5cc   : > { %v7572_v36 = vpop.f32.mrf.mxu1  ;;  %v13067_v43 = vpop.f32.mrf.mxu0 }
 0x5cd   : > { %v5670_v62 = vadd.f32 %v7572_v36, %v12972_v11  ;;  %v5660_v36 = vadd.f32 %v7569_v30, %v12972_v11 }
 0x5ce   : > { %v5664_v4 = vpop.f32.mrf.mxu1  ;;  %v7629_v26 = vpop.f32.mrf.mxu0 }
 0x5cf   : > { %v5665_v17 = vadd.f32 %v12972_v11, %v5664_v4 }
 0x5d0   : > { %v13035_v35 = vpop.f32.mrf.mxu1  ;;  %v6389_v40 = vpop.f32.mrf.mxu0 }
 0x5d1   : > { %13828 = vst [vmem:[#allocation64_spill] sm:$0xff] %v13035_v35  ;;  %v5927_v14 = vmul.f32 %v12921_v41, %v5665_v17  ;;  %v5645_v17 = vadd.f32 %v12972_v11, %v5644_v55 }
 0x5d2   : > { %v13039_v53 = vpop.f32.mrf.mxu1  ;;  %v7630_v12 = vpop.f32.mrf.mxu0 }
 0x5d3   : > { %13830 = vst [vmem:[#allocation77_spill] sm:$0xff] %v13039_v53  ;;  %v5655_v53 = vadd.f32 %v12972_v11, %v5654_v45 }
 0x5d4   : > { %v6392_v50 = vpop.f32.mrf.mxu0 }
 0x5dc   : > { %v13043_v61 = vpop.f32.mrf.mxu1 }
 0x5dd   : > { %13832 = vst [vmem:[#allocation32_spill] sm:$0xff] %v13043_v61 }
 0x5de   : > { %v13047_v39 = vpop.f32.mrf.mxu1 }
 0x5ea   : > { %v13051_v27 = vpop.f32.mrf.mxu1 }
 0x5ec   : > { %v13055_v1 = vpop.f32.mrf.mxu1 }
 0x5fa   : > { %v13059_v63 = vpop.f32.mrf.mxu1 }
 0x5fc   : > { %v5704_v31 = vpop.f32.mrf.mxu1 }
 0x609   : > { %v7587_v29 = vpop.f32.mrf.mxu1 }
 0x60b   : > { %v5714_v28 = vpop.f32.mrf.mxu1 }
 0x618   : > { %v7590_v49 = vpop.f32.mrf.mxu1 }
 0x61a   : > { %v5724_v52 = vpop.f32.mrf.mxu1 }
 0x61b   : > { %v5725_v61 = vadd.f32 %v12972_v11, %v5724_v52  ;;  %v5925_v52 = vmul.f32 %v12931_v34, %v5655_v53 }
 0x628   : > { %v7593_v32 = vpop.f32.mrf.mxu1 }
 0x629   : > { %v5740_v15 = vadd.f32 %v7593_v32, %v12972_v11  ;;  %v5928_v32 = vmul.f32 %v12919_v13, %v5670_v62  ;;  %v5650_v13 = vadd.f32 %v13020_v24, %v12972_v11 }
 0x62a   : > { %v5734_v19 = vpop.f32.mrf.mxu1 }
 0x62b   : > { %v5735_v58 = vadd.f32 %v12972_v11, %v5734_v19  ;;  %v5942_v45 = vmul.f32 %v12923_v8, %v5740_v15  ;;  %v5926_v8 = vmul.f32 %v12928_v57, %v5660_v36  ;;  %v6419_v62 = vmul.f32 %v7614_v46, %v5928_v32  ;;  %v13845_v32 = vld [vmem:[#allocation77_spill] sm:$0xff] }
 0x62d   : > { %v5941_v56 = vmul.f32 %v12925_v33, %v5735_v58  ;;  %v6418_v33 = vmul.f32 %v7613_v6, %v5927_v14  ;;  %v6433_v34 = vmul.f32 %v6392_v50, %v5942_v45  ;;  %v5924_v50 = vmul.f32 %v12937_v7, %v5650_v13  ;;  %v13851_v13 = vld [vmem:[#allocation46_spill] sm:$0xff] }
 0x636   : > { %v7596_v35 = vpop.f32.mrf.mxu1 }
 0x637   : > { %v5750_v47 = vadd.f32 %v7596_v35, %v12972_v11  ;;  %v5730_v35 = vadd.f32 %v7590_v49, %v12972_v11 }
 0x638   : > { %v5744_v48 = vpop.f32.mrf.mxu1 }
 0x639   : > { %v5944_v4 = vmul.f32 %v12911_v22, %v5750_v47  ;;  %v5745_v19 = vadd.f32 %v12972_v11, %v5744_v48  ;;  %v5715_v22 = vadd.f32 %v12972_v11, %v5714_v28  ;;  %v5939_v48 = vmul.f32 %v12935_v20, %v5725_v61  ;;  %v13841_v61 = vld [vmem:[#allocation72_spill] sm:$0xff] }
 0x63a   : > { %v6432_v47 = vmul.f32 %v6389_v40, %v5941_v56  ;;  %v5940_v15 = vmul.f32 %v12933_v25, %v5730_v35  ;;  %v5635_v28 = vadd.f32 %v12972_v11, %v13016_v9  ;;  %v5923_v20 = vmul.f32 %v12939_v51, %v5645_v17  ;;  %v13846_v35 = vld [vmem:[#allocation61_spill] sm:$0xff] }
 0x63b   : > { %v5943_v41 = vmul.f32 %v12914_v2, %v5745_v19  ;;  %v6435_v58 = vmul.f32 %v7630_v12, %v5944_v4  ;;  %v5720_v2 = vadd.f32 %v7587_v29, %v12972_v11  ;;  %v6416_v40 = vmul.f32 %v13031_v38, %v5925_v52  ;;  %v13843_v4 = vld [vmem:[#allocation81_spill] sm:$0xff]  ;;  %v13844_v19 = vld [vmem:[#allocation56_spill] sm:$0xff] }
 0x63c   : > { %v5705_v12 = vadd.f32 %v12972_v11, %v5704_v31  ;;  %v5937_v24 = vmul.f32 %v12945_v0, %v5715_v22  ;;  %v6430_v57 = vmul.f32 %v7625_v37, %v5939_v48  ;;  %v6478_v55 = vpack.c.bf16 %v6433_v34, %v6432_v47  ;;  %v13849_v48 = vld [vmem:[#allocation44_spill] sm:$0xff] }
 0x63d   : > { %v6434_v30 = vmul.f32 %v7629_v26, %v5943_v41  ;;  %v6471_v26 = vpack.c.bf16 %v6419_v62, %v6418_v33  ;;  %v5640_v25 = vadd.f32 %v13006_v5, %v12972_v11  ;;  %v6417_v29 = vmul.f32 %v13033_v60, %v5926_v8  ;;  %v13847_v41 = vld [vmem:[#allocation38_spill] sm:$0xff]  ;;  %v13848_v33 = vld [vmem:[#allocation64_spill] sm:$0xff]  ;;  %v13852_v62 = vld [vmem:[#allocation67_spill] sm:$0xff] }
 0x63e   : > { %v5710_v51 = vadd.f32 %v13059_v63, %v12972_v11  ;;  %v5938_v9 = vmul.f32 %v12943_v54, %v5720_v2  ;;  %v6431_v56 = vmul.f32 %v7626_v44, %v5940_v15  ;;  %v5921_v0 = vmul.f32 %v12949_v23, %v5635_v28  ;;  %v13853_v34 = vld [vmem:[#allocation36_spill] sm:$0xff] }
 0x63f   : > { %v6479_v14 = vpack.c.bf16 %v6435_v58, %v6434_v30  ;;  %v6414_v37 = vmul.f32 %v13014_v21, %v5923_v20  ;;  %v6470_v31 = vpack.c.bf16 %v6417_v29, %v6416_v40  ;;  %v5695_v5 = vadd.f32 %v12972_v11, %v13055_v1  ;;  %v13850_v58 = vld [vmem:[#allocation70_spill] sm:$0xff]  ;;  %v13856_v20 = vld [vmem:[#allocation39_spill] sm:$0xff] }
 0x640   : > { %v5935_v7 = vmul.f32 %v12953_v16, %v5705_v12  ;;  %v6428_v6 = vmul.f32 %v13065_v10, %v5937_v24  ;;  %v6477_v38 = vpack.c.bf16 %v6431_v56, %v6430_v57  ;;  %v5922_v46 = vmul.f32 %v12947_v3, %v5640_v25  ;;  %v13839_v10 = vld [vmem:[#allocation37_spill] sm:$0xff]  ;;  %v13840_v3 = vld [vmem:[#allocation27_spill] sm:$0xff]  ;;  %v13862_v29 = vld [vmem:[#allocation78_spill] sm:$0xff] }
 0x641   : > { %7372 = vmatprep.subr.bf16.mxu1 %v6479_v14  ;;  %v6415_v63 = vmul.f32 %v13027_v59, %v5924_v50  ;;  %v5700_v54 = vadd.f32 %v13051_v27, %v12972_v11  ;;  %v5936_v23 = vmul.f32 %v12951_v18, %v5710_v51  ;;  %v6429_v44 = vmul.f32 %v13067_v43, %v5938_v9  ;;  %v13842_v27 = vld [vmem:[#allocation32_spill] sm:$0xff]  ;;  %v13854_v14 = vld [vmem:[#allocation42_spill] sm:$0xff]  ;;  %v13860_v25 = vld [vmem:[#allocation57_spill] sm:$0xff] }
 0x642   : > { %7373 = vmatpush3.bf16.msra.mxu1 %v6471_v26  ;;  %v6412_v1 = vmul.f32 %v13018_v42, %v5921_v0  ;;  %v5685_v16 = vadd.f32 %v12972_v11, %v13047_v39  ;;  %v5933_v60 = vmul.f32 %v13839_v10, %v5695_v5  ;;  %v6426_v53 = vmul.f32 %v13840_v3, %v5935_v7  ;;  %v13857_v26 = vld [vmem:[#allocation49_spill] sm:$0xff]  ;;  %v13863_v56 = vld [vmem:[#allocation80_spill] sm:$0xff]  ;;  %v13864_v0 = vld [vmem:[#allocation31_spill] sm:$0xff] }
 0x643   : > { %7374 = vmatprep.subr.bf16.mxu1 %v6478_v55  ;;  %v6469_v21 = vpack.c.bf16 %v6415_v63, %v6414_v37  ;;  %v6476_v59 = vpack.c.bf16 %v6429_v44, %v6428_v6  ;;  %v6413_v49 = vmul.f32 %v13841_v61, %v5922_v46  ;;  %v5690_v18 = vadd.f32 %v13842_v27, %v12972_v11  ;;  %v13859_v55 = vld [vmem:[#allocation41_spill] sm:$0xff]  ;;  %v13867_v5 = vld [vmem:[#allocation79_spill] sm:$0xff] }
 0x644   : > { %v5934_v43 = vmul.f32 %v13843_v4, %v5700_v54  ;;  %v6427_v36 = vmul.f32 %v13844_v19, %v5936_v23  ;;  %v5675_v39 = vadd.f32 %v12972_v11, %v13845_v32  ;;  %v5931_v45 = vmul.f32 %v13846_v35, %v5685_v16  ;;  %v6462_v63 = vld [vmem:[#allocation4 + $0x8] sm:$0xff] }
 0x645   : > { %v6468_v42 = vpack.c.bf16 %v6413_v49, %v6412_v1  ;;  %v6424_v17 = vmul.f32 %v13847_v41, %v5933_v60  ;;  %v5680_v22 = vadd.f32 %v13848_v33, %v12972_v11  ;;  %v5932_v47 = vmul.f32 %v13849_v48, %v5690_v18  ;;  %v13858_v11 = vld [vmem:[#allocation25_spill] sm:$0xff] }
 0x646   : > { %7375 = vmatpush3.bf16.msra.mxu1 %v6470_v31  ;;  %v6475_v52 = vpack.c.bf16 %v6427_v36, %v6426_v53  ;;  %v6425_v30 = vmul.f32 %v13850_v58, %v5934_v43  ;;  %v5929_v8 = vmul.f32 %v13851_v13, %v5675_v39  ;;  %v6422_v2 = vmul.f32 %v13852_v62, %v5931_v45  ;;  %v13866_v31 = vld [vmem:[#allocation63_spill] sm:$0xff] }
 0x647   : > { %7376 = vmatprep.subr.bf16.mxu1 %v6477_v38  ;;  %v13855_v28 = vpack.c.bf16 %v13853_v34, %v13854_v14  ;;  %v5930_v40 = vmul.f32 %v13856_v20, %v5680_v22  ;;  %v6423_v12 = vmul.f32 %v13857_v26, %v5932_v47  ;;  %v13861_v50 = vpack.c.bf16 %v13859_v55, %v13860_v25 }
 0x648   : > { %v6474_v15 = vpack.c.bf16 %v6425_v30, %v6424_v17  ;;  %v6420_v24 = vmul.f32 %v13858_v11, %v5929_v8  ;;  %v13865_v37 = vpack.c.bf16 %v13863_v56, %v13864_v0  ;;  %v13868_v7 = vpack.c.bf16 %v13866_v31, %v13867_v5 }
 0x649   : > { %v6473_v57 = vpack.c.bf16 %v6423_v12, %v6422_v2  ;;  %v6421_v51 = vmul.f32 %v13862_v29, %v5930_v40  ;;  %v13869_v6 = vmov 1.0|1.0  }
 0x64a   : > { %7377 = vmatpush3.bf16.msra.mxu1 %v6469_v21  ;;  %v6463_v21 = vld [vmem:[#allocation4] sm:$0xff] }
 0x64b   : > { %7378 = vmatprep.subr.bf16.mxu1 %v6476_v59  ;;  %v6472_v9 = vpack.c.bf16 %v6421_v51, %v6420_v24 }
 0x64e   : > { %7379 = vmatpush3.bf16.msra.mxu1 %v6468_v42 }
 0x64f   : > { %7380 = vmatprep.subr.bf16.mxu1 %v6475_v52 }
 0x652   : > { %7381 = vmatpush3.bf16.msra.mxu1 %v13855_v28 }
 0x653   : > { %7382 = vmatprep.subr.bf16.mxu1 %v6474_v15 }
 0x656   : > { %7383 = vmatpush3.bf16.msra.mxu1 %v13861_v50 }
 0x657   : > { %7384 = vmatprep.subr.bf16.mxu1 %v6473_v57 }
 0x65a   : > { %7385 = vmatpush3.bf16.msra.mxu1 %v13865_v37 }
 0x65b   : > { %7386 = vmatprep.subr.bf16.mxu1 %v6472_v9 }
 0x65e   : > { %7387 = vmatpush3.bf16.msra.mxu1 %v13868_v7 }
 0x661   : > { %7235 = vmatmul.mubr.msk.bf16.vlgmr.msra.gmra.mxu1 %vm13023_vm7, %v13869_v6 }
 0x721   : > { %v7388_v46 = vpop.f32.mrf.mxu1 }
 0x723   : > { %v7389_v54 = vpop.f32.mrf.mxu1 }
 0x724   : > { %v7390_v23 = vadd.f32 %v7389_v54, %v7388_v46 }
 0x725   : > { %v7391_v44 = vpop.f32.mrf.mxu1 }
 0x726   : > { %v6521_v1 = vadd.f32 %v7390_v23, %v6462_v63 }
 0x727   : > { %v7392_v16 = vpop.f32.mrf.mxu1 }
 0x728   : > { %6523 = vst [vmem:[#allocation4 + $0x8] sm:$0xff] %v6521_v1  ;;  %v7393_v10 = vadd.f32 %v7392_v16, %v7391_v44  ;;  %6528 = sbr.rel (%p7236_p13) target bundleno = 2311 (0x907), region = 88 }
 0x72a   : > { %v6522_v60 = vadd.f32 %v7393_v10, %v6463_v21 }
 0x72c   : > { %6524 = vst [vmem:[#allocation4] sm:$0xff] %v6522_v60 }
 0x72d   : > { %v6546_v3 = vld [vmem:[%s8479_s27 + $0x78] sm:$0xff]  ;;  %v6545_v53 = vld [vmem:[%s8479_s27 + $0x70] sm:$0xff]  ;;  %v6544_v59 = vld [vmem:[%s8479_s27 + $0x68] sm:$0xff] }
 0x72e   : > { %7631 = vmatprep.subr.mxu0 %v6546_v3  ;;  %v6543_v61 = vld [vmem:[%s8479_s27 + $0x60] sm:$0xff]  ;;  %v6542_v27 = vld [vmem:[%s8479_s27 + $0x58] sm:$0xff]  ;;  %v6541_v18 = vld [vmem:[%s8479_s27 + $0x50] sm:$0xff] }
 0x72f   : > { %7632 = vmatpush3.msra.mxu0 %v6546_v3  ;;  %v6529_v49 = vld [vmem:[#allocation4 + $0x8] sm:$0xff]  ;;  %v6540_v4 = vld [vmem:[%s8479_s27 + $0x48] sm:$0xff]  ;;  %v6538_v19 = vld [vmem:[%s8479_s27 + $0x38] sm:$0xff] }
 0x730   : > { %7633 = vmatprep.subr.mxu0 %v6545_v53  ;;  %7663 = vmatprep.mubr.f32.mxu0 %v6529_v49  ;;  %v6539_v43 = vld [vmem:[%s8479_s27 + $0x40] sm:$0xff]  ;;  %v6537_v36 = vld [vmem:[%s8479_s27 + $0x30] sm:$0xff]  ;;  %v6536_v42 = vld [vmem:[%s8479_s27 + $0x28] sm:$0xff] }
 0x731   : > { %7634 = vmatpush3.msra.mxu0 %v6545_v53  ;;  %v6535_v32 = vld [vmem:[%s8479_s27 + $0x20] sm:$0xff]  ;;  %v6534_v39 = vld [vmem:[%s8479_s27 + $0x18] sm:$0xff]  ;;  %v6533_v35 = vld [vmem:[%s8479_s27 + $0x10] sm:$0xff] }
 0x732   : > { %7635 = vmatprep.subr.mxu0 %v6544_v59  ;;  %v6532_v45 = vld [vmem:[%s8479_s27 + $0x8] sm:$0xff]  ;;  %v6531_v41 = vld [vmem:[%s8479_s27] sm:$0xff]  ;;  %v6676_v52 = vld [vmem:[%s8488_s7 + $0x78] sm:$0xff] }
 0x733   : > { %7636 = vmatpush3.msra.mxu0 %v6544_v59  ;;  %v6530_v17 = vld [vmem:[#allocation4] sm:$0xff]  ;;  %v6675_v33 = vld [vmem:[%s8488_s7 + $0x70] sm:$0xff]  ;;  %7666 = vmatprep.subr.mxu1 %v6676_v52  ;;  %v6674_v22 = vld [vmem:[%s8488_s7 + $0x68] sm:$0xff] }
 0x734   : > { %7637 = vmatprep.subr.mxu0 %v6543_v61  ;;  %7667 = vmatpush3.msra.mxu1 %v6676_v52  ;;  %v6673_v48 = vld [vmem:[%s8488_s7 + $0x60] sm:$0xff]  ;;  %v6672_v47 = vld [vmem:[%s8488_s7 + $0x58] sm:$0xff]  ;;  %v6671_v58 = vld [vmem:[%s8488_s7 + $0x50] sm:$0xff] }
 0x735   : > { %7638 = vmatpush3.msra.mxu0 %v6543_v61  ;;  %7668 = vmatprep.subr.mxu1 %v6675_v33  ;;  %v6670_v30 = vld [vmem:[%s8488_s7 + $0x48] sm:$0xff]  ;;  %v6669_v13 = vld [vmem:[%s8488_s7 + $0x40] sm:$0xff]  ;;  %v6668_v8 = vld [vmem:[%s8488_s7 + $0x38] sm:$0xff] }
 0x736   : > { %7639 = vmatprep.subr.mxu0 %v6542_v27  ;;  %7669 = vmatpush3.msra.mxu1 %v6675_v33  ;;  %v6667_v62 = vld [vmem:[%s8488_s7 + $0x30] sm:$0xff]  ;;  %v6666_v2 = vld [vmem:[%s8488_s7 + $0x28] sm:$0xff]  ;;  %v6665_v15 = vld [vmem:[%s8488_s7 + $0x20] sm:$0xff] }
 0x737   : > { %7640 = vmatpush3.msra.mxu0 %v6542_v27  ;;  %7670 = vmatprep.subr.mxu1 %v6674_v22  ;;  %v6664_v34 = vld [vmem:[%s8488_s7 + $0x18] sm:$0xff]  ;;  %v6663_v14 = vld [vmem:[%s8488_s7 + $0x10] sm:$0xff]  ;;  %v6662_v28 = vld [vmem:[%s8488_s7 + $0x8] sm:$0xff] }
 0x738   : > { %7641 = vmatprep.subr.mxu0 %v6541_v18  ;;  %7671 = vmatpush3.msra.mxu1 %v6674_v22  ;;  %v6661_v20 = vld [vmem:[%s8488_s7] sm:$0xff] }
 0x739   : > { %7642 = vmatpush3.msra.mxu0 %v6541_v18  ;;  %7672 = vmatprep.subr.mxu1 %v6673_v48  ;;  %v7237_v40 = vld [vmem:[%s655_s28] ss:$0 sm:$0xff] }
 0x73a   : > { %7643 = vmatprep.subr.mxu0 %v6540_v4  ;;  %7673 = vmatpush3.msra.mxu1 %v6673_v48  ;;  %v7240_v27 = vld [vmem:[%s663_s8] ss:$0 sm:$0xff] }
 0x73b   : > { %7644 = vmatpush3.msra.mxu0 %v6540_v4  ;;  %7674 = vmatprep.subr.mxu1 %v6672_v47  ;;  %v6760_v4 = vld [vmem:[#allocation2 + $0x8] sm:$0xff] }
 0x73c   : > { %7645 = vmatprep.subr.mxu0 %v6539_v43  ;;  %7675 = vmatpush3.msra.mxu1 %v6672_v47 }
 0x73d   : > { %7646 = vmatpush3.msra.mxu0 %v6539_v43  ;;  %7676 = vmatprep.subr.mxu1 %v6671_v58 }
 0x73e   : > { %7647 = vmatprep.subr.mxu0 %v6538_v19  ;;  %7677 = vmatpush3.msra.mxu1 %v6671_v58 }
 0x73f   : > { %7648 = vmatpush3.msra.mxu0 %v6538_v19  ;;  %7678 = vmatprep.subr.mxu1 %v6670_v30 }
 0x740   : > { %7649 = vmatprep.subr.mxu0 %v6537_v36  ;;  %7679 = vmatpush3.msra.mxu1 %v6670_v30 }
 0x741   : > { %7650 = vmatpush3.msra.mxu0 %v6537_v36  ;;  %7680 = vmatprep.subr.mxu1 %v6669_v13  ;;  %v6759_v36 = vld [vmem:[#allocation2] sm:$0xff] }
 0x742   : > { %7651 = vmatprep.subr.mxu0 %v6536_v42  ;;  %7681 = vmatpush3.msra.mxu1 %v6669_v13 }
 0x743   : > { %7652 = vmatpush3.msra.mxu0 %v6536_v42  ;;  %7682 = vmatprep.subr.mxu1 %v6668_v8 }
 0x744   : > { %7653 = vmatprep.subr.mxu0 %v6535_v32  ;;  %7683 = vmatpush3.msra.mxu1 %v6668_v8 }
 0x745   : > { %7654 = vmatpush3.msra.mxu0 %v6535_v32  ;;  %7684 = vmatprep.subr.mxu1 %v6667_v62 }
 0x746   : > { %7655 = vmatprep.subr.mxu0 %v6534_v39  ;;  %7685 = vmatpush3.msra.mxu1 %v6667_v62 }
 0x747   : > { %7656 = vmatpush3.msra.mxu0 %v6534_v39  ;;  %7686 = vmatprep.subr.mxu1 %v6666_v2 }
 0x748   : > { %7657 = vmatprep.subr.mxu0 %v6533_v35  ;;  %7687 = vmatpush3.msra.mxu1 %v6666_v2 }
 0x749   : > { %7658 = vmatpush3.msra.mxu0 %v6533_v35  ;;  %7688 = vmatprep.subr.mxu1 %v6665_v15 }
 0x74a   : > { %7659 = vmatprep.subr.mxu0 %v6532_v45  ;;  %7689 = vmatpush3.msra.mxu1 %v6665_v15 }
 0x74b   : > { %7660 = vmatpush3.msra.mxu0 %v6532_v45  ;;  %7690 = vmatprep.subr.mxu1 %v6664_v34 }
 0x74c   : > { %7661 = vmatprep.subr.mxu0 %v6531_v41  ;;  %7691 = vmatpush3.msra.mxu1 %v6664_v34 }
 0x74d   : > { %7662 = vmatpush3.msra.mxu0 %v6531_v41  ;;  %7692 = vmatprep.subr.mxu1 %v6663_v14 }
 0x74e   : > { %7664 = vmatmul.mubr.f32.vlgmr.msra.gmra.mxu0 %v6530_v17  ;;  %7693 = vmatpush3.msra.mxu1 %v6663_v14 }
 0x74f   : > { %7694 = vmatprep.subr.mxu1 %v6662_v28 }
 0x750   : > { %7695 = vmatpush3.msra.mxu1 %v6662_v28 }
 0x751   : > { %7696 = vmatprep.subr.mxu1 %v6661_v20 }
 0x752   : > { %7697 = vmatpush3.msra.mxu1 %v6661_v20 }
 0x80e   : > { %v7665_v26 = vpop.f32.mrf.mxu0 }
 0x80f   : > { %v6626_v12 = vadd.f32 %v7665_v26, %v7237_v40 }
 0x810   : > { %v6620_v11 = vpop.f32.mrf.mxu0 }
 0x811   : > { %v6632_v24 = vand.u32 2147483647, %v6626_v12  ;;  %v6621_v57 = vadd.f32 %v7237_v40, %v6620_v11  ;;  %v6630_v1 = vmax.f32 %v6626_v12, 0.0 }
 0x813   : > { %v6634_v55 = vsub.f32 0.0, %v6632_v24  ;;  %v6631_v25 = vand.u32 2147483647, %v6621_v57  ;;  %v6629_v60 = vmax.f32 %v6621_v57, 0.0 }
 0x815   : > { %v6637_v50 = vmul.f32 1.442695, %v6634_v55  ;;  %v6633_v29 = vsub.f32 0.0, %v6631_v25 }
 0x817   : > { %8258 = vpow2.f32 %v6637_v50  ;;  %v6635_v51 = vmul.f32 1.442695, %v6633_v29 }
 0x819   : > { %8260 = vpow2.f32 %v6635_v51 }
 0x824   : > { %v8259_v9 = vpop.eup %8258 }
 0x825   : > { %v6648_v56 = vadd.f32 1.0, %v8259_v9  ;;  %v6651_v31 = vmul.f32 -0.5, %v8259_v9  ;;  %v6654_v6 = vand.u32 2147483647, %v8259_v9 }
 0x826   : > { %v8261_v0 = vpop.eup %8260 }
 0x827   : > { %v6639_v37 = vadd.f32 1.0, %v8261_v0  ;;  %8262 = vlog2.f32 %v6648_v56  ;;  %v6642_v5 = vmul.f32 -0.5, %v8261_v0  ;;  %v6652_v7 = vadd.f32 1.0, %v6651_v31 }
 0x828   : > { %v6645_v63 = vand.u32 2147483647, %v8261_v0  ;;  %vm6655_vm4 = vcmp.lt.f32.partialorder %v6654_v6, 0.0004427343 }
 0x829   : > { %8264 = vlog2.f32 %v6639_v37  ;;  %v6643_v38 = vadd.f32 1.0, %v6642_v5  ;;  %v6653_v23 = vmul.f32 %v8259_v9, %v6652_v7 }
 0x82a   : > { %vm6646_vm6 = vcmp.lt.f32.partialorder %v6645_v63, 0.0004427343 }
 0x82b   : > { %v6644_v16 = vmul.f32 %v8261_v0, %v6643_v38 }
 0x834   : > { %v8263_v46 = vpop.eup %8262 }
 0x835   : > { %v6650_v54 = vmul.f32 0.6931472, %v8263_v46 }
 0x836   : > { %v8265_v44 = vpop.eup %8264 }
 0x837   : > { %v6641_v21 = vmul.f32 0.6931472, %v8265_v44  ;;  %v6656_v10 = vsel %vm6655_vm4, %v6653_v23, %v6650_v54 }
 0x838   : > { %v6658_v53 = vadd.f32 %v6656_v10, %v6630_v1 }
 0x839   : > { %v6647_v3 = vsel %vm6646_vm6, %v6644_v16, %v6641_v21 }
 0x83a   : > { %v6657_v59 = vadd.f32 %v6647_v3, %v6629_v60  ;;  %v7239_v49 = vadd.f32 -0.6931472, %v6658_v53 }
 0x83c   : > { %v7238_v61 = vadd.f32 -0.6931472, %v6657_v59 }
 0x83e   : > { %7698 = vmatprep.mubr.f32.mxu1 %v7238_v61 }
 0x83f   : > { %7699 = vmatmul.mubr.f32.vlgmr.msra.gmra.mxu1 %v7239_v49 }
 0x8ff   : > { %v7700_v18 = vpop.f32.mrf.mxu1 }
 0x900   : > { %v6756_v43 = vadd.f32 %v7700_v18, %v7240_v27 }
 0x901   : > { %v6750_v19 = vpop.f32.mrf.mxu1 }
 0x902   : > { %v6762_v42 = vadd.f32 %v6760_v4, %v6756_v43  ;;  %v6751_v32 = vadd.f32 %v7240_v27, %v6750_v19 }
 0x904   : > { %6764 = vst [vmem:[#allocation2 + $0x8] sm:$0xff] %v6762_v42  ;;  %v6761_v39 = vadd.f32 %v6759_v36, %v6751_v32 }
 0x906   : > { %6763 = vst [vmem:[#allocation2] sm:$0xff] %v6761_v39 }
 0x907 PF: > { %s13871_s3 = sld [smem:[#allocation5_spill]] }
 0x90d   : > { %p6765_p0 = scmp.eq.s32.totalorder %s13871_s3, 1 }
 0x90f   : > { %p6766_p1 = pnand %p6765_p0, %p6525_p12 }
 0x910   : > { %s13872_s21 = sld [smem:[#allocation89_spill]] (!%p6766_p1) }
 0x911   : > { %6769 = sbr.rel (%p6766_p1) target bundleno = 2328 (0x918), region = 92 }
 0x916   : > { %v6770_v35 = vld [vmem:[#allocation2] sm:$0xff]  ;;  %v6771_v45 = vld [vmem:[#allocation2 + $0x8] sm:$0xff] }
 0x917   : > { %6772 = vst [vmem:[%s13872_s21] sm:$0xff] %v6770_v35  ;;  %6773 = vst [vmem:[%s13872_s21 + $0x8] sm:$0xff] %v6771_v45 }
 0x918 PF: > { %s13873_s6 = sld [smem:[#allocation8_spill]] }
 0x919   : > { %s13874_s29 = sld [smem:[#allocation6_spill]] }
 0x91a   : > { %s13875_s30 = sld [smem:[#allocation7_spill]] }
 0x91b   : > { %s13876_s15 = sld [smem:[#allocation9_spill]] }
 0x91c   : > { %s13877_s16 = sld [smem:[#allocation10_spill]] }
 0x91e   : > { %s24_s17 = sadd.s32 1, %s13873_s6  }
 0x91f   : > { %p21_p2 = scmp.ge.s32.totalorder %s24_s17, 6  }
 0x921   :  { %23 = sbr.rel (!%p21_p2) target bundleno = 9 (0x9), region = 151 }

</bundles_post_ra>
